<compile_context>
chip_gen: v6e
topology: v6e:2x2x1
jax: 0.10.0
libtpu: 0.0.40
codegen_flags: <defaults>
</compile_context>

<pallas_src>
import functools
import math
from typing import NamedTuple

import jax
import jax.numpy as jnp
from jax.experimental import pallas as pl
from jax.experimental.pallas import tpu as pltpu


# ----------------------------------------------------------------------------
# "same" padding, identical semantics to get_same_pad + F.pad(mode='constant')
# ----------------------------------------------------------------------------
def get_same_pad(size, kernel_size, stride):
    """Returns ((h_top, h_bottom), (w_left, w_right)) TF-style SAME padding."""
    if isinstance(kernel_size, int):
        kernel_size = (kernel_size, kernel_size)
    if isinstance(stride, int):
        stride = (stride, stride)
    pads = []
    for i in range(2):
        out = math.ceil(size[i] / stride[i])
        p = max((out - 1) * stride[i] + kernel_size[i] - size[i], 0)
        pads.append((p // 2, p - p // 2))
    return pads[0], pads[1]  # (h pads, w pads)


class _LayerCfg(NamedTuple):
    h: int
    w: int
    cin: int
    cout: int
    kh: int
    kw: int
    sh: int
    sw: int
    pad_t: int
    pad_b: int
    pad_l: int
    pad_r: int
    oh: int
    ow: int
    relu: bool


# ----------------------------------------------------------------------------
# Fused multi-layer conv kernel.
#   refs layout: x_ref, (w_ref, b_ref) * n_layers, o_ref, act_scratch * n_layers
# ----------------------------------------------------------------------------
def _fused_convnn_kernel(*refs, cfgs, matmul_dtype):
    n_layers = len(cfgs)
    x_ref = refs[0]
    w_refs = refs[1:1 + 2 * n_layers:2]
    b_refs = refs[2:2 + 2 * n_layers:2]
    o_ref = refs[1 + 2 * n_layers]
    act_refs = refs[2 + 2 * n_layers:]

    # Stage this batch element's input into the zero-padded layer-0 scratch
    # (in-kernel SAME padding: zero the buffer, write the interior).
    c0 = cfgs[0]
    a0 = act_refs[0]
    a0[...] = jnp.zeros_like(a0)
    a0[c0.pad_t:c0.pad_t + c0.h, c0.pad_l:c0.pad_l + c0.w, :] = (
        x_ref[0].astype(jnp.float32))

    for li, c in enumerate(cfgs):
        src = act_refs[li]
        m = c.oh * c.ow
        acc = jnp.zeros((m, c.cout), jnp.float32)
        # Fully unrolled tap loop: one (M, Cin) @ (Cin, Cout) MXU matmul per
        # tap, all operands resident in VMEM, f32 accumulation.
        for ih in range(c.kh):
            for iw in range(c.kw):
                if c.sh == 1 and c.sw == 1:
                    tap = src[ih:ih + c.oh, iw:iw + c.ow, :]
                else:
                    tap = src[pl.ds(ih, c.oh, stride=c.sh),
                              pl.ds(iw, c.ow, stride=c.sw), :]
                lhs = tap.reshape(m, c.cin).astype(matmul_dtype)
                rhs = w_refs[li][ih * c.kw + iw].astype(matmul_dtype)
                acc = acc + jnp.dot(lhs, rhs,
                                    preferred_element_type=jnp.float32)
        acc = acc + b_refs[li][...]          # (M, Cout) + (1, Cout)
        if c.relu:
            acc = jnp.maximum(acc, 0.0)
        r = acc.reshape(c.oh, c.ow, c.cout)

        if li + 1 < n_layers:
            # Write into the interior of the next layer's zero-padded scratch;
            # the activation stays in VMEM (never hits HBM).
            nc = cfgs[li + 1]
            dst = act_refs[li + 1]
            dst[...] = jnp.zeros_like(dst)
            dst[nc.pad_t:nc.pad_t + nc.h, nc.pad_l:nc.pad_l + nc.w, :] = r
        else:
            o_ref[0] = r.astype(o_ref.dtype)


# ----------------------------------------------------------------------------
# ConvNN: parameter init + multi-layer forward
# ----------------------------------------------------------------------------
def init_conv_nn_params(key, in_channels, out_channels, kernel_size,
                        use_bias=True):
    """Deterministic Kaiming-normal (fan_in, relu gain) init, zero bias."""
    num_layers = len(out_channels)
    if isinstance(kernel_size, (int, tuple)):
        kernel_size = [kernel_size] * num_layers
    in_chs = [in_channels] + out_channels[:-1]
    params = []
    for i in range(num_layers):
        k = kernel_size[i]
        kh, kw = (k, k) if isinstance(k, int) else k
        cin, cout = in_chs[i], out_channels[i]
        key, sub = jax.random.split(key)
        fan_in = cin * kh * kw
        std = math.sqrt(2.0 / fan_in)  # kaiming, relu gain, mode='fan_in'
        w = std * jax.random.normal(sub, (cout, cin, kh, kw), jnp.float32)
        b = jnp.zeros((cout,), jnp.float32) if use_bias else None
        params.append({"weight": w, "bias": b, "kernel_size": (kh, kw)})
    return params


def conv_nn_forward(x_nchw, params, stride=1, padding_mode="constant",
                    matmul_dtype=jnp.float32):
    """Forward pass matching ConvNN.forward.

    x_nchw: (N, C, H, W) — PyTorch convention.  Returns NCHW.
    activation=relu between layers, out_activation=None on the last layer.
    All layers run fused inside a single pallas_call.
    """
    assert padding_mode == "constant", "only 'constant' (zero) padding supported"
    num_layers = len(params)
    if isinstance(stride, (int, tuple)):
        stride = [stride] * num_layers
    assert len(stride) == num_layers

    n, cin0, h0, w0 = x_nchw.shape
    x = jnp.transpose(x_nchw, (0, 2, 3, 1))  # -> NHWC (channels on lanes)

    # Static per-layer configuration (SAME pads, output sizes).
    cfgs = []
    h, w, cin = h0, w0, cin0
    for i, layer in enumerate(params):
        kh, kw = layer["kernel_size"]
        s = stride[i]
        sh, sw = (s, s) if isinstance(s, int) else s
        (pt, pb), (plft, prt) = get_same_pad((h, w), (kh, kw), (sh, sw))
        oh = math.ceil(h / sh)
        ow = math.ceil(w / sw)
        cout = layer["weight"].shape[0]
        cfgs.append(_LayerCfg(h=h, w=w, cin=cin, cout=cout, kh=kh, kw=kw,
                              sh=sh, sw=sw, pad_t=pt, pad_b=pb,
                              pad_l=plft, pad_r=prt, oh=oh, ow=ow,
                              relu=(i < num_layers - 1)))
        h, w, cin = oh, ow, cout

    # Operands: x, then per-layer folded weights (kh*kw, Cin, Cout) and biases.
    operands = [x]
    in_specs = [pl.BlockSpec((1, h0, w0, cin0), lambda b: (b, 0, 0, 0))]
    for layer, c in zip(params, cfgs):
        wt = jnp.transpose(layer["weight"], (2, 3, 1, 0)).reshape(
            c.kh * c.kw, c.cin, c.cout).astype(jnp.float32)
        bias = layer["bias"]
        if bias is None:
            bias = jnp.zeros((c.cout,), jnp.float32)
        operands.append(wt)
        operands.append(bias.astype(jnp.float32).reshape(1, c.cout))
        # Full-array specs with constant index_map -> weights resident in VMEM.
        in_specs.append(pl.BlockSpec((c.kh * c.kw, c.cin, c.cout),
                                     lambda b: (0, 0, 0)))
        in_specs.append(pl.BlockSpec((1, c.cout), lambda b: (0, 0)))

    last = cfgs[-1]
    out_shape = jax.ShapeDtypeStruct((n, last.oh, last.ow, last.cout), x.dtype)
    out_spec = pl.BlockSpec((1, last.oh, last.ow, last.cout),
                            lambda b: (b, 0, 0, 0))

    # One zero-padded activation scratch per layer input (all in VMEM).
    scratch = [
        pltpu.VMEM((c.h + c.pad_t + c.pad_b, c.w + c.pad_l + c.pad_r, c.cin),
                   jnp.float32)
        for c in cfgs
    ]

    kernel = functools.partial(_fused_convnn_kernel, cfgs=tuple(cfgs),
                               matmul_dtype=matmul_dtype)

    y = pl.pallas_call(
        kernel,
        out_shape=out_shape,
        grid_spec=pltpu.PrefetchScalarGridSpec(
            num_scalar_prefetch=0,
            grid=(n,),                       # one batch element per grid step
            in_specs=in_specs,
            out_specs=out_spec,
            scratch_shapes=scratch,
        ),
        compiler_params=pltpu.CompilerParams(
            dimension_semantics=("parallel",)),  # shards batch across v7x TCs
    )(*operands)

    return jnp.transpose(y, (0, 3, 1, 2))  # NHWC -> NCHW


# ----------------------------------------------------------------------------
if __name__ == "__main__":
    key = jax.random.PRNGKey(0)
    k_x, k_p = jax.random.split(key)

    # ConvNN(in_channels=4, out_channels=[8, 16, 4], kernel_size=3, stride=1)
    in_channels = 4
    out_channels = [8, 16, 4]
    kernel_size = 3
    stride = 1

    x = jax.random.normal(k_x, (2, in_channels, 16, 16), jnp.float32)  # NCHW
    params = init_conv_nn_params(k_p, in_channels, out_channels, kernel_size,
                                 use_bias=True)

    out = conv_nn_forward(x, params, stride=stride, padding_mode="constant")
    out = jax.block_until_ready(out)
    assert out.shape == (2, out_channels[-1], 16, 16), out.shape
    assert bool(jnp.all(jnp.isfinite(out)))
    print("KERNEL_OK")
</pallas_src>

<mosaic_0001>
module attributes {stable_mosaic.version = 11 : i64} {
  func.func @_fused_convnn_kernel(%arg0: i32, %arg1: memref<1x16x16x4xf32, #tpu.memory_space<vmem>>, %arg2: memref<9x4x8xf32, #tpu.memory_space<vmem>>, %arg3: memref<1x8xf32, #tpu.memory_space<vmem>>, %arg4: memref<9x8x16xf32, #tpu.memory_space<vmem>>, %arg5: memref<1x16xf32, #tpu.memory_space<vmem>>, %arg6: memref<9x16x4xf32, #tpu.memory_space<vmem>>, %arg7: memref<1x4xf32, #tpu.memory_space<vmem>>, %arg8: memref<1x16x16x4xf32, #tpu.memory_space<vmem>>, %arg9: memref<18x18x4xf32, #tpu.memory_space<vmem>>, %arg10: memref<18x18x8xf32, #tpu.memory_space<vmem>>, %arg11: memref<18x18x16xf32, #tpu.memory_space<vmem>>) attributes {dimension_semantics = [#tpu.dimension_semantics<parallel>], iteration_bounds = array<i64: 2>, scalar_prefetch = 0 : i64, scratch_operands = 3 : i64, tpu.core_type = #tpu.core_type<tc>, window_params = [{transform_indices = @transform_0, window_bounds = array<i64: 1, 16, 16, 4>}, {pipeline_mode = #tpu.pipeline_mode<synchronous>, transform_indices = @transform_1, window_bounds = array<i64: 9, 4, 8>}, {pipeline_mode = #tpu.pipeline_mode<synchronous>, transform_indices = @transform_2, window_bounds = array<i64: 1, 8>}, {pipeline_mode = #tpu.pipeline_mode<synchronous>, transform_indices = @transform_3, window_bounds = array<i64: 9, 8, 16>}, {pipeline_mode = #tpu.pipeline_mode<synchronous>, transform_indices = @transform_4, window_bounds = array<i64: 1, 16>}, {pipeline_mode = #tpu.pipeline_mode<synchronous>, transform_indices = @transform_5, window_bounds = array<i64: 9, 16, 4>}, {pipeline_mode = #tpu.pipeline_mode<synchronous>, transform_indices = @transform_6, window_bounds = array<i64: 1, 4>}, {transform_indices = @transform_7, window_bounds = array<i64: 1, 16, 16, 4>}]} {
    %cst = arith.constant 0.000000e+00 : f32
    %0 = vector.broadcast %cst : f32 to vector<18x18x4xf32>
    %c0 = arith.constant 0 : index
    %c0_0 = arith.constant 0 : index
    %c0_1 = arith.constant 0 : index
    %1 = vector.load %arg9[%c0, %c0_0, %c0_1] : memref<18x18x4xf32, #tpu.memory_space<vmem>>, vector<18x18x4xf32>
    tpu.vector_store %arg9[%c0, %c0_0, %c0_1], %0 {strides = array<i32>} : memref<18x18x4xf32, #tpu.memory_space<vmem>>, vector<18x18x4xf32>,
    %c0_2 = arith.constant 0 : index
    %c0_3 = arith.constant 0 : index
    %c0_4 = arith.constant 0 : index
    %c0_5 = arith.constant 0 : index
    %2 = vector.load %arg1[%c0_2, %c0_3, %c0_4, %c0_5] : memref<1x16x16x4xf32, #tpu.memory_space<vmem>>, vector<1x16x16x4xf32>
    %3 = vector.shape_cast %2 : vector<1x16x16x4xf32> to vector<16x16x4xf32>
    %c1 = arith.constant 1 : index
    %c1_6 = arith.constant 1 : index
    %c0_7 = arith.constant 0 : index
    %4 = vector.load %arg9[%c1, %c1_6, %c0_7] : memref<18x18x4xf32, #tpu.memory_space<vmem>>, vector<16x16x4xf32>
    tpu.vector_store %arg9[%c1, %c1_6, %c0_7], %3 {strides = array<i32>} : memref<18x18x4xf32, #tpu.memory_space<vmem>>, vector<16x16x4xf32>,
    %cst_8 = arith.constant 0.000000e+00 : f32
    %5 = vector.broadcast %cst_8 : f32 to vector<256x8xf32>
    %c0_9 = arith.constant 0 : index
    %c0_10 = arith.constant 0 : index
    %c0_11 = arith.constant 0 : index
    %6 = vector.load %arg9[%c0_9, %c0_10, %c0_11] : memref<18x18x4xf32, #tpu.memory_space<vmem>>, vector<16x16x4xf32>
    %7 = vector.shape_cast %6 : vector<16x16x4xf32> to vector<256x4xf32>
    %c0_12 = arith.constant 0 : index
    %c0_13 = arith.constant 0 : index
    %c0_14 = arith.constant 0 : index
    %8 = vector.load %arg2[%c0_12, %c0_13, %c0_14] : memref<9x4x8xf32, #tpu.memory_space<vmem>>, vector<1x4x8xf32>
    %9 = vector.shape_cast %8 : vector<1x4x8xf32> to vector<4x8xf32>
    %cst_15 = arith.constant dense<0.000000e+00> : vector<256x8xf32>
    %10 = tpu.matmul %7, %9, %cst_15 {dimension_numbers = #tpu.dot_dimension_numbers<[1], [0], [0], [1], [0, 0, 1, 1], [], []>} : vector<256x4xf32>, vector<4x8xf32>, vector<256x8xf32> -> vector<256x8xf32>
    %11 = arith.addf %5, %10 : vector<256x8xf32>
    %c0_16 = arith.constant 0 : index
    %c1_17 = arith.constant 1 : index
    %c0_18 = arith.constant 0 : index
    %12 = vector.load %arg9[%c0_16, %c1_17, %c0_18] : memref<18x18x4xf32, #tpu.memory_space<vmem>>, vector<16x16x4xf32>
    %13 = vector.shape_cast %12 : vector<16x16x4xf32> to vector<256x4xf32>
    %c1_19 = arith.constant 1 : index
    %c0_20 = arith.constant 0 : index
    %c0_21 = arith.constant 0 : index
    %14 = vector.load %arg2[%c1_19, %c0_20, %c0_21] : memref<9x4x8xf32, #tpu.memory_space<vmem>>, vector<1x4x8xf32>
    %15 = vector.shape_cast %14 : vector<1x4x8xf32> to vector<4x8xf32>
    %cst_22 = arith.constant dense<0.000000e+00> : vector<256x8xf32>
    %16 = tpu.matmul %13, %15, %cst_22 {dimension_numbers = #tpu.dot_dimension_numbers<[1], [0], [0], [1], [0, 0, 1, 1], [], []>} : vector<256x4xf32>, vector<4x8xf32>, vector<256x8xf32> -> vector<256x8xf32>
    %17 = arith.addf %11, %16 : vector<256x8xf32>
    %c0_23 = arith.constant 0 : index
    %c2 = arith.constant 2 : index
    %c0_24 = arith.constant 0 : index
    %18 = vector.load %arg9[%c0_23, %c2, %c0_24] : memref<18x18x4xf32, #tpu.memory_space<vmem>>, vector<16x16x4xf32>
    %19 = vector.shape_cast %18 : vector<16x16x4xf32> to vector<256x4xf32>
    %c2_25 = arith.constant 2 : index
    %c0_26 = arith.constant 0 : index
    %c0_27 = arith.constant 0 : index
    %20 = vector.load %arg2[%c2_25, %c0_26, %c0_27] : memref<9x4x8xf32, #tpu.memory_space<vmem>>, vector<1x4x8xf32>
    %21 = vector.shape_cast %20 : vector<1x4x8xf32> to vector<4x8xf32>
    %cst_28 = arith.constant dense<0.000000e+00> : vector<256x8xf32>
    %22 = tpu.matmul %19, %21, %cst_28 {dimension_numbers = #tpu.dot_dimension_numbers<[1], [0], [0], [1], [0, 0, 1, 1], [], []>} : vector<256x4xf32>, vector<4x8xf32>, vector<256x8xf32> -> vector<256x8xf32>
    %23 = arith.addf %17, %22 : vector<256x8xf32>
    %c1_29 = arith.constant 1 : index
    %c0_30 = arith.constant 0 : index
    %c0_31 = arith.constant 0 : index
    %24 = vector.load %arg9[%c1_29, %c0_30, %c0_31] : memref<18x18x4xf32, #tpu.memory_space<vmem>>, vector<16x16x4xf32>
    %25 = vector.shape_cast %24 : vector<16x16x4xf32> to vector<256x4xf32>
    %c3 = arith.constant 3 : index
    %c0_32 = arith.constant 0 : index
    %c0_33 = arith.constant 0 : index
    %26 = vector.load %arg2[%c3, %c0_32, %c0_33] : memref<9x4x8xf32, #tpu.memory_space<vmem>>, vector<1x4x8xf32>
    %27 = vector.shape_cast %26 : vector<1x4x8xf32> to vector<4x8xf32>
    %cst_34 = arith.constant dense<0.000000e+00> : vector<256x8xf32>
    %28 = tpu.matmul %25, %27, %cst_34 {dimension_numbers = #tpu.dot_dimension_numbers<[1], [0], [0], [1], [0, 0, 1, 1], [], []>} : vector<256x4xf32>, vector<4x8xf32>, vector<256x8xf32> -> vector<256x8xf32>
    %29 = arith.addf %23, %28 : vector<256x8xf32>
    %c1_35 = arith.constant 1 : index
    %c1_36 = arith.constant 1 : index
    %c0_37 = arith.constant 0 : index
    %30 = vector.load %arg9[%c1_35, %c1_36, %c0_37] : memref<18x18x4xf32, #tpu.memory_space<vmem>>, vector<16x16x4xf32>
    %31 = vector.shape_cast %30 : vector<16x16x4xf32> to vector<256x4xf32>
    %c4 = arith.constant 4 : index
    %c0_38 = arith.constant 0 : index
    %c0_39 = arith.constant 0 : index
    %32 = vector.load %arg2[%c4, %c0_38, %c0_39] : memref<9x4x8xf32, #tpu.memory_space<vmem>>, vector<1x4x8xf32>
    %33 = vector.shape_cast %32 : vector<1x4x8xf32> to vector<4x8xf32>
    %cst_40 = arith.constant dense<0.000000e+00> : vector<256x8xf32>
    %34 = tpu.matmul %31, %33, %cst_40 {dimension_numbers = #tpu.dot_dimension_numbers<[1], [0], [0], [1], [0, 0, 1, 1], [], []>} : vector<256x4xf32>, vector<4x8xf32>, vector<256x8xf32> -> vector<256x8xf32>
    %35 = arith.addf %29, %34 : vector<256x8xf32>
    %c1_41 = arith.constant 1 : index
    %c2_42 = arith.constant 2 : index
    %c0_43 = arith.constant 0 : index
    %36 = vector.load %arg9[%c1_41, %c2_42, %c0_43] : memref<18x18x4xf32, #tpu.memory_space<vmem>>, vector<16x16x4xf32>
    %37 = vector.shape_cast %36 : vector<16x16x4xf32> to vector<256x4xf32>
    %c5 = arith.constant 5 : index
    %c0_44 = arith.constant 0 : index
    %c0_45 = arith.constant 0 : index
    %38 = vector.load %arg2[%c5, %c0_44, %c0_45] : memref<9x4x8xf32, #tpu.memory_space<vmem>>, vector<1x4x8xf32>
    %39 = vector.shape_cast %38 : vector<1x4x8xf32> to vector<4x8xf32>
    %cst_46 = arith.constant dense<0.000000e+00> : vector<256x8xf32>
    %40 = tpu.matmul %37, %39, %cst_46 {dimension_numbers = #tpu.dot_dimension_numbers<[1], [0], [0], [1], [0, 0, 1, 1], [], []>} : vector<256x4xf32>, vector<4x8xf32>, vector<256x8xf32> -> vector<256x8xf32>
    %41 = arith.addf %35, %40 : vector<256x8xf32>
    %c2_47 = arith.constant 2 : index
    %c0_48 = arith.constant 0 : index
    %c0_49 = arith.constant 0 : index
    %42 = vector.load %arg9[%c2_47, %c0_48, %c0_49] : memref<18x18x4xf32, #tpu.memory_space<vmem>>, vector<16x16x4xf32>
    %43 = vector.shape_cast %42 : vector<16x16x4xf32> to vector<256x4xf32>
    %c6 = arith.constant 6 : index
    %c0_50 = arith.constant 0 : index
    %c0_51 = arith.constant 0 : index
    %44 = vector.load %arg2[%c6, %c0_50, %c0_51] : memref<9x4x8xf32, #tpu.memory_space<vmem>>, vector<1x4x8xf32>
    %45 = vector.shape_cast %44 : vector<1x4x8xf32> to vector<4x8xf32>
    %cst_52 = arith.constant dense<0.000000e+00> : vector<256x8xf32>
    %46 = tpu.matmul %43, %45, %cst_52 {dimension_numbers = #tpu.dot_dimension_numbers<[1], [0], [0], [1], [0, 0, 1, 1], [], []>} : vector<256x4xf32>, vector<4x8xf32>, vector<256x8xf32> -> vector<256x8xf32>
    %47 = arith.addf %41, %46 : vector<256x8xf32>
    %c2_53 = arith.constant 2 : index
    %c1_54 = arith.constant 1 : index
    %c0_55 = arith.constant 0 : index
    %48 = vector.load %arg9[%c2_53, %c1_54, %c0_55] : memref<18x18x4xf32, #tpu.memory_space<vmem>>, vector<16x16x4xf32>
    %49 = vector.shape_cast %48 : vector<16x16x4xf32> to vector<256x4xf32>
    %c7 = arith.constant 7 : index
    %c0_56 = arith.constant 0 : index
    %c0_57 = arith.constant 0 : index
    %50 = vector.load %arg2[%c7, %c0_56, %c0_57] : memref<9x4x8xf32, #tpu.memory_space<vmem>>, vector<1x4x8xf32>
    %51 = vector.shape_cast %50 : vector<1x4x8xf32> to vector<4x8xf32>
    %cst_58 = arith.constant dense<0.000000e+00> : vector<256x8xf32>
    %52 = tpu.matmul %49, %51, %cst_58 {dimension_numbers = #tpu.dot_dimension_numbers<[1], [0], [0], [1], [0, 0, 1, 1], [], []>} : vector<256x4xf32>, vector<4x8xf32>, vector<256x8xf32> -> vector<256x8xf32>
    %53 = arith.addf %47, %52 : vector<256x8xf32>
    %c2_59 = arith.constant 2 : index
    %c2_60 = arith.constant 2 : index
    %c0_61 = arith.constant 0 : index
    %54 = vector.load %arg9[%c2_59, %c2_60, %c0_61] : memref<18x18x4xf32, #tpu.memory_space<vmem>>, vector<16x16x4xf32>
    %55 = vector.shape_cast %54 : vector<16x16x4xf32> to vector<256x4xf32>
    %c8 = arith.constant 8 : index
    %c0_62 = arith.constant 0 : index
    %c0_63 = arith.constant 0 : index
    %56 = vector.load %arg2[%c8, %c0_62, %c0_63] : memref<9x4x8xf32, #tpu.memory_space<vmem>>, vector<1x4x8xf32>
    %57 = vector.shape_cast %56 : vector<1x4x8xf32> to vector<4x8xf32>
    %cst_64 = arith.constant dense<0.000000e+00> : vector<256x8xf32>
    %58 = tpu.matmul %55, %57, %cst_64 {dimension_numbers = #tpu.dot_dimension_numbers<[1], [0], [0], [1], [0, 0, 1, 1], [], []>} : vector<256x4xf32>, vector<4x8xf32>, vector<256x8xf32> -> vector<256x8xf32>
    %59 = arith.addf %53, %58 : vector<256x8xf32>
    %c0_65 = arith.constant 0 : index
    %c0_66 = arith.constant 0 : index
    %60 = vector.load %arg3[%c0_65, %c0_66] : memref<1x8xf32, #tpu.memory_space<vmem>>, vector<1x8xf32>
    %61 = vector.broadcast %60 : vector<1x8xf32> to vector<256x8xf32>
    %62 = arith.addf %59, %61 : vector<256x8xf32>
    %cst_67 = arith.constant 0.000000e+00 : f32
    %63 = vector.broadcast %cst_67 : f32 to vector<256x8xf32>
    %64 = arith.maximumf %62, %63 : vector<256x8xf32>
    %65 = vector.shape_cast %64 : vector<256x8xf32> to vector<16x16x8xf32>
    %cst_68 = arith.constant 0.000000e+00 : f32
    %66 = vector.broadcast %cst_68 : f32 to vector<18x18x8xf32>
    %c0_69 = arith.constant 0 : index
    %c0_70 = arith.constant 0 : index
    %c0_71 = arith.constant 0 : index
    %67 = vector.load %arg10[%c0_69, %c0_70, %c0_71] : memref<18x18x8xf32, #tpu.memory_space<vmem>>, vector<18x18x8xf32>
    tpu.vector_store %arg10[%c0_69, %c0_70, %c0_71], %66 {strides = array<i32>} : memref<18x18x8xf32, #tpu.memory_space<vmem>>, vector<18x18x8xf32>,
    %c1_72 = arith.constant 1 : index
    %c1_73 = arith.constant 1 : index
    %c0_74 = arith.constant 0 : index
    %68 = vector.load %arg10[%c1_72, %c1_73, %c0_74] : memref<18x18x8xf32, #tpu.memory_space<vmem>>, vector<16x16x8xf32>
    tpu.vector_store %arg10[%c1_72, %c1_73, %c0_74], %65 {strides = array<i32>} : memref<18x18x8xf32, #tpu.memory_space<vmem>>, vector<16x16x8xf32>,
    %cst_75 = arith.constant 0.000000e+00 : f32
    %69 = vector.broadcast %cst_75 : f32 to vector<256x16xf32>
    %c0_76 = arith.constant 0 : index
    %c0_77 = arith.constant 0 : index
    %c0_78 = arith.constant 0 : index
    %70 = vector.load %arg10[%c0_76, %c0_77, %c0_78] : memref<18x18x8xf32, #tpu.memory_space<vmem>>, vector<16x16x8xf32>
    %71 = vector.shape_cast %70 : vector<16x16x8xf32> to vector<256x8xf32>
    %c0_79 = arith.constant 0 : index
    %c0_80 = arith.constant 0 : index
    %c0_81 = arith.constant 0 : index
    %72 = vector.load %arg4[%c0_79, %c0_80, %c0_81] : memref<9x8x16xf32, #tpu.memory_space<vmem>>, vector<1x8x16xf32>
    %73 = vector.shape_cast %72 : vector<1x8x16xf32> to vector<8x16xf32>
    %cst_82 = arith.constant dense<0.000000e+00> : vector<256x16xf32>
    %74 = tpu.matmul %71, %73, %cst_82 {dimension_numbers = #tpu.dot_dimension_numbers<[1], [0], [0], [1], [0, 0, 1, 1], [], []>} : vector<256x8xf32>, vector<8x16xf32>, vector<256x16xf32> -> vector<256x16xf32>
    %75 = arith.addf %69, %74 : vector<256x16xf32>
    %c0_83 = arith.constant 0 : index
    %c1_84 = arith.constant 1 : index
    %c0_85 = arith.constant 0 : index
    %76 = vector.load %arg10[%c0_83, %c1_84, %c0_85] : memref<18x18x8xf32, #tpu.memory_space<vmem>>, vector<16x16x8xf32>
    %77 = vector.shape_cast %76 : vector<16x16x8xf32> to vector<256x8xf32>
    %c1_86 = arith.constant 1 : index
    %c0_87 = arith.constant 0 : index
    %c0_88 = arith.constant 0 : index
    %78 = vector.load %arg4[%c1_86, %c0_87, %c0_88] : memref<9x8x16xf32, #tpu.memory_space<vmem>>, vector<1x8x16xf32>
    %79 = vector.shape_cast %78 : vector<1x8x16xf32> to vector<8x16xf32>
    %cst_89 = arith.constant dense<0.000000e+00> : vector<256x16xf32>
    %80 = tpu.matmul %77, %79, %cst_89 {dimension_numbers = #tpu.dot_dimension_numbers<[1], [0], [0], [1], [0, 0, 1, 1], [], []>} : vector<256x8xf32>, vector<8x16xf32>, vector<256x16xf32> -> vector<256x16xf32>
    %81 = arith.addf %75, %80 : vector<256x16xf32>
    %c0_90 = arith.constant 0 : index
    %c2_91 = arith.constant 2 : index
    %c0_92 = arith.constant 0 : index
    %82 = vector.load %arg10[%c0_90, %c2_91, %c0_92] : memref<18x18x8xf32, #tpu.memory_space<vmem>>, vector<16x16x8xf32>
    %83 = vector.shape_cast %82 : vector<16x16x8xf32> to vector<256x8xf32>
    %c2_93 = arith.constant 2 : index
    %c0_94 = arith.constant 0 : index
    %c0_95 = arith.constant 0 : index
    %84 = vector.load %arg4[%c2_93, %c0_94, %c0_95] : memref<9x8x16xf32, #tpu.memory_space<vmem>>, vector<1x8x16xf32>
    %85 = vector.shape_cast %84 : vector<1x8x16xf32> to vector<8x16xf32>
    %cst_96 = arith.constant dense<0.000000e+00> : vector<256x16xf32>
    %86 = tpu.matmul %83, %85, %cst_96 {dimension_numbers = #tpu.dot_dimension_numbers<[1], [0], [0], [1], [0, 0, 1, 1], [], []>} : vector<256x8xf32>, vector<8x16xf32>, vector<256x16xf32> -> vector<256x16xf32>
    %87 = arith.addf %81, %86 : vector<256x16xf32>
    %c1_97 = arith.constant 1 : index
    %c0_98 = arith.constant 0 : index
    %c0_99 = arith.constant 0 : index
    %88 = vector.load %arg10[%c1_97, %c0_98, %c0_99] : memref<18x18x8xf32, #tpu.memory_space<vmem>>, vector<16x16x8xf32>
    %89 = vector.shape_cast %88 : vector<16x16x8xf32> to vector<256x8xf32>
    %c3_100 = arith.constant 3 : index
    %c0_101 = arith.constant 0 : index
    %c0_102 = arith.constant 0 : index
    %90 = vector.load %arg4[%c3_100, %c0_101, %c0_102] : memref<9x8x16xf32, #tpu.memory_space<vmem>>, vector<1x8x16xf32>
    %91 = vector.shape_cast %90 : vector<1x8x16xf32> to vector<8x16xf32>
    %cst_103 = arith.constant dense<0.000000e+00> : vector<256x16xf32>
    %92 = tpu.matmul %89, %91, %cst_103 {dimension_numbers = #tpu.dot_dimension_numbers<[1], [0], [0], [1], [0, 0, 1, 1], [], []>} : vector<256x8xf32>, vector<8x16xf32>, vector<256x16xf32> -> vector<256x16xf32>
    %93 = arith.addf %87, %92 : vector<256x16xf32>
    %c1_104 = arith.constant 1 : index
    %c1_105 = arith.constant 1 : index
    %c0_106 = arith.constant 0 : index
    %94 = vector.load %arg10[%c1_104, %c1_105, %c0_106] : memref<18x18x8xf32, #tpu.memory_space<vmem>>, vector<16x16x8xf32>
    %95 = vector.shape_cast %94 : vector<16x16x8xf32> to vector<256x8xf32>
    %c4_107 = arith.constant 4 : index
    %c0_108 = arith.constant 0 : index
    %c0_109 = arith.constant 0 : index
    %96 = vector.load %arg4[%c4_107, %c0_108, %c0_109] : memref<9x8x16xf32, #tpu.memory_space<vmem>>, vector<1x8x16xf32>
    %97 = vector.shape_cast %96 : vector<1x8x16xf32> to vector<8x16xf32>
    %cst_110 = arith.constant dense<0.000000e+00> : vector<256x16xf32>
    %98 = tpu.matmul %95, %97, %cst_110 {dimension_numbers = #tpu.dot_dimension_numbers<[1], [0], [0], [1], [0, 0, 1, 1], [], []>} : vector<256x8xf32>, vector<8x16xf32>, vector<256x16xf32> -> vector<256x16xf32>
    %99 = arith.addf %93, %98 : vector<256x16xf32>
    %c1_111 = arith.constant 1 : index
    %c2_112 = arith.constant 2 : index
    %c0_113 = arith.constant 0 : index
    %100 = vector.load %arg10[%c1_111, %c2_112, %c0_113] : memref<18x18x8xf32, #tpu.memory_space<vmem>>, vector<16x16x8xf32>
    %101 = vector.shape_cast %100 : vector<16x16x8xf32> to vector<256x8xf32>
    %c5_114 = arith.constant 5 : index
    %c0_115 = arith.constant 0 : index
    %c0_116 = arith.constant 0 : index
    %102 = vector.load %arg4[%c5_114, %c0_115, %c0_116] : memref<9x8x16xf32, #tpu.memory_space<vmem>>, vector<1x8x16xf32>
    %103 = vector.shape_cast %102 : vector<1x8x16xf32> to vector<8x16xf32>
    %cst_117 = arith.constant dense<0.000000e+00> : vector<256x16xf32>
    %104 = tpu.matmul %101, %103, %cst_117 {dimension_numbers = #tpu.dot_dimension_numbers<[1], [0], [0], [1], [0, 0, 1, 1], [], []>} : vector<256x8xf32>, vector<8x16xf32>, vector<256x16xf32> -> vector<256x16xf32>
    %105 = arith.addf %99, %104 : vector<256x16xf32>
    %c2_118 = arith.constant 2 : index
    %c0_119 = arith.constant 0 : index
    %c0_120 = arith.constant 0 : index
    %106 = vector.load %arg10[%c2_118, %c0_119, %c0_120] : memref<18x18x8xf32, #tpu.memory_space<vmem>>, vector<16x16x8xf32>
    %107 = vector.shape_cast %106 : vector<16x16x8xf32> to vector<256x8xf32>
    %c6_121 = arith.constant 6 : index
    %c0_122 = arith.constant 0 : index
    %c0_123 = arith.constant 0 : index
    %108 = vector.load %arg4[%c6_121, %c0_122, %c0_123] : memref<9x8x16xf32, #tpu.memory_space<vmem>>, vector<1x8x16xf32>
    %109 = vector.shape_cast %108 : vector<1x8x16xf32> to vector<8x16xf32>
    %cst_124 = arith.constant dense<0.000000e+00> : vector<256x16xf32>
    %110 = tpu.matmul %107, %109, %cst_124 {dimension_numbers = #tpu.dot_dimension_numbers<[1], [0], [0], [1], [0, 0, 1, 1], [], []>} : vector<256x8xf32>, vector<8x16xf32>, vector<256x16xf32> -> vector<256x16xf32>
    %111 = arith.addf %105, %110 : vector<256x16xf32>
    %c2_125 = arith.constant 2 : index
    %c1_126 = arith.constant 1 : index
    %c0_127 = arith.constant 0 : index
    %112 = vector.load %arg10[%c2_125, %c1_126, %c0_127] : memref<18x18x8xf32, #tpu.memory_space<vmem>>, vector<16x16x8xf32>
    %113 = vector.shape_cast %112 : vector<16x16x8xf32> to vector<256x8xf32>
    %c7_128 = arith.constant 7 : index
    %c0_129 = arith.constant 0 : index
    %c0_130 = arith.constant 0 : index
    %114 = vector.load %arg4[%c7_128, %c0_129, %c0_130] : memref<9x8x16xf32, #tpu.memory_space<vmem>>, vector<1x8x16xf32>
    %115 = vector.shape_cast %114 : vector<1x8x16xf32> to vector<8x16xf32>
    %cst_131 = arith.constant dense<0.000000e+00> : vector<256x16xf32>
    %116 = tpu.matmul %113, %115, %cst_131 {dimension_numbers = #tpu.dot_dimension_numbers<[1], [0], [0], [1], [0, 0, 1, 1], [], []>} : vector<256x8xf32>, vector<8x16xf32>, vector<256x16xf32> -> vector<256x16xf32>
    %117 = arith.addf %111, %116 : vector<256x16xf32>
    %c2_132 = arith.constant 2 : index
    %c2_133 = arith.constant 2 : index
    %c0_134 = arith.constant 0 : index
    %118 = vector.load %arg10[%c2_132, %c2_133, %c0_134] : memref<18x18x8xf32, #tpu.memory_space<vmem>>, vector<16x16x8xf32>
    %119 = vector.shape_cast %118 : vector<16x16x8xf32> to vector<256x8xf32>
    %c8_135 = arith.constant 8 : index
    %c0_136 = arith.constant 0 : index
    %c0_137 = arith.constant 0 : index
    %120 = vector.load %arg4[%c8_135, %c0_136, %c0_137] : memref<9x8x16xf32, #tpu.memory_space<vmem>>, vector<1x8x16xf32>
    %121 = vector.shape_cast %120 : vector<1x8x16xf32> to vector<8x16xf32>
    %cst_138 = arith.constant dense<0.000000e+00> : vector<256x16xf32>
    %122 = tpu.matmul %119, %121, %cst_138 {dimension_numbers = #tpu.dot_dimension_numbers<[1], [0], [0], [1], [0, 0, 1, 1], [], []>} : vector<256x8xf32>, vector<8x16xf32>, vector<256x16xf32> -> vector<256x16xf32>
    %123 = arith.addf %117, %122 : vector<256x16xf32>
    %c0_139 = arith.constant 0 : index
    %c0_140 = arith.constant 0 : index
    %124 = vector.load %arg5[%c0_139, %c0_140] : memref<1x16xf32, #tpu.memory_space<vmem>>, vector<1x16xf32>
    %125 = vector.broadcast %124 : vector<1x16xf32> to vector<256x16xf32>
    %126 = arith.addf %123, %125 : vector<256x16xf32>
    %cst_141 = arith.constant 0.000000e+00 : f32
    %127 = vector.broadcast %cst_141 : f32 to vector<256x16xf32>
    %128 = arith.maximumf %126, %127 : vector<256x16xf32>
    %129 = vector.shape_cast %128 : vector<256x16xf32> to vector<16x16x16xf32>
    %cst_142 = arith.constant 0.000000e+00 : f32
    %130 = vector.broadcast %cst_142 : f32 to vector<18x18x16xf32>
    %c0_143 = arith.constant 0 : index
    %c0_144 = arith.constant 0 : index
    %c0_145 = arith.constant 0 : index
    %131 = vector.load %arg11[%c0_143, %c0_144, %c0_145] : memref<18x18x16xf32, #tpu.memory_space<vmem>>, vector<18x18x16xf32>
    tpu.vector_store %arg11[%c0_143, %c0_144, %c0_145], %130 {strides = array<i32>} : memref<18x18x16xf32, #tpu.memory_space<vmem>>, vector<18x18x16xf32>,
    %c1_146 = arith.constant 1 : index
    %c1_147 = arith.constant 1 : index
    %c0_148 = arith.constant 0 : index
    %132 = vector.load %arg11[%c1_146, %c1_147, %c0_148] : memref<18x18x16xf32, #tpu.memory_space<vmem>>, vector<16x16x16xf32>
    tpu.vector_store %arg11[%c1_146, %c1_147, %c0_148], %129 {strides = array<i32>} : memref<18x18x16xf32, #tpu.memory_space<vmem>>, vector<16x16x16xf32>,
    %cst_149 = arith.constant 0.000000e+00 : f32
    %133 = vector.broadcast %cst_149 : f32 to vector<256x4xf32>
    %c0_150 = arith.constant 0 : index
    %c0_151 = arith.constant 0 : index
    %c0_152 = arith.constant 0 : index
    %134 = vector.load %arg11[%c0_150, %c0_151, %c0_152] : memref<18x18x16xf32, #tpu.memory_space<vmem>>, vector<16x16x16xf32>
    %135 = vector.shape_cast %134 : vector<16x16x16xf32> to vector<256x16xf32>
    %c0_153 = arith.constant 0 : index
    %c0_154 = arith.constant 0 : index
    %c0_155 = arith.constant 0 : index
    %136 = vector.load %arg6[%c0_153, %c0_154, %c0_155] : memref<9x16x4xf32, #tpu.memory_space<vmem>>, vector<1x16x4xf32>
    %137 = vector.shape_cast %136 : vector<1x16x4xf32> to vector<16x4xf32>
    %cst_156 = arith.constant dense<0.000000e+00> : vector<256x4xf32>
    %138 = tpu.matmul %135, %137, %cst_156 {dimension_numbers = #tpu.dot_dimension_numbers<[1], [0], [0], [1], [0, 0, 1, 1], [], []>} : vector<256x16xf32>, vector<16x4xf32>, vector<256x4xf32> -> vector<256x4xf32>
    %139 = arith.addf %133, %138 : vector<256x4xf32>
    %c0_157 = arith.constant 0 : index
    %c1_158 = arith.constant 1 : index
    %c0_159 = arith.constant 0 : index
    %140 = vector.load %arg11[%c0_157, %c1_158, %c0_159] : memref<18x18x16xf32, #tpu.memory_space<vmem>>, vector<16x16x16xf32>
    %141 = vector.shape_cast %140 : vector<16x16x16xf32> to vector<256x16xf32>
    %c1_160 = arith.constant 1 : index
    %c0_161 = arith.constant 0 : index
    %c0_162 = arith.constant 0 : index
    %142 = vector.load %arg6[%c1_160, %c0_161, %c0_162] : memref<9x16x4xf32, #tpu.memory_space<vmem>>, vector<1x16x4xf32>
    %143 = vector.shape_cast %142 : vector<1x16x4xf32> to vector<16x4xf32>
    %cst_163 = arith.constant dense<0.000000e+00> : vector<256x4xf32>
    %144 = tpu.matmul %141, %143, %cst_163 {dimension_numbers = #tpu.dot_dimension_numbers<[1], [0], [0], [1], [0, 0, 1, 1], [], []>} : vector<256x16xf32>, vector<16x4xf32>, vector<256x4xf32> -> vector<256x4xf32>
    %145 = arith.addf %139, %144 : vector<256x4xf32>
    %c0_164 = arith.constant 0 : index
    %c2_165 = arith.constant 2 : index
    %c0_166 = arith.constant 0 : index
    %146 = vector.load %arg11[%c0_164, %c2_165, %c0_166] : memref<18x18x16xf32, #tpu.memory_space<vmem>>, vector<16x16x16xf32>
    %147 = vector.shape_cast %146 : vector<16x16x16xf32> to vector<256x16xf32>
    %c2_167 = arith.constant 2 : index
    %c0_168 = arith.constant 0 : index
    %c0_169 = arith.constant 0 : index
    %148 = vector.load %arg6[%c2_167, %c0_168, %c0_169] : memref<9x16x4xf32, #tpu.memory_space<vmem>>, vector<1x16x4xf32>
    %149 = vector.shape_cast %148 : vector<1x16x4xf32> to vector<16x4xf32>
    %cst_170 = arith.constant dense<0.000000e+00> : vector<256x4xf32>
    %150 = tpu.matmul %147, %149, %cst_170 {dimension_numbers = #tpu.dot_dimension_numbers<[1], [0], [0], [1], [0, 0, 1, 1], [], []>} : vector<256x16xf32>, vector<16x4xf32>, vector<256x4xf32> -> vector<256x4xf32>
    %151 = arith.addf %145, %150 : vector<256x4xf32>
    %c1_171 = arith.constant 1 : index
    %c0_172 = arith.constant 0 : index
    %c0_173 = arith.constant 0 : index
    %152 = vector.load %arg11[%c1_171, %c0_172, %c0_173] : memref<18x18x16xf32, #tpu.memory_space<vmem>>, vector<16x16x16xf32>
    %153 = vector.shape_cast %152 : vector<16x16x16xf32> to vector<256x16xf32>
    %c3_174 = arith.constant 3 : index
    %c0_175 = arith.constant 0 : index
    %c0_176 = arith.constant 0 : index
    %154 = vector.load %arg6[%c3_174, %c0_175, %c0_176] : memref<9x16x4xf32, #tpu.memory_space<vmem>>, vector<1x16x4xf32>
    %155 = vector.shape_cast %154 : vector<1x16x4xf32> to vector<16x4xf32>
    %cst_177 = arith.constant dense<0.000000e+00> : vector<256x4xf32>
    %156 = tpu.matmul %153, %155, %cst_177 {dimension_numbers = #tpu.dot_dimension_numbers<[1], [0], [0], [1], [0, 0, 1, 1], [], []>} : vector<256x16xf32>, vector<16x4xf32>, vector<256x4xf32> -> vector<256x4xf32>
    %157 = arith.addf %151, %156 : vector<256x4xf32>
    %c1_178 = arith.constant 1 : index
    %c1_179 = arith.constant 1 : index
    %c0_180 = arith.constant 0 : index
    %158 = vector.load %arg11[%c1_178, %c1_179, %c0_180] : memref<18x18x16xf32, #tpu.memory_space<vmem>>, vector<16x16x16xf32>
    %159 = vector.shape_cast %158 : vector<16x16x16xf32> to vector<256x16xf32>
    %c4_181 = arith.constant 4 : index
    %c0_182 = arith.constant 0 : index
    %c0_183 = arith.constant 0 : index
    %160 = vector.load %arg6[%c4_181, %c0_182, %c0_183] : memref<9x16x4xf32, #tpu.memory_space<vmem>>, vector<1x16x4xf32>
    %161 = vector.shape_cast %160 : vector<1x16x4xf32> to vector<16x4xf32>
    %cst_184 = arith.constant dense<0.000000e+00> : vector<256x4xf32>
    %162 = tpu.matmul %159, %161, %cst_184 {dimension_numbers = #tpu.dot_dimension_numbers<[1], [0], [0], [1], [0, 0, 1, 1], [], []>} : vector<256x16xf32>, vector<16x4xf32>, vector<256x4xf32> -> vector<256x4xf32>
    %163 = arith.addf %157, %162 : vector<256x4xf32>
    %c1_185 = arith.constant 1 : index
    %c2_186 = arith.constant 2 : index
    %c0_187 = arith.constant 0 : index
    %164 = vector.load %arg11[%c1_185, %c2_186, %c0_187] : memref<18x18x16xf32, #tpu.memory_space<vmem>>, vector<16x16x16xf32>
    %165 = vector.shape_cast %164 : vector<16x16x16xf32> to vector<256x16xf32>
    %c5_188 = arith.constant 5 : index
    %c0_189 = arith.constant 0 : index
    %c0_190 = arith.constant 0 : index
    %166 = vector.load %arg6[%c5_188, %c0_189, %c0_190] : memref<9x16x4xf32, #tpu.memory_space<vmem>>, vector<1x16x4xf32>
    %167 = vector.shape_cast %166 : vector<1x16x4xf32> to vector<16x4xf32>
    %cst_191 = arith.constant dense<0.000000e+00> : vector<256x4xf32>
    %168 = tpu.matmul %165, %167, %cst_191 {dimension_numbers = #tpu.dot_dimension_numbers<[1], [0], [0], [1], [0, 0, 1, 1], [], []>} : vector<256x16xf32>, vector<16x4xf32>, vector<256x4xf32> -> vector<256x4xf32>
    %169 = arith.addf %163, %168 : vector<256x4xf32>
    %c2_192 = arith.constant 2 : index
    %c0_193 = arith.constant 0 : index
    %c0_194 = arith.constant 0 : index
    %170 = vector.load %arg11[%c2_192, %c0_193, %c0_194] : memref<18x18x16xf32, #tpu.memory_space<vmem>>, vector<16x16x16xf32>
    %171 = vector.shape_cast %170 : vector<16x16x16xf32> to vector<256x16xf32>
    %c6_195 = arith.constant 6 : index
    %c0_196 = arith.constant 0 : index
    %c0_197 = arith.constant 0 : index
    %172 = vector.load %arg6[%c6_195, %c0_196, %c0_197] : memref<9x16x4xf32, #tpu.memory_space<vmem>>, vector<1x16x4xf32>
    %173 = vector.shape_cast %172 : vector<1x16x4xf32> to vector<16x4xf32>
    %cst_198 = arith.constant dense<0.000000e+00> : vector<256x4xf32>
    %174 = tpu.matmul %171, %173, %cst_198 {dimension_numbers = #tpu.dot_dimension_numbers<[1], [0], [0], [1], [0, 0, 1, 1], [], []>} : vector<256x16xf32>, vector<16x4xf32>, vector<256x4xf32> -> vector<256x4xf32>
    %175 = arith.addf %169, %174 : vector<256x4xf32>
    %c2_199 = arith.constant 2 : index
    %c1_200 = arith.constant 1 : index
    %c0_201 = arith.constant 0 : index
    %176 = vector.load %arg11[%c2_199, %c1_200, %c0_201] : memref<18x18x16xf32, #tpu.memory_space<vmem>>, vector<16x16x16xf32>
    %177 = vector.shape_cast %176 : vector<16x16x16xf32> to vector<256x16xf32>
    %c7_202 = arith.constant 7 : index
    %c0_203 = arith.constant 0 : index
    %c0_204 = arith.constant 0 : index
    %178 = vector.load %arg6[%c7_202, %c0_203, %c0_204] : memref<9x16x4xf32, #tpu.memory_space<vmem>>, vector<1x16x4xf32>
    %179 = vector.shape_cast %178 : vector<1x16x4xf32> to vector<16x4xf32>
    %cst_205 = arith.constant dense<0.000000e+00> : vector<256x4xf32>
    %180 = tpu.matmul %177, %179, %cst_205 {dimension_numbers = #tpu.dot_dimension_numbers<[1], [0], [0], [1], [0, 0, 1, 1], [], []>} : vector<256x16xf32>, vector<16x4xf32>, vector<256x4xf32> -> vector<256x4xf32>
    %181 = arith.addf %175, %180 : vector<256x4xf32>
    %c2_206 = arith.constant 2 : index
    %c2_207 = arith.constant 2 : index
    %c0_208 = arith.constant 0 : index
    %182 = vector.load %arg11[%c2_206, %c2_207, %c0_208] : memref<18x18x16xf32, #tpu.memory_space<vmem>>, vector<16x16x16xf32>
    %183 = vector.shape_cast %182 : vector<16x16x16xf32> to vector<256x16xf32>
    %c8_209 = arith.constant 8 : index
    %c0_210 = arith.constant 0 : index
    %c0_211 = arith.constant 0 : index
    %184 = vector.load %arg6[%c8_209, %c0_210, %c0_211] : memref<9x16x4xf32, #tpu.memory_space<vmem>>, vector<1x16x4xf32>
    %185 = vector.shape_cast %184 : vector<1x16x4xf32> to vector<16x4xf32>
    %cst_212 = arith.constant dense<0.000000e+00> : vector<256x4xf32>
    %186 = tpu.matmul %183, %185, %cst_212 {dimension_numbers = #tpu.dot_dimension_numbers<[1], [0], [0], [1], [0, 0, 1, 1], [], []>} : vector<256x16xf32>, vector<16x4xf32>, vector<256x4xf32> -> vector<256x4xf32>
    %187 = arith.addf %181, %186 : vector<256x4xf32>
    %c0_213 = arith.constant 0 : index
    %c0_214 = arith.constant 0 : index
    %188 = vector.load %arg7[%c0_213, %c0_214] : memref<1x4xf32, #tpu.memory_space<vmem>>, vector<1x4xf32>
    %189 = vector.broadcast %188 : vector<1x4xf32> to vector<256x4xf32>
    %190 = arith.addf %187, %189 : vector<256x4xf32>
    %191 = vector.shape_cast %190 : vector<256x4xf32> to vector<16x16x4xf32>
    %c0_215 = arith.constant 0 : index
    %c0_216 = arith.constant 0 : index
    %c0_217 = arith.constant 0 : index
    %c0_218 = arith.constant 0 : index
    %192 = vector.load %arg8[%c0_215, %c0_216, %c0_217, %c0_218] : memref<1x16x16x4xf32, #tpu.memory_space<vmem>>, vector<1x16x16x4xf32>
    %193 = vector.shape_cast %192 : vector<1x16x16x4xf32> to vector<16x16x4xf32>
    %194 = vector.shape_cast %191 : vector<16x16x4xf32> to vector<1x16x16x4xf32>
    tpu.vector_store %arg8[%c0_215, %c0_216, %c0_217, %c0_218], %194 {strides = array<i32>} : memref<1x16x16x4xf32, #tpu.memory_space<vmem>>, vector<1x16x16x4xf32>,
    return
  }
  func.func @transform_0(%arg0: i32) -> (i32, i32, i32, i32) {
    %c0_i32 = arith.constant 0 : i32
    %c0_i32_0 = arith.constant 0 : i32
    %c0_i32_1 = arith.constant 0 : i32
    %c0_i32_2 = arith.constant 0 : i32
    return %arg0, %c0_i32, %c0_i32_0, %c0_i32_1 : i32, i32, i32, i32
  }
  func.func @transform_1(%arg0: i32) -> (i32, i32, i32) {
    %c0_i32 = arith.constant 0 : i32
    %c0_i32_0 = arith.constant 0 : i32
    %c0_i32_1 = arith.constant 0 : i32
    %c0_i32_2 = arith.constant 0 : i32
    return %c0_i32, %c0_i32_0, %c0_i32_1 : i32, i32, i32
  }
  func.func @transform_2(%arg0: i32) -> (i32, i32) {
    %c0_i32 = arith.constant 0 : i32
    %c0_i32_0 = arith.constant 0 : i32
    %c0_i32_1 = arith.constant 0 : i32
    return %c0_i32, %c0_i32_0 : i32, i32
  }
  func.func @transform_3(%arg0: i32) -> (i32, i32, i32) {
    %c0_i32 = arith.constant 0 : i32
    %c0_i32_0 = arith.constant 0 : i32
    %c0_i32_1 = arith.constant 0 : i32
    %c0_i32_2 = arith.constant 0 : i32
    return %c0_i32, %c0_i32_0, %c0_i32_1 : i32, i32, i32
  }
  func.func @transform_4(%arg0: i32) -> (i32, i32) {
    %c0_i32 = arith.constant 0 : i32
    %c0_i32_0 = arith.constant 0 : i32
    %c0_i32_1 = arith.constant 0 : i32
    return %c0_i32, %c0_i32_0 : i32, i32
  }
  func.func @transform_5(%arg0: i32) -> (i32, i32, i32) {
    %c0_i32 = arith.constant 0 : i32
    %c0_i32_0 = arith.constant 0 : i32
    %c0_i32_1 = arith.constant 0 : i32
    %c0_i32_2 = arith.constant 0 : i32
    return %c0_i32, %c0_i32_0, %c0_i32_1 : i32, i32, i32
  }
  func.func @transform_6(%arg0: i32) -> (i32, i32) {
    %c0_i32 = arith.constant 0 : i32
    %c0_i32_0 = arith.constant 0 : i32
    %c0_i32_1 = arith.constant 0 : i32
    return %c0_i32, %c0_i32_0 : i32, i32
  }
  func.func @transform_7(%arg0: i32) -> (i32, i32, i32, i32) {
    %c0_i32 = arith.constant 0 : i32
    %c0_i32_0 = arith.constant 0 : i32
    %c0_i32_1 = arith.constant 0 : i32
    %c0_i32_2 = arith.constant 0 : i32
    return %arg0, %c0_i32, %c0_i32_0, %c0_i32_1 : i32, i32, i32, i32
  }
}

</mosaic_0001>

<bundles_post_ra>
// kernel: tpu_custom_call.1
= control target key start
LH: loop header
LB: loop body
LE: loop exit
PB: predicated region body
PF: predicated region fallthrough
CT: control target
= control target key end

     0   :  { %s14390_s24 = smov 0   ;;  %s19209_s0 = inlined_call_operand.vmem [shape: f32[2,16,16,4], index: 0, kind: input, shape index: {}]   ;;  %s19210_s1 = inlined_call_operand.vmem [shape: f32[9,4,8], index: 1, kind: input, shape index: {}]   ;;  %s19211_s2 = inlined_call_operand.vmem [shape: f32[1,8], index: 2, kind: input, shape index: {}]   ;;  %s19212_s3 = inlined_call_operand.vmem [shape: f32[9,8,16], index: 3, kind: input, shape index: {}]   ;;  %s19213_s4 = inlined_call_operand.vmem [shape: f32[1,16], index: 4, kind: input, shape index: {}]   ;;  %s19214_s5 = inlined_call_operand.vmem [shape: f32[9,16,4], index: 5, kind: input, shape index: {}]   ;;  %s19215_s6 = inlined_call_operand.vmem [shape: f32[1,4], index: 6, kind: input, shape index: {}]   ;;  %s19216_s7 = inlined_call_operand.vmem [shape: f32[2,16,16,4], index: 7, kind: output, shape index: {}]  }
   0x1 LB: > { %s11140_s25 = sadd.s32 4294967295, %s14347_s24   ;;  %p11144_p0 = scmp.ge.s32.totalorder %s14347_s24, 1  ;;  %s14347_s24 = sphi %s14390_s24, %s17_s24  }
   0x2   : > { %p237_p1 = scmp.lt.s32.totalorder %s14347_s24, 3 }
   0x4   : > { %p238_p2 = pnand %p11144_p0, %p237_p1 }
   0x6   : > { %241 = sbr.rel (%p238_p2) target bundleno = 1472 (0x5c0), region = 48 }
   0xb   : > { %v11149_v0 = vld [vmem:[%s19210_s1 + $0x4] sm:$0xf]  ;;  %vm563_vm0 = vcmask 1043456   ;;  %vm279_vm1 = vcmask 31744   ;;  %p14403_p3 = scmp.lt.s32.totalorder %s11140_s25, 1  ;;  %v19217_v1 = vmov 0.0  }
   0xc   : > { %14329 = vmatprep.subr.msk.mxu1 %vm563_vm0, %v11149_v0  ;;  %12961 = vmatprep.subr.msk.mxu0 %vm563_vm0, %v11149_v0  ;;  %280 = vst.msk [vmem:[#allocation2] sm:$0xff] %vm279_vm1, %v19217_v1  ;;  %281 = vst.msk [vmem:[#allocation2 + $0x8] sm:$0xff] %vm279_vm1, %v19217_v1  ;;  %v14484_v2 = vld [vmem:[%s19210_s1] sm:$0xf]  ;;  %vm282_vm2 = vcmask 25600   ;;  %vm3918_vm3 = vcmask 64512  }
   0xd   : > { %284 = vst.msk [vmem:[#allocation2 + $0x18] sm:$0xff] %vm279_vm1, %v19217_v1  ;;  %285 = vst.msk [vmem:[#allocation2 + $0x20] sm:$0xff] %vm279_vm1, %v19217_v1  ;;  %v11216_v3 = vld [vmem:[%s19210_s1 + $0x8] sm:$0xf]  ;;  %14330 = vmatpush3.msk.msra.mxu1 %vm563_vm0, %v11149_v0  ;;  %12962 = vmatpush3.msk.msra.mxu0 %vm563_vm0, %v11149_v0  ;;  %s19992_s25 = smov (!%p14403_p3, %s11140_s25), 1  ;;  %vm3921_vm4 = vcmask 58368  }
   0xe   : > { %287 = vst.msk [vmem:[#allocation2 + $0x30] sm:$0xff] %vm279_vm1, %v19217_v1  ;;  %288 = vst.msk [vmem:[#allocation2 + $0x38] sm:$0xff] %vm279_vm1, %v19217_v1  ;;  %13011 = vmatprep.subr.msk.mxu1 %vm563_vm0, %v14484_v2  ;;  %13061 = vmatprep.subr.msk.mxu0 %vm563_vm0, %v11216_v3  ;;  %s12059_s10 = sshll.u32 %s19992_s25, 8  ;;  %v14556_v10 = vld [vmem:[%s19210_s1 + $0x10] sm:$0xf]  ;;  %vm7497_vm5 = vcmask 130048  }
   0xf   : > { %290 = vst.msk [vmem:[#allocation2 + $0x48] sm:$0xff] %vm279_vm1, %v19217_v1  ;;  %291 = vst.msk [vmem:[#allocation2 + $0x50] sm:$0xff] %vm279_vm1, %v19217_v1  ;;  %s14542_s13 = scalar_lea.vmem %s19209_s0, %s12059_s10  ;;  %v14615_v34 = vld [vmem:[%s19210_s1 + $0xc] sm:$0xf]  ;;  %vm7500_vm6 = vcmask 123904   ;;  %s18997_s9 = scalar_lea.vmem %s19216_s7, %s12059_s10 }
  0x10   : > { %293 = vst.msk [vmem:[#allocation2 + $0x60] sm:$0xff] %vm279_vm1, %v19217_v1  ;;  %294 = vst.msk [vmem:[#allocation2 + $0x68] sm:$0xff] %vm279_vm1, %v19217_v1  ;;  %v349_v4 = vld [vmem:[%s14542_s13 + $0x70] sm:$0xff]  ;;  %v350_v5 = vld [vmem:[%s14542_s13 + $0x78] sm:$0xff] }
  0x11   : > { %296 = vst.msk [vmem:[#allocation2 + $0x78] sm:$0xff] %vm279_vm1, %v19217_v1  ;;  %297 = vst.msk [vmem:[#allocation2 + $0x80] sm:$0xff] %vm279_vm1, %v19217_v1  ;;  %v335_v6 = vld [vmem:[%s14542_s13] sm:$0xff]  ;;  %v336_v8 = vld [vmem:[%s14542_s13 + $0x8] sm:$0xff] }
  0x12   : > { %299 = vst.msk [vmem:[#allocation2 + $0x90] sm:$0xff] %vm279_vm1, %v19217_v1  ;;  %300 = vst.msk [vmem:[#allocation2 + $0x98] sm:$0xff] %vm279_vm1, %v19217_v1  ;;  %v351_v7 = vld [vmem:[%s14542_s13 + $0x80] sm:$0xff]  ;;  %v352_v9 = vld [vmem:[%s14542_s13 + $0x88] sm:$0xff] }
  0x13   : > { %302 = vst.msk [vmem:[#allocation2 + $0xa8] sm:$0xff] %vm279_vm1, %v19217_v1  ;;  %303 = vst.msk [vmem:[#allocation2 + $0xb0] sm:$0xff] %vm279_vm1, %v19217_v1  ;;  %v433_v11 = vld [vmem:[#allocation2 + $0x1] sm:$0xff]  ;;  %v337_v12 = vld [vmem:[%s14542_s13 + $0x10] sm:$0xff] }
  0x14   : > { %305 = vst.msk [vmem:[#allocation2 + $0xc0] sm:$0xff] %vm279_vm1, %v19217_v1  ;;  %306 = vst.msk [vmem:[#allocation2 + $0xc8] sm:$0xff] %vm279_vm1, %v19217_v1  ;;  %v353_v13 = vld [vmem:[%s14542_s13 + $0x90] sm:$0xff]  ;;  %12963 = vmatprep.mubr.msk.f32.mxu0 %vm279_vm1, %v433_v11  ;;  %v338_v15 = vld [vmem:[%s14542_s13 + $0x18] sm:$0xff] }
  0x15   : > { %308 = vst.msk [vmem:[#allocation2 + $0xd8] sm:$0xff] %vm279_vm1, %v19217_v1  ;;  %309 = vst.msk [vmem:[#allocation2 + $0xe0] sm:$0xff] %vm279_vm1, %v19217_v1  ;;  %v354_v16 = vld [vmem:[%s14542_s13 + $0x98] sm:$0xff]  ;;  %v339_v17 = vld [vmem:[%s14542_s13 + $0x20] sm:$0xff] }
  0x16   : > { %311 = vst.msk [vmem:[#allocation2 + $0xf0] sm:$0xff] %vm279_vm1, %v19217_v1  ;;  %312 = vst.msk [vmem:[#allocation2 + $0xf8] sm:$0xff] %vm279_vm1, %v19217_v1  ;;  %v355_v18 = vld [vmem:[%s14542_s13 + $0xa0] sm:$0xff]  ;;  %v340_v19 = vld [vmem:[%s14542_s13 + $0x28] sm:$0xff] }
  0x17   : > { %314 = vst.msk [vmem:[#allocation2 + $0x108] sm:$0xff] %vm279_vm1, %v19217_v1  ;;  %315 = vst.msk [vmem:[#allocation2 + $0x110] sm:$0xff] %vm279_vm1, %v19217_v1  ;;  %v356_v20 = vld [vmem:[%s14542_s13 + $0xa8] sm:$0xff]  ;;  %v341_v21 = vld [vmem:[%s14542_s13 + $0x30] sm:$0xff] }
  0x18   : > { %317 = vst.msk [vmem:[#allocation2 + $0x120] sm:$0xff] %vm279_vm1, %v19217_v1  ;;  %318 = vst.msk [vmem:[#allocation2 + $0x128] sm:$0xff] %vm279_vm1, %v19217_v1  ;;  %v357_v22 = vld [vmem:[%s14542_s13 + $0xb0] sm:$0xff]  ;;  %v342_v23 = vld [vmem:[%s14542_s13 + $0x38] sm:$0xff] }
  0x19   : > { %320 = vst.msk [vmem:[#allocation2 + $0x138] sm:$0xff] %vm279_vm1, %v19217_v1  ;;  %321 = vst.msk [vmem:[#allocation2 + $0x140] sm:$0xff] %vm279_vm1, %v19217_v1  ;;  %v358_v24 = vld [vmem:[%s14542_s13 + $0xb8] sm:$0xff]  ;;  %v343_v25 = vld [vmem:[%s14542_s13 + $0x40] sm:$0xff] }
  0x1a   : > { %323 = vst.msk [vmem:[#allocation2 + $0x150] sm:$0xff] %vm279_vm1, %v19217_v1  ;;  %324 = vst.msk [vmem:[#allocation2 + $0x158] sm:$0xff] %vm279_vm1, %v19217_v1  ;;  %v359_v26 = vld [vmem:[%s14542_s13 + $0xc0] sm:$0xff]  ;;  %v344_v27 = vld [vmem:[%s14542_s13 + $0x48] sm:$0xff] }
  0x1b   : > { %326 = vst.msk [vmem:[#allocation2 + $0x168] sm:$0xff] %vm279_vm1, %v19217_v1  ;;  %327 = vst.msk [vmem:[#allocation2 + $0x170] sm:$0xff] %vm279_vm1, %v19217_v1  ;;  %v360_v28 = vld [vmem:[%s14542_s13 + $0xc8] sm:$0xff]  ;;  %v345_v36 = vld [vmem:[%s14542_s13 + $0x50] sm:$0xff] }
  0x1c   : > { %329 = vst.msk [vmem:[#allocation2 + $0x180] sm:$0xff] %vm279_vm1, %v19217_v1  ;;  %330 = vst.msk [vmem:[#allocation2 + $0x188] sm:$0xff] %vm279_vm1, %v19217_v1  ;;  %v361_v39 = vld [vmem:[%s14542_s13 + $0xd0] sm:$0xff]  ;;  %v346_v46 = vld [vmem:[%s14542_s13 + $0x58] sm:$0xff] }
  0x1d   : > { %332 = vst.msk [vmem:[#allocation2 + $0x198] sm:$0xff] %vm279_vm1, %v19217_v1  ;;  %333 = vst.msk [vmem:[#allocation2 + $0x1a0] sm:$0xff] %vm279_vm1, %v19217_v1  ;;  %v362_v47 = vld [vmem:[%s14542_s13 + $0xd8] sm:$0xff]  ;;  %v347_v48 = vld [vmem:[%s14542_s13 + $0x60] sm:$0xff] }
  0x1e   : > { %283 = vst.msk [vmem:[#allocation2 + $0x10] sm:$0x3] %vm282_vm2, %v19217_v1  ;;  %286 = vst.msk [vmem:[#allocation2 + $0x28] sm:$0x3] %vm282_vm2, %v19217_v1  ;;  %v363_v49 = vld [vmem:[%s14542_s13 + $0xe0] sm:$0xff]  ;;  %v348_v50 = vld [vmem:[%s14542_s13 + $0x68] sm:$0xff] }
  0x1f   : > { %289 = vst.msk [vmem:[#allocation2 + $0x40] sm:$0x3] %vm282_vm2, %v19217_v1  ;;  %292 = vst.msk [vmem:[#allocation2 + $0x58] sm:$0x3] %vm282_vm2, %v19217_v1  ;;  %v364_v51 = vld [vmem:[%s14542_s13 + $0xe8] sm:$0xff] }
  0x20   : > { %295 = vst.msk [vmem:[#allocation2 + $0x70] sm:$0x3] %vm282_vm2, %v19217_v1  ;;  %298 = vst.msk [vmem:[#allocation2 + $0x88] sm:$0x3] %vm282_vm2, %v19217_v1  ;;  %v401_v11 = vld [vmem:[#allocation2 + $0x8] sm:$0xff] }
  0x21   : > { %301 = vst.msk [vmem:[#allocation2 + $0xa0] sm:$0x3] %vm282_vm2, %v19217_v1  ;;  %304 = vst.msk [vmem:[#allocation2 + $0xb8] sm:$0x3] %vm282_vm2, %v19217_v1 }
  0x22   : > { %307 = vst.msk [vmem:[#allocation2 + $0xd0] sm:$0x3] %vm282_vm2, %v19217_v1  ;;  %310 = vst.msk [vmem:[#allocation2 + $0xe8] sm:$0x3] %vm282_vm2, %v19217_v1 }
  0x23   : > { %313 = vst.msk [vmem:[#allocation2 + $0x100] sm:$0x3] %vm282_vm2, %v19217_v1  ;;  %316 = vst.msk [vmem:[#allocation2 + $0x118] sm:$0x3] %vm282_vm2, %v19217_v1 }
  0x24   : > { %319 = vst.msk [vmem:[#allocation2 + $0x130] sm:$0x3] %vm282_vm2, %v19217_v1  ;;  %322 = vst.msk [vmem:[#allocation2 + $0x148] sm:$0x3] %vm282_vm2, %v19217_v1 }
  0x25   : > { %325 = vst.msk [vmem:[#allocation2 + $0x160] sm:$0x3] %vm282_vm2, %v19217_v1  ;;  %328 = vst.msk [vmem:[#allocation2 + $0x178] sm:$0x3] %vm282_vm2, %v19217_v1  ;;  %v434_v14 = vld [vmem:[#allocation2 + $0x9] sm:$0xff] }
  0x26   : > { %331 = vst.msk [vmem:[#allocation2 + $0x190] sm:$0x3] %vm282_vm2, %v19217_v1  ;;  %334 = vst.msk [vmem:[#allocation2 + $0x1a8] sm:$0x3] %vm282_vm2, %v19217_v1  ;;  %12964 = vmatmul.mubr.msk.f32.vlgmr.msra.gmra.mxu0 %vm279_vm1, %v434_v14 }
  0x27   : > { %382 = vst.msk [vmem:[#allocation2 + $0xc1] sm:$0xff] %vm279_vm1, %v349_v4  ;;  %383 = vst.msk [vmem:[#allocation2 + $0xc9] sm:$0xff] %vm279_vm1, %v350_v5  ;;  %13062 = vmatpush3.msk.msra.mxu0 %vm563_vm0, %v11216_v3  ;;  %v1116_v4 = vld [vmem:[#allocation2 + $0x2] sm:$0xff] }
  0x28   : > { %368 = vst.msk [vmem:[#allocation2 + $0x19] sm:$0xff] %vm279_vm1, %v335_v6  ;;  %384 = vst.msk [vmem:[#allocation2 + $0xd9] sm:$0xff] %vm279_vm1, %v351_v7  ;;  %13161 = vmatprep.subr.msk.mxu0 %vm563_vm0, %v14556_v10  ;;  %v1117_v6 = vld [vmem:[#allocation2 + $0xa] sm:$0xff]  ;;  %v400_v7 = vld [vmem:[#allocation2] sm:$0xff] }
  0x29   : > { %369 = vst.msk [vmem:[#allocation2 + $0x21] sm:$0xff] %vm279_vm1, %v336_v8  ;;  %385 = vst.msk [vmem:[#allocation2 + $0xe1] sm:$0xff] %vm279_vm1, %v352_v9  ;;  %v14747_v9 = vld [vmem:[%s19210_s1 + $0x18] sm:$0xf] }
  0x2a   : > { %370 = vst.msk [vmem:[#allocation2 + $0x31] sm:$0xff] %vm279_vm1, %v337_v12  ;;  %386 = vst.msk [vmem:[#allocation2 + $0xf1] sm:$0xff] %vm279_vm1, %v353_v13 }
  0x2b   : > { %371 = vst.msk [vmem:[#allocation2 + $0x39] sm:$0xff] %vm279_vm1, %v338_v15  ;;  %387 = vst.msk [vmem:[#allocation2 + $0xf9] sm:$0xff] %vm279_vm1, %v354_v16  ;;  %v14768_v15 = vld [vmem:[%s19210_s1 + $0x14] sm:$0xf]  ;;  %v366_v16 = vld [vmem:[%s14542_s13 + $0xf8] sm:$0xff] }
  0x2c   : > { %372 = vst.msk [vmem:[#allocation2 + $0x49] sm:$0xff] %vm279_vm1, %v339_v17  ;;  %388 = vst.msk [vmem:[#allocation2 + $0x109] sm:$0xff] %vm279_vm1, %v355_v18 }
  0x2d   : > { %373 = vst.msk [vmem:[#allocation2 + $0x51] sm:$0xff] %vm279_vm1, %v340_v19  ;;  %389 = vst.msk [vmem:[#allocation2 + $0x111] sm:$0xff] %vm279_vm1, %v356_v20 }
  0x2e   : > { %374 = vst.msk [vmem:[#allocation2 + $0x61] sm:$0xff] %vm279_vm1, %v341_v21  ;;  %390 = vst.msk [vmem:[#allocation2 + $0x121] sm:$0xff] %vm279_vm1, %v357_v22  ;;  %v14595_v29 = vld [vmem:[#allocation2 + $0xc1] sm:$0xff]  ;;  %v14597_v30 = vld [vmem:[#allocation2 + $0xc9] sm:$0xff] }
  0x2f   : > { %375 = vst.msk [vmem:[#allocation2 + $0x69] sm:$0xff] %vm279_vm1, %v342_v23  ;;  %391 = vst.msk [vmem:[#allocation2 + $0x129] sm:$0xff] %vm279_vm1, %v358_v24  ;;  %v14599_v31 = vld [vmem:[#allocation2 + $0x19] sm:$0xff]  ;;  %12987 = vmatprep.mubr.msk.f32.mxu1 %vm279_vm1, %v14595_v29 }
  0x30   : > { %376 = vst.msk [vmem:[#allocation2 + $0x79] sm:$0xff] %vm279_vm1, %v343_v25  ;;  %392 = vst.msk [vmem:[#allocation2 + $0x139] sm:$0xff] %vm279_vm1, %v359_v26  ;;  %12966 = vmatprep.mubr.msk.f32.mxu0 %vm279_vm1, %v14599_v31  ;;  %v14608_v32 = vld [vmem:[#allocation2 + $0xd9] sm:$0xff]  ;;  %v14610_v33 = vld [vmem:[#allocation2 + $0x21] sm:$0xff]  ;;  %12988 = vmatmul.mubr.msk.f32.vlgmr.msra.gmra.mxu1 %vm279_vm1, %v14597_v30 }
  0x31   : > { %377 = vst.msk [vmem:[#allocation2 + $0x81] sm:$0xff] %vm279_vm1, %v344_v27  ;;  %393 = vst.msk [vmem:[#allocation2 + $0x141] sm:$0xff] %vm279_vm1, %v360_v28  ;;  %12967 = vmatmul.mubr.msk.f32.gmra.mxu0 %vm279_vm1, %v14610_v33  ;;  %v14621_v35 = vld [vmem:[#allocation2 + $0x31] sm:$0xff]  ;;  %13012 = vmatpush3.msk.msra.mxu1 %vm563_vm0, %v14484_v2  ;;  %v14628_v37 = vld [vmem:[#allocation2 + $0xe1] sm:$0xff] }
  0x32   : > { %12990 = vmatprep.mubr.msk.f32.mxu1 %vm279_vm1, %v14608_v32  ;;  %v14630_v38 = vld [vmem:[#allocation2 + $0x39] sm:$0xff]  ;;  %378 = vst.msk [vmem:[#allocation2 + $0x91] sm:$0xff] %vm279_vm1, %v345_v36  ;;  %12969 = vmatprep.mubr.msk.f32.mxu0 %vm279_vm1, %v14621_v35  ;;  %v14636_v40 = vld [vmem:[#allocation2 + $0xf1] sm:$0xff]  ;;  %394 = vst.msk [vmem:[#allocation2 + $0x151] sm:$0xff] %vm279_vm1, %v361_v39 }
  0x33   : > { %v14638_v41 = vld [vmem:[#allocation2 + $0x49] sm:$0xff]  ;;  %13111 = vmatprep.subr.msk.mxu1 %vm563_vm0, %v14615_v34  ;;  %v14647_v42 = vld [vmem:[#allocation2 + $0xf9] sm:$0xff]  ;;  %379 = vst.msk [vmem:[#allocation2 + $0x99] sm:$0xff] %vm279_vm1, %v346_v46  ;;  %395 = vst.msk [vmem:[#allocation2 + $0x159] sm:$0xff] %vm279_vm1, %v362_v47 }
  0x34   : > { %12991 = vmatmul.mubr.msk.f32.gmra.mxu1 %vm279_vm1, %v14628_v37  ;;  %v14653_v43 = vld [vmem:[#allocation2 + $0x109] sm:$0xff]  ;;  %v14655_v44 = vld [vmem:[#allocation2 + $0x51] sm:$0xff]  ;;  %380 = vst.msk [vmem:[#allocation2 + $0xa9] sm:$0xff] %vm279_vm1, %v347_v48  ;;  %396 = vst.msk [vmem:[#allocation2 + $0x169] sm:$0xff] %vm279_vm1, %v363_v49 }
  0x35   : > { %12970 = vmatmul.mubr.msk.f32.gmra.mxu0 %vm279_vm1, %v14630_v38  ;;  %12993 = vmatprep.mubr.msk.f32.mxu1 %vm279_vm1, %v14636_v40  ;;  %v14657_v45 = vld [vmem:[#allocation2 + $0x61] sm:$0xff]  ;;  %381 = vst.msk [vmem:[#allocation2 + $0xb1] sm:$0xff] %vm279_vm1, %v348_v50  ;;  %397 = vst.msk [vmem:[#allocation2 + $0x171] sm:$0xff] %vm279_vm1, %v364_v51  ;;  %v14677_v52 = vld [vmem:[#allocation2 + $0x111] sm:$0xff] }
  0x36   : > { %12972 = vmatprep.mubr.msk.f32.mxu0 %vm279_vm1, %v14638_v41  ;;  %v14681_v53 = vld [vmem:[#allocation2 + $0x69] sm:$0xff]  ;;  %v14683_v54 = vld [vmem:[#allocation2 + $0x121] sm:$0xff]  ;;  %v14757_v13 = vld [vmem:[#allocation2 + $0x18] sm:$0xff]  ;;  %399 = vst.msk [vmem:[#allocation2 + $0x189] sm:$0xff] %vm279_vm1, %v366_v16 }
  0x37   : > { %v14685_v55 = vld [vmem:[#allocation2 + $0x79] sm:$0xff]  ;;  %v14693_v56 = vld [vmem:[#allocation2 + $0x129] sm:$0xff] }
  0x38   : > { %12994 = vmatmul.mubr.msk.f32.gmra.mxu1 %vm279_vm1, %v14647_v42  ;;  %v14697_v57 = vld [vmem:[#allocation2 + $0x81] sm:$0xff]  ;;  %v14699_v58 = vld [vmem:[#allocation2 + $0x139] sm:$0xff]  ;;  %v14785_v19 = vld [vmem:[#allocation2 + $0x30] sm:$0xff] }
  0x39   : > { %12973 = vmatmul.mubr.msk.f32.gmra.mxu0 %vm279_vm1, %v14655_v44  ;;  %12996 = vmatprep.mubr.msk.f32.mxu1 %vm279_vm1, %v14653_v43  ;;  %v14701_v59 = vld [vmem:[#allocation2 + $0x91] sm:$0xff]  ;;  %v14709_v60 = vld [vmem:[#allocation2 + $0x141] sm:$0xff] }
  0x3a   : > { %12975 = vmatprep.mubr.msk.f32.mxu0 %vm279_vm1, %v14657_v45  ;;  %v14713_v61 = vld [vmem:[#allocation2 + $0x99] sm:$0xff]  ;;  %v14715_v62 = vld [vmem:[#allocation2 + $0x151] sm:$0xff]  ;;  %v14755_v12 = vld [vmem:[#allocation2 + $0x22] sm:$0xff] }
  0x3b   : > { %v14717_v63 = vld [vmem:[#allocation2 + $0xa9] sm:$0xff]  ;;  %v14725_v0 = vld [vmem:[#allocation2 + $0x159] sm:$0xff]  ;;  %19340 = vst [vmem:[#allocation6_spill] sm:$0xff] %v14755_v12 }
  0x3c   : > { %12997 = vmatmul.mubr.msk.f32.gmra.mxu1 %vm279_vm1, %v14677_v52  ;;  %v14729_v2 = vld [vmem:[#allocation2 + $0xb1] sm:$0xff]  ;;  %v14731_v3 = vld [vmem:[#allocation2 + $0x169] sm:$0xff]  ;;  %v14742_v8 = vld [vmem:[#allocation2 + $0x1a] sm:$0xff] }
  0x3d   : > { %12976 = vmatmul.mubr.msk.f32.gmra.mxu0 %vm279_vm1, %v14681_v53  ;;  %12999 = vmatprep.mubr.msk.f32.mxu1 %vm279_vm1, %v14683_v54  ;;  %v14739_v5 = vld [vmem:[#allocation2 + $0x171] sm:$0xff]  ;;  %19339 = vst [vmem:[#allocation5_spill] sm:$0xff] %v14742_v8  ;;  %v14779_v17 = vld [vmem:[#allocation2 + $0x20] sm:$0xff]  ;;  %v14805_v23 = vld [vmem:[#allocation2 + $0x48] sm:$0xff] }
  0x3e   : > { %12978 = vmatprep.mubr.msk.f32.mxu0 %vm279_vm1, %v14685_v55  ;;  %v14763_v14 = vld [vmem:[#allocation2 + $0x32] sm:$0xff]  ;;  %v14781_v18 = vld [vmem:[#allocation2 + $0x3a] sm:$0xff]  ;;  %v14789_v20 = vld [vmem:[#allocation2 + $0x4a] sm:$0xff] }
  0x3f   : > { %19341 = vst [vmem:[#allocation7_spill] sm:$0xff] %v14763_v14  ;;  %19342 = vst [vmem:[#allocation8_spill] sm:$0xff] %v14781_v18  ;;  %v14799_v21 = vld [vmem:[#allocation2 + $0x38] sm:$0xff]  ;;  %v14807_v24 = vld [vmem:[#allocation2 + $0x62] sm:$0xff] }
  0x40   : > { %13000 = vmatmul.mubr.msk.f32.gmra.mxu1 %vm279_vm1, %v14693_v56  ;;  %19343 = vst [vmem:[#allocation9_spill] sm:$0xff] %v14789_v20  ;;  %v14803_v22 = vld [vmem:[#allocation2 + $0x52] sm:$0xff]  ;;  %19345 = vst [vmem:[#allocation11_spill] sm:$0xff] %v14807_v24  ;;  %v14819_v26 = vld [vmem:[#allocation2 + $0x6a] sm:$0xff] }
  0x41   : > { %12979 = vmatmul.mubr.msk.f32.gmra.mxu0 %vm279_vm1, %v14697_v57  ;;  %13002 = vmatprep.mubr.msk.f32.mxu1 %vm279_vm1, %v14699_v58  ;;  %19344 = vst [vmem:[#allocation10_spill] sm:$0xff] %v14803_v22  ;;  %v14815_v25 = vld [vmem:[#allocation2 + $0x50] sm:$0xff]  ;;  %19346 = vst [vmem:[#allocation12_spill] sm:$0xff] %v14819_v26  ;;  %v14821_v27 = vld [vmem:[#allocation2 + $0x60] sm:$0xff] }
  0x42   : > { %12981 = vmatprep.mubr.msk.f32.mxu0 %vm279_vm1, %v14701_v59  ;;  %v14823_v28 = vld [vmem:[#allocation2 + $0x7a] sm:$0xff]  ;;  %v14835_v36 = vld [vmem:[#allocation2 + $0x82] sm:$0xff]  ;;  %v14839_v46 = vld [vmem:[#allocation2 + $0x92] sm:$0xff] }
  0x43   : > { %19347 = vst [vmem:[#allocation13_spill] sm:$0xff] %v14823_v28  ;;  %19348 = vst [vmem:[#allocation14_spill] sm:$0xff] %v14835_v36  ;;  %v14837_v39 = vld [vmem:[#allocation2 + $0x78] sm:$0xff]  ;;  %v14847_v47 = vld [vmem:[#allocation2 + $0x80] sm:$0xff] }
  0x44   : > { %13003 = vmatmul.mubr.msk.f32.gmra.mxu1 %vm279_vm1, %v14709_v60  ;;  %19349 = vst [vmem:[#allocation15_spill] sm:$0xff] %v14839_v46  ;;  %v14851_v48 = vld [vmem:[#allocation2 + $0x9a] sm:$0xff]  ;;  %v14853_v49 = vld [vmem:[#allocation2 + $0x90] sm:$0xff] }
  0x45   : > { %12982 = vmatmul.mubr.msk.f32.gmra.mxu0 %vm279_vm1, %v14713_v61  ;;  %13005 = vmatprep.mubr.msk.f32.mxu1 %vm279_vm1, %v14715_v62  ;;  %19350 = vst [vmem:[#allocation16_spill] sm:$0xff] %v14851_v48  ;;  %v14855_v50 = vld [vmem:[#allocation2 + $0xaa] sm:$0xff]  ;;  %v14863_v51 = vld [vmem:[#allocation2 + $0x98] sm:$0xff]  ;;  %v14885_v16 = vld [vmem:[#allocation2 + $0xc0] sm:$0xff] }
  0x46   : > { %12984 = vmatprep.mubr.msk.f32.mxu0 %vm279_vm1, %v14717_v63  ;;  %19351 = vst [vmem:[#allocation17_spill] sm:$0xff] %v14855_v50  ;;  %v14887_v1 = vld [vmem:[#allocation2 + $0xda] sm:$0xff] }
  0x47   : > { %19355 = vst [vmem:[#allocation21_spill] sm:$0xff] %v14887_v1 }
  0x48   : > { %13006 = vmatmul.mubr.msk.f32.gmra.mxu1 %vm279_vm1, %v14725_v0 }
  0x49   : > { %12985 = vmatmul.mubr.msk.f32.gmra.mxu0 %vm279_vm1, %v14729_v2  ;;  %13008 = vmatprep.mubr.msk.f32.mxu1 %vm279_vm1, %v14731_v3 }
  0x4a   : > { %13063 = vmatprep.mubr.msk.f32.mxu0 %vm279_vm1, %v1116_v4  ;;  %v14867_v4 = vld [vmem:[#allocation2 + $0xb2] sm:$0xff] }
  0x4b   : > { %19352 = vst [vmem:[#allocation18_spill] sm:$0xff] %v14867_v4 }
  0x4c   : > { %13009 = vmatmul.mubr.msk.f32.gmra.mxu1 %vm279_vm1, %v14739_v5 }
  0x4d   : > { %13064 = vmatmul.mubr.msk.f32.vlgmr.msra.gmra.mxu0 %vm279_vm1, %v1117_v6  ;;  %13013 = vmatprep.mubr.msk.f32.mxu1 %vm279_vm1, %v400_v7  ;;  %v14869_v6 = vld [vmem:[#allocation2 + $0xa8] sm:$0xff] }
  0x4e   : > { %13162 = vmatpush3.msk.msra.mxu0 %vm563_vm0, %v14556_v10  ;;  %13066 = vmatprep.mubr.msk.f32.mxu0 %vm279_vm1, %v14742_v8  ;;  %v365_v10 = vld [vmem:[%s14542_s13 + $0xf0] sm:$0xff]  ;;  %v14871_v7 = vld [vmem:[#allocation2 + $0xc2] sm:$0xff] }
  0x4f   : > { %13261 = vmatprep.subr.msk.mxu0 %vm563_vm0, %v14747_v9  ;;  %398 = vst.msk [vmem:[#allocation2 + $0x181] sm:$0xff] %vm279_vm1, %v365_v10  ;;  %19353 = vst [vmem:[#allocation19_spill] sm:$0xff] %v14871_v7  ;;  %v14883_v10 = vld [vmem:[#allocation2 + $0xca] sm:$0xff] }
  0x50   : > { %13014 = vmatmul.mubr.msk.f32.vlgmr.msra.gmra.mxu1 %vm279_vm1, %v401_v11  ;;  %v14879_v11 = vld [vmem:[#allocation2 + $0xb0] sm:$0xff]  ;;  %19354 = vst [vmem:[#allocation20_spill] sm:$0xff] %v14883_v10  ;;  %v14997_v8 = vld [vmem:[#allocation2 + $0x168] sm:$0xff] }
  0x51   : > { %13067 = vmatmul.mubr.msk.f32.gmra.mxu0 %vm279_vm1, %v14755_v12  ;;  %13112 = vmatpush3.msk.msra.mxu1 %vm563_vm0, %v14615_v34  ;;  %v14831_v34 = vld [vmem:[#allocation2 + $0x68] sm:$0xff] }
  0x52   : > { %13016 = vmatprep.mubr.msk.f32.mxu1 %vm279_vm1, %v14757_v13  ;;  %13069 = vmatprep.mubr.msk.f32.mxu0 %vm279_vm1, %v14763_v14  ;;  %v14981_v14 = vld [vmem:[#allocation2 + $0x150] sm:$0xff] }
  0x53   : > { %13211 = vmatprep.subr.msk.mxu1 %vm563_vm0, %v14768_v15  ;;  %v14983_v12 = vld [vmem:[#allocation2 + $0x16a] sm:$0xff] }
  0x54   : > { %13017 = vmatmul.mubr.msk.f32.gmra.mxu1 %vm279_vm1, %v14779_v17  ;;  %19367 = vst [vmem:[#allocation33_spill] sm:$0xff] %v14983_v12 }
  0x55   : > { %13070 = vmatmul.mubr.msk.f32.gmra.mxu0 %vm279_vm1, %v14781_v18  ;;  %13019 = vmatprep.mubr.msk.f32.mxu1 %vm279_vm1, %v14785_v19  ;;  %v14967_v18 = vld [vmem:[#allocation2 + $0x152] sm:$0xff] }
  0x56   : > { %13072 = vmatprep.mubr.msk.f32.mxu0 %vm279_vm1, %v14789_v20  ;;  %v14965_v20 = vld [vmem:[#allocation2 + $0x138] sm:$0xff]  ;;  %19365 = vst [vmem:[#allocation31_spill] sm:$0xff] %v14967_v18 }
  0x58   : > { %13020 = vmatmul.mubr.msk.f32.gmra.mxu1 %vm279_vm1, %v14799_v21 }
  0x59   : > { %13073 = vmatmul.mubr.msk.f32.gmra.mxu0 %vm279_vm1, %v14803_v22  ;;  %13022 = vmatprep.mubr.msk.f32.mxu1 %vm279_vm1, %v14805_v23  ;;  %v14951_v22 = vld [vmem:[#allocation2 + $0x13a] sm:$0xff] }
  0x5a   : > { %13075 = vmatprep.mubr.msk.f32.mxu0 %vm279_vm1, %v14807_v24  ;;  %v14949_v24 = vld [vmem:[#allocation2 + $0x120] sm:$0xff]  ;;  %19363 = vst [vmem:[#allocation29_spill] sm:$0xff] %v14951_v22 }
  0x5c   : > { %13023 = vmatmul.mubr.msk.f32.gmra.mxu1 %vm279_vm1, %v14815_v25 }
  0x5d   : > { %13076 = vmatmul.mubr.msk.f32.gmra.mxu0 %vm279_vm1, %v14819_v26  ;;  %13025 = vmatprep.mubr.msk.f32.mxu1 %vm279_vm1, %v14821_v27  ;;  %v14935_v26 = vld [vmem:[#allocation2 + $0x122] sm:$0xff] }
  0x5e   : > { %13078 = vmatprep.mubr.msk.f32.mxu0 %vm279_vm1, %v14823_v28  ;;  %v14933_v28 = vld [vmem:[#allocation2 + $0x108] sm:$0xff]  ;;  %19361 = vst [vmem:[#allocation27_spill] sm:$0xff] %v14935_v26 }
  0x60   : > { %13026 = vmatmul.mubr.msk.f32.gmra.mxu1 %vm279_vm1, %v14831_v34 }
  0x61   : > { %13079 = vmatmul.mubr.msk.f32.gmra.mxu0 %vm279_vm1, %v14835_v36  ;;  %13028 = vmatprep.mubr.msk.f32.mxu1 %vm279_vm1, %v14837_v39  ;;  %v14919_v36 = vld [vmem:[#allocation2 + $0x10a] sm:$0xff] }
  0x62   : > { %13081 = vmatprep.mubr.msk.f32.mxu0 %vm279_vm1, %v14839_v46  ;;  %v14917_v46 = vld [vmem:[#allocation2 + $0xf0] sm:$0xff]  ;;  %19359 = vst [vmem:[#allocation25_spill] sm:$0xff] %v14919_v36 }
  0x64   : > { %13029 = vmatmul.mubr.msk.f32.gmra.mxu1 %vm279_vm1, %v14847_v47 }
  0x65   : > { %13082 = vmatmul.mubr.msk.f32.gmra.mxu0 %vm279_vm1, %v14851_v48  ;;  %13031 = vmatprep.mubr.msk.f32.mxu1 %vm279_vm1, %v14853_v49  ;;  %v14903_v48 = vld [vmem:[#allocation2 + $0xf2] sm:$0xff] }
  0x66   : > { %13084 = vmatprep.mubr.msk.f32.mxu0 %vm279_vm1, %v14855_v50  ;;  %v14901_v50 = vld [vmem:[#allocation2 + $0xd8] sm:$0xff]  ;;  %19357 = vst [vmem:[#allocation23_spill] sm:$0xff] %v14903_v48 }
  0x68   : > { %13032 = vmatmul.mubr.msk.f32.gmra.mxu1 %vm279_vm1, %v14863_v51 }
  0x69   : > { %13085 = vmatmul.mubr.msk.f32.gmra.mxu0 %vm279_vm1, %v14867_v4  ;;  %13034 = vmatprep.mubr.msk.f32.mxu1 %vm279_vm1, %v14869_v6  ;;  %v14895_v4 = vld [vmem:[#allocation2 + $0xc8] sm:$0xff] }
  0x6a   : > { %13087 = vmatprep.mubr.msk.f32.mxu0 %vm279_vm1, %v14871_v7  ;;  %v14899_v7 = vld [vmem:[#allocation2 + $0xe2] sm:$0xff] }
  0x6b   : > { %19356 = vst [vmem:[#allocation22_spill] sm:$0xff] %v14899_v7 }
  0x6c   : > { %13035 = vmatmul.mubr.msk.f32.gmra.mxu1 %vm279_vm1, %v14879_v11 }
  0x6d   : > { %13088 = vmatmul.mubr.msk.f32.gmra.mxu0 %vm279_vm1, %v14883_v10  ;;  %13037 = vmatprep.mubr.msk.f32.mxu1 %vm279_vm1, %v14885_v16  ;;  %v14911_v10 = vld [vmem:[#allocation2 + $0xe0] sm:$0xff] }
  0x6e   : > { %13090 = vmatprep.mubr.msk.f32.mxu0 %vm279_vm1, %v14887_v1  ;;  %v14915_v1 = vld [vmem:[#allocation2 + $0xfa] sm:$0xff] }
  0x6f   : > { %19358 = vst [vmem:[#allocation24_spill] sm:$0xff] %v14915_v1 }
  0x70   : > { %13038 = vmatmul.mubr.msk.f32.gmra.mxu1 %vm279_vm1, %v14895_v4 }
  0x71   : > { %13091 = vmatmul.mubr.msk.f32.gmra.mxu0 %vm279_vm1, %v14899_v7  ;;  %13040 = vmatprep.mubr.msk.f32.mxu1 %vm279_vm1, %v14901_v50  ;;  %v14927_v7 = vld [vmem:[#allocation2 + $0xf8] sm:$0xff] }
  0x72   : > { %13093 = vmatprep.mubr.msk.f32.mxu0 %vm279_vm1, %v14903_v48  ;;  %v14931_v48 = vld [vmem:[#allocation2 + $0x112] sm:$0xff] }
  0x73   : > { %19360 = vst [vmem:[#allocation26_spill] sm:$0xff] %v14931_v48 }
  0x74   : > { %13041 = vmatmul.mubr.msk.f32.gmra.mxu1 %vm279_vm1, %v14911_v10 }
  0x75   : > { %13094 = vmatmul.mubr.msk.f32.gmra.mxu0 %vm279_vm1, %v14915_v1  ;;  %13043 = vmatprep.mubr.msk.f32.mxu1 %vm279_vm1, %v14917_v46  ;;  %v14943_v1 = vld [vmem:[#allocation2 + $0x110] sm:$0xff] }
  0x76   : > { %13096 = vmatprep.mubr.msk.f32.mxu0 %vm279_vm1, %v14919_v36  ;;  %v14947_v36 = vld [vmem:[#allocation2 + $0x12a] sm:$0xff] }
  0x77   : > { %19362 = vst [vmem:[#allocation28_spill] sm:$0xff] %v14947_v36 }
  0x78   : > { %13044 = vmatmul.mubr.msk.f32.gmra.mxu1 %vm279_vm1, %v14927_v7 }
  0x79   : > { %13097 = vmatmul.mubr.msk.f32.gmra.mxu0 %vm279_vm1, %v14931_v48  ;;  %13046 = vmatprep.mubr.msk.f32.mxu1 %vm279_vm1, %v14933_v28  ;;  %v14959_v48 = vld [vmem:[#allocation2 + $0x128] sm:$0xff] }
  0x7a   : > { %13099 = vmatprep.mubr.msk.f32.mxu0 %vm279_vm1, %v14935_v26  ;;  %v14963_v26 = vld [vmem:[#allocation2 + $0x142] sm:$0xff] }
  0x7b   : > { %19364 = vst [vmem:[#allocation30_spill] sm:$0xff] %v14963_v26 }
  0x7c   : > { %13047 = vmatmul.mubr.msk.f32.gmra.mxu1 %vm279_vm1, %v14943_v1 }
  0x7d   : > { %13100 = vmatmul.mubr.msk.f32.gmra.mxu0 %vm279_vm1, %v14947_v36  ;;  %13049 = vmatprep.mubr.msk.f32.mxu1 %vm279_vm1, %v14949_v24  ;;  %v14975_v36 = vld [vmem:[#allocation2 + $0x140] sm:$0xff] }
  0x7e   : > { %13102 = vmatprep.mubr.msk.f32.mxu0 %vm279_vm1, %v14951_v22  ;;  %v14979_v22 = vld [vmem:[#allocation2 + $0x15a] sm:$0xff] }
  0x7f   : > { %19366 = vst [vmem:[#allocation32_spill] sm:$0xff] %v14979_v22 }
  0x80   : > { %13050 = vmatmul.mubr.msk.f32.gmra.mxu1 %vm279_vm1, %v14959_v48 }
  0x81   : > { %13103 = vmatmul.mubr.msk.f32.gmra.mxu0 %vm279_vm1, %v14963_v26  ;;  %13052 = vmatprep.mubr.msk.f32.mxu1 %vm279_vm1, %v14965_v20  ;;  %v14991_v26 = vld [vmem:[#allocation2 + $0x158] sm:$0xff] }
  0x82   : > { %13105 = vmatprep.mubr.msk.f32.mxu0 %vm279_vm1, %v14967_v18  ;;  %v14995_v18 = vld [vmem:[#allocation2 + $0x172] sm:$0xff] }
  0x84   : > { %13053 = vmatmul.mubr.msk.f32.gmra.mxu1 %vm279_vm1, %v14975_v36 }
  0x85   : > { %13106 = vmatmul.mubr.msk.f32.gmra.mxu0 %vm279_vm1, %v14979_v22  ;;  %13055 = vmatprep.mubr.msk.f32.mxu1 %vm279_vm1, %v14981_v14  ;;  %v15005_v22 = vld [vmem:[#allocation2 + $0x170] sm:$0xff] }
  0x86   : > { %13108 = vmatprep.mubr.msk.f32.mxu0 %vm279_vm1, %v14983_v12  ;;  %v15012_v12 = vld [vmem:[%s19210_s1 + $0x20] sm:$0xf] }
  0x88   : > { %13056 = vmatmul.mubr.msk.f32.gmra.mxu1 %vm279_vm1, %v14991_v26 }
  0x89   : > { %13109 = vmatmul.mubr.msk.f32.gmra.mxu0 %vm279_vm1, %v14995_v18  ;;  %13058 = vmatprep.mubr.msk.f32.mxu1 %vm279_vm1, %v14997_v8 }
  0x8a   : > { %13163 = vmatprep.mubr.msk.f32.mxu0 %vm279_vm1, %v14599_v31  ;;  %v15029_v31 = vld [vmem:[%s19210_s1 + $0x1c] sm:$0xf] }
  0x8c   : > { %13059 = vmatmul.mubr.msk.f32.gmra.mxu1 %vm279_vm1, %v15005_v22 }
  0x8d   : > { %13164 = vmatmul.mubr.msk.f32.vlgmr.msra.gmra.mxu0 %vm279_vm1, %v14610_v33  ;;  %13113 = vmatprep.mubr.msk.f32.mxu1 %vm279_vm1, %v14757_v13  ;;  %v15159_v33 = vld [vmem:[#allocation2 + $0x188] sm:$0xff] }
  0x8e   : > { %13262 = vmatpush3.msk.msra.mxu0 %vm563_vm0, %v14747_v9  ;;  %13166 = vmatprep.mubr.msk.f32.mxu0 %vm279_vm1, %v14621_v35  ;;  %v19368_v35 = vld [vmem:[#allocation5_spill] sm:$0xff] }
  0x8f   : > { %13361 = vmatprep.subr.msk.mxu0 %vm563_vm0, %v15012_v12 }
  0x90   : > { %13114 = vmatmul.mubr.msk.f32.vlgmr.msra.gmra.mxu1 %vm279_vm1, %v14779_v17 }
  0x91   : > { %13167 = vmatmul.mubr.msk.f32.gmra.mxu0 %vm279_vm1, %v14630_v38  ;;  %13212 = vmatpush3.msk.msra.mxu1 %vm563_vm0, %v14768_v15  ;;  %v19370_v38 = vld [vmem:[#allocation7_spill] sm:$0xff] }
  0x92   : > { %13116 = vmatprep.mubr.msk.f32.mxu1 %vm279_vm1, %v14785_v19  ;;  %13169 = vmatprep.mubr.msk.f32.mxu0 %vm279_vm1, %v14638_v41  ;;  %v19372_v41 = vld [vmem:[#allocation9_spill] sm:$0xff] }
  0x93   : > { %13311 = vmatprep.subr.msk.mxu1 %vm563_vm0, %v15029_v31 }
  0x94   : > { %13117 = vmatmul.mubr.msk.f32.gmra.mxu1 %vm279_vm1, %v14799_v21 }
  0x95   : > { %13170 = vmatmul.mubr.msk.f32.gmra.mxu0 %vm279_vm1, %v14655_v44  ;;  %13119 = vmatprep.mubr.msk.f32.mxu1 %vm279_vm1, %v14805_v23  ;;  %v19375_v44 = vld [vmem:[#allocation12_spill] sm:$0xff] }
  0x96   : > { %13172 = vmatprep.mubr.msk.f32.mxu0 %vm279_vm1, %v14657_v45  ;;  %v19376_v45 = vld [vmem:[#allocation13_spill] sm:$0xff] }
  0x98   : > { %13120 = vmatmul.mubr.msk.f32.gmra.mxu1 %vm279_vm1, %v14815_v25 }
  0x99   : > { %13173 = vmatmul.mubr.msk.f32.gmra.mxu0 %vm279_vm1, %v14681_v53  ;;  %13122 = vmatprep.mubr.msk.f32.mxu1 %vm279_vm1, %v14821_v27  ;;  %v19378_v53 = vld [vmem:[#allocation15_spill] sm:$0xff] }
  0x9a   : > { %13175 = vmatprep.mubr.msk.f32.mxu0 %vm279_vm1, %v14685_v55  ;;  %v19380_v55 = vld [vmem:[#allocation17_spill] sm:$0xff] }
  0x9c   : > { %13123 = vmatmul.mubr.msk.f32.gmra.mxu1 %vm279_vm1, %v14831_v34 }
  0x9d   : > { %13176 = vmatmul.mubr.msk.f32.gmra.mxu0 %vm279_vm1, %v14697_v57  ;;  %13125 = vmatprep.mubr.msk.f32.mxu1 %vm279_vm1, %v14837_v39  ;;  %v19382_v57 = vld [vmem:[#allocation19_spill] sm:$0xff] }
  0x9e   : > { %13178 = vmatprep.mubr.msk.f32.mxu0 %vm279_vm1, %v14701_v59  ;;  %v19383_v59 = vld [vmem:[#allocation20_spill] sm:$0xff] }
  0xa0   : > { %13126 = vmatmul.mubr.msk.f32.gmra.mxu1 %vm279_vm1, %v14847_v47 }
  0xa1   : > { %13179 = vmatmul.mubr.msk.f32.gmra.mxu0 %vm279_vm1, %v14713_v61  ;;  %13128 = vmatprep.mubr.msk.f32.mxu1 %vm279_vm1, %v14853_v49  ;;  %v19384_v61 = vld [vmem:[#allocation21_spill] sm:$0xff] }
  0xa2   : > { %13181 = vmatprep.mubr.msk.f32.mxu0 %vm279_vm1, %v14717_v63  ;;  %v19385_v63 = vld [vmem:[#allocation22_spill] sm:$0xff] }
  0xa4   : > { %13129 = vmatmul.mubr.msk.f32.gmra.mxu1 %vm279_vm1, %v14863_v51 }
  0xa5   : > { %13182 = vmatmul.mubr.msk.f32.gmra.mxu0 %vm279_vm1, %v14729_v2  ;;  %13131 = vmatprep.mubr.msk.f32.mxu1 %vm279_vm1, %v14869_v6  ;;  %v19386_v2 = vld [vmem:[#allocation23_spill] sm:$0xff] }
  0xa6   : > { %13184 = vmatprep.mubr.msk.f32.mxu0 %vm279_vm1, %v14595_v29  ;;  %v15139_v29 = vld [vmem:[#allocation2 + $0x181] sm:$0xff] }
  0xa8   : > { %13132 = vmatmul.mubr.msk.f32.gmra.mxu1 %vm279_vm1, %v14879_v11 }
  0xa9   : > { %13185 = vmatmul.mubr.msk.f32.gmra.mxu0 %vm279_vm1, %v14597_v30  ;;  %13134 = vmatprep.mubr.msk.f32.mxu1 %vm279_vm1, %v14885_v16  ;;  %v15149_v30 = vld [vmem:[#allocation2 + $0x189] sm:$0xff] }
  0xaa   : > { %13187 = vmatprep.mubr.msk.f32.mxu0 %vm279_vm1, %v14608_v32  ;;  %v15151_v32 = vld [vmem:[#allocation2 + $0x180] sm:$0xff] }
  0xac   : > { %13135 = vmatmul.mubr.msk.f32.gmra.mxu1 %vm279_vm1, %v14895_v4 }
  0xad   : > { %13188 = vmatmul.mubr.msk.f32.gmra.mxu0 %vm279_vm1, %v14628_v37  ;;  %13137 = vmatprep.mubr.msk.f32.mxu1 %vm279_vm1, %v14901_v50  ;;  %v19369_v37 = vld [vmem:[#allocation6_spill] sm:$0xff] }
  0xae   : > { %13190 = vmatprep.mubr.msk.f32.mxu0 %vm279_vm1, %v14636_v40  ;;  %v19371_v40 = vld [vmem:[#allocation8_spill] sm:$0xff] }
  0xb0   : > { %13138 = vmatmul.mubr.msk.f32.gmra.mxu1 %vm279_vm1, %v14911_v10 }
  0xb1   : > { %13191 = vmatmul.mubr.msk.f32.gmra.mxu0 %vm279_vm1, %v14647_v42  ;;  %13140 = vmatprep.mubr.msk.f32.mxu1 %vm279_vm1, %v14917_v46  ;;  %v19373_v42 = vld [vmem:[#allocation10_spill] sm:$0xff] }
  0xb2   : > { %13193 = vmatprep.mubr.msk.f32.mxu0 %vm279_vm1, %v14653_v43  ;;  %v19374_v43 = vld [vmem:[#allocation11_spill] sm:$0xff] }
  0xb4   : > { %13141 = vmatmul.mubr.msk.f32.gmra.mxu1 %vm279_vm1, %v14927_v7 }
  0xb5   : > { %13194 = vmatmul.mubr.msk.f32.gmra.mxu0 %vm279_vm1, %v14677_v52  ;;  %13143 = vmatprep.mubr.msk.f32.mxu1 %vm279_vm1, %v14933_v28  ;;  %v19377_v52 = vld [vmem:[#allocation14_spill] sm:$0xff] }
  0xb6   : > { %13196 = vmatprep.mubr.msk.f32.mxu0 %vm279_vm1, %v14683_v54  ;;  %v19379_v54 = vld [vmem:[#allocation16_spill] sm:$0xff] }
  0xb8   : > { %13144 = vmatmul.mubr.msk.f32.gmra.mxu1 %vm279_vm1, %v14943_v1 }
  0xb9   : > { %13197 = vmatmul.mubr.msk.f32.gmra.mxu0 %vm279_vm1, %v14693_v56  ;;  %13146 = vmatprep.mubr.msk.f32.mxu1 %vm279_vm1, %v14949_v24  ;;  %v19381_v56 = vld [vmem:[#allocation18_spill] sm:$0xff] }
  0xba   : > { %13199 = vmatprep.mubr.msk.f32.mxu0 %vm279_vm1, %v14699_v58 }
  0xbc   : > { %13147 = vmatmul.mubr.msk.f32.gmra.mxu1 %vm279_vm1, %v14959_v48 }
  0xbd   : > { %13200 = vmatmul.mubr.msk.f32.gmra.mxu0 %vm279_vm1, %v14709_v60  ;;  %13149 = vmatprep.mubr.msk.f32.mxu1 %vm279_vm1, %v14965_v20 }
  0xbe   : > { %13202 = vmatprep.mubr.msk.f32.mxu0 %vm279_vm1, %v14715_v62 }
  0xc0   : > { %13150 = vmatmul.mubr.msk.f32.gmra.mxu1 %vm279_vm1, %v14975_v36 }
  0xc1   : > { %13203 = vmatmul.mubr.msk.f32.gmra.mxu0 %vm279_vm1, %v14725_v0  ;;  %13152 = vmatprep.mubr.msk.f32.mxu1 %vm279_vm1, %v14981_v14 }
  0xc2   : > { %13205 = vmatprep.mubr.msk.f32.mxu0 %vm279_vm1, %v14731_v3 }
  0xc4   : > { %13153 = vmatmul.mubr.msk.f32.gmra.mxu1 %vm279_vm1, %v14991_v26 }
  0xc5   : > { %13206 = vmatmul.mubr.msk.f32.gmra.mxu0 %vm279_vm1, %v14739_v5  ;;  %13155 = vmatprep.mubr.msk.f32.mxu1 %vm279_vm1, %v14997_v8 }
  0xc6   : > { %13208 = vmatprep.mubr.msk.f32.mxu0 %vm279_vm1, %v15139_v29 }
  0xc8   : > { %13156 = vmatmul.mubr.msk.f32.gmra.mxu1 %vm279_vm1, %v15005_v22 }
  0xc9   : > { %13209 = vmatmul.mubr.msk.f32.gmra.mxu0 %vm279_vm1, %v15149_v30  ;;  %13158 = vmatprep.mubr.msk.f32.mxu1 %vm279_vm1, %v15151_v32 }
  0xca   : > { %13263 = vmatprep.mubr.msk.f32.mxu0 %vm279_vm1, %v14785_v19 }
  0xcc   : > { %13159 = vmatmul.mubr.msk.f32.gmra.mxu1 %vm279_vm1, %v15159_v33 }
  0xcd   : > { %13264 = vmatmul.mubr.msk.f32.vlgmr.msra.gmra.mxu0 %vm279_vm1, %v14799_v21  ;;  %13213 = vmatprep.mubr.msk.f32.mxu1 %vm279_vm1, %v19368_v35  ;;  %v19390_v21 = vld [vmem:[#allocation26_spill] sm:$0xff] }
  0xce   : > { %13362 = vmatpush3.msk.msra.mxu0 %vm563_vm0, %v15012_v12  ;;  %13266 = vmatprep.mubr.msk.f32.mxu0 %vm279_vm1, %v14805_v23  ;;  %v19387_v12 = vld [vmem:[#allocation24_spill] sm:$0xff] }
  0xd0   : > { %13214 = vmatmul.mubr.msk.f32.vlgmr.msra.gmra.mxu1 %vm279_vm1, %v19369_v37 }
  0xd1   : > { %13267 = vmatmul.mubr.msk.f32.gmra.mxu0 %vm279_vm1, %v14815_v25  ;;  %13312 = vmatpush3.msk.msra.mxu1 %vm563_vm0, %v15029_v31 }
  0xd2   : > { %13216 = vmatprep.mubr.msk.f32.mxu1 %vm279_vm1, %v19370_v38  ;;  %13269 = vmatprep.mubr.msk.f32.mxu0 %vm279_vm1, %v14821_v27 }
  0xd4   : > { %13217 = vmatmul.mubr.msk.f32.gmra.mxu1 %vm279_vm1, %v19371_v40 }
  0xd5   : > { %13270 = vmatmul.mubr.msk.f32.gmra.mxu0 %vm279_vm1, %v14831_v34  ;;  %13219 = vmatprep.mubr.msk.f32.mxu1 %vm279_vm1, %v19372_v41 }
  0xd6   : > { %13272 = vmatprep.mubr.msk.f32.mxu0 %vm279_vm1, %v14837_v39 }
  0xd8   : > { %13220 = vmatmul.mubr.msk.f32.gmra.mxu1 %vm279_vm1, %v19373_v42 }
  0xd9   : > { %13273 = vmatmul.mubr.msk.f32.gmra.mxu0 %vm279_vm1, %v14847_v47  ;;  %13222 = vmatprep.mubr.msk.f32.mxu1 %vm279_vm1, %v19374_v43  ;;  %v19396_v47 = vld [vmem:[#allocation30_spill] sm:$0xff] }
  0xda   : > { %13275 = vmatprep.mubr.msk.f32.mxu0 %vm279_vm1, %v14853_v49 }
  0xdc   : > { %13223 = vmatmul.mubr.msk.f32.gmra.mxu1 %vm279_vm1, %v19375_v44 }
  0xdd   : > { %13276 = vmatmul.mubr.msk.f32.gmra.mxu0 %vm279_vm1, %v14863_v51  ;;  %13225 = vmatprep.mubr.msk.f32.mxu1 %vm279_vm1, %v19376_v45 }
  0xde   : > { %13278 = vmatprep.mubr.msk.f32.mxu0 %vm279_vm1, %v14869_v6 }
  0xe0   : > { %13226 = vmatmul.mubr.msk.f32.gmra.mxu1 %vm279_vm1, %v19377_v52 }
  0xe1   : > { %13279 = vmatmul.mubr.msk.f32.gmra.mxu0 %vm279_vm1, %v14879_v11  ;;  %13228 = vmatprep.mubr.msk.f32.mxu1 %vm279_vm1, %v19378_v53 }
  0xe2   : > { %13281 = vmatprep.mubr.msk.f32.mxu0 %vm279_vm1, %v14885_v16  ;;  %v15338_v16 = vld [vmem:[#allocation2 + $0x182] sm:$0xff] }
  0xe4   : > { %13229 = vmatmul.mubr.msk.f32.gmra.mxu1 %vm279_vm1, %v19379_v54 }
  0xe5   : > { %13282 = vmatmul.mubr.msk.f32.gmra.mxu0 %vm279_vm1, %v14895_v4  ;;  %13231 = vmatprep.mubr.msk.f32.mxu1 %vm279_vm1, %v19380_v55  ;;  %v19399_v4 = vld [vmem:[#allocation32_spill] sm:$0xff] }
  0xe6   : > { %13284 = vmatprep.mubr.msk.f32.mxu0 %vm279_vm1, %v14901_v50  ;;  %v15231_v58 = vpop.f32.mrf.mxu0  ;;  %v2707_v50 = vld [vmem:[#allocation2 + $0x198] sm:$0xff] }
  0xe8   : > { %13232 = vmatmul.mubr.msk.f32.gmra.mxu1 %vm279_vm1, %v19381_v56  ;;  %v15237_v60 = vpop.f32.mrf.mxu0 }
  0xe9   : > { %13285 = vmatmul.mubr.msk.f32.gmra.mxu0 %vm279_vm1, %v14911_v10  ;;  %13234 = vmatprep.mubr.msk.f32.mxu1 %vm279_vm1, %v19382_v57 }
  0xea   : > { %13287 = vmatprep.mubr.msk.f32.mxu0 %vm279_vm1, %v14917_v46 }
  0xec   : > { %13235 = vmatmul.mubr.msk.f32.gmra.mxu1 %vm279_vm1, %v19383_v59 }
  0xed   : > { %13288 = vmatmul.mubr.msk.f32.gmra.mxu0 %vm279_vm1, %v14927_v7  ;;  %13237 = vmatprep.mubr.msk.f32.mxu1 %vm279_vm1, %v19384_v61  ;;  %v2708_v7 = vld [vmem:[#allocation2 + $0x1a0] sm:$0xff] }
  0xee   : > { %13290 = vmatprep.mubr.msk.f32.mxu0 %vm279_vm1, %v14933_v28  ;;  %v19393_v28 = vld [vmem:[#allocation28_spill] sm:$0xff] }
  0xf0   : > { %v15243_v62 = vpop.f32.mrf.mxu1  ;;  %13238 = vmatmul.mubr.msk.f32.gmra.mxu1 %vm279_vm1, %v19385_v63 }
  0xf1   : > { %v15247_v0 = vpop.f32.mrf.mxu0  ;;  %13291 = vmatmul.mubr.msk.f32.gmra.mxu0 %vm279_vm1, %v14943_v1  ;;  %13240 = vmatprep.mubr.msk.f32.mxu1 %vm279_vm1, %v19386_v2  ;;  %v19388_v1 = vld [vmem:[#allocation25_spill] sm:$0xff] }
  0xf2   : > { %13293 = vmatprep.mubr.msk.f32.mxu0 %vm279_vm1, %v14949_v24  ;;  %v15255_v3 = vpop.f32.mrf.mxu1  ;;  %v19391_v24 = vld [vmem:[#allocation27_spill] sm:$0xff] }
  0xf3   : > { %v15257_v5 = vpop.f32.mrf.mxu0 }
  0xf4   : > { %v15259_v9 = vpop.f32.mrf.mxu1  ;;  %13241 = vmatmul.mubr.msk.f32.gmra.mxu1 %vm279_vm1, %v19387_v12 }
  0xf5   : > { %v15263_v13 = vpop.f32.mrf.mxu0  ;;  %13294 = vmatmul.mubr.msk.f32.gmra.mxu0 %vm279_vm1, %v14959_v48  ;;  %13243 = vmatprep.mubr.msk.f32.mxu1 %vm279_vm1, %v19388_v1 }
  0xf6   : > { %13296 = vmatprep.mubr.msk.f32.mxu0 %vm279_vm1, %v14965_v20  ;;  %v15271_v15 = vpop.f32.mrf.mxu1 }
  0xf7   : > { %19389 = vst [vmem:[#allocation5_spill] sm:$0xff] %v15271_v15  ;;  %v15273_v17 = vpop.f32.mrf.mxu0 }
  0xf8   : > { %v15275_v19 = vpop.f32.mrf.mxu1  ;;  %13244 = vmatmul.mubr.msk.f32.gmra.mxu1 %vm279_vm1, %v19390_v21 }
  0xf9   : > { %v15279_v23 = vpop.f32.mrf.mxu0  ;;  %13297 = vmatmul.mubr.msk.f32.gmra.mxu0 %vm279_vm1, %v14975_v36  ;;  %13246 = vmatprep.mubr.msk.f32.mxu1 %vm279_vm1, %v19391_v24  ;;  %v19394_v36 = vld [vmem:[#allocation29_spill] sm:$0xff] }
  0xfa   : > { %13299 = vmatprep.mubr.msk.f32.mxu0 %vm279_vm1, %v14981_v14  ;;  %v15287_v20 = vpop.f32.mrf.mxu1 }
  0xfb   : > { %19392 = vst [vmem:[#allocation6_spill] sm:$0xff] %v15287_v20  ;;  %v15289_v25 = vpop.f32.mrf.mxu0 }
  0xfc   : > { %v15291_v27 = vpop.f32.mrf.mxu1  ;;  %13247 = vmatmul.mubr.msk.f32.gmra.mxu1 %vm279_vm1, %v19393_v28 }
  0xfd   : > { %v15295_v34 = vpop.f32.mrf.mxu0  ;;  %13300 = vmatmul.mubr.msk.f32.gmra.mxu0 %vm279_vm1, %v14991_v26  ;;  %13249 = vmatprep.mubr.msk.f32.mxu1 %vm279_vm1, %v19394_v36  ;;  %v19397_v26 = vld [vmem:[#allocation31_spill] sm:$0xff] }
  0xfe   : > { %13302 = vmatprep.mubr.msk.f32.mxu0 %vm279_vm1, %v14997_v8  ;;  %v15303_v14 = vpop.f32.mrf.mxu1 }
  0xff   : > { %19395 = vst [vmem:[#allocation7_spill] sm:$0xff] %v15303_v14  ;;  %v15305_v39 = vpop.f32.mrf.mxu0 }
 0x100   : > { %v15307_v46 = vpop.f32.mrf.mxu1  ;;  %13250 = vmatmul.mubr.msk.f32.gmra.mxu1 %vm279_vm1, %v19396_v47 }
 0x101   : > { %v15311_v48 = vpop.f32.mrf.mxu0  ;;  %13303 = vmatmul.mubr.msk.f32.gmra.mxu0 %vm279_vm1, %v15005_v22  ;;  %13252 = vmatprep.mubr.msk.f32.mxu1 %vm279_vm1, %v19397_v26  ;;  %v19400_v22 = vld [vmem:[#allocation33_spill] sm:$0xff] }
 0x102   : > { %13305 = vmatprep.mubr.msk.f32.mxu0 %vm279_vm1, %v15151_v32  ;;  %v15319_v8 = vpop.f32.mrf.mxu1 }
 0x103   : > { %19398 = vst [vmem:[#allocation8_spill] sm:$0xff] %v15319_v8  ;;  %v15321_v49 = vpop.f32.mrf.mxu0 }
 0x104   : > { %v15323_v51 = vpop.f32.mrf.mxu1  ;;  %13253 = vmatmul.mubr.msk.f32.gmra.mxu1 %vm279_vm1, %v19399_v4 }
 0x105   : > { %v15327_v6 = vpop.f32.mrf.mxu0  ;;  %13306 = vmatmul.mubr.msk.f32.gmra.mxu0 %vm279_vm1, %v15159_v33  ;;  %13255 = vmatprep.mubr.msk.f32.mxu1 %vm279_vm1, %v19400_v22  ;;  %v15349_v33 = vld [vmem:[#allocation2 + $0x18a] sm:$0xff]  ;;  %v3068_v22 = vld [vmem:[#allocation2 + $0x39] sm:$0xff] }
 0x106   : > { %13308 = vmatprep.mubr.msk.f32.mxu0 %vm279_vm1, %v2707_v50  ;;  %v15334_v11 = vpop.f32.mrf.mxu1  ;;  %v3067_v50 = vld [vmem:[#allocation2 + $0x31] sm:$0xff] }
 0x107   : > { %19401 = vst [vmem:[#allocation9_spill] sm:$0xff] %v15334_v11  ;;  %v15336_v10 = vpop.f32.mrf.mxu0 }
 0x108   : > { %v15340_v31 = vpop.f32.mrf.mxu1  ;;  %13256 = vmatmul.mubr.msk.f32.gmra.mxu1 %vm279_vm1, %v14995_v18 }
 0x109   : > { %v15344_v32 = vpop.f32.mrf.mxu0  ;;  %13309 = vmatmul.mubr.msk.f32.gmra.mxu0 %vm279_vm1, %v2708_v7  ;;  %13258 = vmatprep.mubr.msk.f32.mxu1 %vm279_vm1, %v15338_v16 }
 0x10a   : > { %13363 = vmatprep.mubr.msk.f32.mxu0 %vm279_vm1, %v19370_v38  ;;  %v15353_v35 = vpop.f32.mrf.mxu1 }
 0x10b   : > { %19402 = vst [vmem:[#allocation10_spill] sm:$0xff] %v15353_v35  ;;  %v15355_v37 = vpop.f32.mrf.mxu0  ;;  %v3069_v35 = vld [vmem:[#allocation2 + $0x49] sm:$0xff] }
 0x10c   : > { %v15357_v4 = vpop.f32.mrf.mxu1  ;;  %13259 = vmatmul.mubr.msk.f32.gmra.mxu1 %vm279_vm1, %v15349_v33 }
 0x10d   : > { %19403 = vst [vmem:[#allocation11_spill] sm:$0xff] %v15357_v4  ;;  %v13065_v18 = vpop.f32.mrf.mxu0  ;;  %13364 = vmatmul.mubr.msk.f32.vlgmr.msra.gmra.mxu0 %vm279_vm1, %v19371_v40  ;;  %13313 = vmatprep.mubr.msk.f32.mxu1 %vm279_vm1, %v3067_v50  ;;  %v3070_v40 = vld [vmem:[#allocation2 + $0x51] sm:$0xff] }
 0x10e   : > { %13366 = vmatprep.mubr.msk.f32.mxu0 %vm279_vm1, %v19372_v41  ;;  %v15366_v38 = vpop.f32.mrf.mxu1 }
 0x10f   : > { %19404 = vst [vmem:[#allocation12_spill] sm:$0xff] %v15366_v38  ;;  %v1315_v7 = vpop.f32.mrf.mxu0  ;;  %v3071_v38 = vld [vmem:[#allocation2 + $0x61] sm:$0xff] }
 0x110   : > { %v13015_v11 = vpop.f32.mrf.mxu1  ;;  %13314 = vmatmul.mubr.msk.f32.vlgmr.msra.gmra.mxu1 %vm279_vm1, %v3068_v22 }
 0x111   : > { %v13068_v8 = vpop.f32.mrf.mxu0  ;;  %13367 = vmatmul.mubr.msk.f32.gmra.mxu0 %vm279_vm1, %v19373_v42  ;;  %v963_v14 = vadd.f32 %v13015_v11, %v15231_v58  ;;  %13316 = vmatprep.mubr.msk.f32.mxu1 %vm279_vm1, %v3069_v35 }
 0x112   : > { %13369 = vmatprep.mubr.msk.f32.mxu0 %vm279_vm1, %v19374_v43  ;;  %v957_v41 = vpop.f32.mrf.mxu1  ;;  %v3072_v43 = vld [vmem:[#allocation2 + $0x69] sm:$0xff] }
 0x113   : > { %v1325_v50 = vpop.f32.mrf.mxu0  ;;  %v15375_v20 = vadd.f32 %v13065_v18, %v963_v14  ;;  %v958_v15 = vadd.f32 %v957_v41, %v15237_v60  ;;  %v3073_v60 = vld [vmem:[#allocation2 + $0x79] sm:$0xff] }
 0x114   : > { %v13018_v22 = vpop.f32.mrf.mxu1  ;;  %13317 = vmatmul.mubr.msk.f32.gmra.mxu1 %vm279_vm1, %v3070_v40 }
 0x115   : > { %v13071_v4 = vpop.f32.mrf.mxu0  ;;  %13370 = vmatmul.mubr.msk.f32.gmra.mxu0 %vm279_vm1, %v19375_v44  ;;  %v15381_v42 = vadd.f32 %v1315_v7, %v958_v15  ;;  %v973_v58 = vadd.f32 %v13018_v22, %v15247_v0  ;;  %13319 = vmatprep.mubr.msk.f32.mxu1 %vm279_vm1, %v3071_v38 }
 0x116   : > { %13372 = vmatprep.mubr.msk.f32.mxu0 %vm279_vm1, %v19376_v45  ;;  %v967_v14 = vpop.f32.mrf.mxu1  ;;  %v3074_v45 = vld [vmem:[#allocation2 + $0x81] sm:$0xff] }
 0x117   : > { %v1335_v11 = vpop.f32.mrf.mxu0  ;;  %v15387_v35 = vadd.f32 %v13068_v8, %v973_v58  ;;  %v968_v18 = vadd.f32 %v967_v14, %v15257_v5  ;;  %v3075_v5 = vld [vmem:[#allocation2 + $0x91] sm:$0xff] }
 0x118   : > { %v13021_v40 = vpop.f32.mrf.mxu1  ;;  %13320 = vmatmul.mubr.msk.f32.gmra.mxu1 %vm279_vm1, %v3072_v43 }
 0x119   : > { %v13074_v44 = vpop.f32.mrf.mxu0  ;;  %13373 = vmatmul.mubr.msk.f32.gmra.mxu0 %vm279_vm1, %v19377_v52  ;;  %v15393_v0 = vadd.f32 %v1325_v50, %v968_v18  ;;  %v983_v15 = vadd.f32 %v13021_v40, %v15263_v13  ;;  %13322 = vmatprep.mubr.msk.f32.mxu1 %vm279_vm1, %v3073_v60 }
 0x11a   : > { %13375 = vmatprep.mubr.msk.f32.mxu0 %vm279_vm1, %v19378_v53  ;;  %v977_v8 = vpop.f32.mrf.mxu1  ;;  %v3076_v53 = vld [vmem:[#allocation2 + $0x99] sm:$0xff] }
 0x11b   : > { %v1345_v38 = vpop.f32.mrf.mxu0  ;;  %v15399_v7 = vadd.f32 %v13071_v4, %v983_v15  ;;  %v978_v41 = vadd.f32 %v977_v8, %v15273_v17  ;;  %v3077_v17 = vld [vmem:[#allocation2 + $0xa9] sm:$0xff] }
 0x11c   : > { %v13024_v22 = vpop.f32.mrf.mxu1  ;;  %13323 = vmatmul.mubr.msk.f32.gmra.mxu1 %vm279_vm1, %v3074_v45 }
 0x11d   : > { %v13077_v52 = vpop.f32.mrf.mxu0  ;;  %13376 = vmatmul.mubr.msk.f32.gmra.mxu0 %vm279_vm1, %v19379_v54  ;;  %v15405_v13 = vadd.f32 %v1335_v11, %v978_v41  ;;  %v993_v50 = vadd.f32 %v13024_v22, %v15279_v23  ;;  %13325 = vmatprep.mubr.msk.f32.mxu1 %vm279_vm1, %v3075_v5  ;;  %v3081_v41 = vld [vmem:[#allocation2 + $0xd9] sm:$0xff] }
 0x11e   : > { %13378 = vmatprep.mubr.msk.f32.mxu0 %vm279_vm1, %v19380_v55  ;;  %v987_v4 = vpop.f32.mrf.mxu1  ;;  %v3078_v55 = vld [vmem:[#allocation2 + $0xb1] sm:$0xff] }
 0x11f   : > { %v1355_v58 = vpop.f32.mrf.mxu0  ;;  %v15411_v43 = vadd.f32 %v13074_v44, %v993_v50  ;;  %v988_v14 = vadd.f32 %v987_v4, %v15289_v25  ;;  %v11455_v25 = vld [vmem:[%s19212_s3 + $0x8] sm:$0xff] }
 0x120   : > { %v13027_v60 = vpop.f32.mrf.mxu1  ;;  %13326 = vmatmul.mubr.msk.f32.gmra.mxu1 %vm279_vm1, %v3076_v53  ;;  %v3079_v44 = vld [vmem:[#allocation2 + $0xc1] sm:$0xff]  ;;  %13411 = vmatprep.subr.mxu1 %v11455_v25 }
 0x121   : > { %v13080_v54 = vpop.f32.mrf.mxu0  ;;  %13379 = vmatmul.mubr.msk.f32.gmra.mxu0 %vm279_vm1, %v19381_v56  ;;  %v15417_v23 = vadd.f32 %v1345_v38, %v988_v14  ;;  %v1003_v11 = vadd.f32 %v13027_v60, %v15295_v34  ;;  %13328 = vmatprep.mubr.msk.f32.mxu1 %vm279_vm1, %v3077_v17  ;;  %v3080_v38 = vld [vmem:[#allocation2 + $0xc9] sm:$0xff] }
 0x122   : > { %13381 = vmatprep.mubr.msk.f32.mxu0 %vm279_vm1, %v19382_v57  ;;  %v997_v18 = vpop.f32.mrf.mxu1  ;;  %13412 = vmatpush3.msra.mxu1 %v11455_v25 }
 0x123   : > { %v1365_v40 = vpop.f32.mrf.mxu0  ;;  %v15426_v15 = vadd.f32 %v13077_v52, %v1003_v11  ;;  %v998_v56 = vadd.f32 %v997_v18, %v15305_v39 }
 0x124   : > { %v13030_v34 = vpop.f32.mrf.mxu1  ;;  %13329 = vmatmul.mubr.msk.f32.gmra.mxu1 %vm279_vm1, %v3078_v55 }
 0x125   : > { %v13083_v45 = vpop.f32.mrf.mxu0  ;;  %13382 = vmatmul.mubr.msk.f32.gmra.mxu0 %vm279_vm1, %v19383_v59  ;;  %v15432_v57 = vadd.f32 %v1355_v58, %v998_v56  ;;  %v1013_v8 = vadd.f32 %v13030_v34, %v15311_v48  ;;  %13331 = vmatprep.mubr.msk.f32.mxu1 %vm279_vm1, %v3079_v44 }
 0x126   : > { %13384 = vmatprep.mubr.msk.f32.mxu0 %vm279_vm1, %v19384_v61  ;;  %v1007_v5 = vpop.f32.mrf.mxu1  ;;  %v3082_v61 = vld [vmem:[#allocation2 + $0xe1] sm:$0xff] }
 0x127   : > { %v1375_v39 = vpop.f32.mrf.mxu0  ;;  %v15438_v22 = vadd.f32 %v13080_v54, %v1013_v8  ;;  %v1008_v52 = vadd.f32 %v1007_v5, %v15321_v49  ;;  %v3083_v49 = vld [vmem:[#allocation2 + $0xf1] sm:$0xff] }
 0x128   : > { %v13033_v50 = vpop.f32.mrf.mxu1  ;;  %13332 = vmatmul.mubr.msk.f32.gmra.mxu1 %vm279_vm1, %v3080_v38 }
 0x129   : > { %v13086_v59 = vpop.f32.mrf.mxu0  ;;  %13385 = vmatmul.mubr.msk.f32.gmra.mxu0 %vm279_vm1, %v19385_v63  ;;  %v15444_v48 = vadd.f32 %v1365_v40, %v1008_v52  ;;  %v1023_v53 = vadd.f32 %v13033_v50, %v15327_v6  ;;  %13334 = vmatprep.mubr.msk.f32.mxu1 %vm279_vm1, %v3081_v41  ;;  %v3089_v41 = vld [vmem:[#allocation2 + $0x139] sm:$0xff] }
 0x12a   : > { %13387 = vmatprep.mubr.msk.f32.mxu0 %vm279_vm1, %v19386_v2  ;;  %v1017_v4 = vpop.f32.mrf.mxu1  ;;  %v3084_v2 = vld [vmem:[#allocation2 + $0xf9] sm:$0xff] }
 0x12b   : > { %v1385_v58 = vpop.f32.mrf.mxu0  ;;  %v15450_v17 = vadd.f32 %v13083_v45, %v1023_v53  ;;  %v1018_v14 = vadd.f32 %v1017_v4, %v15336_v10  ;;  %v3085_v10 = vld [vmem:[#allocation2 + $0x109] sm:$0xff]  ;;  %v3091_v4 = vld [vmem:[#allocation2 + $0x151] sm:$0xff] }
 0x12c   : > { %v13036_v60 = vpop.f32.mrf.mxu1  ;;  %13335 = vmatmul.mubr.msk.f32.gmra.mxu1 %vm279_vm1, %v3082_v61 }
 0x12d   : > { %v13089_v63 = vpop.f32.mrf.mxu0  ;;  %13388 = vmatmul.mubr.msk.f32.gmra.mxu0 %vm279_vm1, %v19387_v12  ;;  %v15456_v6 = vadd.f32 %v1375_v39, %v1018_v14  ;;  %v1033_v54 = vadd.f32 %v13036_v60, %v15344_v32  ;;  %13337 = vmatprep.mubr.msk.f32.mxu1 %vm279_vm1, %v3083_v49  ;;  %v3484_v60 = vld [vmem:[#allocation2 + $0x172] sm:$0xff] }
 0x12e   : > { %13390 = vmatprep.mubr.msk.f32.mxu0 %vm279_vm1, %v19388_v1  ;;  %v1027_v11 = vpop.f32.mrf.mxu1  ;;  %v3086_v1 = vld [vmem:[#allocation2 + $0x111] sm:$0xff] }
 0x12f   : > { %v1395_v55 = vpop.f32.mrf.mxu0  ;;  %v15462_v25 = vadd.f32 %v13086_v59, %v1033_v54  ;;  %v1028_v18 = vadd.f32 %v1027_v11, %v15355_v37  ;;  %v3087_v37 = vld [vmem:[#allocation2 + $0x121] sm:$0xff] }
 0x130   : > { %v13039_v40 = vpop.f32.mrf.mxu1  ;;  %13338 = vmatmul.mubr.msk.f32.gmra.mxu1 %vm279_vm1, %v3084_v2  ;;  %v3090_v59 = vld [vmem:[#allocation2 + $0x141] sm:$0xff]  ;;  %v3093_v2 = vld [vmem:[#allocation2 + $0x169] sm:$0xff] }
 0x131   : > { %v13092_v12 = vpop.f32.mrf.mxu0  ;;  %13391 = vmatmul.mubr.msk.f32.gmra.mxu0 %vm279_vm1, %v19390_v21  ;;  %v15468_v32 = vadd.f32 %v1385_v58, %v1028_v18  ;;  %v1043_v44 = vadd.f32 %v13039_v40, %v15243_v62  ;;  %13340 = vmatprep.mubr.msk.f32.mxu1 %vm279_vm1, %v3085_v10  ;;  %v3483_v58 = vld [vmem:[#allocation2 + $0x16a] sm:$0xff] }
 0x132   : > { %13393 = vmatprep.mubr.msk.f32.mxu0 %vm279_vm1, %v19391_v24  ;;  %v1037_v56 = vpop.f32.mrf.mxu1  ;;  %v3088_v24 = vld [vmem:[#allocation2 + $0x129] sm:$0xff]  ;;  %v3094_v18 = vld [vmem:[#allocation2 + $0x171] sm:$0xff] }
 0x133   : > { %19405 = vst [vmem:[#allocation13_spill] sm:$0xff] %v15468_v32  ;;  %v15474_v34 = vpop.f32.mrf.mxu0  ;;  %v15476_v45 = vadd.f32 %v13089_v63, %v1043_v44  ;;  %v1038_v8 = vadd.f32 %v1037_v56, %v15255_v3  ;;  %v3487_v44 = vld [vmem:[#allocation2 + $0x19a] sm:$0xff] }
 0x134   : > { %v13042_v38 = vpop.f32.mrf.mxu1  ;;  %13341 = vmatmul.mubr.msk.f32.gmra.mxu1 %vm279_vm1, %v3086_v1 }
 0x135   : > { %v13095_v21 = vpop.f32.mrf.mxu0  ;;  %13394 = vmatmul.mubr.msk.f32.gmra.mxu0 %vm279_vm1, %v19393_v28  ;;  %v15482_v62 = vadd.f32 %v1395_v55, %v1038_v8  ;;  %v1053_v5 = vadd.f32 %v13042_v38, %v15259_v9  ;;  %13343 = vmatprep.mubr.msk.f32.mxu1 %vm279_vm1, %v3087_v37 }
 0x136   : > { %13396 = vmatprep.mubr.msk.f32.mxu0 %vm279_vm1, %v19394_v36  ;;  %v15488_v39 = vpop.f32.mrf.mxu1  ;;  %v3482_v36 = vld [vmem:[#allocation2 + $0x15a] sm:$0xff] }
 0x137   : > { %19406 = vst [vmem:[#allocation14_spill] sm:$0xff] %v15482_v62  ;;  %v15490_v3 = vpop.f32.mrf.mxu0  ;;  %v15492_v52 = vadd.f32 %v13092_v12, %v1053_v5 }
 0x138   : > { %v13045_v50 = vpop.f32.mrf.mxu1  ;;  %13344 = vmatmul.mubr.msk.f32.gmra.mxu1 %vm279_vm1, %v3088_v24 }
 0x139   : > { %v13098_v28 = vpop.f32.mrf.mxu0  ;;  %13397 = vmatmul.mubr.msk.f32.gmra.mxu0 %vm279_vm1, %v19396_v47  ;;  %v1063_v9 = vadd.f32 %v13045_v50, %v15275_v19  ;;  %13346 = vmatprep.mubr.msk.f32.mxu1 %vm279_vm1, %v3089_v41 }
 0x13a   : > { %13399 = vmatprep.mubr.msk.f32.mxu0 %vm279_vm1, %v19397_v26  ;;  %v15501_v53 = vpop.f32.mrf.mxu1  ;;  %v3092_v26 = vld [vmem:[#allocation2 + $0x159] sm:$0xff] }
 0x13b   : > { %v15503_v61 = vpop.f32.mrf.mxu0  ;;  %v15505_v49 = vadd.f32 %v13095_v21, %v1063_v9  ;;  %v3097_v21 = vld [vmem:[#allocation2 + $0x199] sm:$0xff] }
 0x13c   : > { %v13048_v14 = vpop.f32.mrf.mxu1  ;;  %13347 = vmatmul.mubr.msk.f32.gmra.mxu1 %vm279_vm1, %v3090_v59 }
 0x13d   : > { %v13101_v47 = vpop.f32.mrf.mxu0  ;;  %13400 = vmatmul.mubr.msk.f32.gmra.mxu0 %vm279_vm1, %v3482_v36  ;;  %v1073_v19 = vadd.f32 %v13048_v14, %v15291_v27  ;;  %13349 = vmatprep.mubr.msk.f32.mxu1 %vm279_vm1, %v3091_v4  ;;  %v19414_v36 = vld [vmem:[#allocation11_spill] sm:$0xff] }
 0x13e   : > { %13402 = vmatprep.mubr.msk.f32.mxu0 %vm279_vm1, %v3483_v58  ;;  %v15512_v63 = vpop.f32.mrf.mxu1 }
 0x13f   : > { %v15514_v54 = vpop.f32.mrf.mxu0  ;;  %v15516_v11 = vadd.f32 %v13098_v28, %v1073_v19 }
 0x140   : > { %19407 = vst [vmem:[#allocation15_spill] sm:$0xff] %v15514_v54  ;;  %v13051_v55 = vpop.f32.mrf.mxu1  ;;  %13350 = vmatmul.mubr.msk.f32.gmra.mxu1 %vm279_vm1, %v3092_v26 }
 0x141   : > { %v13104_v10 = vpop.f32.mrf.mxu0  ;;  %13403 = vmatmul.mubr.msk.f32.gmra.mxu0 %vm279_vm1, %v3484_v60  ;;  %v1083_v27 = vadd.f32 %v13051_v55, %v15307_v46  ;;  %13352 = vmatprep.mubr.msk.f32.mxu1 %vm279_vm1, %v3093_v2 }
 0x142   : > { %13405 = vmatprep.mubr.msk.f32.mxu0 %vm279_vm1, %v15338_v16  ;;  %v15524_v40 = vpop.f32.mrf.mxu1  ;;  %v3488_v16 = vld [vmem:[#allocation2 + $0x1a2] sm:$0xff] }
 0x143   : > { %19408 = vst [vmem:[#allocation16_spill] sm:$0xff] %v15524_v40  ;;  %v15526_v12 = vpop.f32.mrf.mxu0  ;;  %v15528_v1 = vadd.f32 %v13101_v47, %v1083_v27 }
 0x144   : > { %19409 = vst [vmem:[#allocation17_spill] sm:$0xff] %v15526_v12  ;;  %v13054_v56 = vpop.f32.mrf.mxu1  ;;  %13353 = vmatmul.mubr.msk.f32.gmra.mxu1 %vm279_vm1, %v3094_v18  ;;  %v19416_v18 = vmov 0.0  }
 0x145   : > { %v13107_v37 = vpop.f32.mrf.mxu0  ;;  %13406 = vmatmul.mubr.msk.f32.gmra.mxu0 %vm279_vm1, %v15349_v33  ;;  %v1093_v46 = vadd.f32 %v13054_v56, %v15323_v51  ;;  %13355 = vmatprep.mubr.msk.f32.mxu1 %vm279_vm1, %v15139_v29  ;;  %v3098_v29 = vld [vmem:[#allocation2 + $0x1a1] sm:$0xff]  ;;  %3924 = vst.msk [vmem:[#allocation3 + $0x20] sm:$0xff] %vm3918_vm3, %v19416_v18  ;;  %3919 = vst.msk [vmem:[#allocation3] sm:$0xff] %vm3918_vm3, %v19416_v18 }
 0x146   : > { %13408 = vmatprep.mubr.msk.f32.mxu0 %vm279_vm1, %v3487_v44  ;;  %v15537_v8 = vpop.f32.mrf.mxu1  ;;  %3920 = vst.msk [vmem:[#allocation3 + $0x8] sm:$0xff] %vm3918_vm3, %v19416_v18  ;;  %3923 = vst.msk [vmem:[#allocation3 + $0x18] sm:$0xff] %vm3918_vm3, %v19416_v18 }
 0x147   : > { %19410 = vst [vmem:[#allocation18_spill] sm:$0xff] %v15537_v8  ;;  %v15539_v38 = vpop.f32.mrf.mxu0  ;;  %v15541_v5 = vadd.f32 %v13104_v10, %v1093_v46  ;;  %3926 = vst.msk [vmem:[#allocation3 + $0x30] sm:$0xff] %vm3918_vm3, %v19416_v18 }
 0x148   : > { %19411 = vst [vmem:[#allocation19_spill] sm:$0xff] %v15539_v38  ;;  %v13057_v24 = vpop.f32.mrf.mxu1  ;;  %13356 = vmatmul.mubr.msk.f32.gmra.mxu1 %vm279_vm1, %v15149_v30  ;;  %3927 = vst.msk [vmem:[#allocation3 + $0x38] sm:$0xff] %vm3918_vm3, %v19416_v18 }
 0x149   : > { %v13110_v33 = vpop.f32.mrf.mxu0  ;;  %13409 = vmatmul.mubr.msk.f32.gmra.mxu0 %vm279_vm1, %v3488_v16  ;;  %v1103_v51 = vadd.f32 %v13057_v24, %v15340_v31  ;;  %13358 = vmatprep.mubr.msk.f32.mxu1 %vm279_vm1, %v3097_v21  ;;  %3929 = vst.msk [vmem:[#allocation3 + $0x48] sm:$0xff] %vm3918_vm3, %v19416_v18  ;;  %3930 = vst.msk [vmem:[#allocation3 + $0x50] sm:$0xff] %vm3918_vm3, %v19416_v18 }
 0x14a   : > { %v15548_v41 = vpop.f32.mrf.mxu1  ;;  %3932 = vst.msk [vmem:[#allocation3 + $0x60] sm:$0xff] %vm3918_vm3, %v19416_v18  ;;  %3933 = vst.msk [vmem:[#allocation3 + $0x68] sm:$0xff] %vm3918_vm3, %v19416_v18 }
 0x14b   : > { %19412 = vst [vmem:[#allocation20_spill] sm:$0xff] %v15548_v41  ;;  %v15550_v50 = vpop.f32.mrf.mxu0  ;;  %v15552_v28 = vadd.f32 %v13107_v37, %v1103_v51  ;;  %3935 = vst.msk [vmem:[#allocation3 + $0x78] sm:$0xff] %vm3918_vm3, %v19416_v18 }
 0x14c   : > { %19413 = vst [vmem:[#allocation21_spill] sm:$0xff] %v15550_v50  ;;  %v13060_v9 = vpop.f32.mrf.mxu1  ;;  %13359 = vmatmul.mubr.msk.f32.gmra.mxu1 %vm279_vm1, %v3098_v29  ;;  %3936 = vst.msk [vmem:[#allocation3 + $0x80] sm:$0xff] %vm3918_vm3, %v19416_v18 }
 0x14d   : > { %v13165_v59 = vpop.f32.mrf.mxu0  ;;  %v1113_v30 = vadd.f32 %v13060_v9, %v19414_v36  ;;  %3938 = vst.msk [vmem:[#allocation3 + $0x90] sm:$0xff] %vm3918_vm3, %v19416_v18  ;;  %3939 = vst.msk [vmem:[#allocation3 + $0x98] sm:$0xff] %vm3918_vm3, %v19416_v18  ;;  %v4040_v9 = vld [vmem:[#allocation3 + $0x1] sm:$0xff] }
 0x14e   : > { %v15556_v4 = vpop.f32.mrf.mxu1  ;;  %3941 = vst.msk [vmem:[#allocation3 + $0xa8] sm:$0xff] %vm3918_vm3, %v19416_v18  ;;  %3942 = vst.msk [vmem:[#allocation3 + $0xb0] sm:$0xff] %vm3918_vm3, %v19416_v18  ;;  %13413 = vmatprep.mubr.msk.f32.mxu1 %vm3918_vm3, %v4040_v9 }
 0x14f   : > { %19415 = vst [vmem:[#allocation22_spill] sm:$0xff] %v15556_v4  ;;  %v15558_v58 = vpop.f32.mrf.mxu0  ;;  %v15560_v31 = vadd.f32 %v13110_v33, %v1113_v30  ;;  %3944 = vst.msk [vmem:[#allocation3 + $0xc0] sm:$0xff] %vm3918_vm3, %v19416_v18  ;;  %v4039_v33 = vld [vmem:[%s19212_s3] sm:$0xff]  ;;  %v4008_v30 = vld [vmem:[#allocation3 + $0x8] sm:$0xff] }
 0x150   : > { %v13115_v14 = vpop.f32.mrf.mxu1  ;;  %3945 = vst.msk [vmem:[#allocation3 + $0xc8] sm:$0xff] %vm3918_vm3, %v19416_v18  ;;  %3947 = vst.msk [vmem:[#allocation3 + $0xd8] sm:$0xff] %vm3918_vm3, %v19416_v18  ;;  %13461 = vmatprep.subr.mxu0 %v4039_v33 }
 0x151   : > { %v15562_v47 = vpop.f32.mrf.mxu0  ;;  %v1865_v19 = vadd.f32 %v13115_v14, %v15375_v20  ;;  %3948 = vst.msk [vmem:[#allocation3 + $0xe0] sm:$0xff] %vm3918_vm3, %v19416_v18  ;;  %3950 = vst.msk [vmem:[#allocation3 + $0xf0] sm:$0xff] %vm3918_vm3, %v19416_v18  ;;  %13462 = vmatpush3.msra.mxu0 %v4039_v33 }
 0x152   : > { %v15565_v26 = vpop.f32.mrf.mxu1  ;;  %3951 = vst.msk [vmem:[#allocation3 + $0xf8] sm:$0xff] %vm3918_vm3, %v19416_v18  ;;  %3953 = vst.msk [vmem:[#allocation3 + $0x108] sm:$0xff] %vm3918_vm3, %v19416_v18 }
 0x153   : > { %v15567_v60 = vpop.f32.mrf.mxu0  ;;  %v15569_v2 = vadd.f32 %v13165_v59, %v1865_v19  ;;  %3954 = vst.msk [vmem:[#allocation3 + $0x110] sm:$0xff] %vm3918_vm3, %v19416_v18  ;;  %3956 = vst.msk [vmem:[#allocation3 + $0x120] sm:$0xff] %vm3918_vm3, %v19416_v18  ;;  %v4007_v59 = vld [vmem:[#allocation3] sm:$0xff] }
 0x154   : > { %v13118_v55 = vpop.f32.mrf.mxu1  ;;  %3957 = vst.msk [vmem:[#allocation3 + $0x128] sm:$0xff] %vm3918_vm3, %v19416_v18  ;;  %3959 = vst.msk [vmem:[#allocation3 + $0x138] sm:$0xff] %vm3918_vm3, %v19416_v18  ;;  %13463 = vmatprep.mubr.msk.f32.mxu0 %vm3918_vm3, %v4007_v59 }
 0x155   : > { %v15571_v10 = vpop.f32.mrf.mxu0  ;;  %v1867_v27 = vadd.f32 %v13118_v55, %v15387_v35  ;;  %3960 = vst.msk [vmem:[#allocation3 + $0x140] sm:$0xff] %vm3918_vm3, %v19416_v18  ;;  %3962 = vst.msk [vmem:[#allocation3 + $0x150] sm:$0xff] %vm3918_vm3, %v19416_v18  ;;  %13464 = vmatmul.mubr.msk.f32.vlgmr.msra.gmra.mxu0 %vm3918_vm3, %v4008_v30 }
 0x156   : > { %3963 = vst.msk [vmem:[#allocation3 + $0x158] sm:$0xff] %vm3918_vm3, %v19416_v18  ;;  %3965 = vst.msk [vmem:[#allocation3 + $0x168] sm:$0xff] %vm3918_vm3, %v19416_v18  ;;  %v15646_v20 = vpop.f32.mrf.mxu1 }
 0x157   : > { %3966 = vst.msk [vmem:[#allocation3 + $0x170] sm:$0xff] %vm3918_vm3, %v19416_v18  ;;  %3968 = vst.msk [vmem:[#allocation3 + $0x180] sm:$0xff] %vm3918_vm3, %v19416_v18  ;;  %v15648_v35 = vpop.f32.mrf.mxu0  ;;  %v15687_v44 = vadd.f32 %v15562_v47, %v1867_v27 }
 0x158   : > { %3969 = vst.msk [vmem:[#allocation3 + $0x188] sm:$0xff] %vm3918_vm3, %v19416_v18  ;;  %3971 = vst.msk [vmem:[#allocation3 + $0x198] sm:$0xff] %vm3918_vm3, %v19416_v18  ;;  %v13121_v56 = vpop.f32.mrf.mxu1 }
 0x159   : > { %3972 = vst.msk [vmem:[#allocation3 + $0x1a0] sm:$0xff] %vm3918_vm3, %v19416_v18  ;;  %v13174_v37 = vpop.f32.mrf.mxu0  ;;  %v1869_v46 = vadd.f32 %v13121_v56, %v15399_v7 }
 0x15a   : > { %3925 = vst.msk [vmem:[#allocation3 + $0x28] sm:$0x3] %vm3921_vm4, %v19416_v18  ;;  %3922 = vst.msk [vmem:[#allocation3 + $0x10] sm:$0x3] %vm3921_vm4, %v19416_v18  ;;  %v15690_v16 = vpop.f32.mrf.mxu1 }
 0x15b   : > { %3928 = vst.msk [vmem:[#allocation3 + $0x40] sm:$0x3] %vm3921_vm4, %v19416_v18  ;;  %3931 = vst.msk [vmem:[#allocation3 + $0x58] sm:$0x3] %vm3921_vm4, %v19416_v18  ;;  %v15692_v21 = vpop.f32.mrf.mxu0  ;;  %v15695_v24 = vadd.f32 %v15571_v10, %v1869_v46 }
 0x15c   : > { %3934 = vst.msk [vmem:[#allocation3 + $0x70] sm:$0x3] %vm3921_vm4, %v19416_v18  ;;  %3937 = vst.msk [vmem:[#allocation3 + $0x88] sm:$0x3] %vm3921_vm4, %v19416_v18  ;;  %v13124_v51 = vpop.f32.mrf.mxu1 }
 0x15d   : > { %3940 = vst.msk [vmem:[#allocation3 + $0xa0] sm:$0x3] %vm3921_vm4, %v19416_v18  ;;  %3943 = vst.msk [vmem:[#allocation3 + $0xb8] sm:$0x3] %vm3921_vm4, %v19416_v18  ;;  %v13177_v29 = vpop.f32.mrf.mxu0  ;;  %v1871_v36 = vadd.f32 %v13124_v51, %v15411_v43 }
 0x15e   : > { %3946 = vst.msk [vmem:[#allocation3 + $0xd0] sm:$0x3] %vm3921_vm4, %v19416_v18  ;;  %3949 = vst.msk [vmem:[#allocation3 + $0xe8] sm:$0x3] %vm3921_vm4, %v19416_v18  ;;  %v15702_v14 = vpop.f32.mrf.mxu1 }
 0x15f   : > { %3952 = vst.msk [vmem:[#allocation3 + $0x100] sm:$0x3] %vm3921_vm4, %v19416_v18  ;;  %3955 = vst.msk [vmem:[#allocation3 + $0x118] sm:$0x3] %vm3921_vm4, %v19416_v18  ;;  %v15704_v47 = vpop.f32.mrf.mxu0  ;;  %v15708_v19 = vadd.f32 %v13174_v37, %v1871_v36 }
 0x160   : > { %3958 = vst.msk [vmem:[#allocation3 + $0x130] sm:$0x3] %vm3921_vm4, %v19416_v18  ;;  %3961 = vst.msk [vmem:[#allocation3 + $0x148] sm:$0x3] %vm3921_vm4, %v19416_v18  ;;  %v13127_v55 = vpop.f32.mrf.mxu1 }
 0x161   : > { %3964 = vst.msk [vmem:[#allocation3 + $0x160] sm:$0x3] %vm3921_vm4, %v19416_v18  ;;  %3967 = vst.msk [vmem:[#allocation3 + $0x178] sm:$0x3] %vm3921_vm4, %v19416_v18  ;;  %v4041_v7 = vld [vmem:[#allocation3 + $0x9] sm:$0xff]  ;;  %v13180_v10 = vpop.f32.mrf.mxu0  ;;  %v1873_v43 = vadd.f32 %v13127_v55, %v15426_v15  ;;  %v11520_v15 = vld [vmem:[%s19212_s3 + $0x10] sm:$0xff] }
 0x162   : > { %3970 = vst.msk [vmem:[#allocation3 + $0x190] sm:$0x3] %vm3921_vm4, %v19416_v18  ;;  %3973 = vst.msk [vmem:[#allocation3 + $0x1a8] sm:$0x3] %vm3921_vm4, %v19416_v18  ;;  %13414 = vmatmul.mubr.msk.f32.vlgmr.msra.gmra.mxu1 %vm3918_vm3, %v4041_v7  ;;  %v15712_v27 = vpop.f32.mrf.mxu1  ;;  %13511 = vmatprep.subr.mxu1 %v11520_v15 }
 0x163   : > { %v15714_v56 = vpop.f32.mrf.mxu0  ;;  %v15716_v46 = vadd.f32 %v13177_v29, %v1873_v43  ;;  %13512 = vmatpush3.msra.mxu1 %v11520_v15 }
 0x164   : > { %v13130_v33 = vpop.f32.mrf.mxu1 }
 0x165   : > { %v13183_v51 = vpop.f32.mrf.mxu0  ;;  %v1875_v9 = vadd.f32 %v13130_v33, %v15438_v22 }
 0x166   : > { %v15719_v59 = vpop.f32.mrf.mxu1 }
 0x167   : > { %v15721_v37 = vpop.f32.mrf.mxu0  ;;  %v15723_v36 = vadd.f32 %v13180_v10, %v1875_v9 }
 0x168   : > { %19417 = vst [vmem:[#allocation23_spill] sm:$0xff] %v15721_v37  ;;  %v13133_v7 = vpop.f32.mrf.mxu1 }
 0x169   : > { %v13186_v30 = vpop.f32.mrf.mxu0  ;;  %v1877_v29 = vadd.f32 %v13133_v7, %v15450_v17 }
 0x16a   : > { %v15729_v55 = vpop.f32.mrf.mxu1 }
 0x16b   : > { %v15731_v43 = vpop.f32.mrf.mxu0  ;;  %v15733_v22 = vadd.f32 %v13183_v51, %v1877_v29 }
 0x16c   : > { %19418 = vst [vmem:[#allocation24_spill] sm:$0xff] %v15731_v43  ;;  %v13136_v33 = vpop.f32.mrf.mxu1 }
 0x16d   : > { %19419 = vst [vmem:[#allocation25_spill] sm:$0xff] %v15733_v22  ;;  %v13189_v18 = vpop.f32.mrf.mxu0  ;;  %v1879_v10 = vadd.f32 %v13136_v33, %v15462_v25 }
 0x16e   : > { %v15736_v9 = vpop.f32.mrf.mxu1 }
 0x16f   : > { %19420 = vst [vmem:[#allocation26_spill] sm:$0xff] %v15736_v9  ;;  %v15738_v50 = vpop.f32.mrf.mxu0  ;;  %v15740_v4 = vadd.f32 %v13186_v30, %v1879_v10 }
 0x170   : > { %19421 = vst [vmem:[#allocation27_spill] sm:$0xff] %v15738_v50  ;;  %v13139_v38 = vpop.f32.mrf.mxu1 }
 0x171   : > { %19422 = vst [vmem:[#allocation28_spill] sm:$0xff] %v15740_v4  ;;  %v13192_v41 = vpop.f32.mrf.mxu0  ;;  %v1881_v17 = vadd.f32 %v13139_v38, %v15476_v45 }
 0x172   : > { %v15743_v15 = vpop.f32.mrf.mxu1 }
 0x173   : > { %19423 = vst [vmem:[#allocation29_spill] sm:$0xff] %v15743_v15  ;;  %v15745_v7 = vpop.f32.mrf.mxu0  ;;  %v15747_v51 = vadd.f32 %v13189_v18, %v1881_v17 }
 0x174   : > { %19424 = vst [vmem:[#allocation30_spill] sm:$0xff] %v15745_v7  ;;  %v13142_v29 = vpop.f32.mrf.mxu1 }
 0x175   : > { %19425 = vst [vmem:[#allocation31_spill] sm:$0xff] %v15747_v51  ;;  %v13195_v12 = vpop.f32.mrf.mxu0  ;;  %v1883_v25 = vadd.f32 %v13142_v29, %v15492_v52 }
 0x176   : > { %v15750_v33 = vpop.f32.mrf.mxu1 }
 0x177   : > { %19426 = vst [vmem:[#allocation32_spill] sm:$0xff] %v15750_v33  ;;  %v15752_v8 = vpop.f32.mrf.mxu0  ;;  %v15754_v30 = vadd.f32 %v13192_v41, %v1883_v25 }
 0x178   : > { %19427 = vst [vmem:[#allocation33_spill] sm:$0xff] %v15752_v8  ;;  %v13145_v10 = vpop.f32.mrf.mxu1 }
 0x179   : > { %19428 = vst [vmem:[#allocation11_spill] sm:$0xff] %v15754_v30  ;;  %v13198_v50 = vpop.f32.mrf.mxu0  ;;  %v1885_v45 = vadd.f32 %v13145_v10, %v15505_v49 }
 0x17a   : > { %v15757_v38 = vpop.f32.mrf.mxu1 }
 0x17b   : > { %19429 = vst [vmem:[#allocation34_spill] sm:$0xff] %v15757_v38  ;;  %v15759_v54 = vpop.f32.mrf.mxu0  ;;  %v15761_v18 = vadd.f32 %v13195_v12, %v1885_v45 }
 0x17c   : > { %19430 = vst [vmem:[#allocation35_spill] sm:$0xff] %v15759_v54  ;;  %v13148_v17 = vpop.f32.mrf.mxu1 }
 0x17d   : > { %19431 = vst [vmem:[#allocation36_spill] sm:$0xff] %v15761_v18  ;;  %v13201_v7 = vpop.f32.mrf.mxu0  ;;  %v1887_v52 = vadd.f32 %v13148_v17, %v15516_v11 }
 0x17e   : > { %v15764_v29 = vpop.f32.mrf.mxu1 }
 0x17f   : > { %19432 = vst [vmem:[#allocation37_spill] sm:$0xff] %v15764_v29  ;;  %v15766_v51 = vpop.f32.mrf.mxu0  ;;  %v15768_v41 = vadd.f32 %v13198_v50, %v1887_v52 }
 0x180   : > { %19433 = vst [vmem:[#allocation38_spill] sm:$0xff] %v15766_v51  ;;  %v13151_v25 = vpop.f32.mrf.mxu1 }
 0x181   : > { %19434 = vst [vmem:[#allocation39_spill] sm:$0xff] %v15768_v41  ;;  %v13204_v8 = vpop.f32.mrf.mxu0  ;;  %v1889_v49 = vadd.f32 %v13151_v25, %v15528_v1 }
 0x182   : > { %v15771_v10 = vpop.f32.mrf.mxu1 }
 0x183   : > { %19435 = vst [vmem:[#allocation40_spill] sm:$0xff] %v15771_v10  ;;  %v15773_v30 = vpop.f32.mrf.mxu0  ;;  %v15775_v12 = vadd.f32 %v13201_v7, %v1889_v49 }
 0x184   : > { %19436 = vst [vmem:[#allocation41_spill] sm:$0xff] %v15773_v30  ;;  %v13154_v45 = vpop.f32.mrf.mxu1 }
 0x185   : > { %19437 = vst [vmem:[#allocation42_spill] sm:$0xff] %v15775_v12  ;;  %v13207_v54 = vpop.f32.mrf.mxu0  ;;  %v1891_v11 = vadd.f32 %v13154_v45, %v15541_v5  ;;  %v11586_v12 = vld [vmem:[%s19212_s3 + $0x20] sm:$0xff] }
 0x186   : > { %v15778_v17 = vpop.f32.mrf.mxu1  ;;  %13611 = vmatprep.subr.mxu1 %v11586_v12 }
 0x187   : > { %19438 = vst [vmem:[#allocation43_spill] sm:$0xff] %v15778_v17  ;;  %v15780_v18 = vpop.f32.mrf.mxu0  ;;  %v15782_v50 = vadd.f32 %v13204_v8, %v1891_v11 }
 0x188   : > { %19439 = vst [vmem:[#allocation44_spill] sm:$0xff] %v15780_v18  ;;  %v13157_v52 = vpop.f32.mrf.mxu1 }
 0x189   : > { %19440 = vst [vmem:[#allocation45_spill] sm:$0xff] %v15782_v50  ;;  %v13210_v51 = vpop.f32.mrf.mxu0  ;;  %v1893_v1 = vadd.f32 %v13157_v52, %v15552_v28 }
 0x18a   : > { %v15785_v25 = vpop.f32.mrf.mxu1 }
 0x18b   : > { %19441 = vst [vmem:[#allocation46_spill] sm:$0xff] %v15785_v25  ;;  %v15787_v41 = vpop.f32.mrf.mxu0  ;;  %v15789_v7 = vadd.f32 %v13207_v54, %v1893_v1  ;;  %v11553_v25 = vld [vmem:[%s19212_s3 + $0x18] sm:$0xff] }
 0x18c   : > { %19442 = vst [vmem:[#allocation47_spill] sm:$0xff] %v15787_v41  ;;  %v13160_v49 = vpop.f32.mrf.mxu1  ;;  %13561 = vmatprep.subr.mxu0 %v11553_v25 }
 0x18d   : > { %19443 = vst [vmem:[#allocation48_spill] sm:$0xff] %v15789_v7  ;;  %v15791_v30 = vpop.f32.mrf.mxu0  ;;  %v1895_v5 = vadd.f32 %v13160_v49, %v15560_v31  ;;  %13562 = vmatpush3.msra.mxu0 %v11553_v25 }
 0x18e   : > { %v15794_v45 = vpop.f32.mrf.mxu1 }
 0x18f   : > { %19444 = vst [vmem:[#allocation49_spill] sm:$0xff] %v15794_v45  ;;  %v15796_v18 = vpop.f32.mrf.mxu0  ;;  %v15798_v8 = vadd.f32 %v13210_v51, %v1895_v5 }
 0x190   : > { %v15800_v11 = vpop.f32.mrf.mxu1 }
 0x191   : > { %19445 = vst [vmem:[#allocation50_spill] sm:$0xff] %v15798_v8  ;;  %v15802_v28 = vpop.f32.mrf.mxu0 }
 0x192   : > { %v15804_v52 = vpop.f32.mrf.mxu1 }
 0x193   : > { %v15806_v41 = vpop.f32.mrf.mxu0 }
 0x194   : > { %v15808_v54 = vpop.f32.mrf.mxu1 }
 0x195   : > { %v15810_v1 = vpop.f32.mrf.mxu0 }
 0x196   : > { %v15812_v7 = vpop.f32.mrf.mxu1 }
 0x197   : > { %v15814_v31 = vpop.f32.mrf.mxu0 }
 0x198   : > { %v15816_v49 = vpop.f32.mrf.mxu1 }
 0x199   : > { %v15818_v51 = vpop.f32.mrf.mxu0 }
 0x19a   : > { %v15820_v5 = vpop.f32.mrf.mxu1 }
 0x19b   : > { %v15822_v8 = vpop.f32.mrf.mxu0 }
 0x19c   : > { %v15824_v45 = vpop.f32.mrf.mxu1 }
 0x19d   : > { %v15826_v50 = vpop.f32.mrf.mxu0 }
 0x19e   : > { %v15834_v17 = vpop.f32.mrf.mxu1 }
 0x19f   : > { %v15836_v10 = vpop.f32.mrf.mxu0 }
 0x1a0   : > { %v15838_v29 = vpop.f32.mrf.mxu1 }
 0x1a1   : > { %v15840_v38 = vpop.f32.mrf.mxu0 }
 0x1a2   : > { %19446 = vst [vmem:[#allocation51_spill] sm:$0xff] %v15840_v38  ;;  %v15842_v33 = vpop.f32.mrf.mxu1 }
 0x1a3   : > { %v15844_v4 = vpop.f32.mrf.mxu0 }
 0x1a4   : > { %19447 = vst [vmem:[#allocation52_spill] sm:$0xff] %v15844_v4  ;;  %v15846_v15 = vpop.f32.mrf.mxu1 }
 0x1a5   : > { %v15848_v62 = vpop.f32.mrf.mxu0 }
 0x1a6   : > { %19448 = vst [vmem:[#allocation53_spill] sm:$0xff] %v15848_v62  ;;  %v15850_v43 = vpop.f32.mrf.mxu1 }
 0x1a7   : > { %19449 = vst [vmem:[#allocation54_spill] sm:$0xff] %v15850_v43  ;;  %v15852_v40 = vpop.f32.mrf.mxu0 }
 0x1a8   : > { %19450 = vst [vmem:[#allocation55_spill] sm:$0xff] %v15852_v40  ;;  %v15854_v22 = vpop.f32.mrf.mxu1 }
 0x1a9   : > { %19451 = vst [vmem:[#allocation56_spill] sm:$0xff] %v15854_v22  ;;  %v15856_v25 = vpop.f32.mrf.mxu0 }
 0x1aa   : > { %19452 = vst [vmem:[#allocation57_spill] sm:$0xff] %v15856_v25  ;;  %v15858_v12 = vpop.f32.mrf.mxu1 }
 0x1ab   : > { %19453 = vst [vmem:[#allocation58_spill] sm:$0xff] %v15858_v12  ;;  %v15860_v9 = vpop.f32.mrf.mxu0 }
 0x1ac   : > { %19454 = vst [vmem:[#allocation59_spill] sm:$0xff] %v15860_v9  ;;  %v15862_v38 = vpop.f32.mrf.mxu1 }
 0x1ad   : > { %19455 = vst [vmem:[#allocation60_spill] sm:$0xff] %v15862_v38  ;;  %v15864_v32 = vpop.f32.mrf.mxu0 }
 0x1ae   : > { %19456 = vst [vmem:[#allocation61_spill] sm:$0xff] %v15864_v32  ;;  %v15866_v4 = vpop.f32.mrf.mxu1 }
 0x1af   : > { %19457 = vst [vmem:[#allocation62_spill] sm:$0xff] %v15866_v4  ;;  %v15868_v37 = vpop.f32.mrf.mxu0 }
 0x1b0   : > { %19458 = vst [vmem:[#allocation63_spill] sm:$0xff] %v15868_v37  ;;  %v15870_v62 = vpop.f32.mrf.mxu1 }
 0x1b1   : > { %19459 = vst [vmem:[#allocation64_spill] sm:$0xff] %v15870_v62  ;;  %v15872_v43 = vpop.f32.mrf.mxu0 }
 0x1b2   : > { %19460 = vst [vmem:[#allocation65_spill] sm:$0xff] %v15872_v43  ;;  %v15874_v40 = vpop.f32.mrf.mxu1 }
 0x1b3   : > { %19461 = vst [vmem:[#allocation66_spill] sm:$0xff] %v15874_v40  ;;  %v15876_v22 = vpop.f32.mrf.mxu0 }
 0x1b4   : > { %19462 = vst [vmem:[#allocation67_spill] sm:$0xff] %v15876_v22  ;;  %v15878_v25 = vpop.f32.mrf.mxu1 }
 0x1b5   : > { %19463 = vst [vmem:[#allocation68_spill] sm:$0xff] %v15878_v25  ;;  %v15880_v12 = vpop.f32.mrf.mxu0 }
 0x1b6   : > { %19464 = vst [vmem:[#allocation69_spill] sm:$0xff] %v15880_v12  ;;  %v15882_v9 = vpop.f32.mrf.mxu1 }
 0x1b7   : > { %19465 = vst [vmem:[#allocation70_spill] sm:$0xff] %v15882_v9  ;;  %v15884_v38 = vpop.f32.mrf.mxu0 }
 0x1b8   : > { %19466 = vst [vmem:[#allocation71_spill] sm:$0xff] %v15884_v38  ;;  %v15886_v32 = vpop.f32.mrf.mxu1 }
 0x1b9   : > { %19467 = vst [vmem:[#allocation72_spill] sm:$0xff] %v15886_v32  ;;  %v15888_v4 = vpop.f32.mrf.mxu0 }
 0x1ba   : > { %19468 = vst [vmem:[#allocation73_spill] sm:$0xff] %v15888_v4  ;;  %v15890_v37 = vpop.f32.mrf.mxu1 }
 0x1bb   : > { %19469 = vst [vmem:[#allocation74_spill] sm:$0xff] %v15890_v37  ;;  %v15892_v62 = vpop.f32.mrf.mxu0 }
 0x1bc   : > { %19470 = vst [vmem:[#allocation75_spill] sm:$0xff] %v15892_v62  ;;  %v15894_v43 = vpop.f32.mrf.mxu1 }
 0x1bd   : > { %19471 = vst [vmem:[#allocation76_spill] sm:$0xff] %v15894_v43  ;;  %v15896_v40 = vpop.f32.mrf.mxu0 }
 0x1be   : > { %19472 = vst [vmem:[#allocation77_spill] sm:$0xff] %v15896_v40  ;;  %v15898_v22 = vpop.f32.mrf.mxu1  ;;  %v1864_v40 = vadd.f32 %v15565_v26, %v15381_v42  ;;  %v1868_v26 = vadd.f32 %v15690_v16, %v15405_v13  ;;  %v1870_v13 = vadd.f32 %v15702_v14, %v15417_v23 }
 0x1bf   : > { %v15900_v25 = vpop.f32.mrf.mxu0 }
 0x1c0   : > { %19473 = vst [vmem:[#allocation78_spill] sm:$0xff] %v15900_v25  ;;  %v15902_v12 = vpop.f32.mrf.mxu1 }
 0x1c1   : > { %19474 = vst [vmem:[#allocation79_spill] sm:$0xff] %v15902_v12  ;;  %v15904_v9 = vpop.f32.mrf.mxu0 }
 0x1c2   : > { %19475 = vst [vmem:[#allocation80_spill] sm:$0xff] %v15904_v9  ;;  %v15906_v38 = vpop.f32.mrf.mxu1 }
 0x1c3   : > { %19476 = vst [vmem:[#allocation81_spill] sm:$0xff] %v15906_v38  ;;  %v15908_v32 = vpop.f32.mrf.mxu0 }
 0x1c4   : > { %19477 = vst [vmem:[#allocation82_spill] sm:$0xff] %v15908_v32  ;;  %v15910_v4 = vpop.f32.mrf.mxu1  ;;  %v2254_v32 = vadd.f32 %v15558_v58, %v1864_v40 }
 0x1c5   : > { %19478 = vst [vmem:[#allocation83_spill] sm:$0xff] %v15910_v4  ;;  %v15912_v37 = vpop.f32.mrf.mxu0 }
 0x1c6   : > { %19479 = vst [vmem:[#allocation84_spill] sm:$0xff] %v15912_v37  ;;  %v15914_v62 = vpop.f32.mrf.mxu1  ;;  %v1866_v37 = vadd.f32 %v15646_v20, %v15393_v0  ;;  %v2644_v42 = vadd.f32 %v15804_v52, %v2254_v32  ;;  %v2647_v0 = vadd.f32 %v15808_v54, %v15687_v44  ;;  %v2258_v52 = vadd.f32 %v15648_v35, %v1868_v26 }
 0x1c7   : > { %19480 = vst [vmem:[#allocation85_spill] sm:$0xff] %v15914_v62  ;;  %v15916_v43 = vpop.f32.mrf.mxu0  ;;  %v2645_v62 = vadd.f32 %v15800_v11, %v15569_v2  ;;  %v2260_v26 = vadd.f32 %v15692_v21, %v1870_v13 }
 0x1c8   : > { %19481 = vst [vmem:[#allocation86_spill] sm:$0xff] %v15916_v43  ;;  %v15920_v25 = vpop.f32.mrf.mxu1  ;;  %v3035_v20 = vadd.f32 %v15796_v18, %v2644_v42  ;;  %v19485_v18 = vld [vmem:[#allocation5_spill] sm:$0xff] }
 0x1c9   : > { %v15922_v12 = vpop.f32.mrf.mxu0  ;;  %v3036_v40 = vadd.f32 %v15791_v30, %v2645_v62  ;;  %v15954_v62 = vld [vmem:[%s19211_s2] ss:$0 sm:$0xff]  ;;  %v1048_v35 = vadd.f32 %v15488_v39, %v19485_v18  ;;  %v2651_v39 = vadd.f32 %v15824_v45, %v15708_v19 }
 0x1ca   : > { %19482 = vst [vmem:[#allocation87_spill] sm:$0xff] %v15922_v12  ;;  %v15924_v9 = vpop.f32.mrf.mxu1 }
 0x1cb   : > { %19483 = vst [vmem:[#allocation88_spill] sm:$0xff] %v15924_v9  ;;  %v15926_v38 = vpop.f32.mrf.mxu0 }
 0x1cc   : > { %19484 = vst [vmem:[#allocation89_spill] sm:$0xff] %v15926_v38  ;;  %v15933_v43 = vpop.f32.mrf.mxu1  ;;  %v2256_v38 = vadd.f32 %v15567_v60, %v1866_v37  ;;  %v2649_v60 = vadd.f32 %v15816_v49, %v15695_v24  ;;  %v3038_v37 = vadd.f32 %v15802_v28, %v2647_v0  ;;  %v1872_v28 = vadd.f32 %v15712_v27, %v15432_v57 }
 0x1cd   : > { %v13365_v4 = vpop.f32.mrf.mxu0 }
 0x1ce   : > { %v15938_v12 = vpop.f32.mrf.mxu1  ;;  %v2646_v11 = vadd.f32 %v15812_v7, %v2256_v38  ;;  %v2648_v7 = vadd.f32 %v15820_v5, %v2258_v52  ;;  %v2262_v52 = vadd.f32 %v15704_v47, %v1872_v28 }
 0x1cf   : > { %v3656_v9 = vpop.f32.mrf.mxu0 }
 0x1d0   : > { %v13315_v58 = vpop.f32.mrf.mxu1  ;;  %v3037_v24 = vadd.f32 %v15806_v41, %v2646_v11  ;;  %v3039_v21 = vadd.f32 %v15814_v31, %v2648_v7  ;;  %v2650_v11 = vadd.f32 %v15834_v17, %v2260_v26  ;;  %v2653_v31 = vadd.f32 %v15838_v29, %v15716_v46 }
 0x1d1   : > { %v13368_v2 = vpop.f32.mrf.mxu0  ;;  %v3426_v32 = vadd.f32 %v13315_v58, %v3036_v40 }
 0x1d2   : > { %v3266_v44 = vpop.f32.mrf.mxu1 }
 0x1d3   : > { %v3666_v16 = vpop.f32.mrf.mxu0  ;;  %v3816_v30 = vadd.f32 %v13365_v4, %v3426_v32  ;;  %v3425_v38 = vadd.f32 %v3266_v44, %v3035_v20  ;;  %v3040_v4 = vadd.f32 %v15810_v1, %v2649_v60 }
 0x1d4   : > { %v13318_v23 = vpop.f32.mrf.mxu1 }
 0x1d5   : > { %v13371_v14 = vpop.f32.mrf.mxu0  ;;  %v3855_v54 = vadd.f32 %v15954_v62, %v3816_v30  ;;  %v3815_v49 = vadd.f32 %v3656_v9, %v3425_v38  ;;  %v3428_v42 = vadd.f32 %v13318_v23, %v3038_v37  ;;  %v15970_v9 = vadd.f32 %v15474_v34, %v1048_v35  ;;  %v19486_v30 = vld [vmem:[#allocation6_spill] sm:$0xff]  ;;  %v19487_v38 = vld [vmem:[#allocation7_spill] sm:$0xff] }
 0x1d6   : > { %v3276_v40 = vpop.f32.mrf.mxu1  ;;  %v3042_v34 = vadd.f32 %v15818_v51, %v2651_v39  ;;  %v1058_v47 = vadd.f32 %v15501_v53, %v19486_v30  ;;  %v2652_v51 = vadd.f32 %v15842_v33, %v2262_v52  ;;  %v15995_v53 = vld [vmem:[%s19212_s3 + $0x28] sm:$0xff]  ;;  %v3044_v33 = vadd.f32 %v15826_v50, %v2653_v31 }
 0x1d7   : > { %v3676_v5 = vpop.f32.mrf.mxu0  ;;  %v3887_v0 = vmax.f32 %v3855_v54, 0.0  ;;  %v3854_v58 = vadd.f32 %v15954_v62, %v3815_v49  ;;  %v3818_v41 = vadd.f32 %v13368_v2, %v3428_v42  ;;  %v3427_v20 = vadd.f32 %v3276_v40, %v3037_v24  ;;  %13661 = vmatprep.subr.mxu0 %v15995_v53 }
 0x1d8   : > { %v13321_v57 = vpop.f32.mrf.mxu1  ;;  %v1874_v2 = vadd.f32 %v15719_v59, %v15444_v48  ;;  %v1068_v48 = vadd.f32 %v15512_v63, %v19487_v38  ;;  %v3041_v59 = vadd.f32 %v15822_v8, %v2650_v11  ;;  %v1876_v8 = vadd.f32 %v15729_v55, %v15456_v6 }
 0x1d9   : > { %v13374_v27 = vpop.f32.mrf.mxu0  ;;  %3976 = vst.msk [vmem:[#allocation3 + $0x21] sm:$0xff] %vm3918_vm3, %v3887_v0  ;;  %v3886_v1 = vmax.f32 %v3854_v58, 0.0  ;;  %v3857_v19 = vadd.f32 %v15954_v62, %v3818_v41  ;;  %v3817_v45 = vadd.f32 %v3666_v16, %v3427_v20  ;;  %v3430_v32 = vadd.f32 %v13321_v57, %v3040_v4  ;;  %v19489_v58 = vld [vmem:[#allocation23_spill] sm:$0xff]  ;;  %v19491_v20 = vld [vmem:[#allocation26_spill] sm:$0xff]  ;;  %v19493_v57 = vld [vmem:[#allocation25_spill] sm:$0xff] }
 0x1da   : > { %v3286_v17 = vpop.f32.mrf.mxu1  ;;  %v2264_v63 = vadd.f32 %v15714_v56, %v1874_v2  ;;  %v16007_v56 = vadd.f32 %v15490_v3, %v1058_v47  ;;  %v16010_v6 = vadd.f32 %v15503_v61, %v1068_v48  ;;  %v3043_v55 = vadd.f32 %v15836_v10, %v2652_v51  ;;  %v19490_v3 = vld [vmem:[#allocation13_spill] sm:$0xff]  ;;  %v19492_v61 = vld [vmem:[#allocation51_spill] sm:$0xff]  ;;  %v19494_v10 = vld [vmem:[#allocation56_spill] sm:$0xff] }
 0x1db   : > { %v3686_v13 = vpop.f32.mrf.mxu0  ;;  %3975 = vst.msk [vmem:[#allocation3 + $0x19] sm:$0xff] %vm3918_vm3, %v3886_v1  ;;  %v3889_v60 = vmax.f32 %v3857_v19, 0.0  ;;  %v3856_v44 = vadd.f32 %v15954_v62, %v3817_v45  ;;  %v3820_v37 = vadd.f32 %v13371_v14, %v3430_v32  ;;  %v3429_v16 = vadd.f32 %v3286_v17, %v3039_v21  ;;  %v19498_v47 = vld [vmem:[#allocation58_spill] sm:$0xff] }
 0x1dc   : > { %v13324_v46 = vpop.f32.mrf.mxu1  ;;  %v2655_v14 = vadd.f32 %v15846_v15, %v15723_v36  ;;  %v19488_v36 = vld [vmem:[#allocation54_spill] sm:$0xff]  ;;  %v2266_v41 = vadd.f32 %v19489_v58, %v1876_v8  ;;  %v1878_v21 = vadd.f32 %v19491_v20, %v19490_v3 }
 0x1dd   : > { %v13377_v29 = vpop.f32.mrf.mxu0  ;;  %3978 = vst.msk [vmem:[#allocation3 + $0x39] sm:$0xff] %vm3918_vm3, %v3889_v60  ;;  %v3888_v18 = vmax.f32 %v3856_v44, 0.0  ;;  %v3859_v35 = vadd.f32 %v15954_v62, %v3820_v37  ;;  %v3819_v7 = vadd.f32 %v3676_v5, %v3429_v16  ;;  %v3432_v23 = vadd.f32 %v13324_v46, %v3042_v34  ;;  %v19495_v60 = vld [vmem:[#allocation8_spill] sm:$0xff]  ;;  %v19507_v20 = vld [vmem:[#allocation62_spill] sm:$0xff] }
 0x1de   : > { %v3296_v24 = vpop.f32.mrf.mxu1  ;;  %v2654_v15 = vadd.f32 %v19488_v36, %v2264_v63  ;;  %v3046_v11 = vadd.f32 %v19492_v61, %v2655_v14  ;;  %v19496_v44 = vld [vmem:[#allocation16_spill] sm:$0xff]  ;;  %v2656_v38 = vadd.f32 %v19498_v47, %v2266_v41  ;;  %v19501_v63 = vld [vmem:[#allocation29_spill] sm:$0xff]  ;;  %v19506_v41 = vld [vmem:[#allocation55_spill] sm:$0xff] }
 0x1df   : > { %v3696_v54 = vpop.f32.mrf.mxu0  ;;  %3977 = vst.msk [vmem:[#allocation3 + $0x31] sm:$0xff] %vm3918_vm3, %v3888_v18  ;;  %v3891_v49 = vmax.f32 %v3859_v35, 0.0  ;;  %v3858_v42 = vadd.f32 %v15954_v62, %v3819_v7  ;;  %v3822_v26 = vadd.f32 %v13374_v27, %v3432_v23  ;;  %v3431_v28 = vadd.f32 %v3296_v24, %v3041_v59  ;;  %v19497_v16 = vld [vmem:[#allocation52_spill] sm:$0xff]  ;;  %v19500_v23 = vld [vmem:[#allocation14_spill] sm:$0xff] }
 0x1e0   : > { %v13327_v50 = vpop.f32.mrf.mxu1  ;;  %v2657_v27 = vadd.f32 %v19494_v10, %v19493_v57  ;;  %v1078_v37 = vadd.f32 %v19496_v44, %v19495_v60  ;;  %v3045_v30 = vadd.f32 %v19497_v16, %v2654_v15  ;;  %v19499_v35 = vld [vmem:[#allocation24_spill] sm:$0xff]  ;;  %v1880_v8 = vadd.f32 %v19501_v63, %v19500_v23  ;;  %v19511_v44 = vld [vmem:[#allocation31_spill] sm:$0xff] }
 0x1e1   : > { %v13380_v4 = vpop.f32.mrf.mxu0  ;;  %3980 = vst.msk [vmem:[#allocation3 + $0x51] sm:$0xff] %vm3918_vm3, %v3891_v49  ;;  %v3890_v39 = vmax.f32 %v3858_v42, 0.0  ;;  %v3861_v40 = vadd.f32 %v15954_v62, %v3822_v26  ;;  %v3821_v5 = vadd.f32 %v3686_v13, %v3431_v28  ;;  %v3434_v0 = vadd.f32 %v13327_v50, %v3044_v33  ;;  %v16034_v13 = vld [vmem:[#allocation3 + $0x21] sm:$0xff]  ;;  %v19503_v24 = vld [vmem:[#allocation28_spill] sm:$0xff]  ;;  %v19515_v63 = vld [vmem:[#allocation59_spill] sm:$0xff] }
 0x1e2   : > { %v3306_v1 = vpop.f32.mrf.mxu1  ;;  %v16022_v19 = vld [vmem:[#allocation3 + $0x19] sm:$0xff]  ;;  %v2268_v7 = vadd.f32 %v19499_v35, %v1878_v21  ;;  %v3047_v3 = vadd.f32 %v19506_v41, %v2656_v38 }
 0x1e3   : > { %v16024_v45 = vld [vmem:[#allocation3 + $0x18] sm:$0xff]  ;;  %v16026_v32 = vld [vmem:[#allocation3 + $0x20] sm:$0xff]  ;;  %v3706_v52 = vpop.f32.mrf.mxu0  ;;  %3979 = vst.msk [vmem:[#allocation3 + $0x49] sm:$0xff] %vm3918_vm3, %v3890_v39  ;;  %v3893_v2 = vmax.f32 %v3861_v40, 0.0  ;;  %v3860_v34 = vadd.f32 %v15954_v62, %v3821_v5  ;;  %v3824_v31 = vadd.f32 %v13377_v29, %v3434_v0  ;;  %v3433_v17 = vadd.f32 %v3306_v1, %v3043_v55  ;;  %13416 = vmatprep.mubr.msk.f32.mxu1 %vm3918_vm3, %v16022_v19  ;;  %v19505_v0 = vld [vmem:[#allocation15_spill] sm:$0xff] }
 0x1e4   : > { %13466 = vmatprep.mubr.msk.f32.mxu0 %vm3918_vm3, %v16024_v45  ;;  %v13330_v48 = vpop.f32.mrf.mxu1  ;;  %13417 = vmatmul.mubr.msk.f32.gmra.mxu1 %vm3918_vm3, %v16034_v13  ;;  %v19502_v33 = vld [vmem:[#allocation53_spill] sm:$0xff]  ;;  %v19504_v49 = vld [vmem:[#allocation60_spill] sm:$0xff]  ;;  %v16067_v58 = vadd.f32 %v19505_v0, %v1078_v37  ;;  %v2658_v21 = vadd.f32 %v19507_v20, %v2268_v7  ;;  %v19508_v1 = vld [vmem:[#allocation27_spill] sm:$0xff] }
 0x1e5   : > { %13467 = vmatmul.mubr.msk.f32.gmra.mxu0 %vm3918_vm3, %v16026_v32  ;;  %v13383_v59 = vpop.f32.mrf.mxu0  ;;  %3982 = vst.msk [vmem:[#allocation3 + $0x69] sm:$0xff] %vm3918_vm3, %v3893_v2  ;;  %v3892_v51 = vmax.f32 %v3860_v34, 0.0  ;;  %v3863_v46 = vadd.f32 %v15954_v62, %v3824_v31  ;;  %v3823_v29 = vadd.f32 %v3696_v54, %v3433_v17  ;;  %v3436_v18 = vadd.f32 %v13330_v48, %v3046_v11  ;;  %v16064_v5 = vld [vmem:[#allocation3 + $0x39] sm:$0xff]  ;;  %v19514_v7 = vld [vmem:[#allocation18_spill] sm:$0xff]  ;;  %v19520_v20 = vld [vmem:[#allocation11_spill] sm:$0xff] }
 0x1e6   : > { %v3048_v14 = vadd.f32 %v19502_v33, %v2657_v27  ;;  %v2659_v42 = vadd.f32 %v19504_v49, %v19503_v24  ;;  %v3316_v26 = vpop.f32.mrf.mxu1  ;;  %v16052_v28 = vld [vmem:[#allocation3 + $0x31] sm:$0xff]  ;;  %v2270_v2 = vadd.f32 %v19508_v1, %v1880_v8  ;;  %v19510_v17 = vld [vmem:[#allocation57_spill] sm:$0xff]  ;;  %v3049_v8 = vadd.f32 %v19515_v63, %v2658_v21  ;;  %v19516_v33 = vld [vmem:[#allocation66_spill] sm:$0xff] }
 0x1e7   : > { %v16054_v55 = vld [vmem:[#allocation3 + $0x30] sm:$0xff]  ;;  %v16056_v36 = vld [vmem:[#allocation3 + $0x38] sm:$0xff]  ;;  %v3716_v15 = vpop.f32.mrf.mxu0  ;;  %3981 = vst.msk [vmem:[#allocation3 + $0x61] sm:$0xff] %vm3918_vm3, %v3892_v51  ;;  %v3895_v54 = vmax.f32 %v3863_v46, 0.0  ;;  %v3862_v50 = vadd.f32 %v15954_v62, %v3823_v29  ;;  %v3826_v39 = vadd.f32 %v13380_v4, %v3436_v18  ;;  %v3435_v40 = vadd.f32 %v3316_v26, %v3045_v30  ;;  %13419 = vmatprep.mubr.msk.f32.mxu1 %vm3918_vm3, %v16052_v28  ;;  %v19513_v35 = vld [vmem:[#allocation9_spill] sm:$0xff] }
 0x1e8   : > { %13469 = vmatprep.mubr.msk.f32.mxu0 %vm3918_vm3, %v16054_v55  ;;  %v13333_v61 = vpop.f32.mrf.mxu1  ;;  %13420 = vmatmul.mubr.msk.f32.gmra.mxu1 %vm3918_vm3, %v16064_v5  ;;  %v19509_v34 = vld [vmem:[#allocation32_spill] sm:$0xff]  ;;  %v3050_v60 = vadd.f32 %v19510_v17, %v2659_v42  ;;  %v1088_v23 = vadd.f32 %v19514_v7, %v19513_v35  ;;  %v19519_v41 = vld [vmem:[#allocation61_spill] sm:$0xff] }
 0x1e9   : > { %13470 = vmatmul.mubr.msk.f32.gmra.mxu0 %vm3918_vm3, %v16056_v36  ;;  %v13386_v4 = vpop.f32.mrf.mxu0  ;;  %3984 = vst.msk [vmem:[#allocation3 + $0x81] sm:$0xff] %vm3918_vm3, %v3895_v54  ;;  %v3894_v11 = vmax.f32 %v3862_v50, 0.0  ;;  %v3865_v57 = vadd.f32 %v15954_v62, %v3826_v39  ;;  %v3825_v10 = vadd.f32 %v3706_v52, %v3435_v40  ;;  %v3438_v27 = vadd.f32 %v13333_v61, %v3048_v14  ;;  %v19512_v37 = vld [vmem:[#allocation64_spill] sm:$0xff]  ;;  %v19517_v50 = vld [vmem:[#allocation30_spill] sm:$0xff]  ;;  %v19522_v17 = vld [vmem:[#allocation17_spill] sm:$0xff] }
 0x1ea   : > { %v1882_v31 = vadd.f32 %v19509_v34, %v15970_v9  ;;  %v2661_v16 = vadd.f32 %v19512_v37, %v19511_v44  ;;  %v3326_v30 = vpop.f32.mrf.mxu1  ;;  %v16083_v47 = vld [vmem:[#allocation3 + $0x49] sm:$0xff]  ;;  %v16095_v18 = vld [vmem:[#allocation3 + $0x51] sm:$0xff]  ;;  %v2660_v14 = vadd.f32 %v19516_v33, %v2270_v2  ;;  %v19525_v7 = vld [vmem:[#allocation33_spill] sm:$0xff] }
 0x1eb   : > { %v16085_v38 = vld [vmem:[#allocation3 + $0x48] sm:$0xff]  ;;  %v16087_v48 = vld [vmem:[#allocation3 + $0x50] sm:$0xff]  ;;  %v3726_v51 = vpop.f32.mrf.mxu0  ;;  %3983 = vst.msk [vmem:[#allocation3 + $0x79] sm:$0xff] %vm3918_vm3, %v3894_v11  ;;  %v3897_v52 = vmax.f32 %v3865_v57, 0.0  ;;  %v3864_v46 = vadd.f32 %v15954_v62, %v3825_v10  ;;  %v3828_v29 = vadd.f32 %v13383_v59, %v3438_v27  ;;  %v3437_v9 = vadd.f32 %v3326_v30, %v3047_v3  ;;  %13422 = vmatprep.mubr.msk.f32.mxu1 %vm3918_vm3, %v16083_v47  ;;  %v19521_v21 = vld [vmem:[#allocation68_spill] sm:$0xff] }
 0x1ec   : > { %13472 = vmatprep.mubr.msk.f32.mxu0 %vm3918_vm3, %v16085_v38  ;;  %v13336_v24 = vpop.f32.mrf.mxu1  ;;  %13423 = vmatmul.mubr.msk.f32.gmra.mxu1 %vm3918_vm3, %v16095_v18  ;;  %v2272_v39 = vadd.f32 %v19517_v50, %v1882_v31  ;;  %v19518_v40 = vld [vmem:[#allocation34_spill] sm:$0xff]  ;;  %v3052_v3 = vadd.f32 %v19519_v41, %v2661_v16  ;;  %v2663_v61 = vadd.f32 %v19521_v21, %v19520_v20  ;;  %v19523_v44 = vld [vmem:[#allocation63_spill] sm:$0xff]  ;;  %v19526_v63 = vld [vmem:[#allocation37_spill] sm:$0xff] }
 0x1ed   : > { %13473 = vmatmul.mubr.msk.f32.gmra.mxu0 %vm3918_vm3, %v16087_v48  ;;  %v13389_v59 = vpop.f32.mrf.mxu0  ;;  %3986 = vst.msk [vmem:[#allocation3 + $0x99] sm:$0xff] %vm3918_vm3, %v3897_v52  ;;  %v3896_v49 = vmax.f32 %v3864_v46, 0.0  ;;  %v3867_v42 = vadd.f32 %v15954_v62, %v3828_v29  ;;  %v3827_v26 = vadd.f32 %v3716_v15, %v3437_v9  ;;  %v3440_v54 = vadd.f32 %v13336_v24, %v3050_v60  ;;  %v16125_v31 = vld [vmem:[#allocation3 + $0x69] sm:$0xff]  ;;  %v19527_v33 = vld [vmem:[#allocation65_spill] sm:$0xff]  ;;  %v19528_v24 = vld [vmem:[#allocation36_spill] sm:$0xff] }
 0x1ee   : > { %v1884_v0 = vadd.f32 %v19518_v40, %v16007_v56  ;;  %v3336_v11 = vpop.f32.mrf.mxu1  ;;  %v16113_v57 = vld [vmem:[#allocation3 + $0x61] sm:$0xff]  ;;  %v16128_v60 = vadd.f32 %v19522_v17, %v1088_v23  ;;  %v3051_v37 = vadd.f32 %v19523_v44, %v2660_v14  ;;  %v3054_v14 = vadd.f32 %v19527_v33, %v2663_v61  ;;  %v19533_v21 = vld [vmem:[#allocation20_spill] sm:$0xff] }
 0x1ef   : > { %v16115_v10 = vld [vmem:[#allocation3 + $0x60] sm:$0xff]  ;;  %v16117_v27 = vld [vmem:[#allocation3 + $0x68] sm:$0xff]  ;;  %v3736_v1 = vpop.f32.mrf.mxu0  ;;  %3985 = vst.msk [vmem:[#allocation3 + $0x91] sm:$0xff] %vm3918_vm3, %v3896_v49  ;;  %v3899_v15 = vmax.f32 %v3867_v42, 0.0  ;;  %v3866_v2 = vadd.f32 %v15954_v62, %v3827_v26  ;;  %v3830_v34 = vadd.f32 %v13386_v4, %v3440_v54  ;;  %v3439_v56 = vadd.f32 %v3336_v11, %v3049_v8  ;;  %13425 = vmatprep.mubr.msk.f32.mxu1 %vm3918_vm3, %v16113_v57  ;;  %v19529_v49 = vld [vmem:[#allocation72_spill] sm:$0xff] }
 0x1f0   : > { %13475 = vmatprep.mubr.msk.f32.mxu0 %vm3918_vm3, %v16115_v10  ;;  %v19524_v16 = vld [vmem:[#allocation70_spill] sm:$0xff]  ;;  %v13339_v52 = vpop.f32.mrf.mxu1  ;;  %13426 = vmatmul.mubr.msk.f32.gmra.mxu1 %vm3918_vm3, %v16125_v31  ;;  %v2274_v23 = vadd.f32 %v19525_v7, %v1884_v0  ;;  %v1886_v8 = vadd.f32 %v19526_v63, %v16010_v6  ;;  %v2665_v42 = vadd.f32 %v19529_v49, %v19528_v24  ;;  %v19534_v11 = vld [vmem:[#allocation67_spill] sm:$0xff] }
 0x1f1   : > { %v2662_v30 = vadd.f32 %v19524_v16, %v2272_v39  ;;  %13476 = vmatmul.mubr.msk.f32.gmra.mxu0 %vm3918_vm3, %v16117_v27  ;;  %v13392_v4 = vpop.f32.mrf.mxu0  ;;  %3988 = vst.msk [vmem:[#allocation3 + $0xb1] sm:$0xff] %vm3918_vm3, %v3899_v15  ;;  %v3898_v46 = vmax.f32 %v3866_v2, 0.0  ;;  %v3869_v29 = vadd.f32 %v15954_v62, %v3830_v34  ;;  %v3829_v9 = vadd.f32 %v3726_v51, %v3439_v56  ;;  %v19532_v20 = vld [vmem:[#allocation10_spill] sm:$0xff]  ;;  %v19539_v7 = vld [vmem:[#allocation39_spill] sm:$0xff] }
 0x1f2   : > { %v3442_v35 = vadd.f32 %v13339_v52, %v3052_v3  ;;  %v3346_v26 = vpop.f32.mrf.mxu1  ;;  %v16144_v54 = vld [vmem:[#allocation3 + $0x79] sm:$0xff]  ;;  %v16156_v3 = vld [vmem:[#allocation3 + $0x81] sm:$0xff]  ;;  %v1098_v61 = vadd.f32 %v19533_v21, %v19532_v20  ;;  %v19536_v52 = vld [vmem:[#allocation35_spill] sm:$0xff] }
 0x1f3   : > { %v16146_v50 = vld [vmem:[#allocation3 + $0x78] sm:$0xff]  ;;  %v16148_v39 = vld [vmem:[#allocation3 + $0x80] sm:$0xff]  ;;  %v3746_v40 = vpop.f32.mrf.mxu0  ;;  %3987 = vst.msk [vmem:[#allocation3 + $0xa9] sm:$0xff] %vm3918_vm3, %v3898_v46  ;;  %v3901_v51 = vmax.f32 %v3869_v29, 0.0  ;;  %v3868_v0 = vadd.f32 %v15954_v62, %v3829_v9  ;;  %v3441_v6 = vadd.f32 %v3346_v26, %v3051_v37  ;;  %13428 = vmatprep.mubr.msk.f32.mxu1 %vm3918_vm3, %v16144_v54  ;;  %v3053_v15 = vadd.f32 %v19534_v11, %v2662_v30  ;;  %v19535_v2 = vld [vmem:[#allocation74_spill] sm:$0xff] }
 0x1f4   : > { %19530 = vst [vmem:[#allocation5_spill] sm:$0xff] %v16146_v50  ;;  %19531 = vst [vmem:[#allocation6_spill] sm:$0xff] %v16148_v39  ;;  %v3832_v41 = vadd.f32 %v13389_v59, %v3442_v35  ;;  %13478 = vmatprep.mubr.msk.f32.mxu0 %vm3918_vm3, %v16146_v50  ;;  %v2664_v34 = vadd.f32 %v19535_v2, %v2274_v23  ;;  %v13342_v56 = vpop.f32.mrf.mxu1  ;;  %13429 = vmatmul.mubr.msk.f32.gmra.mxu1 %vm3918_vm3, %v16156_v3  ;;  %v19537_v30 = vld [vmem:[#allocation40_spill] sm:$0xff]  ;;  %v19538_v9 = vld [vmem:[#allocation69_spill] sm:$0xff] }
 0x1f5   : > { %13479 = vmatmul.mubr.msk.f32.gmra.mxu0 %vm3918_vm3, %v16148_v39  ;;  %v13395_v59 = vpop.f32.mrf.mxu0  ;;  %3990 = vst.msk [vmem:[#allocation3 + $0xc9] sm:$0xff] %vm3918_vm3, %v3901_v51  ;;  %v3900_v17 = vmax.f32 %v3868_v0, 0.0  ;;  %v3831_v37 = vadd.f32 %v3736_v1, %v3441_v6  ;;  %v3444_v16 = vadd.f32 %v13342_v56, %v3054_v14  ;;  %v2276_v46 = vadd.f32 %v19536_v52, %v1886_v8  ;;  %v19540_v23 = vld [vmem:[#allocation76_spill] sm:$0xff]  ;;  %v19543_v0 = vld [vmem:[#allocation19_spill] sm:$0xff]  ;;  %v19548_v52 = vld [vmem:[#allocation42_spill] sm:$0xff] }
 0x1f6   : > { %v3871_v44 = vadd.f32 %v15954_v62, %v3832_v41  ;;  %v1888_v29 = vadd.f32 %v19537_v30, %v16067_v58  ;;  %v3056_v35 = vadd.f32 %v19538_v9, %v2665_v42  ;;  %v2667_v63 = vadd.f32 %v19540_v23, %v19539_v7  ;;  %v3356_v33 = vpop.f32.mrf.mxu1  ;;  %v16174_v24 = vld [vmem:[#allocation3 + $0x91] sm:$0xff]  ;;  %v16186_v42 = vld [vmem:[#allocation3 + $0x99] sm:$0xff] }
 0x1f7   : > { %v16176_v49 = vld [vmem:[#allocation3 + $0x90] sm:$0xff]  ;;  %v16178_v26 = vld [vmem:[#allocation3 + $0x98] sm:$0xff]  ;;  %v3756_v51 = vpop.f32.mrf.mxu0  ;;  %3989 = vst.msk [vmem:[#allocation3 + $0xc1] sm:$0xff] %vm3918_vm3, %v3900_v17  ;;  %v3870_v8 = vadd.f32 %v15954_v62, %v3831_v37  ;;  %v3834_v14 = vadd.f32 %v13392_v4, %v3444_v16  ;;  %v3443_v58 = vadd.f32 %v3356_v33, %v3053_v15  ;;  %13431 = vmatprep.mubr.msk.f32.mxu1 %vm3918_vm3, %v16174_v24  ;;  %v19547_v37 = vld [vmem:[#allocation73_spill] sm:$0xff] }
 0x1f8   : > { %19541 = vst [vmem:[#allocation7_spill] sm:$0xff] %v16176_v49  ;;  %19542 = vst [vmem:[#allocation54_spill] sm:$0xff] %v16178_v26  ;;  %v3903_v1 = vmax.f32 %v3871_v44, 0.0  ;;  %13481 = vmatprep.mubr.msk.f32.mxu0 %vm3918_vm3, %v16176_v49  ;;  %v1502_v41 = vadd.f32 %v19543_v0, %v1098_v61  ;;  %v19544_v6 = vld [vmem:[#allocation71_spill] sm:$0xff]  ;;  %v2666_v21 = vadd.f32 %v15898_v22, %v2276_v46  ;;  %v13345_v11 = vpop.f32.mrf.mxu1  ;;  %13432 = vmatmul.mubr.msk.f32.gmra.mxu1 %vm3918_vm3, %v16186_v42  ;;  %v19545_v61 = vld [vmem:[#allocation38_spill] sm:$0xff] }
 0x1f9   : > { %v3055_v20 = vadd.f32 %v19544_v6, %v2664_v34  ;;  %13482 = vmatmul.mubr.msk.f32.gmra.mxu0 %vm3918_vm3, %v16178_v26  ;;  %v13398_v4 = vpop.f32.mrf.mxu0  ;;  %v3902_v15 = vmax.f32 %v3870_v8, 0.0  ;;  %v3873_v2 = vadd.f32 %v15954_v62, %v3834_v14  ;;  %v3833_v56 = vadd.f32 %v3746_v40, %v3443_v58  ;;  %v19546_v34 = vld [vmem:[#allocation43_spill] sm:$0xff]  ;;  %v19553_v8 = vld [vmem:[#allocation12_spill] sm:$0xff]  ;;  %v19554_v14 = vld [vmem:[#allocation22_spill] sm:$0xff] }
 0x1fa   : > { %3992 = vst.msk [vmem:[#allocation3 + $0xe1] sm:$0xff] %vm3918_vm3, %v3903_v1  ;;  %v3446_v17 = vadd.f32 %v13345_v11, %v3056_v35  ;;  %v2278_v44 = vadd.f32 %v19545_v61, %v1888_v29  ;;  %v1890_v22 = vadd.f32 %v19546_v34, %v16128_v60  ;;  %v3058_v16 = vadd.f32 %v19547_v37, %v2667_v63  ;;  %v19549_v46 = vld [vmem:[#allocation79_spill] sm:$0xff]  ;;  %v3366_v9 = vpop.f32.mrf.mxu1  ;;  %v16205_v23 = vld [vmem:[#allocation3 + $0xa8] sm:$0xff]  ;;  %v19556_v11 = vld [vmem:[#allocation81_spill] sm:$0xff] }
 0x1fb   : > { %v2669_v30 = vadd.f32 %v19549_v46, %v19548_v52  ;;  %v16203_v7 = vld [vmem:[#allocation3 + $0xa9] sm:$0xff]  ;;  %19550 = vst [vmem:[#allocation23_spill] sm:$0xff] %v16205_v23  ;;  %v3766_v1 = vpop.f32.mrf.mxu0  ;;  %3991 = vst.msk [vmem:[#allocation3 + $0xd9] sm:$0xff] %vm3918_vm3, %v3902_v15  ;;  %v3905_v40 = vmax.f32 %v3873_v2, 0.0  ;;  %v3872_v29 = vadd.f32 %v15954_v62, %v3833_v56  ;;  %v3445_v60 = vadd.f32 %v3366_v9, %v3055_v20  ;;  %v16215_v63 = vld [vmem:[#allocation3 + $0xb1] sm:$0xff] }
 0x1fc   : > { %v16207_v33 = vld [vmem:[#allocation3 + $0xb0] sm:$0xff]  ;;  %v3836_v35 = vadd.f32 %v13395_v59, %v3446_v17  ;;  %13434 = vmatprep.mubr.msk.f32.mxu1 %vm3918_vm3, %v16203_v7  ;;  %13484 = vmatprep.mubr.msk.f32.mxu0 %vm3918_vm3, %v16205_v23  ;;  %19552 = vst [vmem:[#allocation26_spill] sm:$0xff] %v16215_v63  ;;  %v1108_v58 = vadd.f32 %v19554_v14, %v19553_v8  ;;  %v13348_v2 = vpop.f32.mrf.mxu1  ;;  %v19557_v34 = vld [vmem:[#allocation41_spill] sm:$0xff] }
 0x1fd   : > { %19551 = vst [vmem:[#allocation13_spill] sm:$0xff] %v16207_v33  ;;  %v19555_v0 = vld [vmem:[#allocation75_spill] sm:$0xff]  ;;  %v2668_v15 = vadd.f32 %v19556_v11, %v2278_v44  ;;  %13435 = vmatmul.mubr.msk.f32.gmra.mxu1 %vm3918_vm3, %v16215_v63  ;;  %13485 = vmatmul.mubr.msk.f32.gmra.mxu0 %vm3918_vm3, %v16207_v33  ;;  %v13401_v59 = vpop.f32.mrf.mxu0  ;;  %3994 = vst.msk [vmem:[#allocation3 + $0xf9] sm:$0xff] %vm3918_vm3, %v3905_v40  ;;  %v3904_v20 = vmax.f32 %v3872_v29, 0.0  ;;  %v3835_v17 = vadd.f32 %v3756_v51, %v3445_v60  ;;  %v19559_v44 = vld [vmem:[#allocation77_spill] sm:$0xff] }
 0x1fe   : > { %v3057_v6 = vadd.f32 %v19555_v0, %v2666_v21  ;;  %v3875_v56 = vadd.f32 %v15954_v62, %v3836_v35  ;;  %v3448_v61 = vadd.f32 %v13348_v2, %v3058_v16  ;;  %v2280_v37 = vadd.f32 %v19557_v34, %v1890_v22  ;;  %v19558_v21 = vld [vmem:[#allocation46_spill] sm:$0xff]  ;;  %v19560_v9 = vld [vmem:[#allocation45_spill] sm:$0xff]  ;;  %v19561_v8 = vld [vmem:[#allocation83_spill] sm:$0xff]  ;;  %v3376_v0 = vpop.f32.mrf.mxu1 }
 0x1ff   : > { %v1892_v52 = vadd.f32 %v19558_v21, %v1502_v41  ;;  %v3060_v46 = vadd.f32 %v19559_v44, %v2669_v30  ;;  %v2671_v14 = vadd.f32 %v19561_v8, %v19560_v9  ;;  %v16232_v11 = vld [vmem:[#allocation3 + $0xc1] sm:$0xff]  ;;  %v3776_v29 = vpop.f32.mrf.mxu0  ;;  %3993 = vst.msk [vmem:[#allocation3 + $0xf1] sm:$0xff] %vm3918_vm3, %v3904_v20  ;;  %v3874_v22 = vadd.f32 %v15954_v62, %v3835_v17  ;;  %v16244_v30 = vld [vmem:[#allocation3 + $0xc9] sm:$0xff] }
 0x200   : > { %19562 = vst [vmem:[#allocation51_spill] sm:$0xff] %v16232_v11  ;;  %v16234_v63 = vld [vmem:[#allocation3 + $0xc0] sm:$0xff]  ;;  %v16236_v40 = vld [vmem:[#allocation3 + $0xc8] sm:$0xff]  ;;  %v3907_v51 = vmax.f32 %v3875_v56, 0.0  ;;  %v3838_v16 = vadd.f32 %v13398_v4, %v3448_v61  ;;  %v3447_v41 = vadd.f32 %v3376_v0, %v3057_v6  ;;  %13437 = vmatprep.mubr.msk.f32.mxu1 %vm3918_vm3, %v16232_v11  ;;  %19565 = vst [vmem:[#allocation8_spill] sm:$0xff] %v16244_v30  ;;  %v13351_v20 = vpop.f32.mrf.mxu1 }
 0x201   : > { %19563 = vst [vmem:[#allocation25_spill] sm:$0xff] %v16234_v63  ;;  %19564 = vst [vmem:[#allocation56_spill] sm:$0xff] %v16236_v40  ;;  %13487 = vmatprep.mubr.msk.f32.mxu0 %vm3918_vm3, %v16234_v63  ;;  %v19566_v35 = vld [vmem:[#allocation21_spill] sm:$0xff]  ;;  %v19567_v2 = vld [vmem:[#allocation78_spill] sm:$0xff]  ;;  %13438 = vmatmul.mubr.msk.f32.gmra.mxu1 %vm3918_vm3, %v16244_v30  ;;  %v13404_v4 = vpop.f32.mrf.mxu0  ;;  %v3906_v6 = vmax.f32 %v3874_v22, 0.0  ;;  %v3450_v61 = vadd.f32 %v13351_v20, %v3060_v46 }
 0x202   : > { %v1504_v60 = vadd.f32 %v19566_v35, %v1108_v58  ;;  %v3059_v34 = vadd.f32 %v19567_v2, %v2668_v15  ;;  %v19568_v21 = vld [vmem:[#allocation85_spill] sm:$0xff]  ;;  %13488 = vmatmul.mubr.msk.f32.gmra.mxu0 %vm3918_vm3, %v16236_v40  ;;  %3996 = vst.msk [vmem:[#allocation3 + $0x111] sm:$0xff] %vm3918_vm3, %v3907_v51  ;;  %v3877_v56 = vadd.f32 %v15954_v62, %v3838_v16  ;;  %v19569_v58 = vld [vmem:[#allocation44_spill] sm:$0xff] }
 0x203   : > { %v2670_v44 = vadd.f32 %v19568_v21, %v2280_v37  ;;  %v3837_v17 = vadd.f32 %v3766_v1, %v3447_v41  ;;  %v2282_v9 = vadd.f32 %v19569_v58, %v1892_v52  ;;  %v19570_v15 = vld [vmem:[#allocation49_spill] sm:$0xff]  ;;  %v19571_v37 = vld [vmem:[#allocation80_spill] sm:$0xff]  ;;  %v3386_v21 = vpop.f32.mrf.mxu1  ;;  %v3786_v22 = vpop.f32.mrf.mxu0  ;;  %3995 = vst.msk [vmem:[#allocation3 + $0x109] sm:$0xff] %vm3918_vm3, %v3906_v6  ;;  %v3840_v46 = vadd.f32 %v13401_v59, %v3450_v61  ;;  %v19578_v61 = vld [vmem:[#allocation47_spill] sm:$0xff] }
 0x204   : > { %v1894_v8 = vadd.f32 %v19570_v15, %v1504_v60  ;;  %v3062_v0 = vadd.f32 %v19571_v37, %v2671_v14  ;;  %v19572_v35 = vld [vmem:[#allocation48_spill] sm:$0xff]  ;;  %v16264_v51 = vld [vmem:[#allocation3 + $0xe0] sm:$0xff]  ;;  %v3909_v1 = vmax.f32 %v3877_v56, 0.0  ;;  %v3449_v16 = vadd.f32 %v3386_v21, %v3059_v34  ;;  %v19576_v14 = vld [vmem:[#allocation82_spill] sm:$0xff] }
 0x205   : > { %v2673_v2 = vadd.f32 %v15920_v25, %v19572_v35  ;;  %v16260_v30 = vld [vmem:[#allocation3 + $0xd9] sm:$0xff]  ;;  %19574 = vst [vmem:[#allocation52_spill] sm:$0xff] %v16264_v51  ;;  %v3876_v52 = vadd.f32 %v15954_v62, %v3837_v17  ;;  %v16272_v25 = vld [vmem:[#allocation3 + $0xe1] sm:$0xff]  ;;  %v3061_v41 = vadd.f32 %v19576_v14, %v2670_v44  ;;  %v13354_v58 = vpop.f32.mrf.mxu1  ;;  %v13407_v59 = vpop.f32.mrf.mxu0  ;;  %v3879_v6 = vadd.f32 %v15954_v62, %v3840_v46 }
 0x206   : > { %v16262_v11 = vld [vmem:[#allocation3 + $0xd8] sm:$0xff]  ;;  %13440 = vmatprep.mubr.msk.f32.mxu1 %vm3918_vm3, %v16260_v30  ;;  %19575 = vst [vmem:[#allocation58_spill] sm:$0xff] %v16272_v25  ;;  %3998 = vst.msk [vmem:[#allocation3 + $0x129] sm:$0xff] %vm3918_vm3, %v3909_v1  ;;  %v3839_v56 = vadd.f32 %v3776_v29, %v3449_v16  ;;  %v3452_v17 = vadd.f32 %v13354_v58, %v3062_v0  ;;  %v2284_v15 = vadd.f32 %v19578_v61, %v1894_v8  ;;  %v19583_v8 = vld [vmem:[#allocation86_spill] sm:$0xff] }
 0x207   : > { %19573 = vst [vmem:[#allocation16_spill] sm:$0xff] %v16262_v11  ;;  %13490 = vmatprep.mubr.msk.f32.mxu0 %vm3918_vm3, %v16262_v11  ;;  %v19577_v60 = vld [vmem:[#allocation88_spill] sm:$0xff]  ;;  %13441 = vmatmul.mubr.msk.f32.gmra.mxu1 %vm3918_vm3, %v16272_v25  ;;  %v3908_v34 = vmax.f32 %v3876_v52, 0.0  ;;  %v3396_v21 = vpop.f32.mrf.mxu1  ;;  %v3911_v1 = vmax.f32 %v3879_v6, 0.0 }
 0x208   : > { %v2672_v20 = vadd.f32 %v19577_v60, %v2282_v9  ;;  %13491 = vmatmul.mubr.msk.f32.gmra.mxu0 %vm3918_vm3, %v16264_v51  ;;  %v19579_v44 = vld [vmem:[#allocation84_spill] sm:$0xff]  ;;  %v19580_v9 = vld [vmem:[#allocation50_spill] sm:$0xff]  ;;  %v16288_v60 = vld [vmem:[#allocation3 + $0xf0] sm:$0xff]  ;;  %v3878_v29 = vadd.f32 %v15954_v62, %v3839_v56  ;;  %v3842_v0 = vadd.f32 %v13404_v4, %v3452_v17  ;;  %v3451_v52 = vadd.f32 %v3396_v21, %v3061_v41  ;;  %v3796_v4 = vpop.f32.mrf.mxu0 }
 0x209   : > { %v3064_v37 = vadd.f32 %v19579_v44, %v2673_v2  ;;  %v2675_v35 = vadd.f32 %v15933_v43, %v19580_v9  ;;  %v16286_v14 = vld [vmem:[#allocation3 + $0xf1] sm:$0xff]  ;;  %19581 = vst [vmem:[#allocation24_spill] sm:$0xff] %v16288_v60  ;;  %3997 = vst.msk [vmem:[#allocation3 + $0x121] sm:$0xff] %vm3918_vm3, %v3908_v34  ;;  %13493 = vmatprep.mubr.msk.f32.mxu0 %vm3918_vm3, %v16288_v60  ;;  %v16298_v43 = vld [vmem:[#allocation3 + $0xf9] sm:$0xff]  ;;  %v2674_v46 = vadd.f32 %v15938_v12, %v2284_v15  ;;  %v13357_v16 = vpop.f32.mrf.mxu1 }
 0x20a   : > { %v16290_v25 = vld [vmem:[#allocation3 + $0xf8] sm:$0xff]  ;;  %13443 = vmatprep.mubr.msk.f32.mxu1 %vm3918_vm3, %v16286_v14  ;;  %v3063_v2 = vadd.f32 %v19583_v8, %v2672_v20  ;;  %4000 = vst.msk [vmem:[#allocation3 + $0x141] sm:$0xff] %vm3918_vm3, %v3911_v1  ;;  %v3910_v41 = vmax.f32 %v3878_v29, 0.0  ;;  %v3881_v58 = vadd.f32 %v15954_v62, %v3842_v0  ;;  %v3841_v34 = vadd.f32 %v3786_v22, %v3451_v52  ;;  %v19584_v56 = vld [vmem:[#allocation87_spill] sm:$0xff]  ;;  %v16311_v12 = vld [vmem:[#allocation3 + $0x108] sm:$0xff]  ;;  %v13410_v44 = vpop.f32.mrf.mxu0 }
 0x20b   : > { %19582 = vst [vmem:[#allocation14_spill] sm:$0xff] %v16290_v25  ;;  %13444 = vmatmul.mubr.msk.f32.gmra.mxu1 %vm3918_vm3, %v16298_v43  ;;  %v3454_v6 = vadd.f32 %v13357_v16, %v3064_v37  ;;  %v3066_v17 = vadd.f32 %v19584_v56, %v2675_v35  ;;  %v3406_v20 = vpop.f32.mrf.mxu1  ;;  %v16309_v61 = vld [vmem:[#allocation3 + $0x109] sm:$0xff]  ;;  %19585 = vst [vmem:[#allocation29_spill] sm:$0xff] %v16311_v12  ;;  %v16321_v22 = vld [vmem:[#allocation3 + $0x111] sm:$0xff] }
 0x20c   : > { %13494 = vmatmul.mubr.msk.f32.gmra.mxu0 %vm3918_vm3, %v16290_v25  ;;  %v16313_v15 = vld [vmem:[#allocation3 + $0x110] sm:$0xff]  ;;  %3999 = vst.msk [vmem:[#allocation3 + $0x139] sm:$0xff] %vm3918_vm3, %v3910_v41  ;;  %v3913_v9 = vmax.f32 %v3881_v58, 0.0  ;;  %v3880_v21 = vadd.f32 %v15954_v62, %v3841_v34  ;;  %v3453_v29 = vadd.f32 %v3406_v20, %v3063_v2  ;;  %13446 = vmatprep.mubr.msk.f32.mxu1 %vm3918_vm3, %v16309_v61  ;;  %v19587_v37 = vld [vmem:[#allocation89_spill] sm:$0xff] }
 0x20d   : > { %19586 = vst [vmem:[#allocation53_spill] sm:$0xff] %v16313_v15  ;;  %v3844_v1 = vadd.f32 %v13407_v59, %v3454_v6  ;;  %13496 = vmatprep.mubr.msk.f32.mxu0 %vm3918_vm3, %v16311_v12  ;;  %v3065_v35 = vadd.f32 %v19587_v37, %v2674_v46  ;;  %v13360_v0 = vpop.f32.mrf.mxu1  ;;  %v3806_v46 = vpop.f32.mrf.mxu0 }
 0x20e   : > { %4002 = vst.msk [vmem:[#allocation3 + $0x159] sm:$0xff] %vm3918_vm3, %v3913_v9  ;;  %v3912_v59 = vmax.f32 %v3880_v21, 0.0  ;;  %v3843_v8 = vadd.f32 %v3796_v4, %v3453_v29  ;;  %v3456_v2 = vadd.f32 %v13360_v0, %v3066_v17  ;;  %v16342_v4 = vld [vmem:[#allocation3 + $0x129] sm:$0xff] }
 0x20f   : > { %13447 = vmatmul.mubr.msk.f32.gmra.mxu1 %vm3918_vm3, %v16321_v22  ;;  %v3883_v52 = vadd.f32 %v15954_v62, %v3844_v1  ;;  %v3416_v16 = vpop.f32.mrf.mxu1 }
 0x210   : > { %13497 = vmatmul.mubr.msk.f32.gmra.mxu0 %vm3918_vm3, %v16313_v15  ;;  %v16330_v41 = vld [vmem:[#allocation3 + $0x121] sm:$0xff]  ;;  %4001 = vst.msk [vmem:[#allocation3 + $0x151] sm:$0xff] %vm3918_vm3, %v3912_v59  ;;  %v3882_v56 = vadd.f32 %v15954_v62, %v3843_v8  ;;  %v3455_v20 = vadd.f32 %v3416_v16, %v3065_v35  ;;  %v3846_v9 = vadd.f32 %v13410_v44, %v3456_v2 }
 0x211   : > { %v16332_v58 = vld [vmem:[#allocation3 + $0x120] sm:$0xff]  ;;  %v16334_v34 = vld [vmem:[#allocation3 + $0x128] sm:$0xff]  ;;  %v3915_v6 = vmax.f32 %v3883_v52, 0.0  ;;  %13449 = vmatprep.mubr.msk.f32.mxu1 %vm3918_vm3, %v16330_v41 }
 0x212   : > { %19588 = vst [vmem:[#allocation28_spill] sm:$0xff] %v16332_v58  ;;  %19589 = vst [vmem:[#allocation60_spill] sm:$0xff] %v16334_v34  ;;  %13499 = vmatprep.mubr.msk.f32.mxu0 %vm3918_vm3, %v16332_v58  ;;  %v3914_v17 = vmax.f32 %v3882_v56, 0.0  ;;  %v3885_v21 = vadd.f32 %v15954_v62, %v3846_v9  ;;  %v3845_v44 = vadd.f32 %v3806_v46, %v3455_v20  ;;  %v16362_v59 = vld [vmem:[#allocation3 + $0x141] sm:$0xff] }
 0x213   : > { %13450 = vmatmul.mubr.msk.f32.gmra.mxu1 %vm3918_vm3, %v16342_v4  ;;  %4004 = vst.msk [vmem:[#allocation3 + $0x171] sm:$0xff] %vm3918_vm3, %v3915_v6  ;;  %v16350_v1 = vld [vmem:[#allocation3 + $0x139] sm:$0xff]  ;;  %v4716_v46 = vld [vmem:[#allocation3 + $0x2] sm:$0xff] }
 0x214   : > { %13500 = vmatmul.mubr.msk.f32.gmra.mxu0 %vm3918_vm3, %v16334_v34  ;;  %v16352_v29 = vld [vmem:[#allocation3 + $0x138] sm:$0xff]  ;;  %v16354_v37 = vld [vmem:[#allocation3 + $0x140] sm:$0xff]  ;;  %4003 = vst.msk [vmem:[#allocation3 + $0x169] sm:$0xff] %vm3918_vm3, %v3914_v17  ;;  %v3917_v35 = vmax.f32 %v3885_v21, 0.0  ;;  %v3884_v0 = vadd.f32 %v15954_v62, %v3845_v44  ;;  %13452 = vmatprep.mubr.msk.f32.mxu1 %vm3918_vm3, %v16350_v1  ;;  %v4717_v17 = vld [vmem:[#allocation3 + $0xa] sm:$0xff] }
 0x215   : > { %19590 = vst [vmem:[#allocation15_spill] sm:$0xff] %v16352_v29  ;;  %19591 = vst [vmem:[#allocation55_spill] sm:$0xff] %v16354_v37  ;;  %13502 = vmatprep.mubr.msk.f32.mxu0 %vm3918_vm3, %v16352_v29  ;;  %v16380_v16 = vld [vmem:[#allocation3 + $0x159] sm:$0xff]  ;;  %v13465_v44 = vpop.f32.mrf.mxu0 }
 0x216   : > { %4006 = vst.msk [vmem:[#allocation3 + $0x189] sm:$0xff] %vm3918_vm3, %v3917_v35  ;;  %v3916_v52 = vmax.f32 %v3884_v0, 0.0  ;;  %v16408_v35 = vld [vmem:[#allocation3 + $0x1a] sm:$0xff] }
 0x217   : > { %13453 = vmatmul.mubr.msk.f32.gmra.mxu1 %vm3918_vm3, %v16362_v59  ;;  %v16369_v8 = vld [vmem:[#allocation3 + $0x151] sm:$0xff]  ;;  %v16413_v0 = vld [vmem:[%s19212_s3 + $0x30] sm:$0xff] }
 0x218   : > { %13503 = vmatmul.mubr.msk.f32.gmra.mxu0 %vm3918_vm3, %v16354_v37  ;;  %v16371_v62 = vld [vmem:[#allocation3 + $0x150] sm:$0xff]  ;;  %v16373_v2 = vld [vmem:[#allocation3 + $0x158] sm:$0xff]  ;;  %4005 = vst.msk [vmem:[#allocation3 + $0x181] sm:$0xff] %vm3918_vm3, %v3916_v52  ;;  %13455 = vmatprep.mubr.msk.f32.mxu1 %vm3918_vm3, %v16369_v8 }
 0x219   : > { %19592 = vst [vmem:[#allocation62_spill] sm:$0xff] %v16371_v62  ;;  %19593 = vst [vmem:[#allocation27_spill] sm:$0xff] %v16373_v2  ;;  %13505 = vmatprep.mubr.msk.f32.mxu0 %vm3918_vm3, %v16371_v62 }
 0x21a   : > { %v16396_v9 = vld [vmem:[#allocation3 + $0x171] sm:$0xff] }
 0x21b   : > { %13456 = vmatmul.mubr.msk.f32.gmra.mxu1 %vm3918_vm3, %v16380_v16  ;;  %v16386_v6 = vld [vmem:[#allocation3 + $0x169] sm:$0xff] }
 0x21c   : > { %13506 = vmatmul.mubr.msk.f32.gmra.mxu0 %vm3918_vm3, %v16373_v2  ;;  %v16388_v56 = vld [vmem:[#allocation3 + $0x168] sm:$0xff]  ;;  %v16390_v20 = vld [vmem:[#allocation3 + $0x170] sm:$0xff]  ;;  %13458 = vmatprep.mubr.msk.f32.mxu1 %vm3918_vm3, %v16386_v6 }
 0x21d   : > { %19594 = vst [vmem:[#allocation32_spill] sm:$0xff] %v16388_v56  ;;  %13508 = vmatprep.mubr.msk.f32.mxu0 %vm3918_vm3, %v16388_v56 }
 0x21f   : > { %13459 = vmatmul.mubr.msk.f32.gmra.mxu1 %vm3918_vm3, %v16396_v9 }
 0x220   : > { %13509 = vmatmul.mubr.msk.f32.gmra.mxu0 %vm3918_vm3, %v16390_v20  ;;  %13513 = vmatprep.mubr.msk.f32.mxu1 %vm3918_vm3, %v4716_v46  ;;  %v14340_v46 = vld [vmem:[%s19212_s3 + $0x20] sm:$0xff] }
 0x221   : > { %13563 = vmatprep.mubr.msk.f32.mxu0 %vm3918_vm3, %v16024_v45  ;;  %v16418_v45 = vld [vmem:[%s19212_s3 + $0x38] sm:$0xff] }
 0x222   : > { %v13415_v21 = vpop.f32.mrf.mxu1 }
 0x223   : > { %13514 = vmatmul.mubr.msk.f32.vlgmr.msra.gmra.mxu1 %vm3918_vm3, %v4717_v17  ;;  %v16420_v52 = vadd.f32 %v13465_v44, %v13415_v21  ;;  %v16438_v17 = vld [vmem:[#allocation3 + $0x32] sm:$0xff]  ;;  %v16468_v21 = vld [vmem:[#allocation3 + $0x6a] sm:$0xff]  ;;  %v16474_v44 = vld [vmem:[#allocation3 + $0x7a] sm:$0xff] }
 0x224   : > { %13564 = vmatmul.mubr.msk.f32.vlgmr.msra.gmra.mxu0 %vm3918_vm3, %v16026_v32  ;;  %13612 = vmatpush3.msra.mxu1 %v14340_v46  ;;  %v16430_v32 = vld [vmem:[#allocation3 + $0x22] sm:$0xff] }
 0x225   : > { %19595 = vst [vmem:[#allocation57_spill] sm:$0xff] %v16420_v52  ;;  %13516 = vmatprep.mubr.msk.f32.mxu1 %vm3918_vm3, %v16408_v35  ;;  %13566 = vmatprep.mubr.msk.f32.mxu0 %vm3918_vm3, %v16054_v55  ;;  %v16450_v55 = vld [vmem:[#allocation3 + $0x4a] sm:$0xff]  ;;  %v16480_v46 = vld [vmem:[#allocation3 + $0x82] sm:$0xff]  ;;  %v16486_v52 = vld [vmem:[#allocation3 + $0x92] sm:$0xff] }
 0x226   : > { %13662 = vmatpush3.msra.mxu0 %v15995_v53  ;;  %13711 = vmatprep.subr.mxu1 %v16413_v0  ;;  %v16444_v53 = vld [vmem:[#allocation3 + $0x3a] sm:$0xff] }
 0x227   : > { %13761 = vmatprep.subr.mxu0 %v16418_v45  ;;  %13517 = vmatmul.mubr.msk.f32.gmra.mxu1 %vm3918_vm3, %v16430_v32 }
 0x228   : > { %13567 = vmatmul.mubr.msk.f32.gmra.mxu0 %vm3918_vm3, %v16056_v36  ;;  %13519 = vmatprep.mubr.msk.f32.mxu1 %vm3918_vm3, %v16438_v17  ;;  %v16456_v36 = vld [vmem:[#allocation3 + $0x52] sm:$0xff] }
 0x229   : > { %13569 = vmatprep.mubr.msk.f32.mxu0 %vm3918_vm3, %v16085_v38  ;;  %v16462_v38 = vld [vmem:[#allocation3 + $0x62] sm:$0xff] }
 0x22b   : > { %13520 = vmatmul.mubr.msk.f32.gmra.mxu1 %vm3918_vm3, %v16444_v53 }
 0x22c   : > { %13570 = vmatmul.mubr.msk.f32.gmra.mxu0 %vm3918_vm3, %v16087_v48  ;;  %13522 = vmatprep.mubr.msk.f32.mxu1 %vm3918_vm3, %v16450_v55 }
 0x22d   : > { %13572 = vmatprep.mubr.msk.f32.mxu0 %vm3918_vm3, %v16115_v10 }
 0x22f   : > { %13523 = vmatmul.mubr.msk.f32.gmra.mxu1 %vm3918_vm3, %v16456_v36 }
 0x230   : > { %13573 = vmatmul.mubr.msk.f32.gmra.mxu0 %vm3918_vm3, %v16117_v27  ;;  %13525 = vmatprep.mubr.msk.f32.mxu1 %vm3918_vm3, %v16462_v38 }
 0x231   : > { %13575 = vmatprep.mubr.msk.f32.mxu0 %vm3918_vm3, %v16146_v50  ;;  %v16596_v50 = vld [vmem:[#allocation3 + $0x180] sm:$0xff] }
 0x232   : > { %19596 = vst [vmem:[#allocation31_spill] sm:$0xff] %v16596_v50 }
 0x233   : > { %13526 = vmatmul.mubr.msk.f32.gmra.mxu1 %vm3918_vm3, %v16468_v21 }
 0x234   : > { %13576 = vmatmul.mubr.msk.f32.gmra.mxu0 %vm3918_vm3, %v16148_v39  ;;  %13528 = vmatprep.mubr.msk.f32.mxu1 %vm3918_vm3, %v16474_v44  ;;  %v16492_v39 = vld [vmem:[#allocation3 + $0x9a] sm:$0xff] }
 0x235   : > { %13578 = vmatprep.mubr.msk.f32.mxu0 %vm3918_vm3, %v16176_v49  ;;  %v16498_v49 = vld [vmem:[#allocation3 + $0xaa] sm:$0xff] }
 0x237   : > { %13529 = vmatmul.mubr.msk.f32.gmra.mxu1 %vm3918_vm3, %v16480_v46 }
 0x238   : > { %13579 = vmatmul.mubr.msk.f32.gmra.mxu0 %vm3918_vm3, %v16178_v26  ;;  %13531 = vmatprep.mubr.msk.f32.mxu1 %vm3918_vm3, %v16486_v52  ;;  %v16504_v26 = vld [vmem:[#allocation3 + $0xb2] sm:$0xff] }
 0x239   : > { %13581 = vmatprep.mubr.msk.f32.mxu0 %vm3918_vm3, %v16205_v23  ;;  %v16510_v23 = vld [vmem:[#allocation3 + $0xc2] sm:$0xff] }
 0x23b   : > { %13532 = vmatmul.mubr.msk.f32.gmra.mxu1 %vm3918_vm3, %v16492_v39 }
 0x23c   : > { %13582 = vmatmul.mubr.msk.f32.gmra.mxu0 %vm3918_vm3, %v16207_v33  ;;  %13534 = vmatprep.mubr.msk.f32.mxu1 %vm3918_vm3, %v16498_v49  ;;  %v16516_v33 = vld [vmem:[#allocation3 + $0xca] sm:$0xff] }
 0x23d   : > { %13584 = vmatprep.mubr.msk.f32.mxu0 %vm3918_vm3, %v16234_v63  ;;  %v16522_v63 = vld [vmem:[#allocation3 + $0xda] sm:$0xff] }
 0x23f   : > { %13535 = vmatmul.mubr.msk.f32.gmra.mxu1 %vm3918_vm3, %v16504_v26 }
 0x240   : > { %13585 = vmatmul.mubr.msk.f32.gmra.mxu0 %vm3918_vm3, %v16236_v40  ;;  %13537 = vmatprep.mubr.msk.f32.mxu1 %vm3918_vm3, %v16510_v23  ;;  %v16528_v40 = vld [vmem:[#allocation3 + $0xe2] sm:$0xff] }
 0x241   : > { %13587 = vmatprep.mubr.msk.f32.mxu0 %vm3918_vm3, %v16262_v11  ;;  %v16534_v11 = vld [vmem:[#allocation3 + $0xf2] sm:$0xff] }
 0x243   : > { %13538 = vmatmul.mubr.msk.f32.gmra.mxu1 %vm3918_vm3, %v16516_v33 }
 0x244   : > { %13588 = vmatmul.mubr.msk.f32.gmra.mxu0 %vm3918_vm3, %v16264_v51  ;;  %13540 = vmatprep.mubr.msk.f32.mxu1 %vm3918_vm3, %v16522_v63  ;;  %v16540_v51 = vld [vmem:[#allocation3 + $0xfa] sm:$0xff] }
 0x245   : > { %13590 = vmatprep.mubr.msk.f32.mxu0 %vm3918_vm3, %v16288_v60  ;;  %v16546_v60 = vld [vmem:[#allocation3 + $0x10a] sm:$0xff] }
 0x247   : > { %13541 = vmatmul.mubr.msk.f32.gmra.mxu1 %vm3918_vm3, %v16528_v40 }
 0x248   : > { %13591 = vmatmul.mubr.msk.f32.gmra.mxu0 %vm3918_vm3, %v16290_v25  ;;  %13543 = vmatprep.mubr.msk.f32.mxu1 %vm3918_vm3, %v16534_v11  ;;  %v16552_v25 = vld [vmem:[#allocation3 + $0x112] sm:$0xff] }
 0x249   : > { %13593 = vmatprep.mubr.msk.f32.mxu0 %vm3918_vm3, %v16311_v12  ;;  %v16558_v12 = vld [vmem:[#allocation3 + $0x122] sm:$0xff] }
 0x24b   : > { %13544 = vmatmul.mubr.msk.f32.gmra.mxu1 %vm3918_vm3, %v16540_v51 }
 0x24c   : > { %13594 = vmatmul.mubr.msk.f32.gmra.mxu0 %vm3918_vm3, %v16313_v15  ;;  %13546 = vmatprep.mubr.msk.f32.mxu1 %vm3918_vm3, %v16546_v60  ;;  %v16564_v15 = vld [vmem:[#allocation3 + $0x12a] sm:$0xff] }
 0x24d   : > { %13596 = vmatprep.mubr.msk.f32.mxu0 %vm3918_vm3, %v16332_v58  ;;  %v16570_v58 = vld [vmem:[#allocation3 + $0x13a] sm:$0xff] }
 0x24f   : > { %13547 = vmatmul.mubr.msk.f32.gmra.mxu1 %vm3918_vm3, %v16552_v25 }
 0x250   : > { %13597 = vmatmul.mubr.msk.f32.gmra.mxu0 %vm3918_vm3, %v16334_v34  ;;  %13549 = vmatprep.mubr.msk.f32.mxu1 %vm3918_vm3, %v16558_v12  ;;  %v16576_v34 = vld [vmem:[#allocation3 + $0x142] sm:$0xff] }
 0x251   : > { %13599 = vmatprep.mubr.msk.f32.mxu0 %vm3918_vm3, %v16352_v29  ;;  %v16582_v29 = vld [vmem:[#allocation3 + $0x152] sm:$0xff] }
 0x253   : > { %13550 = vmatmul.mubr.msk.f32.gmra.mxu1 %vm3918_vm3, %v16564_v15 }
 0x254   : > { %13600 = vmatmul.mubr.msk.f32.gmra.mxu0 %vm3918_vm3, %v16354_v37  ;;  %13552 = vmatprep.mubr.msk.f32.mxu1 %vm3918_vm3, %v16570_v58  ;;  %v16588_v37 = vld [vmem:[#allocation3 + $0x15a] sm:$0xff] }
 0x255   : > { %13602 = vmatprep.mubr.msk.f32.mxu0 %vm3918_vm3, %v16371_v62  ;;  %v16594_v62 = vld [vmem:[#allocation3 + $0x16a] sm:$0xff] }
 0x257   : > { %13553 = vmatmul.mubr.msk.f32.gmra.mxu1 %vm3918_vm3, %v16576_v34 }
 0x258   : > { %13603 = vmatmul.mubr.msk.f32.gmra.mxu0 %vm3918_vm3, %v16373_v2  ;;  %13555 = vmatprep.mubr.msk.f32.mxu1 %vm3918_vm3, %v16582_v29  ;;  %v16602_v2 = vld [vmem:[#allocation3 + $0x172] sm:$0xff] }
 0x259   : > { %13605 = vmatprep.mubr.msk.f32.mxu0 %vm3918_vm3, %v16388_v56  ;;  %v16604_v56 = vld [vmem:[#allocation3 + $0x188] sm:$0xff] }
 0x25b   : > { %13556 = vmatmul.mubr.msk.f32.gmra.mxu1 %vm3918_vm3, %v16588_v37 }
 0x25c   : > { %13606 = vmatmul.mubr.msk.f32.gmra.mxu0 %vm3918_vm3, %v16390_v20  ;;  %13558 = vmatprep.mubr.msk.f32.mxu1 %vm3918_vm3, %v16594_v62 }
 0x25d   : > { %13608 = vmatprep.mubr.msk.f32.mxu0 %vm3918_vm3, %v16596_v50  ;;  %v16621_v50 = vld [vmem:[%s19212_s3 + $0x40] sm:$0xff] }
 0x25f   : > { %13559 = vmatmul.mubr.msk.f32.gmra.mxu1 %vm3918_vm3, %v16602_v2 }
 0x260   : > { %13609 = vmatmul.mubr.msk.f32.gmra.mxu0 %vm3918_vm3, %v16604_v56  ;;  %13613 = vmatprep.mubr.msk.f32.mxu1 %vm3918_vm3, %v16022_v19  ;;  %v19597_v19 = vld [vmem:[#allocation26_spill] sm:$0xff] }
 0x261   : > { %13663 = vmatprep.mubr.msk.f32.mxu0 %vm3918_vm3, %v16408_v35  ;;  %v16760_v35 = vpop.f32.mrf.mxu1 }
 0x263   : > { %13614 = vmatmul.mubr.msk.f32.vlgmr.msra.gmra.mxu1 %vm3918_vm3, %v16034_v13  ;;  %v19598_v13 = vld [vmem:[#allocation51_spill] sm:$0xff] }
 0x264   : > { %13664 = vmatmul.mubr.msk.f32.vlgmr.msra.gmra.mxu0 %vm3918_vm3, %v16430_v32  ;;  %13712 = vmatpush3.msra.mxu1 %v16413_v0  ;;  %v16762_v0 = vpop.f32.mrf.mxu0 }
 0x265   : > { %13616 = vmatprep.mubr.msk.f32.mxu1 %vm3918_vm3, %v16052_v28  ;;  %13666 = vmatprep.mubr.msk.f32.mxu0 %vm3918_vm3, %v16438_v17  ;;  %v19599_v28 = vld [vmem:[#allocation8_spill] sm:$0xff] }
 0x266   : > { %13762 = vmatpush3.msra.mxu0 %v16418_v45  ;;  %13811 = vmatprep.subr.mxu1 %v16621_v50  ;;  %v6655_v45 = vld [vmem:[#allocation3 + $0x51] sm:$0xff] }
 0x267   : > { %13617 = vmatmul.mubr.msk.f32.gmra.mxu1 %vm3918_vm3, %v16064_v5  ;;  %v19600_v5 = vld [vmem:[#allocation58_spill] sm:$0xff] }
 0x268   : > { %13667 = vmatmul.mubr.msk.f32.gmra.mxu0 %vm3918_vm3, %v16444_v53  ;;  %13619 = vmatprep.mubr.msk.f32.mxu1 %vm3918_vm3, %v16083_v47  ;;  %v16738_v47 = vld [vmem:[#allocation3 + $0x181] sm:$0xff] }
 0x269   : > { %13669 = vmatprep.mubr.msk.f32.mxu0 %vm3918_vm3, %v16450_v55 }
 0x26b   : > { %13620 = vmatmul.mubr.msk.f32.gmra.mxu1 %vm3918_vm3, %v16095_v18  ;;  %v16740_v18 = vld [vmem:[#allocation3 + $0x182] sm:$0xff] }
 0x26c   : > { %13670 = vmatmul.mubr.msk.f32.gmra.mxu0 %vm3918_vm3, %v16456_v36  ;;  %13622 = vmatprep.mubr.msk.f32.mxu1 %vm3918_vm3, %v16113_v57 }
 0x26d   : > { %13672 = vmatprep.mubr.msk.f32.mxu0 %vm3918_vm3, %v16462_v38 }
 0x26f   : > { %13623 = vmatmul.mubr.msk.f32.gmra.mxu1 %vm3918_vm3, %v16125_v31 }
 0x270   : > { %13673 = vmatmul.mubr.msk.f32.gmra.mxu0 %vm3918_vm3, %v16468_v21  ;;  %13625 = vmatprep.mubr.msk.f32.mxu1 %vm3918_vm3, %v16144_v54 }
 0x271   : > { %13675 = vmatprep.mubr.msk.f32.mxu0 %vm3918_vm3, %v16474_v44 }
 0x273   : > { %13626 = vmatmul.mubr.msk.f32.gmra.mxu1 %vm3918_vm3, %v16156_v3 }
 0x274   : > { %13676 = vmatmul.mubr.msk.f32.gmra.mxu0 %vm3918_vm3, %v16480_v46  ;;  %13628 = vmatprep.mubr.msk.f32.mxu1 %vm3918_vm3, %v16174_v24 }
 0x275   : > { %13678 = vmatprep.mubr.msk.f32.mxu0 %vm3918_vm3, %v16486_v52 }
 0x277   : > { %13629 = vmatmul.mubr.msk.f32.gmra.mxu1 %vm3918_vm3, %v16186_v42 }
 0x278   : > { %13679 = vmatmul.mubr.msk.f32.gmra.mxu0 %vm3918_vm3, %v16492_v39  ;;  %13631 = vmatprep.mubr.msk.f32.mxu1 %vm3918_vm3, %v16203_v7 }
 0x279   : > { %13681 = vmatprep.mubr.msk.f32.mxu0 %vm3918_vm3, %v16498_v49 }
 0x27b   : > { %13632 = vmatmul.mubr.msk.f32.gmra.mxu1 %vm3918_vm3, %v19597_v19 }
 0x27c   : > { %13682 = vmatmul.mubr.msk.f32.gmra.mxu0 %vm3918_vm3, %v16504_v26  ;;  %13634 = vmatprep.mubr.msk.f32.mxu1 %vm3918_vm3, %v19598_v13 }
 0x27d   : > { %13684 = vmatprep.mubr.msk.f32.mxu0 %vm3918_vm3, %v16510_v23 }
 0x27f   : > { %13635 = vmatmul.mubr.msk.f32.gmra.mxu1 %vm3918_vm3, %v19599_v28 }
 0x280   : > { %13685 = vmatmul.mubr.msk.f32.gmra.mxu0 %vm3918_vm3, %v16516_v33  ;;  %13637 = vmatprep.mubr.msk.f32.mxu1 %vm3918_vm3, %v16260_v30 }
 0x281   : > { %13687 = vmatprep.mubr.msk.f32.mxu0 %vm3918_vm3, %v16522_v63 }
 0x283   : > { %13638 = vmatmul.mubr.msk.f32.gmra.mxu1 %vm3918_vm3, %v19600_v5 }
 0x284   : > { %13688 = vmatmul.mubr.msk.f32.gmra.mxu0 %vm3918_vm3, %v16528_v40  ;;  %13640 = vmatprep.mubr.msk.f32.mxu1 %vm3918_vm3, %v16286_v14 }
 0x285   : > { %13690 = vmatprep.mubr.msk.f32.mxu0 %vm3918_vm3, %v16534_v11 }
 0x287   : > { %13641 = vmatmul.mubr.msk.f32.gmra.mxu1 %vm3918_vm3, %v16298_v43 }
 0x288   : > { %13691 = vmatmul.mubr.msk.f32.gmra.mxu0 %vm3918_vm3, %v16540_v51  ;;  %13643 = vmatprep.mubr.msk.f32.mxu1 %vm3918_vm3, %v16309_v61 }
 0x289   : > { %13693 = vmatprep.mubr.msk.f32.mxu0 %vm3918_vm3, %v16546_v60 }
 0x28b   : > { %13644 = vmatmul.mubr.msk.f32.gmra.mxu1 %vm3918_vm3, %v16321_v22 }
 0x28c   : > { %13694 = vmatmul.mubr.msk.f32.gmra.mxu0 %vm3918_vm3, %v16552_v25  ;;  %13646 = vmatprep.mubr.msk.f32.mxu1 %vm3918_vm3, %v16330_v41  ;;  %v16746_v25 = vld [vmem:[#allocation3 + $0x189] sm:$0xff] }
 0x28d   : > { %13696 = vmatprep.mubr.msk.f32.mxu0 %vm3918_vm3, %v16558_v12 }
 0x28f   : > { %13647 = vmatmul.mubr.msk.f32.gmra.mxu1 %vm3918_vm3, %v16342_v4 }
 0x290   : > { %13697 = vmatmul.mubr.msk.f32.gmra.mxu0 %vm3918_vm3, %v16564_v15  ;;  %13649 = vmatprep.mubr.msk.f32.mxu1 %vm3918_vm3, %v16350_v1  ;;  %v16748_v15 = vld [vmem:[#allocation3 + $0x18a] sm:$0xff] }
 0x291   : > { %13699 = vmatprep.mubr.msk.f32.mxu0 %vm3918_vm3, %v16570_v58  ;;  %v6265_v58 = vld [vmem:[#allocation3 + $0x30] sm:$0xff] }
 0x293   : > { %13650 = vmatmul.mubr.msk.f32.gmra.mxu1 %vm3918_vm3, %v16362_v59 }
 0x294   : > { %13700 = vmatmul.mubr.msk.f32.gmra.mxu0 %vm3918_vm3, %v16576_v34  ;;  %13652 = vmatprep.mubr.msk.f32.mxu1 %vm3918_vm3, %v16369_v8  ;;  %v6652_v34 = vld [vmem:[#allocation3 + $0x31] sm:$0xff] }
 0x295   : > { %13702 = vmatprep.mubr.msk.f32.mxu0 %vm3918_vm3, %v16582_v29  ;;  %v6266_v29 = vld [vmem:[#allocation3 + $0x38] sm:$0xff] }
 0x297   : > { %13653 = vmatmul.mubr.msk.f32.gmra.mxu1 %vm3918_vm3, %v16380_v16 }
 0x298   : > { %13703 = vmatmul.mubr.msk.f32.gmra.mxu0 %vm3918_vm3, %v16588_v37  ;;  %13655 = vmatprep.mubr.msk.f32.mxu1 %vm3918_vm3, %v16386_v6  ;;  %v6653_v37 = vld [vmem:[#allocation3 + $0x39] sm:$0xff] }
 0x299   : > { %13705 = vmatprep.mubr.msk.f32.mxu0 %vm3918_vm3, %v16594_v62  ;;  %v6267_v62 = vld [vmem:[#allocation3 + $0x48] sm:$0xff] }
 0x29b   : > { %13656 = vmatmul.mubr.msk.f32.gmra.mxu1 %vm3918_vm3, %v16396_v9 }
 0x29c   : > { %13706 = vmatmul.mubr.msk.f32.gmra.mxu0 %vm3918_vm3, %v16602_v2  ;;  %13658 = vmatprep.mubr.msk.f32.mxu1 %vm3918_vm3, %v16738_v47  ;;  %v6654_v2 = vld [vmem:[#allocation3 + $0x49] sm:$0xff] }
 0x29d   : > { %13708 = vmatprep.mubr.msk.f32.mxu0 %vm3918_vm3, %v16740_v18 }
 0x29f   : > { %13659 = vmatmul.mubr.msk.f32.gmra.mxu1 %vm3918_vm3, %v16746_v25 }
 0x2a0   : > { %13709 = vmatmul.mubr.msk.f32.gmra.mxu0 %vm3918_vm3, %v16748_v15  ;;  %13713 = vmatprep.mubr.msk.f32.mxu1 %vm3918_vm3, %v6265_v58 }
 0x2a1   : > { %13763 = vmatprep.mubr.msk.f32.mxu0 %vm3918_vm3, %v6652_v34 }
 0x2a3   : > { %13714 = vmatmul.mubr.msk.f32.vlgmr.msra.gmra.mxu1 %vm3918_vm3, %v6266_v29 }
 0x2a4   : > { %13764 = vmatmul.mubr.msk.f32.vlgmr.msra.gmra.mxu0 %vm3918_vm3, %v6653_v37  ;;  %13812 = vmatpush3.msra.mxu1 %v16621_v50  ;;  %v13418_v32 = vpop.f32.mrf.mxu1 }
 0x2a5   : > { %13716 = vmatprep.mubr.msk.f32.mxu1 %vm3918_vm3, %v6267_v62  ;;  %13766 = vmatprep.mubr.msk.f32.mxu0 %vm3918_vm3, %v6654_v2  ;;  %v13468_v58 = vpop.f32.mrf.mxu0 }
 0x2a6   : > { %v16768_v34 = vadd.f32 %v13468_v58, %v13418_v32  ;;  %v4246_v50 = vpop.f32.mrf.mxu1 }
 0x2a7   : > { %13717 = vmatmul.mubr.msk.f32.gmra.mxu1 %vm3918_vm3, %v16087_v48  ;;  %v4567_v29 = vpop.f32.mrf.mxu0 }
 0x2a8   : > { %13767 = vmatmul.mubr.msk.f32.gmra.mxu0 %vm3918_vm3, %v6655_v45  ;;  %13719 = vmatprep.mubr.msk.f32.mxu1 %vm3918_vm3, %v16115_v10  ;;  %v16774_v37 = vadd.f32 %v4567_v29, %v4246_v50  ;;  %v13421_v62 = vpop.f32.mrf.mxu1  ;;  %v19601_v45 = vld [vmem:[#allocation5_spill] sm:$0xff]  ;;  %v19602_v29 = vld [vmem:[#allocation6_spill] sm:$0xff] }
 0x2a9   : > { %13769 = vmatprep.mubr.msk.f32.mxu0 %vm3918_vm3, %v16113_v57  ;;  %v13471_v2 = vpop.f32.mrf.mxu0 }
 0x2aa   : > { %v16780_v48 = vadd.f32 %v13471_v2, %v13421_v62  ;;  %v4256_v57 = vpop.f32.mrf.mxu1 }
 0x2ab   : > { %13720 = vmatmul.mubr.msk.f32.gmra.mxu1 %vm3918_vm3, %v16117_v27  ;;  %v4577_v10 = vpop.f32.mrf.mxu0 }
 0x2ac   : > { %13770 = vmatmul.mubr.msk.f32.gmra.mxu0 %vm3918_vm3, %v16125_v31  ;;  %13722 = vmatprep.mubr.msk.f32.mxu1 %vm3918_vm3, %v19601_v45  ;;  %v16786_v32 = vadd.f32 %v4577_v10, %v4256_v57  ;;  %v13424_v58 = vpop.f32.mrf.mxu1  ;;  %v19603_v31 = vld [vmem:[#allocation7_spill] sm:$0xff]  ;;  %v19604_v10 = vld [vmem:[#allocation54_spill] sm:$0xff] }
 0x2ad   : > { %13772 = vmatprep.mubr.msk.f32.mxu0 %vm3918_vm3, %v16144_v54  ;;  %v13474_v50 = vpop.f32.mrf.mxu0 }
 0x2ae   : > { %v16792_v27 = vadd.f32 %v13474_v50, %v13424_v58  ;;  %v4266_v54 = vpop.f32.mrf.mxu1  ;;  %v19605_v58 = vld [vmem:[#allocation23_spill] sm:$0xff] }
 0x2af   : > { %13723 = vmatmul.mubr.msk.f32.gmra.mxu1 %vm3918_vm3, %v19602_v29  ;;  %v4587_v62 = vpop.f32.mrf.mxu0 }
 0x2b0   : > { %13773 = vmatmul.mubr.msk.f32.gmra.mxu0 %vm3918_vm3, %v16156_v3  ;;  %13725 = vmatprep.mubr.msk.f32.mxu1 %vm3918_vm3, %v19603_v31  ;;  %v16798_v2 = vadd.f32 %v4587_v62, %v4266_v54  ;;  %v13427_v45 = vpop.f32.mrf.mxu1  ;;  %v19606_v62 = vld [vmem:[#allocation13_spill] sm:$0xff] }
 0x2b1   : > { %13775 = vmatprep.mubr.msk.f32.mxu0 %vm3918_vm3, %v16174_v24  ;;  %v13477_v57 = vpop.f32.mrf.mxu0 }
 0x2b2   : > { %v16804_v3 = vadd.f32 %v13477_v57, %v13427_v45  ;;  %v4276_v24 = vpop.f32.mrf.mxu1  ;;  %v19607_v45 = vld [vmem:[#allocation25_spill] sm:$0xff] }
 0x2b3   : > { %13726 = vmatmul.mubr.msk.f32.gmra.mxu1 %vm3918_vm3, %v19604_v10  ;;  %v4597_v50 = vpop.f32.mrf.mxu0 }
 0x2b4   : > { %13776 = vmatmul.mubr.msk.f32.gmra.mxu0 %vm3918_vm3, %v16186_v42  ;;  %13728 = vmatprep.mubr.msk.f32.mxu1 %vm3918_vm3, %v19605_v58  ;;  %v16810_v29 = vadd.f32 %v4597_v50, %v4276_v24  ;;  %v13430_v31 = vpop.f32.mrf.mxu1  ;;  %v19608_v50 = vld [vmem:[#allocation56_spill] sm:$0xff] }
 0x2b5   : > { %13778 = vmatprep.mubr.msk.f32.mxu0 %vm3918_vm3, %v16203_v7  ;;  %v13480_v54 = vpop.f32.mrf.mxu0 }
 0x2b6   : > { %v16816_v42 = vadd.f32 %v13480_v54, %v13430_v31  ;;  %v4286_v7 = vpop.f32.mrf.mxu1  ;;  %v19609_v31 = vld [vmem:[#allocation16_spill] sm:$0xff] }
 0x2b7   : > { %13729 = vmatmul.mubr.msk.f32.gmra.mxu1 %vm3918_vm3, %v19606_v62  ;;  %v4607_v57 = vpop.f32.mrf.mxu0 }
 0x2b8   : > { %13779 = vmatmul.mubr.msk.f32.gmra.mxu0 %vm3918_vm3, %v19597_v19  ;;  %13731 = vmatprep.mubr.msk.f32.mxu1 %vm3918_vm3, %v19607_v45  ;;  %v16822_v10 = vadd.f32 %v4607_v57, %v4286_v7  ;;  %v13433_v58 = vpop.f32.mrf.mxu1  ;;  %v19610_v57 = vld [vmem:[#allocation52_spill] sm:$0xff] }
 0x2b9   : > { %13781 = vmatprep.mubr.msk.f32.mxu0 %vm3918_vm3, %v19598_v13  ;;  %v13483_v24 = vpop.f32.mrf.mxu0 }
 0x2ba   : > { %v16828_v19 = vadd.f32 %v13483_v24, %v13433_v58  ;;  %v4296_v13 = vpop.f32.mrf.mxu1  ;;  %v19611_v58 = vld [vmem:[#allocation24_spill] sm:$0xff] }
 0x2bb   : > { %13732 = vmatmul.mubr.msk.f32.gmra.mxu1 %vm3918_vm3, %v19608_v50  ;;  %v4617_v54 = vpop.f32.mrf.mxu0 }
 0x2bc   : > { %13782 = vmatmul.mubr.msk.f32.gmra.mxu0 %vm3918_vm3, %v19599_v28  ;;  %13734 = vmatprep.mubr.msk.f32.mxu1 %vm3918_vm3, %v19609_v31  ;;  %v16834_v62 = vadd.f32 %v4617_v54, %v4296_v13  ;;  %v19612_v54 = vld [vmem:[#allocation14_spill] sm:$0xff] }
 0x2bd   : > { %13784 = vmatprep.mubr.msk.f32.mxu0 %vm3918_vm3, %v16260_v30  ;;  %v13436_v45 = vpop.f32.mrf.mxu1  ;;  %v13486_v7 = vpop.f32.mrf.mxu0 }
 0x2be   : > { %v16840_v28 = vadd.f32 %v13486_v7, %v13436_v45  ;;  %v19613_v45 = vld [vmem:[#allocation29_spill] sm:$0xff] }
 0x2bf   : > { %13735 = vmatmul.mubr.msk.f32.gmra.mxu1 %vm3918_vm3, %v19610_v57  ;;  %v4306_v30 = vpop.f32.mrf.mxu1  ;;  %v4627_v24 = vpop.f32.mrf.mxu0 }
 0x2c0   : > { %13785 = vmatmul.mubr.msk.f32.gmra.mxu0 %vm3918_vm3, %v19600_v5  ;;  %13737 = vmatprep.mubr.msk.f32.mxu1 %vm3918_vm3, %v19611_v58  ;;  %v16846_v50 = vadd.f32 %v4627_v24, %v4306_v30  ;;  %v19614_v30 = vld [vmem:[#allocation53_spill] sm:$0xff]  ;;  %v19615_v24 = vld [vmem:[#allocation28_spill] sm:$0xff] }
 0x2c1   : > { %13787 = vmatprep.mubr.msk.f32.mxu0 %vm3918_vm3, %v16286_v14  ;;  %v13439_v31 = vpop.f32.mrf.mxu1 }
 0x2c2   : > { %v13489_v13 = vpop.f32.mrf.mxu0 }
 0x2c3   : > { %13738 = vmatmul.mubr.msk.f32.gmra.mxu1 %vm3918_vm3, %v19612_v54  ;;  %v16852_v5 = vadd.f32 %v13489_v13, %v13439_v31  ;;  %v16858_v14 = vpop.f32.mrf.mxu1 }
 0x2c4   : > { %13788 = vmatmul.mubr.msk.f32.gmra.mxu0 %vm3918_vm3, %v16298_v43  ;;  %13740 = vmatprep.mubr.msk.f32.mxu1 %vm3918_vm3, %v19613_v45  ;;  %v16860_v7 = vpop.f32.mrf.mxu0  ;;  %v19617_v45 = vld [vmem:[#allocation60_spill] sm:$0xff] }
 0x2c5   : > { %13790 = vmatprep.mubr.msk.f32.mxu0 %vm3918_vm3, %v16309_v61 }
 0x2c7   : > { %v13442_v57 = vpop.f32.mrf.mxu1  ;;  %13741 = vmatmul.mubr.msk.f32.gmra.mxu1 %vm3918_vm3, %v19614_v30 }
 0x2c8   : > { %v13492_v58 = vpop.f32.mrf.mxu0  ;;  %13791 = vmatmul.mubr.msk.f32.gmra.mxu0 %vm3918_vm3, %v16321_v22  ;;  %13743 = vmatprep.mubr.msk.f32.mxu1 %vm3918_vm3, %v19615_v24 }
 0x2c9   : > { %v16866_v43 = vadd.f32 %v13492_v58, %v13442_v57  ;;  %13793 = vmatprep.mubr.msk.f32.mxu0 %vm3918_vm3, %v16330_v41  ;;  %v16872_v61 = vpop.f32.mrf.mxu1  ;;  %v19618_v57 = vld [vmem:[#allocation15_spill] sm:$0xff] }
 0x2ca   : > { %v16874_v31 = vpop.f32.mrf.mxu0 }
 0x2cb   : > { %19616 = vst [vmem:[#allocation64_spill] sm:$0xff] %v16874_v31  ;;  %v13445_v13 = vpop.f32.mrf.mxu1  ;;  %13744 = vmatmul.mubr.msk.f32.gmra.mxu1 %vm3918_vm3, %v19617_v45  ;;  %v19620_v31 = vld [vmem:[#allocation55_spill] sm:$0xff] }
 0x2cc   : > { %v13495_v54 = vpop.f32.mrf.mxu0  ;;  %13794 = vmatmul.mubr.msk.f32.gmra.mxu0 %vm3918_vm3, %v16342_v4  ;;  %13746 = vmatprep.mubr.msk.f32.mxu1 %vm3918_vm3, %v19618_v57 }
 0x2cd   : > { %v16880_v22 = vadd.f32 %v13495_v54, %v13445_v13  ;;  %13796 = vmatprep.mubr.msk.f32.mxu0 %vm3918_vm3, %v16350_v1  ;;  %v16886_v41 = vpop.f32.mrf.mxu1  ;;  %v19621_v13 = vld [vmem:[#allocation62_spill] sm:$0xff] }
 0x2ce   : > { %v16888_v58 = vpop.f32.mrf.mxu0 }
 0x2cf   : > { %19619 = vst [vmem:[#allocation9_spill] sm:$0xff] %v16888_v58  ;;  %v13448_v30 = vpop.f32.mrf.mxu1  ;;  %13747 = vmatmul.mubr.msk.f32.gmra.mxu1 %vm3918_vm3, %v19620_v31  ;;  %v19622_v58 = vld [vmem:[#allocation27_spill] sm:$0xff]  ;;  %v19623_v31 = vld [vmem:[#allocation32_spill] sm:$0xff] }
 0x2d0   : > { %v13498_v24 = vpop.f32.mrf.mxu0  ;;  %13797 = vmatmul.mubr.msk.f32.gmra.mxu0 %vm3918_vm3, %v16362_v59  ;;  %13749 = vmatprep.mubr.msk.f32.mxu1 %vm3918_vm3, %v19621_v13 }
 0x2d1   : > { %v16894_v4 = vadd.f32 %v13498_v24, %v13448_v30  ;;  %13799 = vmatprep.mubr.msk.f32.mxu0 %vm3918_vm3, %v16369_v8  ;;  %v16900_v1 = vpop.f32.mrf.mxu1 }
 0x2d2   : > { %v16902_v54 = vpop.f32.mrf.mxu0 }
 0x2d3   : > { %v13451_v45 = vpop.f32.mrf.mxu1  ;;  %13750 = vmatmul.mubr.msk.f32.gmra.mxu1 %vm3918_vm3, %v19622_v58  ;;  %v19626_v58 = vld [vmem:[#allocation31_spill] sm:$0xff] }
 0x2d4   : > { %v13501_v57 = vpop.f32.mrf.mxu0  ;;  %13800 = vmatmul.mubr.msk.f32.gmra.mxu0 %vm3918_vm3, %v16380_v16  ;;  %13752 = vmatprep.mubr.msk.f32.mxu1 %vm3918_vm3, %v19623_v31  ;;  %v6682_v31 = vld [vmem:[#allocation3 + $0x199] sm:$0xff] }
 0x2d5   : > { %v16908_v59 = vadd.f32 %v13501_v57, %v13451_v45  ;;  %13802 = vmatprep.mubr.msk.f32.mxu0 %vm3918_vm3, %v16386_v6  ;;  %v16914_v8 = vpop.f32.mrf.mxu1  ;;  %v6295_v57 = vld [vmem:[#allocation3 + $0x198] sm:$0xff] }
 0x2d6   : > { %19624 = vst [vmem:[#allocation18_spill] sm:$0xff] %v16914_v8  ;;  %v16916_v30 = vpop.f32.mrf.mxu0 }
 0x2d7   : > { %19625 = vst [vmem:[#allocation59_spill] sm:$0xff] %v16916_v30  ;;  %v13454_v24 = vpop.f32.mrf.mxu1  ;;  %13753 = vmatmul.mubr.msk.f32.gmra.mxu1 %vm3918_vm3, %v16390_v20 }
 0x2d8   : > { %v13504_v13 = vpop.f32.mrf.mxu0  ;;  %13803 = vmatmul.mubr.msk.f32.gmra.mxu0 %vm3918_vm3, %v16396_v9  ;;  %13755 = vmatprep.mubr.msk.f32.mxu1 %vm3918_vm3, %v19626_v58  ;;  %v6296_v9 = vld [vmem:[#allocation3 + $0x1a0] sm:$0xff] }
 0x2d9   : > { %v16922_v16 = vadd.f32 %v13504_v13, %v13454_v24  ;;  %13805 = vmatprep.mubr.msk.f32.mxu0 %vm3918_vm3, %v16738_v47  ;;  %v16928_v6 = vpop.f32.mrf.mxu1  ;;  %v6683_v47 = vld [vmem:[#allocation3 + $0x1a1] sm:$0xff] }
 0x2da   : > { %19627 = vst [vmem:[#allocation66_spill] sm:$0xff] %v16928_v6  ;;  %v16930_v45 = vpop.f32.mrf.mxu0 }
 0x2db   : > { %19628 = vst [vmem:[#allocation30_spill] sm:$0xff] %v16930_v45  ;;  %v13457_v30 = vpop.f32.mrf.mxu1  ;;  %13756 = vmatmul.mubr.msk.f32.gmra.mxu1 %vm3918_vm3, %v16604_v56 }
 0x2dc   : > { %v13507_v8 = vpop.f32.mrf.mxu0  ;;  %13806 = vmatmul.mubr.msk.f32.gmra.mxu0 %vm3918_vm3, %v16746_v25  ;;  %13758 = vmatprep.mubr.msk.f32.mxu1 %vm3918_vm3, %v6295_v57 }
 0x2dd   : > { %v16936_v20 = vadd.f32 %v13507_v8, %v13457_v30  ;;  %13808 = vmatprep.mubr.msk.f32.mxu0 %vm3918_vm3, %v6682_v31  ;;  %v16940_v24 = vpop.f32.mrf.mxu1  ;;  %v19633_v31 = vld [vmem:[#allocation57_spill] sm:$0xff] }
 0x2de   : > { %19629 = vst [vmem:[#allocation34_spill] sm:$0xff] %v16940_v24  ;;  %v16942_v13 = vpop.f32.mrf.mxu0 }
 0x2df   : > { %19630 = vst [vmem:[#allocation61_spill] sm:$0xff] %v16942_v13  ;;  %v13460_v58 = vpop.f32.mrf.mxu1  ;;  %13759 = vmatmul.mubr.msk.f32.gmra.mxu1 %vm3918_vm3, %v6296_v9 }
 0x2e0   : > { %v13510_v45 = vpop.f32.mrf.mxu0  ;;  %13809 = vmatmul.mubr.msk.f32.gmra.mxu0 %vm3918_vm3, %v6683_v47  ;;  %13813 = vmatprep.mubr.msk.f32.mxu1 %vm3918_vm3, %v16438_v17 }
 0x2e1   : > { %v16946_v56 = vadd.f32 %v13510_v45, %v13460_v58  ;;  %v16950_v25 = vpop.f32.mrf.mxu1 }
 0x2e2   : > { %19631 = vst [vmem:[#allocation11_spill] sm:$0xff] %v16950_v25  ;;  %v16952_v8 = vpop.f32.mrf.mxu0 }
 0x2e3   : > { %19632 = vst [vmem:[#allocation68_spill] sm:$0xff] %v16952_v8  ;;  %v13515_v30 = vpop.f32.mrf.mxu1  ;;  %13814 = vmatmul.mubr.msk.f32.vlgmr.msra.gmra.mxu1 %vm3918_vm3, %v16444_v53 }
 0x2e4   : > { %v13565_v57 = vpop.f32.mrf.mxu0  ;;  %v5072_v13 = vadd.f32 %v13515_v30, %v19633_v31  ;;  %13816 = vmatprep.mubr.msk.f32.mxu1 %vm3918_vm3, %v16450_v55 }
 0x2e5   : > { %v16959_v9 = vpop.f32.mrf.mxu1 }
 0x2e6   : > { %v16961_v45 = vpop.f32.mrf.mxu0  ;;  %v16963_v47 = vadd.f32 %v13565_v57, %v5072_v13 }
 0x2e7   : > { %v13518_v17 = vpop.f32.mrf.mxu1  ;;  %13817 = vmatmul.mubr.msk.f32.gmra.mxu1 %vm3918_vm3, %v16456_v36 }
 0x2e8   : > { %v13568_v58 = vpop.f32.mrf.mxu0  ;;  %v5074_v8 = vadd.f32 %v13518_v17, %v16768_v34  ;;  %13819 = vmatprep.mubr.msk.f32.mxu1 %vm3918_vm3, %v16462_v38 }
 0x2e9   : > { %v4922_v53 = vpop.f32.mrf.mxu1 }
 0x2ea   : > { %v16970_v30 = vpop.f32.mrf.mxu0  ;;  %v16972_v55 = vadd.f32 %v13568_v58, %v5074_v8  ;;  %v16975_v31 = vadd.f32 %v4922_v53, %v16774_v37 }
 0x2eb   : > { %v13521_v13 = vpop.f32.mrf.mxu1  ;;  %13820 = vmatmul.mubr.msk.f32.gmra.mxu1 %vm3918_vm3, %v16468_v21 }
 0x2ec   : > { %v13571_v57 = vpop.f32.mrf.mxu0  ;;  %v5076_v36 = vadd.f32 %v13521_v13, %v16780_v48  ;;  %13822 = vmatprep.mubr.msk.f32.mxu1 %vm3918_vm3, %v16474_v44 }
 0x2ed   : > { %v4932_v34 = vpop.f32.mrf.mxu1 }
 0x2ee   : > { %v16982_v38 = vpop.f32.mrf.mxu0  ;;  %v16984_v17 = vadd.f32 %v13571_v57, %v5076_v36  ;;  %v16987_v8 = vadd.f32 %v4932_v34, %v16786_v32  ;;  %v11753_v32 = vld [vmem:[%s19214_s5 + $0x18] sm:$0xff] }
 0x2ef   : > { %v13524_v37 = vpop.f32.mrf.mxu1  ;;  %13823 = vmatmul.mubr.msk.f32.gmra.mxu1 %vm3918_vm3, %v16480_v46  ;;  %13861 = vmatprep.subr.mxu0 %v11753_v32 }
 0x2f0   : > { %v13574_v58 = vpop.f32.mrf.mxu0  ;;  %v5078_v21 = vadd.f32 %v13524_v37, %v16792_v27  ;;  %13825 = vmatprep.mubr.msk.f32.mxu1 %vm3918_vm3, %v16486_v52  ;;  %13862 = vmatpush3.msra.mxu0 %v11753_v32 }
 0x2f1   : > { %v4942_v48 = vpop.f32.mrf.mxu1 }
 0x2f2   : > { %v16994_v44 = vpop.f32.mrf.mxu0  ;;  %v16996_v53 = vadd.f32 %v13574_v58, %v5078_v21  ;;  %v16999_v13 = vadd.f32 %v4942_v48, %v16798_v2 }
 0x2f3   : > { %v13527_v57 = vpop.f32.mrf.mxu1  ;;  %13826 = vmatmul.mubr.msk.f32.gmra.mxu1 %vm3918_vm3, %v16492_v39 }
 0x2f4   : > { %v13577_v36 = vpop.f32.mrf.mxu0  ;;  %v5080_v52 = vadd.f32 %v13527_v57, %v16804_v3  ;;  %13828 = vmatprep.mubr.msk.f32.mxu1 %vm3918_vm3, %v16498_v49 }
 0x2f5   : > { %v4952_v46 = vpop.f32.mrf.mxu1 }
 0x2f6   : > { %v17009_v27 = vpop.f32.mrf.mxu0  ;;  %v17011_v2 = vadd.f32 %v13577_v36, %v5080_v52  ;;  %v17014_v34 = vadd.f32 %v4952_v46, %v16810_v29 }
 0x2f7   : > { %v13530_v37 = vpop.f32.mrf.mxu1  ;;  %13829 = vmatmul.mubr.msk.f32.gmra.mxu1 %vm3918_vm3, %v16504_v26 }
 0x2f8   : > { %v13580_v58 = vpop.f32.mrf.mxu0  ;;  %v5082_v39 = vadd.f32 %v13530_v37, %v16816_v42  ;;  %13831 = vmatprep.mubr.msk.f32.mxu1 %vm3918_vm3, %v16510_v23 }
 0x2f9   : > { %v4962_v49 = vpop.f32.mrf.mxu1 }
 0x2fa   : > { %v17021_v3 = vpop.f32.mrf.mxu0  ;;  %v17023_v21 = vadd.f32 %v13580_v58, %v5082_v39  ;;  %v17026_v48 = vadd.f32 %v4962_v49, %v16822_v10 }
 0x2fb   : > { %v13533_v29 = vpop.f32.mrf.mxu1  ;;  %13832 = vmatmul.mubr.msk.f32.gmra.mxu1 %vm3918_vm3, %v16516_v33 }
 0x2fc   : > { %v13583_v32 = vpop.f32.mrf.mxu0  ;;  %v5084_v26 = vadd.f32 %v13533_v29, %v16828_v19  ;;  %13834 = vmatprep.mubr.msk.f32.mxu1 %vm3918_vm3, %v16522_v63  ;;  %v7058_v29 = vld [vmem:[#allocation3 + $0x112] sm:$0xff] }
 0x2fd   : > { %v4972_v42 = vpop.f32.mrf.mxu1 }
 0x2fe   : > { %v17033_v23 = vpop.f32.mrf.mxu0  ;;  %v17035_v57 = vadd.f32 %v13583_v32, %v5084_v26  ;;  %v17038_v36 = vadd.f32 %v4972_v42, %v16834_v62 }
 0x2ff   : > { %19634 = vst [vmem:[#allocation17_spill] sm:$0xff] %v17033_v23  ;;  %v13536_v10 = vpop.f32.mrf.mxu1  ;;  %13835 = vmatmul.mubr.msk.f32.gmra.mxu1 %vm3918_vm3, %v16528_v40  ;;  %v4638_v40 = vadd.f32 %v16860_v7, %v16858_v14  ;;  %v7060_v7 = vld [vmem:[#allocation3 + $0x12a] sm:$0xff] }
 0x300   : > { %19635 = vst [vmem:[#allocation63_spill] sm:$0xff] %v17038_v36  ;;  %v13586_v52 = vpop.f32.mrf.mxu0  ;;  %v5086_v33 = vadd.f32 %v13536_v10, %v16840_v28  ;;  %13837 = vmatprep.mubr.msk.f32.mxu1 %vm3918_vm3, %v16534_v11 }
 0x301   : > { %v4982_v19 = vpop.f32.mrf.mxu1 }
 0x302   : > { %v17045_v63 = vpop.f32.mrf.mxu0  ;;  %v17047_v46 = vadd.f32 %v13586_v52, %v5086_v33  ;;  %v17050_v37 = vadd.f32 %v4982_v19, %v16846_v50  ;;  %v7061_v52 = vld [vmem:[#allocation3 + $0x13a] sm:$0xff] }
 0x303   : > { %19636 = vst [vmem:[#allocation70_spill] sm:$0xff] %v17045_v63  ;;  %v13539_v62 = vpop.f32.mrf.mxu1  ;;  %13838 = vmatmul.mubr.msk.f32.gmra.mxu1 %vm3918_vm3, %v16540_v51 }
 0x304   : > { %19637 = vst [vmem:[#allocation33_spill] sm:$0xff] %v17050_v37  ;;  %v13589_v58 = vpop.f32.mrf.mxu0  ;;  %v5088_v28 = vadd.f32 %v13539_v62, %v16852_v5  ;;  %13840 = vmatprep.mubr.msk.f32.mxu1 %vm3918_vm3, %v16546_v60  ;;  %v7062_v62 = vld [vmem:[#allocation3 + $0x142] sm:$0xff] }
 0x305   : > { %v4992_v11 = vpop.f32.mrf.mxu1 }
 0x306   : > { %v17059_v39 = vpop.f32.mrf.mxu0  ;;  %v17061_v49 = vadd.f32 %v13589_v58, %v5088_v28  ;;  %v17063_v50 = vadd.f32 %v4992_v11, %v4638_v40  ;;  %v7063_v28 = vld [vmem:[#allocation3 + $0x152] sm:$0xff] }
 0x307   : > { %19638 = vst [vmem:[#allocation37_spill] sm:$0xff] %v17059_v39  ;;  %v13542_v32 = vpop.f32.mrf.mxu1  ;;  %13841 = vmatmul.mubr.msk.f32.gmra.mxu1 %vm3918_vm3, %v7058_v29 }
 0x308   : > { %19639 = vst [vmem:[#allocation65_spill] sm:$0xff] %v17063_v50  ;;  %v13592_v26 = vpop.f32.mrf.mxu0  ;;  %v5090_v51 = vadd.f32 %v13542_v32, %v16866_v43  ;;  %13843 = vmatprep.mubr.msk.f32.mxu1 %vm3918_vm3, %v16558_v12 }
 0x309   : > { %v17069_v5 = vpop.f32.mrf.mxu1 }
 0x30a   : > { %19640 = vst [vmem:[#allocation36_spill] sm:$0xff] %v17069_v5  ;;  %v17071_v60 = vpop.f32.mrf.mxu0  ;;  %v17073_v14 = vadd.f32 %v13592_v26, %v5090_v51  ;;  %v7064_v26 = vld [vmem:[#allocation3 + $0x15a] sm:$0xff] }
 0x30b   : > { %19641 = vst [vmem:[#allocation72_spill] sm:$0xff] %v17071_v60  ;;  %v13545_v42 = vpop.f32.mrf.mxu1  ;;  %13844 = vmatmul.mubr.msk.f32.gmra.mxu1 %vm3918_vm3, %v7060_v7  ;;  %v11752_v51 = vld [vmem:[%s19214_s5 + $0x10] sm:$0xff] }
 0x30c   : > { %v13595_v10 = vpop.f32.mrf.mxu0  ;;  %v5092_v33 = vadd.f32 %v13545_v42, %v16880_v22  ;;  %13846 = vmatprep.mubr.msk.f32.mxu1 %vm3918_vm3, %v7061_v52  ;;  %13863 = vmatprep.subr.mxu0 %v11752_v51 }
 0x30d   : > { %v17078_v43 = vpop.f32.mrf.mxu1  ;;  %13864 = vmatpush3.msra.mxu0 %v11752_v51  ;;  %v7069_v51 = vld [vmem:[#allocation3 + $0x19a] sm:$0xff] }
 0x30e   : > { %19642 = vst [vmem:[#allocation10_spill] sm:$0xff] %v17078_v43  ;;  %v17080_v19 = vpop.f32.mrf.mxu0  ;;  %v17082_v12 = vadd.f32 %v13595_v10, %v5092_v33  ;;  %v7065_v10 = vld [vmem:[#allocation3 + $0x16a] sm:$0xff] }
 0x30f   : > { %19643 = vst [vmem:[#allocation20_spill] sm:$0xff] %v17080_v19  ;;  %v13548_v58 = vpop.f32.mrf.mxu1  ;;  %13847 = vmatmul.mubr.msk.f32.gmra.mxu1 %vm3918_vm3, %v7062_v62 }
 0x310   : > { %v13598_v40 = vpop.f32.mrf.mxu0  ;;  %v5094_v11 = vadd.f32 %v13548_v58, %v16894_v4  ;;  %13849 = vmatprep.mubr.msk.f32.mxu1 %vm3918_vm3, %v7063_v28  ;;  %v7066_v58 = vld [vmem:[#allocation3 + $0x172] sm:$0xff] }
 0x311   : > { %v17087_v29 = vpop.f32.mrf.mxu1 }
 0x312   : > { %19644 = vst [vmem:[#allocation67_spill] sm:$0xff] %v17087_v29  ;;  %v17089_v22 = vpop.f32.mrf.mxu0  ;;  %v17091_v32 = vadd.f32 %v13598_v40, %v5094_v11 }
 0x313   : > { %19645 = vst [vmem:[#allocation74_spill] sm:$0xff] %v17089_v22  ;;  %v13551_v7 = vpop.f32.mrf.mxu1  ;;  %13850 = vmatmul.mubr.msk.f32.gmra.mxu1 %vm3918_vm3, %v7064_v26 }
 0x314   : > { %v13601_v42 = vpop.f32.mrf.mxu0  ;;  %v5096_v4 = vadd.f32 %v13551_v7, %v16908_v59  ;;  %13852 = vmatprep.mubr.msk.f32.mxu1 %vm3918_vm3, %v7065_v10 }
 0x315   : > { %v17099_v52 = vpop.f32.mrf.mxu1 }
 0x316   : > { %19646 = vst [vmem:[#allocation35_spill] sm:$0xff] %v17099_v52  ;;  %v17101_v33 = vpop.f32.mrf.mxu0  ;;  %v17103_v62 = vadd.f32 %v13601_v42, %v5096_v4 }
 0x317   : > { %19647 = vst [vmem:[#allocation40_spill] sm:$0xff] %v17101_v33  ;;  %v13554_v40 = vpop.f32.mrf.mxu1  ;;  %13853 = vmatmul.mubr.msk.f32.gmra.mxu1 %vm3918_vm3, %v7066_v58 }
 0x318   : > { %v13604_v28 = vpop.f32.mrf.mxu0  ;;  %v5098_v11 = vadd.f32 %v13554_v40, %v16922_v16  ;;  %13855 = vmatprep.mubr.msk.f32.mxu1 %vm3918_vm3, %v16740_v18  ;;  %v7070_v16 = vld [vmem:[#allocation3 + $0x1a2] sm:$0xff] }
 0x319   : > { %v17109_v59 = vpop.f32.mrf.mxu1 }
 0x31a   : > { %19648 = vst [vmem:[#allocation69_spill] sm:$0xff] %v17109_v59  ;;  %v17111_v26 = vpop.f32.mrf.mxu0  ;;  %v17113_v7 = vadd.f32 %v13604_v28, %v5098_v11 }
 0x31b   : > { %19649 = vst [vmem:[#allocation39_spill] sm:$0xff] %v17111_v26  ;;  %v13557_v10 = vpop.f32.mrf.mxu1  ;;  %13856 = vmatmul.mubr.msk.f32.gmra.mxu1 %vm3918_vm3, %v16748_v15 }
 0x31c   : > { %v13607_v42 = vpop.f32.mrf.mxu0  ;;  %v5100_v4 = vadd.f32 %v13557_v10, %v16936_v20  ;;  %13858 = vmatprep.mubr.msk.f32.mxu1 %vm3918_vm3, %v7069_v51 }
 0x31d   : > { %v17119_v58 = vpop.f32.mrf.mxu1 }
 0x31e   : > { %19650 = vst [vmem:[#allocation76_spill] sm:$0xff] %v17119_v58  ;;  %v17121_v18 = vpop.f32.mrf.mxu0  ;;  %v17123_v40 = vadd.f32 %v13607_v42, %v5100_v4 }
 0x31f   : > { %19651 = vst [vmem:[#allocation19_spill] sm:$0xff] %v17121_v18  ;;  %v13560_v26 = vpop.f32.mrf.mxu1  ;;  %13859 = vmatmul.mubr.msk.f32.gmra.mxu1 %vm3918_vm3, %v7070_v16 }
 0x320   : > { %v13610_v59 = vpop.f32.mrf.mxu0  ;;  %v5102_v28 = vadd.f32 %v13560_v26, %v16946_v56 }
 0x321   : > { %v17127_v11 = vpop.f32.mrf.mxu1 }
 0x322   : > { %19652 = vst [vmem:[#allocation71_spill] sm:$0xff] %v17127_v11  ;;  %v17129_v15 = vpop.f32.mrf.mxu0  ;;  %v17131_v20 = vadd.f32 %v13610_v59, %v5102_v28  ;;  %v19654_v59 = vmov 0.0  }
 0x323   : > { %19653 = vst [vmem:[#allocation38_spill] sm:$0xff] %v17129_v15  ;;  %v13615_v51 = vpop.f32.mrf.mxu1  ;;  %7503 = vst.msk [vmem:[#allocation4 + $0x20] sm:$0xff] %vm7497_vm5, %v19654_v59 }
 0x324   : > { %v17133_v10 = vpop.f32.mrf.mxu0  ;;  %v17136_v58 = vadd.f32 %v13615_v51, %v16963_v47  ;;  %7498 = vst.msk [vmem:[#allocation4] sm:$0xff] %vm7497_vm5, %v19654_v59  ;;  %7499 = vst.msk [vmem:[#allocation4 + $0x8] sm:$0xff] %vm7497_vm5, %v19654_v59  ;;  %v7619_v51 = vld [vmem:[%s19214_s5 + $0x8] sm:$0xff] }
 0x325   : > { %v17138_v42 = vpop.f32.mrf.mxu1  ;;  %7502 = vst.msk [vmem:[#allocation4 + $0x18] sm:$0xff] %vm7497_vm5, %v19654_v59  ;;  %7505 = vst.msk [vmem:[#allocation4 + $0x30] sm:$0xff] %vm7497_vm5, %v19654_v59  ;;  %13913 = vmatprep.subr.mxu1 %v7619_v51 }
 0x326   : > { %v17140_v4 = vpop.f32.mrf.mxu0  ;;  %7506 = vst.msk [vmem:[#allocation4 + $0x38] sm:$0xff] %vm7497_vm5, %v19654_v59  ;;  %7508 = vst.msk [vmem:[#allocation4 + $0x48] sm:$0xff] %vm7497_vm5, %v19654_v59  ;;  %13914 = vmatpush3.msra.mxu1 %v7619_v51 }
 0x327   : > { %v13618_v18 = vpop.f32.mrf.mxu1  ;;  %7509 = vst.msk [vmem:[#allocation4 + $0x50] sm:$0xff] %vm7497_vm5, %v19654_v59  ;;  %7511 = vst.msk [vmem:[#allocation4 + $0x60] sm:$0xff] %vm7497_vm5, %v19654_v59 }
 0x328   : > { %v17142_v16 = vpop.f32.mrf.mxu0  ;;  %v17145_v56 = vadd.f32 %v13618_v18, %v16972_v55  ;;  %7512 = vst.msk [vmem:[#allocation4 + $0x68] sm:$0xff] %vm7497_vm5, %v19654_v59  ;;  %7514 = vst.msk [vmem:[#allocation4 + $0x78] sm:$0xff] %vm7497_vm5, %v19654_v59 }
 0x329   : > { %7515 = vst.msk [vmem:[#allocation4 + $0x80] sm:$0xff] %vm7497_vm5, %v19654_v59  ;;  %7517 = vst.msk [vmem:[#allocation4 + $0x90] sm:$0xff] %vm7497_vm5, %v19654_v59  ;;  %v17219_v47 = vpop.f32.mrf.mxu1 }
 0x32a   : > { %7518 = vst.msk [vmem:[#allocation4 + $0x98] sm:$0xff] %vm7497_vm5, %v19654_v59  ;;  %7520 = vst.msk [vmem:[#allocation4 + $0xa8] sm:$0xff] %vm7497_vm5, %v19654_v59  ;;  %v17221_v55 = vpop.f32.mrf.mxu0 }
 0x32b   : > { %7521 = vst.msk [vmem:[#allocation4 + $0xb0] sm:$0xff] %vm7497_vm5, %v19654_v59  ;;  %7523 = vst.msk [vmem:[#allocation4 + $0xc0] sm:$0xff] %vm7497_vm5, %v19654_v59  ;;  %v13621_v26 = vpop.f32.mrf.mxu1  ;;  %v7587_v19 = vld [vmem:[#allocation4 + $0x8] sm:$0xff] }
 0x32c   : > { %7524 = vst.msk [vmem:[#allocation4 + $0xc8] sm:$0xff] %vm7497_vm5, %v19654_v59  ;;  %7526 = vst.msk [vmem:[#allocation4 + $0xd8] sm:$0xff] %vm7497_vm5, %v19654_v59  ;;  %v17259_v18 = vpop.f32.mrf.mxu0  ;;  %v17262_v28 = vadd.f32 %v13621_v26, %v16984_v17  ;;  %v7620_v17 = vld [vmem:[#allocation4 + $0x1] sm:$0xff] }
 0x32d   : > { %7527 = vst.msk [vmem:[#allocation4 + $0xe0] sm:$0xff] %vm7497_vm5, %v19654_v59  ;;  %7529 = vst.msk [vmem:[#allocation4 + $0xf0] sm:$0xff] %vm7497_vm5, %v19654_v59  ;;  %v17267_v15 = vpop.f32.mrf.mxu1  ;;  %v7586_v26 = vld [vmem:[#allocation4] sm:$0xff]  ;;  %13865 = vmatprep.mubr.msk.f32.mxu0 %vm7497_vm5, %v7620_v17  ;;  %v11819_v17 = vld [vmem:[%s19214_s5 + $0x28] sm:$0xff] }
 0x32e   : > { %7530 = vst.msk [vmem:[#allocation4 + $0xf8] sm:$0xff] %vm7497_vm5, %v19654_v59  ;;  %7532 = vst.msk [vmem:[#allocation4 + $0x108] sm:$0xff] %vm7497_vm5, %v19654_v59  ;;  %v17269_v11 = vpop.f32.mrf.mxu0  ;;  %13917 = vmatprep.mubr.msk.f32.mxu1 %vm7497_vm5, %v7586_v26  ;;  %13965 = vmatprep.subr.mxu0 %v11819_v17 }
 0x32f   : > { %7533 = vst.msk [vmem:[#allocation4 + $0x110] sm:$0xff] %vm7497_vm5, %v19654_v59  ;;  %7535 = vst.msk [vmem:[#allocation4 + $0x120] sm:$0xff] %vm7497_vm5, %v19654_v59  ;;  %v13624_v33 = vpop.f32.mrf.mxu1 }
 0x330   : > { %7536 = vst.msk [vmem:[#allocation4 + $0x128] sm:$0xff] %vm7497_vm5, %v19654_v59  ;;  %7538 = vst.msk [vmem:[#allocation4 + $0x138] sm:$0xff] %vm7497_vm5, %v19654_v59  ;;  %v17274_v52 = vpop.f32.mrf.mxu0  ;;  %v17277_v22 = vadd.f32 %v13624_v33, %v16996_v53 }
 0x331   : > { %7539 = vst.msk [vmem:[#allocation4 + $0x140] sm:$0xff] %vm7497_vm5, %v19654_v59  ;;  %7541 = vst.msk [vmem:[#allocation4 + $0x150] sm:$0xff] %vm7497_vm5, %v19654_v59  ;;  %v17280_v43 = vpop.f32.mrf.mxu1 }
 0x332   : > { %7542 = vst.msk [vmem:[#allocation4 + $0x158] sm:$0xff] %vm7497_vm5, %v19654_v59  ;;  %7544 = vst.msk [vmem:[#allocation4 + $0x168] sm:$0xff] %vm7497_vm5, %v19654_v59  ;;  %v17282_v51 = vpop.f32.mrf.mxu0 }
 0x333   : > { %7545 = vst.msk [vmem:[#allocation4 + $0x170] sm:$0xff] %vm7497_vm5, %v19654_v59  ;;  %7547 = vst.msk [vmem:[#allocation4 + $0x180] sm:$0xff] %vm7497_vm5, %v19654_v59  ;;  %v13627_v60 = vpop.f32.mrf.mxu1 }
 0x334   : > { %7548 = vst.msk [vmem:[#allocation4 + $0x188] sm:$0xff] %vm7497_vm5, %v19654_v59  ;;  %7550 = vst.msk [vmem:[#allocation4 + $0x198] sm:$0xff] %vm7497_vm5, %v19654_v59  ;;  %v17287_v5 = vpop.f32.mrf.mxu0  ;;  %v17290_v53 = vadd.f32 %v13627_v60, %v17011_v2 }
 0x335   : > { %7551 = vst.msk [vmem:[#allocation4 + $0x1a0] sm:$0xff] %vm7497_vm5, %v19654_v59  ;;  %v17292_v33 = vpop.f32.mrf.mxu1 }
 0x336   : > { %7504 = vst.msk [vmem:[#allocation4 + $0x28] sm:$0x3] %vm7500_vm6, %v19654_v59  ;;  %7501 = vst.msk [vmem:[#allocation4 + $0x10] sm:$0x3] %vm7500_vm6, %v19654_v59 }
 0x337   : > { %7507 = vst.msk [vmem:[#allocation4 + $0x40] sm:$0x3] %vm7500_vm6, %v19654_v59  ;;  %7510 = vst.msk [vmem:[#allocation4 + $0x58] sm:$0x3] %vm7500_vm6, %v19654_v59  ;;  %v13630_v39 = vpop.f32.mrf.mxu1 }
 0x338   : > { %7513 = vst.msk [vmem:[#allocation4 + $0x70] sm:$0x3] %vm7500_vm6, %v19654_v59  ;;  %7516 = vst.msk [vmem:[#allocation4 + $0x88] sm:$0x3] %vm7500_vm6, %v19654_v59 }
 0x339   : > { %7519 = vst.msk [vmem:[#allocation4 + $0xa0] sm:$0x3] %vm7500_vm6, %v19654_v59  ;;  %7522 = vst.msk [vmem:[#allocation4 + $0xb8] sm:$0x3] %vm7500_vm6, %v19654_v59 }
 0x33a   : > { %7525 = vst.msk [vmem:[#allocation4 + $0xd0] sm:$0x3] %vm7500_vm6, %v19654_v59  ;;  %7528 = vst.msk [vmem:[#allocation4 + $0xe8] sm:$0x3] %vm7500_vm6, %v19654_v59 }
 0x33b   : > { %7531 = vst.msk [vmem:[#allocation4 + $0x100] sm:$0x3] %vm7500_vm6, %v19654_v59  ;;  %7534 = vst.msk [vmem:[#allocation4 + $0x118] sm:$0x3] %vm7500_vm6, %v19654_v59 }
 0x33c   : > { %7537 = vst.msk [vmem:[#allocation4 + $0x130] sm:$0x3] %vm7500_vm6, %v19654_v59  ;;  %7540 = vst.msk [vmem:[#allocation4 + $0x148] sm:$0x3] %vm7500_vm6, %v19654_v59 }
 0x33d   : > { %7543 = vst.msk [vmem:[#allocation4 + $0x160] sm:$0x3] %vm7500_vm6, %v19654_v59  ;;  %7546 = vst.msk [vmem:[#allocation4 + $0x178] sm:$0x3] %vm7500_vm6, %v19654_v59  ;;  %v7621_v29 = vld [vmem:[#allocation4 + $0x9] sm:$0xff] }
 0x33e   : > { %7549 = vst.msk [vmem:[#allocation4 + $0x190] sm:$0x3] %vm7500_vm6, %v19654_v59  ;;  %7552 = vst.msk [vmem:[#allocation4 + $0x1a8] sm:$0x3] %vm7500_vm6, %v19654_v59  ;;  %v7618_v59 = vld [vmem:[%s19214_s5] sm:$0xff]  ;;  %13866 = vmatmul.mubr.msk.f32.vlgmr.msra.gmra.mxu0 %vm7497_vm5, %v7621_v29  ;;  %v17304_v29 = vpop.f32.mrf.mxu1 }
 0x33f   : > { %13915 = vmatprep.subr.mxu1 %v7618_v59  ;;  %13966 = vmatpush3.msra.mxu0 %v11819_v17 }
 0x340   : > { %13916 = vmatpush3.msra.mxu1 %v7618_v59  ;;  %v17294_v59 = vpop.f32.mrf.mxu0  ;;  %v13633_v60 = vpop.f32.mrf.mxu1 }
 0x341   : > { %13918 = vmatmul.mubr.msk.f32.vlgmr.msra.gmra.mxu1 %vm7497_vm5, %v7587_v19  ;;  %v17302_v19 = vadd.f32 %v13630_v39, %v17023_v21  ;;  %v17311_v63 = vadd.f32 %v13633_v60, %v17035_v57 }
 0x342   : > { %v17299_v26 = vpop.f32.mrf.mxu0  ;;  %v17313_v37 = vpop.f32.mrf.mxu1 }
 0x343   : > { %19655 = vst [vmem:[#allocation43_spill] sm:$0xff] %v17299_v26  ;;  %19656 = vst [vmem:[#allocation73_spill] sm:$0xff] %v17302_v19 }
 0x344   : > { %v17306_v2 = vpop.f32.mrf.mxu0  ;;  %19659 = vst [vmem:[#allocation12_spill] sm:$0xff] %v17311_v63  ;;  %19660 = vst [vmem:[#allocation22_spill] sm:$0xff] %v17313_v37  ;;  %v13636_v24 = vpop.f32.mrf.mxu1 }
 0x345   : > { %19657 = vst [vmem:[#allocation42_spill] sm:$0xff] %v17306_v2  ;;  %v17320_v21 = vadd.f32 %v13636_v24, %v17047_v46 }
 0x346   : > { %v17308_v50 = vpop.f32.mrf.mxu0  ;;  %v17322_v39 = vpop.f32.mrf.mxu1 }
 0x347   : > { %19658 = vst [vmem:[#allocation79_spill] sm:$0xff] %v17308_v50  ;;  %19663 = vst [vmem:[#allocation41_spill] sm:$0xff] %v17320_v21 }
 0x348   : > { %v17315_v25 = vpop.f32.mrf.mxu0  ;;  %19664 = vst [vmem:[#allocation46_spill] sm:$0xff] %v17322_v39  ;;  %v13639_v2 = vpop.f32.mrf.mxu1 }
 0x349   : > { %19661 = vst [vmem:[#allocation75_spill] sm:$0xff] %v17315_v25  ;;  %v17329_v57 = vadd.f32 %v13639_v2, %v17061_v49 }
 0x34a   : > { %v17317_v26 = vpop.f32.mrf.mxu0  ;;  %v17331_v60 = vpop.f32.mrf.mxu1 }
 0x34b   : > { %19662 = vst [vmem:[#allocation81_spill] sm:$0xff] %v17317_v26  ;;  %19667 = vst [vmem:[#allocation83_spill] sm:$0xff] %v17329_v57 }
 0x34c   : > { %v17324_v17 = vpop.f32.mrf.mxu0  ;;  %19668 = vst [vmem:[#allocation21_spill] sm:$0xff] %v17331_v60  ;;  %v13642_v25 = vpop.f32.mrf.mxu1 }
 0x34d   : > { %19665 = vst [vmem:[#allocation77_spill] sm:$0xff] %v17324_v17  ;;  %v17338_v24 = vadd.f32 %v13642_v25, %v17073_v14 }
 0x34e   : > { %v17326_v19 = vpop.f32.mrf.mxu0  ;;  %v17340_v46 = vpop.f32.mrf.mxu1 }
 0x34f   : > { %19666 = vst [vmem:[#allocation45_spill] sm:$0xff] %v17326_v19  ;;  %19671 = vst [vmem:[#allocation44_spill] sm:$0xff] %v17338_v24 }
 0x350   : > { %v17333_v50 = vpop.f32.mrf.mxu0  ;;  %19672 = vst [vmem:[#allocation49_spill] sm:$0xff] %v17340_v46  ;;  %v13645_v17 = vpop.f32.mrf.mxu1 }
 0x351   : > { %19669 = vst [vmem:[#allocation78_spill] sm:$0xff] %v17333_v50  ;;  %v17347_v49 = vadd.f32 %v13645_v17, %v17082_v12 }
 0x352   : > { %v17335_v63 = vpop.f32.mrf.mxu0  ;;  %v17349_v2 = vpop.f32.mrf.mxu1 }
 0x353   : > { %19670 = vst [vmem:[#allocation85_spill] sm:$0xff] %v17335_v63  ;;  %19675 = vst [vmem:[#allocation82_spill] sm:$0xff] %v17347_v49 }
 0x354   : > { %v17342_v26 = vpop.f32.mrf.mxu0  ;;  %19676 = vst [vmem:[#allocation88_spill] sm:$0xff] %v17349_v2  ;;  %v13648_v50 = vpop.f32.mrf.mxu1 }
 0x355   : > { %19673 = vst [vmem:[#allocation80_spill] sm:$0xff] %v17342_v26  ;;  %v17356_v25 = vadd.f32 %v13648_v50, %v17091_v32 }
 0x356   : > { %v17344_v21 = vpop.f32.mrf.mxu0  ;;  %v17358_v14 = vpop.f32.mrf.mxu1 }
 0x357   : > { %19674 = vst [vmem:[#allocation48_spill] sm:$0xff] %v17344_v21  ;;  %19679 = vst [vmem:[#allocation50_spill] sm:$0xff] %v17356_v25 }
 0x358   : > { %v17351_v19 = vpop.f32.mrf.mxu0  ;;  %19680 = vst [vmem:[#allocation86_spill] sm:$0xff] %v17358_v14  ;;  %v13651_v26 = vpop.f32.mrf.mxu1 }
 0x359   : > { %19677 = vst [vmem:[#allocation47_spill] sm:$0xff] %v17351_v19  ;;  %v17365_v12 = vadd.f32 %v13651_v26, %v17103_v62 }
 0x35a   : > { %v17353_v57 = vpop.f32.mrf.mxu0  ;;  %v17367_v17 = vpop.f32.mrf.mxu1 }
 0x35b   : > { %19678 = vst [vmem:[#allocation84_spill] sm:$0xff] %v17353_v57  ;;  %19683 = vst [vmem:[#allocation26_spill] sm:$0xff] %v17365_v12  ;;  %v11818_v57 = vld [vmem:[%s19214_s5 + $0x20] sm:$0xff] }
 0x35c   : > { %v17360_v63 = vpop.f32.mrf.mxu0  ;;  %19684 = vst [vmem:[#allocation51_spill] sm:$0xff] %v17367_v17  ;;  %v13654_v50 = vpop.f32.mrf.mxu1  ;;  %13967 = vmatprep.subr.mxu0 %v11818_v57 }
 0x35d   : > { %19681 = vst [vmem:[#allocation87_spill] sm:$0xff] %v17360_v63  ;;  %v17377_v63 = vadd.f32 %v13654_v50, %v17113_v7  ;;  %13968 = vmatpush3.msra.mxu0 %v11818_v57 }
 0x35e   : > { %v17362_v24 = vpop.f32.mrf.mxu0 }
 0x35f   : > { %19682 = vst [vmem:[#allocation89_spill] sm:$0xff] %v17362_v24  ;;  %19687 = vst [vmem:[#allocation5_spill] sm:$0xff] %v17377_v63  ;;  %v17379_v24 = vpop.f32.mrf.mxu1 }
 0x360   : > { %v17369_v21 = vpop.f32.mrf.mxu0  ;;  %19688 = vst [vmem:[#allocation6_spill] sm:$0xff] %v17379_v24 }
 0x361   : > { %19685 = vst [vmem:[#allocation8_spill] sm:$0xff] %v17369_v21  ;;  %v13657_v26 = vpop.f32.mrf.mxu1 }
 0x362   : > { %v17374_v32 = vpop.f32.mrf.mxu0  ;;  %v17386_v21 = vadd.f32 %v13657_v26, %v17123_v40 }
 0x363   : > { %19686 = vst [vmem:[#allocation58_spill] sm:$0xff] %v17374_v32  ;;  %v17388_v17 = vpop.f32.mrf.mxu1 }
 0x364   : > { %v17381_v62 = vpop.f32.mrf.mxu0  ;;  %19691 = vst [vmem:[#allocation23_spill] sm:$0xff] %v17386_v21  ;;  %19692 = vst [vmem:[#allocation13_spill] sm:$0xff] %v17388_v17 }
 0x365   : > { %19689 = vst [vmem:[#allocation7_spill] sm:$0xff] %v17381_v62  ;;  %v13660_v32 = vpop.f32.mrf.mxu1 }
 0x366   : > { %v17383_v12 = vpop.f32.mrf.mxu0  ;;  %v17395_v7 = vadd.f32 %v13660_v32, %v17131_v20  ;;  %v11853_v32 = vld [vmem:[%s19214_s5 + $0x38] sm:$0xff] }
 0x367   : > { %19690 = vst [vmem:[#allocation54_spill] sm:$0xff] %v17383_v12  ;;  %v17397_v57 = vpop.f32.mrf.mxu1  ;;  %14017 = vmatprep.subr.mxu1 %v11853_v32 }
 0x368   : > { %v17390_v25 = vpop.f32.mrf.mxu0  ;;  %19695 = vst [vmem:[#allocation16_spill] sm:$0xff] %v17395_v7  ;;  %19696 = vst [vmem:[#allocation52_spill] sm:$0xff] %v17397_v57  ;;  %v17426_v7 = vld [vmem:[%s19214_s5 + $0x48] sm:$0xff]  ;;  %14018 = vmatpush3.msra.mxu1 %v11853_v32 }
 0x369   : > { %19693 = vst [vmem:[#allocation25_spill] sm:$0xff] %v17390_v25  ;;  %v13715_v62 = vpop.f32.mrf.mxu1  ;;  %19698 = vst [vmem:[#allocation14_spill] sm:$0xff] %v17426_v7  ;;  %14069 = vmatprep.subr.mxu0 %v17426_v7 }
 0x36a   : > { %v17392_v14 = vpop.f32.mrf.mxu0 }
 0x36b   : > { %19694 = vst [vmem:[#allocation56_spill] sm:$0xff] %v17392_v14  ;;  %v17403_v12 = vpop.f32.mrf.mxu1 }
 0x36c   : > { %v17399_v50 = vpop.f32.mrf.mxu0 }
 0x36d   : > { %19697 = vst [vmem:[#allocation24_spill] sm:$0xff] %v17399_v50  ;;  %v17407_v26 = vpop.f32.mrf.mxu1  ;;  %v11852_v50 = vld [vmem:[%s19214_s5 + $0x30] sm:$0xff] }
 0x36e   : > { %v17401_v63 = vpop.f32.mrf.mxu0  ;;  %14019 = vmatprep.subr.mxu1 %v11852_v50 }
 0x36f   : > { %v17409_v25 = vpop.f32.mrf.mxu1  ;;  %14020 = vmatpush3.msra.mxu1 %v11852_v50 }
 0x370   : > { %v17405_v40 = vpop.f32.mrf.mxu0 }
 0x371   : > { %v17413_v14 = vpop.f32.mrf.mxu1 }
 0x372   : > { %v17411_v21 = vpop.f32.mrf.mxu0 }
 0x373   : > { %v17415_v20 = vpop.f32.mrf.mxu1 }
 0x374   : > { %v17428_v57 = vpop.f32.mrf.mxu0 }
 0x375   : > { %v17430_v17 = vpop.f32.mrf.mxu1 }
 0x376   : > { %v17435_v19 = vpop.f32.mrf.mxu0 }
 0x377   : > { %v17433_v24 = vpop.f32.mrf.mxu1 }
 0x378   : > { %v17441_v46 = vpop.f32.mrf.mxu0 }
 0x379   : > { %v17437_v49 = vpop.f32.mrf.mxu1 }
 0x37a   : > { %19699 = vst [vmem:[#allocation29_spill] sm:$0xff] %v17437_v49  ;;  %v17447_v37 = vpop.f32.mrf.mxu0 }
 0x37b   : > { %v17439_v2 = vpop.f32.mrf.mxu1  ;;  %19703 = vst [vmem:[#allocation15_spill] sm:$0xff] %v17447_v37 }
 0x37c   : > { %19700 = vst [vmem:[#allocation53_spill] sm:$0xff] %v17439_v2  ;;  %v17453_v23 = vpop.f32.mrf.mxu0 }
 0x37d   : > { %v17443_v60 = vpop.f32.mrf.mxu1  ;;  %19706 = vst [vmem:[#allocation27_spill] sm:$0xff] %v17453_v23 }
 0x37e   : > { %19701 = vst [vmem:[#allocation28_spill] sm:$0xff] %v17443_v60  ;;  %v17459_v6 = vpop.f32.mrf.mxu0 }
 0x37f   : > { %v17445_v39 = vpop.f32.mrf.mxu1  ;;  %19709 = vst [vmem:[#allocation57_spill] sm:$0xff] %v17459_v6 }
 0x380   : > { %19702 = vst [vmem:[#allocation60_spill] sm:$0xff] %v17445_v39  ;;  %v17465_v60 = vpop.f32.mrf.mxu0 }
 0x381   : > { %v17449_v32 = vpop.f32.mrf.mxu1  ;;  %19712 = vst [vmem:[#allocation92_spill] sm:$0xff] %v17465_v60 }
 0x382   : > { %19704 = vst [vmem:[#allocation55_spill] sm:$0xff] %v17449_v32  ;;  %v17471_v32 = vpop.f32.mrf.mxu0 }
 0x383   : > { %v17451_v7 = vpop.f32.mrf.mxu1  ;;  %19715 = vst [vmem:[#allocation95_spill] sm:$0xff] %v17471_v32 }
 0x384   : > { %19705 = vst [vmem:[#allocation62_spill] sm:$0xff] %v17451_v7 }
 0x385   : > { %v17455_v50 = vpop.f32.mrf.mxu1 }
 0x386   : > { %19707 = vst [vmem:[#allocation32_spill] sm:$0xff] %v17455_v50  ;;  %v17477_v50 = vpop.f32.mrf.mxu0 }
 0x387   : > { %v17457_v36 = vpop.f32.mrf.mxu1  ;;  %19718 = vst [vmem:[#allocation98_spill] sm:$0xff] %v17477_v50 }
 0x388   : > { %19708 = vst [vmem:[#allocation31_spill] sm:$0xff] %v17457_v36 }
 0x389   : > { %v17461_v2 = vpop.f32.mrf.mxu1 }
 0x38a   : > { %19710 = vst [vmem:[#allocation90_spill] sm:$0xff] %v17461_v2  ;;  %v17485_v2 = vpop.f32.mrf.mxu0 }
 0x38b   : > { %v17463_v49 = vpop.f32.mrf.mxu1 }
 0x38c   : > { %19711 = vst [vmem:[#allocation91_spill] sm:$0xff] %v17463_v49  ;;  %v4558_v49 = vadd.f32 %v16762_v0, %v16760_v35  ;;  %v5460_v0 = vadd.f32 %v16970_v30, %v16975_v31  ;;  %v6235_v30 = vadd.f32 %v17142_v16, %v17145_v56 }
 0x38d   : > { %v17467_v39 = vpop.f32.mrf.mxu1 }
 0x38e   : > { %19713 = vst [vmem:[#allocation93_spill] sm:$0xff] %v17467_v39 }
 0x38f   : > { %v17469_v37 = vpop.f32.mrf.mxu1 }
 0x390   : > { %19714 = vst [vmem:[#allocation94_spill] sm:$0xff] %v17469_v37  ;;  %v5071_v37 = vadd.f32 %v16959_v9, %v4558_v49  ;;  %v6233_v9 = vadd.f32 %v17133_v10, %v17136_v58 }
 0x391   : > { %v17473_v7 = vpop.f32.mrf.mxu1 }
 0x392   : > { %19716 = vst [vmem:[#allocation96_spill] sm:$0xff] %v17473_v7  ;;  %v17492_v7 = vpop.f32.mrf.mxu0  ;;  %v5458_v50 = vadd.f32 %v16961_v45, %v5071_v37  ;;  %v5847_v45 = vadd.f32 %v17219_v47, %v5460_v0  ;;  %v6621_v37 = vadd.f32 %v13715_v62, %v6233_v9  ;;  %v6623_v47 = vadd.f32 %v17407_v26, %v6235_v30  ;;  %v19723_v0 = vld [vmem:[#allocation64_spill] sm:$0xff] }
 0x393   : > { %v17475_v23 = vpop.f32.mrf.mxu1  ;;  %v17547_v9 = vadd.f32 %v19723_v0, %v16872_v61  ;;  %v19724_v61 = vld [vmem:[#allocation9_spill] sm:$0xff]  ;;  %v19734_v0 = vld [vmem:[#allocation43_spill] sm:$0xff] }
 0x394   : > { %19717 = vst [vmem:[#allocation97_spill] sm:$0xff] %v17475_v23  ;;  %v17500_v60 = vpop.f32.mrf.mxu0  ;;  %v17560_v30 = vadd.f32 %v19724_v61, %v16886_v41  ;;  %v5468_v41 = vadd.f32 %v17021_v3, %v17026_v48 }
 0x395   : > { %v17479_v36 = vpop.f32.mrf.mxu1 }
 0x396   : > { %19719 = vst [vmem:[#allocation99_spill] sm:$0xff] %v17479_v36  ;;  %v5855_v48 = vadd.f32 %v17304_v29, %v5468_v41  ;;  %v19730_v29 = vld [vmem:[#allocation30_spill] sm:$0xff]  ;;  %v19741_v41 = vld [vmem:[#allocation57_spill] sm:$0xff] }
 0x397   : > { %v17481_v6 = vpop.f32.mrf.mxu1 }
 0x398   : > { %19720 = vst [vmem:[#allocation100_spill] sm:$0xff] %v17481_v6  ;;  %v5845_v6 = vadd.f32 %v17138_v42, %v5458_v50  ;;  %v5462_v42 = vadd.f32 %v16982_v38, %v16987_v8  ;;  %v17514_v50 = vpop.f32.mrf.mxu0  ;;  %v5464_v38 = vadd.f32 %v16994_v44, %v16999_v13  ;;  %v6237_v8 = vadd.f32 %v17259_v18, %v17262_v28 }
 0x399   : > { %v17487_v39 = vpop.f32.mrf.mxu1  ;;  %v7010_v28 = vadd.f32 %v17411_v21, %v6623_v47 }
 0x39a   : > { %v5849_v58 = vadd.f32 %v17267_v15, %v5462_v42  ;;  %v17531_v62 = vpop.f32.mrf.mxu0  ;;  %v5851_v44 = vadd.f32 %v17280_v43, %v5464_v38  ;;  %v6625_v13 = vadd.f32 %v17413_v14, %v6237_v8  ;;  %v19726_v8 = vld [vmem:[#allocation59_spill] sm:$0xff] }
 0x39b   : > { %v17490_v32 = vpop.f32.mrf.mxu1 }
 0x39d   : > { %v17494_v23 = vpop.f32.mrf.mxu1 }
 0x39e   : > { %19721 = vst [vmem:[#allocation101_spill] sm:$0xff] %v17494_v23  ;;  %v6232_v23 = vadd.f32 %v17140_v4, %v5845_v6  ;;  %v6234_v6 = vadd.f32 %v17221_v55, %v5847_v45  ;;  %v7008_v4 = vadd.f32 %v17401_v63, %v6621_v37  ;;  %v6236_v55 = vadd.f32 %v17269_v11, %v5849_v58 }
 0x39f   : > { %v17497_v36 = vpop.f32.mrf.mxu1  ;;  %v6239_v11 = vadd.f32 %v17274_v52, %v17277_v22  ;;  %v7012_v22 = vadd.f32 %v17435_v19, %v6625_v13 }
 0x3a0   : > { %19722 = vst [vmem:[#allocation102_spill] sm:$0xff] %v17497_v36  ;;  %v6620_v31 = vadd.f32 %v17403_v12, %v6232_v23  ;;  %v17536_v23 = vld [vmem:[%s19213_s4] ss:$0 sm:$0xff]  ;;  %v6622_v63 = vadd.f32 %v17409_v25, %v6234_v6  ;;  %v5466_v25 = vadd.f32 %v17009_v27, %v17014_v34  ;;  %v6624_v43 = vadd.f32 %v17415_v20, %v6236_v55 }
 0x3a1   : > { %v17502_v35 = vpop.f32.mrf.mxu1  ;;  %v6238_v27 = vadd.f32 %v17282_v51, %v5851_v44  ;;  %v6627_v20 = vadd.f32 %v17430_v17, %v6239_v11  ;;  %v17570_v6 = vadd.f32 %v16902_v54, %v16900_v1  ;;  %v6241_v51 = vadd.f32 %v17287_v5, %v17290_v53  ;;  %v19725_v54 = vld [vmem:[#allocation18_spill] sm:$0xff]  ;;  %v19727_v5 = vld [vmem:[#allocation29_spill] sm:$0xff] }
 0x3a2   : > { %v7007_v15 = vadd.f32 %v17405_v40, %v6620_v31  ;;  %v17554_v40 = vpop.f32.mrf.mxu0  ;;  %v7009_v21 = vadd.f32 %v17428_v57, %v6622_v63  ;;  %v5853_v34 = vadd.f32 %v17292_v33, %v5466_v25  ;;  %v7011_v33 = vadd.f32 %v17441_v46, %v6624_v43  ;;  %v19735_v11 = vld [vmem:[#allocation53_spill] sm:$0xff] }
 0x3a3   : > { %v17508_v49 = vpop.f32.mrf.mxu1  ;;  %v6629_v53 = vadd.f32 %v19727_v5, %v6241_v51  ;;  %v19745_v5 = vld [vmem:[#allocation33_spill] sm:$0xff] }
 0x3a4   : > { %v17577_v19 = vpop.f32.mrf.mxu0  ;;  %v6240_v3 = vadd.f32 %v17294_v59, %v5853_v34  ;;  %v19729_v59 = vld [vmem:[#allocation66_spill] sm:$0xff] }
 0x3a5   : > { %v17516_v36 = vpop.f32.mrf.mxu1  ;;  %v17600_v13 = vadd.f32 %v19730_v29, %v19729_v59  ;;  %v19737_v34 = vld [vmem:[#allocation34_spill] sm:$0xff]  ;;  %v7016_v51 = vadd.f32 %v19741_v41, %v6629_v53  ;;  %v19749_v53 = vld [vmem:[#allocation92_spill] sm:$0xff] }
 0x3a6   : > { %v6628_v43 = vadd.f32 %v19735_v11, %v6240_v3 }
 0x3a7   : > { %v17522_v10 = vpop.f32.mrf.mxu1 }
 0x3a9   : > { %v13815_v16 = vpop.f32.mrf.mxu1 }
 0x3aa   : > { %v7395_v56 = vadd.f32 %v13815_v16, %v7008_v4  ;;  %v6626_v4 = vadd.f32 %v17433_v24, %v6238_v27  ;;  %v17584_v16 = vadd.f32 %v19726_v8, %v19725_v54  ;;  %v17592_v24 = vld [vmem:[%s19214_s5 + $0x58] sm:$0xff]  ;;  %v19743_v54 = vld [vmem:[#allocation11_spill] sm:$0xff]  ;;  %v19744_v8 = vld [vmem:[#allocation68_spill] sm:$0xff] }
 0x3ab   : > { %v7235_v18 = vpop.f32.mrf.mxu1  ;;  %14121 = vmatprep.subr.mxu1 %v17592_v24  ;;  %v17624_v3 = vadd.f32 %v19744_v8, %v19743_v54  ;;  %v19760_v8 = vld [vmem:[#allocation62_spill] sm:$0xff] }
 0x3ac   : > { %v7434_v12 = vadd.f32 %v17536_v23, %v7395_v56  ;;  %v7394_v26 = vadd.f32 %v7235_v18, %v7007_v15  ;;  %v19728_v15 = vld [vmem:[#allocation15_spill] sm:$0xff] }
 0x3ad   : > { %v13818_v14 = vpop.f32.mrf.mxu1  ;;  %v7014_v63 = vadd.f32 %v19728_v15, %v6627_v20  ;;  %v19731_v18 = vld [vmem:[#allocation63_spill] sm:$0xff]  ;;  %v19739_v20 = vld [vmem:[#allocation42_spill] sm:$0xff]  ;;  %v19747_v15 = vld [vmem:[#allocation12_spill] sm:$0xff] }
 0x3ae   : > { %v7466_v45 = vmax.f32 %v7434_v12, 0.0  ;;  %v7433_v37 = vadd.f32 %v17536_v23, %v7394_v26  ;;  %v7397_v42 = vadd.f32 %v13818_v14, %v7010_v28  ;;  %v19732_v28 = vld [vmem:[#allocation17_spill] sm:$0xff]  ;;  %v17607_v14 = vpop.f32.mrf.mxu0 }
 0x3af   : > { %v7245_v52 = vpop.f32.mrf.mxu1  ;;  %v5470_v12 = vadd.f32 %v19732_v28, %v19731_v18  ;;  %v19733_v26 = vld [vmem:[#allocation73_spill] sm:$0xff] }
 0x3b0   : > { %7555 = vst.msk [vmem:[#allocation4 + $0x21] sm:$0xff] %vm7497_vm5, %v7466_v45  ;;  %v7465_v57 = vmax.f32 %v7433_v37, 0.0  ;;  %v7436_v31 = vadd.f32 %v17536_v23, %v7397_v42  ;;  %v7396_v58 = vadd.f32 %v7245_v52, %v7009_v21  ;;  %v6243_v25 = vadd.f32 %v19734_v0, %v19733_v26  ;;  %v19736_v45 = vld [vmem:[#allocation27_spill] sm:$0xff] }
 0x3b1   : > { %v13821_v17 = vpop.f32.mrf.mxu1  ;;  %v7013_v37 = vadd.f32 %v19736_v45, %v6626_v4 }
 0x3b2   : > { %7554 = vst.msk [vmem:[#allocation4 + $0x19] sm:$0xff] %vm7497_vm5, %v7465_v57  ;;  %v7468_v47 = vmax.f32 %v7436_v31, 0.0  ;;  %v7435_v38 = vadd.f32 %v17536_v23, %v7396_v58  ;;  %v7399_v1 = vadd.f32 %v13821_v17, %v7012_v22  ;;  %v19738_v22 = vld [vmem:[#allocation61_spill] sm:$0xff]  ;;  %v6242_v57 = vadd.f32 %v19739_v20, %v5855_v48  ;;  %v19740_v31 = vld [vmem:[#allocation22_spill] sm:$0xff]  ;;  %v19742_v17 = vld [vmem:[#allocation28_spill] sm:$0xff] }
 0x3b3   : > { %v7255_v46 = vpop.f32.mrf.mxu1  ;;  %v17614_v52 = vadd.f32 %v19738_v22, %v19737_v34  ;;  %v5857_v58 = vadd.f32 %v19740_v31, %v5470_v12  ;;  %v19750_v12 = vld [vmem:[#allocation60_spill] sm:$0xff]  ;;  %v19754_v22 = vld [vmem:[#allocation95_spill] sm:$0xff] }
 0x3b4   : > { %7557 = vst.msk [vmem:[#allocation4 + $0x39] sm:$0xff] %vm7497_vm5, %v7468_v47  ;;  %v7467_v56 = vmax.f32 %v7435_v38, 0.0  ;;  %v7438_v55 = vadd.f32 %v17536_v23, %v7399_v1  ;;  %v7398_v44 = vadd.f32 %v7255_v46, %v7011_v33  ;;  %v6631_v47 = vadd.f32 %v19742_v17, %v6243_v25  ;;  %v19746_v46 = vld [vmem:[#allocation70_spill] sm:$0xff]  ;;  %v19757_v17 = vld [vmem:[#allocation36_spill] sm:$0xff] }
 0x3b5   : > { %v13824_v21 = vpop.f32.mrf.mxu1  ;;  %v5472_v48 = vadd.f32 %v19746_v46, %v19745_v5  ;;  %v6630_v26 = vadd.f32 %v19750_v12, %v6242_v57 }
 0x3b6   : > { %7556 = vst.msk [vmem:[#allocation4 + $0x31] sm:$0xff] %vm7497_vm5, %v7467_v56  ;;  %v7470_v42 = vmax.f32 %v7438_v55, 0.0  ;;  %v7437_v61 = vadd.f32 %v17536_v23, %v7398_v44  ;;  %v7401_v27 = vadd.f32 %v13824_v21, %v7014_v63  ;;  %v19748_v63 = vld [vmem:[#allocation79_spill] sm:$0xff]  ;;  %v7015_v55 = vadd.f32 %v19749_v53, %v6628_v43  ;;  %v17631_v44 = vpop.f32.mrf.mxu0 }
 0x3b7   : > { %v7265_v33 = vpop.f32.mrf.mxu1  ;;  %v6245_v56 = vadd.f32 %v19748_v63, %v19747_v15  ;;  %v17646_v43 = vld [vmem:[#allocation4 + $0x21] sm:$0xff]  ;;  %v7018_v20 = vadd.f32 %v19754_v22, %v6631_v47 }
 0x3b8   : > { %7559 = vst.msk [vmem:[#allocation4 + $0x51] sm:$0xff] %vm7497_vm5, %v7470_v42  ;;  %v7469_v4 = vmax.f32 %v7437_v61, 0.0  ;;  %v7440_v38 = vadd.f32 %v17536_v23, %v7401_v27  ;;  %v7400_v1 = vadd.f32 %v7265_v33, %v7013_v37  ;;  %v19751_v21 = vld [vmem:[#allocation75_spill] sm:$0xff]  ;;  %v19752_v37 = vld [vmem:[#allocation46_spill] sm:$0xff]  ;;  %v17665_v46 = vpop.f32.mrf.mxu0 }
 0x3b9   : > { %v13827_v59 = vpop.f32.mrf.mxu1  ;;  %v17633_v29 = vld [vmem:[#allocation4 + $0x19] sm:$0xff]  ;;  %v6244_v45 = vadd.f32 %v19751_v21, %v5857_v58  ;;  %v5859_v42 = vadd.f32 %v19752_v37, %v5472_v48  ;;  %v19755_v58 = vld [vmem:[#allocation65_spill] sm:$0xff]  ;;  %v19764_v37 = vld [vmem:[#allocation32_spill] sm:$0xff] }
 0x3ba   : > { %v17635_v18 = vld [vmem:[#allocation4 + $0x18] sm:$0xff]  ;;  %v17637_v28 = vld [vmem:[#allocation4 + $0x20] sm:$0xff]  ;;  %7558 = vst.msk [vmem:[#allocation4 + $0x49] sm:$0xff] %vm7497_vm5, %v7469_v4  ;;  %v7472_v0 = vmax.f32 %v7440_v38, 0.0  ;;  %v7439_v25 = vadd.f32 %v17536_v23, %v7400_v1  ;;  %v7403_v11 = vadd.f32 %v13827_v59, %v7016_v51  ;;  %13868 = vmatprep.mubr.msk.f32.mxu0 %vm7497_vm5, %v17633_v29  ;;  %v19756_v51 = vld [vmem:[#allocation37_spill] sm:$0xff]  ;;  %v5089_v4 = vadd.f32 %v19757_v17, %v17547_v9 }
 0x3bb   : > { %13920 = vmatprep.mubr.msk.f32.mxu1 %vm7497_vm5, %v17635_v18  ;;  %v19753_v61 = vld [vmem:[#allocation55_spill] sm:$0xff]  ;;  %v7275_v34 = vpop.f32.mrf.mxu1  ;;  %13869 = vmatmul.mubr.msk.f32.gmra.mxu0 %vm7497_vm5, %v17646_v43  ;;  %v5474_v33 = vadd.f32 %v19756_v51, %v19755_v58  ;;  %v19758_v38 = vld [vmem:[#allocation41_spill] sm:$0xff]  ;;  %v6632_v5 = vadd.f32 %v19760_v8, %v6244_v45 }
 0x3bc   : > { %v6633_v27 = vadd.f32 %v19753_v61, %v6245_v56  ;;  %13921 = vmatmul.mubr.msk.f32.gmra.mxu1 %vm7497_vm5, %v17637_v28  ;;  %7561 = vst.msk [vmem:[#allocation4 + $0x69] sm:$0xff] %vm7497_vm5, %v7472_v0  ;;  %v7471_v57 = vmax.f32 %v7439_v25, 0.0  ;;  %v7442_v31 = vadd.f32 %v17536_v23, %v7403_v11  ;;  %v7402_v41 = vadd.f32 %v7275_v34, %v7015_v55  ;;  %v19759_v1 = vld [vmem:[#allocation81_spill] sm:$0xff]  ;;  %v19761_v56 = vld [vmem:[#allocation98_spill] sm:$0xff]  ;;  %v19770_v8 = vld [vmem:[#allocation31_spill] sm:$0xff] }
 0x3bd   : > { %v6247_v54 = vadd.f32 %v19759_v1, %v19758_v38  ;;  %v13830_v47 = vpop.f32.mrf.mxu1  ;;  %v17667_v48 = vld [vmem:[#allocation4 + $0x31] sm:$0xff]  ;;  %v7017_v53 = vadd.f32 %v19761_v56, %v6630_v26  ;;  %v17680_v12 = vld [vmem:[#allocation4 + $0x39] sm:$0xff]  ;;  %v7019_v51 = vadd.f32 %v17492_v7, %v6632_v5 }
 0x3be   : > { %v17669_v15 = vld [vmem:[#allocation4 + $0x30] sm:$0xff]  ;;  %v17671_v63 = vld [vmem:[#allocation4 + $0x38] sm:$0xff]  ;;  %7560 = vst.msk [vmem:[#allocation4 + $0x61] sm:$0xff] %vm7497_vm5, %v7471_v57  ;;  %v7474_v55 = vmax.f32 %v7442_v31, 0.0  ;;  %v7441_v9 = vadd.f32 %v17536_v23, %v7402_v41  ;;  %v7405_v59 = vadd.f32 %v13830_v47, %v7018_v20  ;;  %13871 = vmatprep.mubr.msk.f32.mxu0 %vm7497_vm5, %v17667_v48  ;;  %v7020_v26 = vadd.f32 %v17485_v2, %v6633_v27  ;;  %v19767_v27 = vld [vmem:[#allocation83_spill] sm:$0xff] }
 0x3bf   : > { %13923 = vmatprep.mubr.msk.f32.mxu1 %vm7497_vm5, %v17669_v15  ;;  %v19762_v0 = vld [vmem:[#allocation77_spill] sm:$0xff]  ;;  %v7285_v45 = vpop.f32.mrf.mxu1  ;;  %13872 = vmatmul.mubr.msk.f32.gmra.mxu0 %vm7497_vm5, %v17680_v12  ;;  %v6635_v61 = vadd.f32 %v19764_v37, %v6247_v54  ;;  %v19766_v31 = vld [vmem:[#allocation10_spill] sm:$0xff] }
 0x3c0   : > { %v6246_v25 = vadd.f32 %v19762_v0, %v5859_v42  ;;  %v19763_v11 = vld [vmem:[#allocation21_spill] sm:$0xff]  ;;  %13924 = vmatmul.mubr.msk.f32.gmra.mxu1 %vm7497_vm5, %v17671_v63  ;;  %7563 = vst.msk [vmem:[#allocation4 + $0x81] sm:$0xff] %vm7497_vm5, %v7474_v55  ;;  %v7473_v34 = vmax.f32 %v7441_v9, 0.0  ;;  %v7444_v22 = vadd.f32 %v17536_v23, %v7405_v59  ;;  %v7404_v20 = vadd.f32 %v7285_v45, %v7017_v53  ;;  %v19765_v42 = vld [vmem:[#allocation72_spill] sm:$0xff]  ;;  %v19771_v5 = vld [vmem:[#allocation78_spill] sm:$0xff] }
 0x3c1   : > { %v5861_v21 = vadd.f32 %v19763_v11, %v5474_v33  ;;  %v5476_v57 = vadd.f32 %v19765_v42, %v5089_v4  ;;  %v5091_v2 = vadd.f32 %v19766_v31, %v17560_v30  ;;  %v19768_v41 = vld [vmem:[#allocation45_spill] sm:$0xff]  ;;  %v17698_v33 = vpop.f32.mrf.mxu0  ;;  %v13833_v17 = vpop.f32.mrf.mxu1  ;;  %v17702_v1 = vld [vmem:[#allocation4 + $0x48] sm:$0xff]  ;;  %v19773_v59 = vld [vmem:[#allocation90_spill] sm:$0xff]  ;;  %v7022_v11 = vadd.f32 %v17500_v60, %v6635_v61 }
 0x3c2   : > { %v6249_v58 = vadd.f32 %v19768_v41, %v19767_v27  ;;  %v17700_v38 = vld [vmem:[#allocation4 + $0x49] sm:$0xff]  ;;  %v6634_v47 = vadd.f32 %v19770_v8, %v6246_v25  ;;  %7562 = vst.msk [vmem:[#allocation4 + $0x79] sm:$0xff] %vm7497_vm5, %v7473_v34  ;;  %v7476_v4 = vmax.f32 %v7444_v22, 0.0  ;;  %v7443_v30 = vadd.f32 %v17536_v23, %v7404_v20  ;;  %13926 = vmatprep.mubr.msk.f32.mxu1 %vm7497_vm5, %v17702_v1  ;;  %v17713_v7 = vld [vmem:[#allocation4 + $0x51] sm:$0xff]  ;;  %v19775_v22 = vld [vmem:[#allocation67_spill] sm:$0xff] }
 0x3c3   : > { %v17704_v54 = vld [vmem:[#allocation4 + $0x50] sm:$0xff]  ;;  %v7407_v56 = vadd.f32 %v13833_v17, %v7020_v26  ;;  %13874 = vmatprep.mubr.msk.f32.mxu0 %vm7497_vm5, %v17700_v38  ;;  %v6248_v53 = vadd.f32 %v19771_v5, %v5861_v21  ;;  %v7295_v25 = vpop.f32.mrf.mxu1  ;;  %v19774_v21 = vld [vmem:[#allocation20_spill] sm:$0xff]  ;;  %v5093_v20 = vadd.f32 %v19775_v22, %v17570_v6  ;;  %v19778_v27 = vld [vmem:[#allocation91_spill] sm:$0xff] }
 0x3c4   : > { %19769 = vst [vmem:[#allocation64_spill] sm:$0xff] %v17704_v54  ;;  %v19772_v55 = vld [vmem:[#allocation49_spill] sm:$0xff]  ;;  %v6637_v0 = vadd.f32 %v19773_v59, %v6249_v58  ;;  %13875 = vmatmul.mubr.msk.f32.gmra.mxu0 %vm7497_vm5, %v17713_v7  ;;  %13927 = vmatmul.mubr.msk.f32.gmra.mxu1 %vm7497_vm5, %v17704_v54  ;;  %7565 = vst.msk [vmem:[#allocation4 + $0x99] sm:$0xff] %vm7497_vm5, %v7476_v4  ;;  %v7475_v26 = vmax.f32 %v7443_v30, 0.0  ;;  %v7406_v37 = vadd.f32 %v7295_v25, %v7019_v51  ;;  %v19776_v42 = vld [vmem:[#allocation44_spill] sm:$0xff]  ;;  %v17731_v58 = vpop.f32.mrf.mxu0 }
 0x3c5   : > { %v5863_v9 = vadd.f32 %v19772_v55, %v5476_v57  ;;  %v7446_v45 = vadd.f32 %v17536_v23, %v7407_v56  ;;  %v5478_v34 = vadd.f32 %v19774_v21, %v5091_v2  ;;  %v19777_v57 = vld [vmem:[#allocation85_spill] sm:$0xff]  ;;  %v6636_v41 = vadd.f32 %v19778_v27, %v6248_v53  ;;  %v13836_v17 = vpop.f32.mrf.mxu1  ;;  %v17733_v60 = vld [vmem:[#allocation4 + $0x61] sm:$0xff] }
 0x3c6   : > { %v6251_v31 = vadd.f32 %v19777_v57, %v19776_v42  ;;  %v17735_v61 = vld [vmem:[#allocation4 + $0x60] sm:$0xff]  ;;  %v17737_v8 = vld [vmem:[#allocation4 + $0x68] sm:$0xff]  ;;  %v7021_v51 = vadd.f32 %v17514_v50, %v6634_v47  ;;  %7564 = vst.msk [vmem:[#allocation4 + $0x91] sm:$0xff] %vm7497_vm5, %v7475_v26  ;;  %v7445_v6 = vadd.f32 %v17536_v23, %v7406_v37  ;;  %v7409_v4 = vadd.f32 %v13836_v17, %v7022_v11  ;;  %v19783_v59 = vld [vmem:[#allocation93_spill] sm:$0xff]  ;;  %v17764_v57 = vpop.f32.mrf.mxu0 }
 0x3c7   : > { %19779 = vst [vmem:[#allocation9_spill] sm:$0xff] %v17735_v61  ;;  %19780 = vst [vmem:[#allocation18_spill] sm:$0xff] %v17737_v8  ;;  %v7478_v2 = vmax.f32 %v7446_v45, 0.0  ;;  %13877 = vmatprep.mubr.msk.f32.mxu0 %vm7497_vm5, %v17733_v60  ;;  %13929 = vmatprep.mubr.msk.f32.mxu1 %vm7497_vm5, %v17735_v61  ;;  %v17746_v30 = vld [vmem:[#allocation4 + $0x69] sm:$0xff]  ;;  %v7024_v50 = vadd.f32 %v17531_v62, %v6637_v0  ;;  %v7305_v47 = vpop.f32.mrf.mxu1  ;;  %v19785_v21 = vld [vmem:[#allocation35_spill] sm:$0xff]  ;;  %v7023_v42 = vadd.f32 %v17554_v40, %v6636_v41 }
 0x3c8   : > { %v19781_v56 = vld [vmem:[#allocation80_spill] sm:$0xff]  ;;  %13878 = vmatmul.mubr.msk.f32.gmra.mxu0 %vm7497_vm5, %v17746_v30  ;;  %13930 = vmatmul.mubr.msk.f32.gmra.mxu1 %vm7497_vm5, %v17737_v8  ;;  %v6639_v25 = vadd.f32 %v19783_v59, %v6251_v31  ;;  %v7477_v11 = vmax.f32 %v7445_v6, 0.0  ;;  %v7448_v26 = vadd.f32 %v17536_v23, %v7409_v4  ;;  %v7408_v45 = vadd.f32 %v7305_v47, %v7021_v51  ;;  %v19786_v0 = vld [vmem:[#allocation82_spill] sm:$0xff]  ;;  %v19791_v41 = vld [vmem:[#allocation47_spill] sm:$0xff] }
 0x3c9   : > { %v6250_v5 = vadd.f32 %v19781_v56, %v5863_v9  ;;  %v19782_v53 = vld [vmem:[#allocation88_spill] sm:$0xff]  ;;  %7567 = vst.msk [vmem:[#allocation4 + $0xb1] sm:$0xff] %vm7497_vm5, %v7478_v2  ;;  %v19784_v9 = vld [vmem:[#allocation74_spill] sm:$0xff]  ;;  %v5095_v62 = vadd.f32 %v19785_v21, %v17584_v16  ;;  %v13839_v27 = vpop.f32.mrf.mxu1  ;;  %v17770_v2 = vld [vmem:[#allocation4 + $0x80] sm:$0xff] }
 0x3ca   : > { %v5865_v55 = vadd.f32 %v19782_v53, %v5478_v34  ;;  %v5480_v37 = vadd.f32 %v19784_v9, %v5093_v20  ;;  %v19787_v34 = vld [vmem:[#allocation48_spill] sm:$0xff]  ;;  %v17766_v31 = vld [vmem:[#allocation4 + $0x79] sm:$0xff]  ;;  %19789 = vst [vmem:[#allocation29_spill] sm:$0xff] %v17770_v2  ;;  %7566 = vst.msk [vmem:[#allocation4 + $0xa9] sm:$0xff] %vm7497_vm5, %v7477_v11  ;;  %v7480_v20 = vmax.f32 %v7448_v26, 0.0  ;;  %v7447_v16 = vadd.f32 %v17536_v23, %v7408_v45 }
 0x3cb   : > { %v6253_v22 = vadd.f32 %v19787_v34, %v19786_v0  ;;  %v17768_v17 = vld [vmem:[#allocation4 + $0x78] sm:$0xff]  ;;  %v7411_v4 = vadd.f32 %v13839_v27, %v7024_v50  ;;  %13880 = vmatprep.mubr.msk.f32.mxu0 %vm7497_vm5, %v17766_v31  ;;  %v17779_v40 = vld [vmem:[#allocation4 + $0x81] sm:$0xff]  ;;  %v7315_v9 = vpop.f32.mrf.mxu1  ;;  %v7026_v50 = vadd.f32 %v17577_v19, %v6639_v25 }
 0x3cc   : > { %19788 = vst [vmem:[#allocation59_spill] sm:$0xff] %v17768_v17  ;;  %v19790_v51 = vld [vmem:[#allocation94_spill] sm:$0xff]  ;;  %13932 = vmatprep.mubr.msk.f32.mxu1 %vm7497_vm5, %v17768_v17  ;;  %v6252_v56 = vadd.f32 %v19791_v41, %v5865_v55  ;;  %v19793_v59 = vld [vmem:[#allocation96_spill] sm:$0xff]  ;;  %13881 = vmatmul.mubr.msk.f32.gmra.mxu0 %vm7497_vm5, %v17779_v40  ;;  %7569 = vst.msk [vmem:[#allocation4 + $0xc9] sm:$0xff] %vm7497_vm5, %v7480_v20  ;;  %v7479_v11 = vmax.f32 %v7447_v16, 0.0  ;;  %v7410_v45 = vadd.f32 %v7315_v9, %v7023_v42 }
 0x3cd   : > { %v6638_v6 = vadd.f32 %v19790_v51, %v6250_v5  ;;  %v19792_v53 = vld [vmem:[#allocation86_spill] sm:$0xff]  ;;  %v6641_v5 = vadd.f32 %v19793_v59, %v6253_v22  ;;  %13933 = vmatmul.mubr.msk.f32.gmra.mxu1 %vm7497_vm5, %v17770_v2  ;;  %v7450_v26 = vadd.f32 %v17536_v23, %v7411_v4  ;;  %v19794_v55 = vld [vmem:[#allocation40_spill] sm:$0xff]  ;;  %v19798_v51 = vld [vmem:[#allocation97_spill] sm:$0xff]  ;;  %v13842_v59 = vpop.f32.mrf.mxu1 }
 0x3ce   : > { %v5867_v47 = vadd.f32 %v19792_v53, %v5480_v37  ;;  %v5482_v21 = vadd.f32 %v19794_v55, %v5095_v62  ;;  %v19795_v37 = vld [vmem:[#allocation69_spill] sm:$0xff]  ;;  %v19796_v34 = vld [vmem:[#allocation50_spill] sm:$0xff]  ;;  %v19797_v22 = vld [vmem:[#allocation84_spill] sm:$0xff]  ;;  %v6640_v41 = vadd.f32 %v19798_v51, %v6252_v56  ;;  %v17797_v53 = vpop.f32.mrf.mxu0  ;;  %7568 = vst.msk [vmem:[#allocation4 + $0xc1] sm:$0xff] %vm7497_vm5, %v7479_v11  ;;  %v7413_v16 = vadd.f32 %v13842_v59, %v7026_v50 }
 0x3cf   : > { %v5097_v0 = vadd.f32 %v19795_v37, %v17600_v13  ;;  %v6255_v27 = vadd.f32 %v19797_v22, %v19796_v34  ;;  %v17799_v19 = vld [vmem:[#allocation4 + $0x91] sm:$0xff]  ;;  %v7025_v42 = vadd.f32 %v17607_v14, %v6638_v6  ;;  %v7482_v62 = vmax.f32 %v7450_v26, 0.0  ;;  %v17812_v4 = vld [vmem:[#allocation4 + $0x99] sm:$0xff]  ;;  %v7325_v6 = vpop.f32.mrf.mxu1 }
 0x3d0   : > { %v17801_v25 = vld [vmem:[#allocation4 + $0x90] sm:$0xff]  ;;  %v17803_v20 = vld [vmem:[#allocation4 + $0x98] sm:$0xff]  ;;  %v7449_v13 = vadd.f32 %v17536_v23, %v7410_v45  ;;  %13883 = vmatprep.mubr.msk.f32.mxu0 %vm7497_vm5, %v17799_v19  ;;  %19801 = vst [vmem:[#allocation30_spill] sm:$0xff] %v17812_v4  ;;  %v19802_v56 = vld [vmem:[#allocation87_spill] sm:$0xff]  ;;  %v7028_v14 = vadd.f32 %v17631_v44, %v6641_v5  ;;  %v7452_v45 = vadd.f32 %v17536_v23, %v7413_v16 }
 0x3d1   : > { %19799 = vst [vmem:[#allocation15_spill] sm:$0xff] %v17801_v25  ;;  %19800 = vst [vmem:[#allocation66_spill] sm:$0xff] %v17803_v20  ;;  %13935 = vmatprep.mubr.msk.f32.mxu1 %vm7497_vm5, %v17801_v25  ;;  %v6254_v9 = vadd.f32 %v19802_v56, %v5867_v47  ;;  %v19803_v55 = vld [vmem:[#allocation51_spill] sm:$0xff]  ;;  %13884 = vmatmul.mubr.msk.f32.gmra.mxu0 %vm7497_vm5, %v17812_v4  ;;  %v7412_v34 = vadd.f32 %v7325_v6, %v7025_v42  ;;  %v19807_v5 = vld [vmem:[#allocation26_spill] sm:$0xff]  ;;  %v13845_v4 = vpop.f32.mrf.mxu1 }
 0x3d2   : > { %v5869_v37 = vadd.f32 %v19803_v55, %v5482_v21  ;;  %13936 = vmatmul.mubr.msk.f32.gmra.mxu1 %vm7497_vm5, %v17803_v20  ;;  %v19804_v50 = vld [vmem:[#allocation99_spill] sm:$0xff]  ;;  %7571 = vst.msk [vmem:[#allocation4 + $0xe1] sm:$0xff] %vm7497_vm5, %v7482_v62  ;;  %v7481_v26 = vmax.f32 %v7449_v13, 0.0  ;;  %v19806_v21 = vld [vmem:[#allocation76_spill] sm:$0xff]  ;;  %v19808_v51 = vld [vmem:[#allocation89_spill] sm:$0xff]  ;;  %v7027_v56 = vadd.f32 %v17665_v46, %v6640_v41  ;;  %v17830_v55 = vpop.f32.mrf.mxu0  ;;  %v7415_v6 = vadd.f32 %v13845_v4, %v7028_v14 }
 0x3d3   : > { %v6643_v11 = vadd.f32 %v19804_v50, %v6255_v27  ;;  %v19805_v47 = vld [vmem:[#allocation39_spill] sm:$0xff]  ;;  %v5099_v44 = vadd.f32 %v19806_v21, %v17614_v52  ;;  %v6257_v59 = vadd.f32 %v19808_v51, %v19807_v5  ;;  %v17832_v27 = vld [vmem:[#allocation4 + $0xa9] sm:$0xff]  ;;  %v7451_v52 = vadd.f32 %v17536_v23, %v7412_v34  ;;  %v17845_v46 = vld [vmem:[#allocation4 + $0xb1] sm:$0xff]  ;;  %v7335_v5 = vpop.f32.mrf.mxu1 }
 0x3d4   : > { %v5484_v22 = vadd.f32 %v19805_v47, %v5097_v0  ;;  %19809 = vst [vmem:[#allocation63_spill] sm:$0xff] %v17832_v27  ;;  %v17834_v62 = vld [vmem:[#allocation4 + $0xa8] sm:$0xff]  ;;  %v17836_v13 = vld [vmem:[#allocation4 + $0xb0] sm:$0xff]  ;;  %7570 = vst.msk [vmem:[#allocation4 + $0xd9] sm:$0xff] %vm7497_vm5, %v7481_v26  ;;  %v7484_v0 = vmax.f32 %v7452_v45, 0.0  ;;  %13886 = vmatprep.mubr.msk.f32.mxu0 %vm7497_vm5, %v17832_v27  ;;  %v7454_v26 = vadd.f32 %v17536_v23, %v7415_v6 }
 0x3d5   : > { %19810 = vst [vmem:[#allocation17_spill] sm:$0xff] %v17834_v62  ;;  %19811 = vst [vmem:[#allocation73_spill] sm:$0xff] %v17836_v13  ;;  %v19812_v42 = vld [vmem:[#allocation100_spill] sm:$0xff]  ;;  %13938 = vmatprep.mubr.msk.f32.mxu1 %vm7497_vm5, %v17834_v62  ;;  %v19815_v47 = vld [vmem:[#allocation6_spill] sm:$0xff]  ;;  %13887 = vmatmul.mubr.msk.f32.gmra.mxu0 %vm7497_vm5, %v17845_v46  ;;  %v7030_v4 = vadd.f32 %v17698_v33, %v6643_v11  ;;  %v7483_v14 = vmax.f32 %v7451_v52, 0.0  ;;  %v7414_v45 = vadd.f32 %v7335_v5, %v7027_v56 }
 0x3d6   : > { %v6642_v16 = vadd.f32 %v19812_v42, %v6254_v9  ;;  %19813 = vst [vmem:[#allocation43_spill] sm:$0xff] %v17845_v46  ;;  %v19814_v41 = vld [vmem:[#allocation8_spill] sm:$0xff]  ;;  %v5871_v21 = vadd.f32 %v19815_v47, %v5484_v22  ;;  %v6645_v9 = vadd.f32 %v17487_v39, %v6257_v59  ;;  %13939 = vmatmul.mubr.msk.f32.gmra.mxu1 %vm7497_vm5, %v17836_v13  ;;  %7573 = vst.msk [vmem:[#allocation4 + $0xf9] sm:$0xff] %vm7497_vm5, %v7484_v0  ;;  %v19817_v22 = vld [vmem:[#allocation71_spill] sm:$0xff]  ;;  %v6978_v47 = vpop.f32.mrf.mxu0  ;;  %v13848_v46 = vpop.f32.mrf.mxu1 }
 0x3d7   : > { %v6256_v50 = vadd.f32 %v19814_v41, %v5869_v37  ;;  %v19816_v37 = vld [vmem:[#allocation19_spill] sm:$0xff]  ;;  %v5101_v39 = vadd.f32 %v19817_v22, %v17624_v3  ;;  %v19818_v51 = vld [vmem:[#allocation5_spill] sm:$0xff]  ;;  %v19819_v59 = vld [vmem:[#allocation58_spill] sm:$0xff]  ;;  %7572 = vst.msk [vmem:[#allocation4 + $0xf1] sm:$0xff] %vm7497_vm5, %v7483_v14  ;;  %v7453_v3 = vadd.f32 %v17536_v23, %v7414_v45  ;;  %v7417_v0 = vadd.f32 %v13848_v46, %v7030_v4 }
 0x3d8   : > { %v5486_v34 = vadd.f32 %v19816_v37, %v5099_v44  ;;  %v6259_v42 = vadd.f32 %v19819_v59, %v19818_v51  ;;  %v17863_v27 = vld [vmem:[#allocation4 + $0xc1] sm:$0xff]  ;;  %v7029_v56 = vadd.f32 %v17731_v58, %v6642_v16  ;;  %v7486_v44 = vmax.f32 %v7454_v26, 0.0  ;;  %v7345_v16 = vpop.f32.mrf.mxu1  ;;  %v19824_v46 = vld [vmem:[#allocation101_spill] sm:$0xff]  ;;  %v19827_v22 = vld [vmem:[#allocation54_spill] sm:$0xff]  ;;  %v13807_v51 = vpop.f32.mrf.mxu0 }
 0x3d9   : > { %v6644_v41 = vadd.f32 %v17490_v32, %v6256_v50  ;;  %v17865_v33 = vld [vmem:[#allocation4 + $0xc0] sm:$0xff]  ;;  %v17867_v11 = vld [vmem:[#allocation4 + $0xc8] sm:$0xff]  ;;  %13889 = vmatprep.mubr.msk.f32.mxu0 %vm7497_vm5, %v17863_v27  ;;  %v19823_v50 = vld [vmem:[#allocation13_spill] sm:$0xff]  ;;  %v7032_v58 = vadd.f32 %v17764_v57, %v6645_v9  ;;  %v7485_v14 = vmax.f32 %v7453_v3, 0.0  ;;  %v7456_v26 = vadd.f32 %v17536_v23, %v7417_v0 }
 0x3da   : > { %19820 = vst [vmem:[#allocation53_spill] sm:$0xff] %v17865_v33  ;;  %19821 = vst [vmem:[#allocation27_spill] sm:$0xff] %v17867_v11  ;;  %13941 = vmatprep.mubr.msk.f32.mxu1 %vm7497_vm5, %v17865_v33  ;;  %v17876_v32 = vld [vmem:[#allocation4 + $0xc9] sm:$0xff]  ;;  %v19822_v52 = vld [vmem:[#allocation7_spill] sm:$0xff]  ;;  %v5873_v5 = vadd.f32 %v19823_v50, %v5486_v34  ;;  %v6647_v4 = vadd.f32 %v19824_v46, %v6259_v42  ;;  %v7416_v45 = vadd.f32 %v7345_v16, %v7029_v56  ;;  %v13851_v59 = vpop.f32.mrf.mxu1 }
 0x3db   : > { %v6258_v6 = vadd.f32 %v19822_v52, %v5871_v21  ;;  %13890 = vmatmul.mubr.msk.f32.gmra.mxu0 %vm7497_vm5, %v17876_v32  ;;  %13942 = vmatmul.mubr.msk.f32.gmra.mxu1 %vm7497_vm5, %v17867_v11  ;;  %7575 = vst.msk [vmem:[#allocation4 + $0x111] sm:$0xff] %vm7497_vm5, %v7486_v44  ;;  %v19825_v21 = vld [vmem:[#allocation38_spill] sm:$0xff]  ;;  %v19826_v34 = vld [vmem:[#allocation23_spill] sm:$0xff]  ;;  %v7031_v9 = vadd.f32 %v17797_v53, %v6644_v41  ;;  %7574 = vst.msk [vmem:[#allocation4 + $0x109] sm:$0xff] %vm7497_vm5, %v7485_v14  ;;  %v7488_v56 = vmax.f32 %v7456_v26, 0.0 }
 0x3dc   : > { %v5488_v37 = vadd.f32 %v19825_v21, %v5101_v39  ;;  %v6261_v57 = vadd.f32 %v19827_v22, %v19826_v34  ;;  %v17892_v52 = vld [vmem:[#allocation4 + $0xd9] sm:$0xff]  ;;  %v7455_v39 = vadd.f32 %v17536_v23, %v7416_v45  ;;  %v7419_v0 = vadd.f32 %v13851_v59, %v7032_v58  ;;  %v17905_v53 = vld [vmem:[#allocation4 + $0xe1] sm:$0xff]  ;;  %v19831_v41 = vld [vmem:[#allocation25_spill] sm:$0xff]  ;;  %v7355_v34 = vpop.f32.mrf.mxu1 }
 0x3dd   : > { %v17894_v50 = vld [vmem:[#allocation4 + $0xd8] sm:$0xff]  ;;  %v17896_v42 = vld [vmem:[#allocation4 + $0xe0] sm:$0xff]  ;;  %13892 = vmatprep.mubr.msk.f32.mxu0 %vm7497_vm5, %v17892_v52  ;;  %v6260_v16 = vadd.f32 %v19831_v41, %v5873_v5  ;;  %v19832_v46 = vld [vmem:[#allocation52_spill] sm:$0xff]  ;;  %v7034_v58 = vadd.f32 %v17830_v55, %v6647_v4  ;;  %7577 = vst.msk [vmem:[#allocation4 + $0x129] sm:$0xff] %vm7497_vm5, %v7488_v56  ;;  %v7418_v45 = vadd.f32 %v7355_v34, %v7031_v9 }
 0x3de   : > { %19828 = vst [vmem:[#allocation34_spill] sm:$0xff] %v17894_v50  ;;  %19829 = vst [vmem:[#allocation61_spill] sm:$0xff] %v17896_v42  ;;  %v19830_v44 = vld [vmem:[#allocation102_spill] sm:$0xff]  ;;  %13944 = vmatprep.mubr.msk.f32.mxu1 %vm7497_vm5, %v17894_v50  ;;  %v5875_v21 = vadd.f32 %v19832_v46, %v5488_v37  ;;  %v7487_v14 = vmax.f32 %v7455_v39, 0.0  ;;  %v7458_v26 = vadd.f32 %v17536_v23, %v7419_v0  ;;  %v19833_v5 = vld [vmem:[#allocation16_spill] sm:$0xff]  ;;  %v13854_v59 = vpop.f32.mrf.mxu1 }
 0x3df   : > { %v6646_v3 = vadd.f32 %v19830_v44, %v6258_v6  ;;  %v6649_v6 = vadd.f32 %v17502_v35, %v6261_v57  ;;  %13893 = vmatmul.mubr.msk.f32.gmra.mxu0 %vm7497_vm5, %v17905_v53  ;;  %13945 = vmatmul.mubr.msk.f32.gmra.mxu1 %vm7497_vm5, %v17896_v42  ;;  %v19834_v22 = vld [vmem:[#allocation56_spill] sm:$0xff]  ;;  %v6648_v35 = vadd.f32 %v17508_v49, %v6260_v16  ;;  %v6988_v57 = vpop.f32.mrf.mxu0  ;;  %v17920_v44 = vld [vmem:[#allocation4 + $0xf1] sm:$0xff]  ;;  %v17932_v49 = vld [vmem:[#allocation4 + $0xf9] sm:$0xff] }
 0x3e0   : > { %v6263_v37 = vadd.f32 %v19834_v22, %v19833_v5  ;;  %v17922_v41 = vld [vmem:[#allocation4 + $0xf0] sm:$0xff]  ;;  %v17924_v46 = vld [vmem:[#allocation4 + $0xf8] sm:$0xff]  ;;  %7576 = vst.msk [vmem:[#allocation4 + $0x121] sm:$0xff] %vm7497_vm5, %v7487_v14  ;;  %v7490_v4 = vmax.f32 %v7458_v26, 0.0  ;;  %v7457_v56 = vadd.f32 %v17536_v23, %v7418_v45  ;;  %v7421_v9 = vadd.f32 %v13854_v59, %v7034_v58  ;;  %13895 = vmatprep.mubr.msk.f32.mxu0 %vm7497_vm5, %v17920_v44  ;;  %v19837_v39 = vld [vmem:[#allocation24_spill] sm:$0xff]  ;;  %v7365_v5 = vpop.f32.mrf.mxu1 }
 0x3e1   : > { %19835 = vst [vmem:[#allocation42_spill] sm:$0xff] %v17922_v41  ;;  %19836 = vst [vmem:[#allocation22_spill] sm:$0xff] %v17924_v46  ;;  %v7033_v55 = vadd.f32 %v6978_v47, %v6646_v3  ;;  %13947 = vmatprep.mubr.msk.f32.mxu1 %vm7497_vm5, %v17922_v41  ;;  %v6262_v0 = vadd.f32 %v19837_v39, %v5875_v21  ;;  %v7036_v16 = vadd.f32 %v13807_v51, %v6649_v6  ;;  %v13810_v34 = vpop.f32.mrf.mxu0 }
 0x3e2   : > { %v6651_v47 = vadd.f32 %v17516_v36, %v6263_v37  ;;  %7579 = vst.msk [vmem:[#allocation4 + $0x141] sm:$0xff] %vm7497_vm5, %v7490_v4  ;;  %v7489_v3 = vmax.f32 %v7457_v56, 0.0  ;;  %v7460_v58 = vadd.f32 %v17536_v23, %v7421_v9  ;;  %v7035_v26 = vadd.f32 %v6988_v57, %v6648_v35  ;;  %v13857_v45 = vpop.f32.mrf.mxu1  ;;  %v17942_v21 = vld [vmem:[#allocation4 + $0x109] sm:$0xff]  ;;  %v17955_v35 = vld [vmem:[#allocation4 + $0x111] sm:$0xff] }
 0x3e3   : > { %13896 = vmatmul.mubr.msk.f32.gmra.mxu0 %vm7497_vm5, %v17932_v49  ;;  %13948 = vmatmul.mubr.msk.f32.gmra.mxu1 %vm7497_vm5, %v17924_v46  ;;  %v7420_v14 = vadd.f32 %v7365_v5, %v7033_v55  ;;  %v17944_v51 = vld [vmem:[#allocation4 + $0x108] sm:$0xff]  ;;  %v17946_v6 = vld [vmem:[#allocation4 + $0x110] sm:$0xff]  ;;  %v6650_v22 = vadd.f32 %v17522_v10, %v6262_v0  ;;  %v7423_v37 = vadd.f32 %v13857_v45, %v7036_v16  ;;  %v6998_v57 = vpop.f32.mrf.mxu0 }
 0x3e4   : > { %19838 = vst [vmem:[#allocation57_spill] sm:$0xff] %v17944_v51  ;;  %19839 = vst [vmem:[#allocation28_spill] sm:$0xff] %v17946_v6  ;;  %v7492_v59 = vmax.f32 %v7460_v58, 0.0  ;;  %13898 = vmatprep.mubr.msk.f32.mxu0 %vm7497_vm5, %v17942_v21  ;;  %13950 = vmatprep.mubr.msk.f32.mxu1 %vm7497_vm5, %v17944_v51  ;;  %v7375_v55 = vpop.f32.mrf.mxu1  ;;  %v7038_v10 = vadd.f32 %v13810_v34, %v6651_v47  ;;  %v17975_v47 = vld [vmem:[#allocation4 + $0x129] sm:$0xff] }
 0x3e5   : > { %7578 = vst.msk [vmem:[#allocation4 + $0x139] sm:$0xff] %vm7497_vm5, %v7489_v3  ;;  %v7459_v36 = vadd.f32 %v17536_v23, %v7420_v14  ;;  %v7462_v56 = vadd.f32 %v17536_v23, %v7423_v37  ;;  %v7422_v9 = vadd.f32 %v7375_v55, %v7035_v26  ;;  %v7037_v3 = vadd.f32 %v6998_v57, %v6650_v22 }
 0x3e6   : > { %7581 = vst.msk [vmem:[#allocation4 + $0x159] sm:$0xff] %vm7497_vm5, %v7492_v59  ;;  %v13860_v39 = vpop.f32.mrf.mxu1 }
 0x3e7   : > { %13899 = vmatmul.mubr.msk.f32.gmra.mxu0 %vm7497_vm5, %v17955_v35  ;;  %13951 = vmatmul.mubr.msk.f32.gmra.mxu1 %vm7497_vm5, %v17946_v6  ;;  %v7491_v4 = vmax.f32 %v7459_v36, 0.0  ;;  %v17963_v0 = vld [vmem:[#allocation4 + $0x121] sm:$0xff]  ;;  %v7494_v58 = vmax.f32 %v7462_v56, 0.0  ;;  %v7461_v14 = vadd.f32 %v17536_v23, %v7422_v9  ;;  %v7425_v34 = vadd.f32 %v13860_v39, %v7038_v10 }
 0x3e8   : > { %v17965_v16 = vld [vmem:[#allocation4 + $0x120] sm:$0xff]  ;;  %v17967_v5 = vld [vmem:[#allocation4 + $0x128] sm:$0xff]  ;;  %13901 = vmatprep.mubr.msk.f32.mxu0 %vm7497_vm5, %v17963_v0  ;;  %v7385_v26 = vpop.f32.mrf.mxu1 }
 0x3e9   : > { %19840 = vst [vmem:[#allocation11_spill] sm:$0xff] %v17965_v16  ;;  %19841 = vst [vmem:[#allocation68_spill] sm:$0xff] %v17967_v5  ;;  %13953 = vmatprep.mubr.msk.f32.mxu1 %vm7497_vm5, %v17965_v16  ;;  %v7493_v45 = vmax.f32 %v7461_v14, 0.0  ;;  %v7464_v22 = vadd.f32 %v17536_v23, %v7425_v34  ;;  %v7424_v59 = vadd.f32 %v7385_v26, %v7037_v3 }
 0x3ea   : > { %7580 = vst.msk [vmem:[#allocation4 + $0x151] sm:$0xff] %vm7497_vm5, %v7491_v4  ;;  %7583 = vst.msk [vmem:[#allocation4 + $0x171] sm:$0xff] %vm7497_vm5, %v7494_v58  ;;  %v17995_v4 = vld [vmem:[#allocation4 + $0x141] sm:$0xff] }
 0x3eb   : > { %13902 = vmatmul.mubr.msk.f32.gmra.mxu0 %vm7497_vm5, %v17975_v47  ;;  %13954 = vmatmul.mubr.msk.f32.gmra.mxu1 %vm7497_vm5, %v17967_v5  ;;  %7582 = vst.msk [vmem:[#allocation4 + $0x169] sm:$0xff] %vm7497_vm5, %v7493_v45  ;;  %v7496_v55 = vmax.f32 %v7464_v22, 0.0  ;;  %v7463_v10 = vadd.f32 %v17536_v23, %v7424_v59  ;;  %v8297_v58 = vld [vmem:[#allocation4 + $0x2] sm:$0xff]  ;;  %v8298_v22 = vld [vmem:[#allocation4 + $0xa] sm:$0xff] }
 0x3ec   : > { %v17983_v36 = vld [vmem:[#allocation4 + $0x139] sm:$0xff] }
 0x3ed   : > { %v17985_v37 = vld [vmem:[#allocation4 + $0x138] sm:$0xff]  ;;  %v17987_v57 = vld [vmem:[#allocation4 + $0x140] sm:$0xff]  ;;  %13904 = vmatprep.mubr.msk.f32.mxu0 %vm7497_vm5, %v17983_v36  ;;  %7585 = vst.msk [vmem:[#allocation4 + $0x189] sm:$0xff] %vm7497_vm5, %v7496_v55  ;;  %v7495_v56 = vmax.f32 %v7463_v10, 0.0 }
 0x3ee   : > { %19842 = vst [vmem:[#allocation33_spill] sm:$0xff] %v17985_v37  ;;  %19843 = vst [vmem:[#allocation70_spill] sm:$0xff] %v17987_v57  ;;  %13956 = vmatprep.mubr.msk.f32.mxu1 %vm7497_vm5, %v17985_v37  ;;  %v18013_v3 = vld [vmem:[#allocation4 + $0x159] sm:$0xff] }
 0x3ef   : > { %13905 = vmatmul.mubr.msk.f32.gmra.mxu0 %vm7497_vm5, %v17995_v4  ;;  %13957 = vmatmul.mubr.msk.f32.gmra.mxu1 %vm7497_vm5, %v17987_v57  ;;  %7584 = vst.msk [vmem:[#allocation4 + $0x181] sm:$0xff] %vm7497_vm5, %v7495_v56  ;;  %v11886_v59 = vld [vmem:[%s19214_s5 + $0x40] sm:$0xff]  ;;  %v19848_v10 = vld [vmem:[#allocation14_spill] sm:$0xff] }
 0x3f0   : > { %v18044_v55 = vld [vmem:[#allocation4 + $0x1a] sm:$0xff] }
 0x3f1   : > { %v18002_v9 = vld [vmem:[#allocation4 + $0x151] sm:$0xff] }
 0x3f2   : > { %v18004_v23 = vld [vmem:[#allocation4 + $0x150] sm:$0xff]  ;;  %v18006_v39 = vld [vmem:[#allocation4 + $0x158] sm:$0xff]  ;;  %13907 = vmatprep.mubr.msk.f32.mxu0 %vm7497_vm5, %v18002_v9  ;;  %v18021_v34 = vld [vmem:[#allocation4 + $0x168] sm:$0xff] }
 0x3f3   : > { %19844 = vst [vmem:[#allocation12_spill] sm:$0xff] %v18004_v23  ;;  %19845 = vst [vmem:[#allocation79_spill] sm:$0xff] %v18006_v39  ;;  %13959 = vmatprep.mubr.msk.f32.mxu1 %vm7497_vm5, %v18004_v23  ;;  %13908 = vmatmul.mubr.msk.f32.gmra.mxu0 %vm7497_vm5, %v18013_v3  ;;  %v18019_v14 = vld [vmem:[#allocation4 + $0x169] sm:$0xff]  ;;  %v18029_v45 = vld [vmem:[#allocation4 + $0x171] sm:$0xff] }
 0x3f4   : > { %13960 = vmatmul.mubr.msk.f32.gmra.mxu1 %vm7497_vm5, %v18006_v39  ;;  %19846 = vst [vmem:[#allocation92_spill] sm:$0xff] %v18021_v34  ;;  %v18023_v26 = vld [vmem:[#allocation4 + $0x170] sm:$0xff]  ;;  %13910 = vmatprep.mubr.msk.f32.mxu0 %vm7497_vm5, %v18019_v14  ;;  %19847 = vst [vmem:[#allocation60_spill] sm:$0xff] %v18029_v45 }
 0x3f5   : > { %13962 = vmatprep.mubr.msk.f32.mxu1 %vm7497_vm5, %v18021_v34 }
 0x3f7   : > { %13911 = vmatmul.mubr.msk.f32.gmra.mxu0 %vm7497_vm5, %v18029_v45  ;;  %v18053_v45 = vld [vmem:[#allocation4 + $0x22] sm:$0xff] }
 0x3f8   : > { %13963 = vmatmul.mubr.msk.f32.gmra.mxu1 %vm7497_vm5, %v18023_v26  ;;  %13969 = vmatprep.mubr.msk.f32.mxu0 %vm7497_vm5, %v8297_v58 }
 0x3f9   : > { %14021 = vmatprep.mubr.msk.f32.mxu1 %vm7497_vm5, %v17635_v18 }
 0x3fb   : > { %13970 = vmatmul.mubr.msk.f32.vlgmr.msra.gmra.mxu0 %vm7497_vm5, %v8298_v22  ;;  %v18062_v22 = vld [vmem:[%s19214_s5 + $0x68] sm:$0xff] }
 0x3fc   : > { %14022 = vmatmul.mubr.msk.f32.vlgmr.msra.gmra.mxu1 %vm7497_vm5, %v17637_v28  ;;  %14070 = vmatpush3.msra.mxu0 %v19848_v10  ;;  %v11920_v28 = vld [vmem:[%s19214_s5 + $0x50] sm:$0xff] }
 0x3fd   : > { %13972 = vmatprep.mubr.msk.f32.mxu0 %vm7497_vm5, %v18044_v55  ;;  %14024 = vmatprep.mubr.msk.f32.mxu1 %vm7497_vm5, %v17669_v15  ;;  %v18068_v10 = vld [vmem:[#allocation4 + $0x32] sm:$0xff] }
 0x3fe   : > { %v13867_v18 = vpop.f32.mrf.mxu0  ;;  %14071 = vmatprep.subr.mxu0 %v11886_v59  ;;  %14122 = vmatpush3.msra.mxu1 %v17592_v24  ;;  %v18075_v24 = vld [vmem:[#allocation4 + $0x3a] sm:$0xff] }
 0x3ff   : > { %14072 = vmatpush3.msra.mxu0 %v11886_v59  ;;  %14123 = vmatprep.subr.mxu1 %v11920_v28  ;;  %v18080_v59 = vld [vmem:[%s19214_s5 + $0x78] sm:$0xff] }
 0x400   : > { %13973 = vmatmul.mubr.msk.f32.gmra.mxu0 %vm7497_vm5, %v18053_v45  ;;  %14025 = vmatmul.mubr.msk.f32.gmra.mxu1 %vm7497_vm5, %v17671_v63 }
 0x401   : > { %v13919_v56 = vpop.f32.mrf.mxu1  ;;  %13975 = vmatprep.mubr.msk.f32.mxu0 %vm7497_vm5, %v18068_v10  ;;  %14027 = vmatprep.mubr.msk.f32.mxu1 %vm7497_vm5, %v17702_v1 }
 0x402   : > { %v18051_v58 = vadd.f32 %v13919_v56, %v13867_v18  ;;  %14173 = vmatprep.subr.mxu0 %v18062_v22  ;;  %14124 = vmatpush3.msra.mxu1 %v11920_v28  ;;  %v18086_v18 = vld [vmem:[#allocation4 + $0x4a] sm:$0xff]  ;;  %v18093_v56 = vld [vmem:[#allocation4 + $0x52] sm:$0xff]  ;;  %v18099_v28 = vld [vmem:[#allocation4 + $0x62] sm:$0xff] }
 0x403   : > { %14225 = vmatprep.subr.mxu1 %v18080_v59 }
 0x404   : > { %19849 = vst [vmem:[#allocation75_spill] sm:$0xff] %v18051_v58  ;;  %13976 = vmatmul.mubr.msk.f32.gmra.mxu0 %vm7497_vm5, %v18075_v24  ;;  %14028 = vmatmul.mubr.msk.f32.gmra.mxu1 %vm7497_vm5, %v17704_v54  ;;  %v18105_v58 = vld [vmem:[#allocation4 + $0x6a] sm:$0xff]  ;;  %v18233_v54 = vld [vmem:[#allocation4 + $0x180] sm:$0xff] }
 0x405   : > { %13978 = vmatprep.mubr.msk.f32.mxu0 %vm7497_vm5, %v18086_v18  ;;  %14030 = vmatprep.mubr.msk.f32.mxu1 %vm7497_vm5, %v17735_v61  ;;  %v18111_v61 = vld [vmem:[#allocation4 + $0x7a] sm:$0xff]  ;;  %19850 = vst [vmem:[#allocation46_spill] sm:$0xff] %v18233_v54 }
 0x408   : > { %13979 = vmatmul.mubr.msk.f32.gmra.mxu0 %vm7497_vm5, %v18093_v56  ;;  %14031 = vmatmul.mubr.msk.f32.gmra.mxu1 %vm7497_vm5, %v17737_v8  ;;  %v18117_v8 = vld [vmem:[#allocation4 + $0x82] sm:$0xff] }
 0x409   : > { %13981 = vmatprep.mubr.msk.f32.mxu0 %vm7497_vm5, %v18099_v28  ;;  %14033 = vmatprep.mubr.msk.f32.mxu1 %vm7497_vm5, %v17768_v17  ;;  %v18123_v17 = vld [vmem:[#allocation4 + $0x92] sm:$0xff] }
 0x40c   : > { %13982 = vmatmul.mubr.msk.f32.gmra.mxu0 %vm7497_vm5, %v18105_v58  ;;  %14034 = vmatmul.mubr.msk.f32.gmra.mxu1 %vm7497_vm5, %v17770_v2  ;;  %v18129_v2 = vld [vmem:[#allocation4 + $0x9a] sm:$0xff] }
 0x40d   : > { %13984 = vmatprep.mubr.msk.f32.mxu0 %vm7497_vm5, %v18111_v61  ;;  %14036 = vmatprep.mubr.msk.f32.mxu1 %vm7497_vm5, %v17801_v25  ;;  %v18135_v25 = vld [vmem:[#allocation4 + $0xaa] sm:$0xff] }
 0x410   : > { %13985 = vmatmul.mubr.msk.f32.gmra.mxu0 %vm7497_vm5, %v18117_v8  ;;  %14037 = vmatmul.mubr.msk.f32.gmra.mxu1 %vm7497_vm5, %v17803_v20  ;;  %v18141_v20 = vld [vmem:[#allocation4 + $0xb2] sm:$0xff] }
 0x411   : > { %13987 = vmatprep.mubr.msk.f32.mxu0 %vm7497_vm5, %v18123_v17  ;;  %14039 = vmatprep.mubr.msk.f32.mxu1 %vm7497_vm5, %v17834_v62  ;;  %v18147_v62 = vld [vmem:[#allocation4 + $0xc2] sm:$0xff] }
 0x414   : > { %13988 = vmatmul.mubr.msk.f32.gmra.mxu0 %vm7497_vm5, %v18129_v2  ;;  %14040 = vmatmul.mubr.msk.f32.gmra.mxu1 %vm7497_vm5, %v17836_v13  ;;  %v18153_v13 = vld [vmem:[#allocation4 + $0xca] sm:$0xff] }
 0x415   : > { %13990 = vmatprep.mubr.msk.f32.mxu0 %vm7497_vm5, %v18135_v25  ;;  %14042 = vmatprep.mubr.msk.f32.mxu1 %vm7497_vm5, %v17865_v33  ;;  %v18159_v33 = vld [vmem:[#allocation4 + $0xda] sm:$0xff] }
 0x418   : > { %13991 = vmatmul.mubr.msk.f32.gmra.mxu0 %vm7497_vm5, %v18141_v20  ;;  %14043 = vmatmul.mubr.msk.f32.gmra.mxu1 %vm7497_vm5, %v17867_v11  ;;  %v18165_v11 = vld [vmem:[#allocation4 + $0xe2] sm:$0xff] }
 0x419   : > { %13993 = vmatprep.mubr.msk.f32.mxu0 %vm7497_vm5, %v18147_v62  ;;  %14045 = vmatprep.mubr.msk.f32.mxu1 %vm7497_vm5, %v17894_v50  ;;  %v18171_v50 = vld [vmem:[#allocation4 + $0xf2] sm:$0xff] }
 0x41c   : > { %13994 = vmatmul.mubr.msk.f32.gmra.mxu0 %vm7497_vm5, %v18153_v13  ;;  %14046 = vmatmul.mubr.msk.f32.gmra.mxu1 %vm7497_vm5, %v17896_v42  ;;  %v18177_v42 = vld [vmem:[#allocation4 + $0xfa] sm:$0xff] }
 0x41d   : > { %13996 = vmatprep.mubr.msk.f32.mxu0 %vm7497_vm5, %v18159_v33  ;;  %14048 = vmatprep.mubr.msk.f32.mxu1 %vm7497_vm5, %v17922_v41  ;;  %v18183_v41 = vld [vmem:[#allocation4 + $0x10a] sm:$0xff] }
 0x420   : > { %13997 = vmatmul.mubr.msk.f32.gmra.mxu0 %vm7497_vm5, %v18165_v11  ;;  %14049 = vmatmul.mubr.msk.f32.gmra.mxu1 %vm7497_vm5, %v17924_v46  ;;  %v18189_v46 = vld [vmem:[#allocation4 + $0x112] sm:$0xff] }
 0x421   : > { %13999 = vmatprep.mubr.msk.f32.mxu0 %vm7497_vm5, %v18171_v50  ;;  %14051 = vmatprep.mubr.msk.f32.mxu1 %vm7497_vm5, %v17944_v51  ;;  %v18195_v51 = vld [vmem:[#allocation4 + $0x122] sm:$0xff] }
 0x424   : > { %14000 = vmatmul.mubr.msk.f32.gmra.mxu0 %vm7497_vm5, %v18177_v42  ;;  %14052 = vmatmul.mubr.msk.f32.gmra.mxu1 %vm7497_vm5, %v17946_v6  ;;  %v18201_v6 = vld [vmem:[#allocation4 + $0x12a] sm:$0xff] }
 0x425   : > { %14002 = vmatprep.mubr.msk.f32.mxu0 %vm7497_vm5, %v18183_v41  ;;  %14054 = vmatprep.mubr.msk.f32.mxu1 %vm7497_vm5, %v17965_v16  ;;  %v18207_v16 = vld [vmem:[#allocation4 + $0x13a] sm:$0xff] }
 0x428   : > { %14003 = vmatmul.mubr.msk.f32.gmra.mxu0 %vm7497_vm5, %v18189_v46  ;;  %14055 = vmatmul.mubr.msk.f32.gmra.mxu1 %vm7497_vm5, %v17967_v5  ;;  %v18213_v5 = vld [vmem:[#allocation4 + $0x142] sm:$0xff] }
 0x429   : > { %14005 = vmatprep.mubr.msk.f32.mxu0 %vm7497_vm5, %v18195_v51  ;;  %14057 = vmatprep.mubr.msk.f32.mxu1 %vm7497_vm5, %v17985_v37  ;;  %v18219_v37 = vld [vmem:[#allocation4 + $0x152] sm:$0xff] }
 0x42c   : > { %14006 = vmatmul.mubr.msk.f32.gmra.mxu0 %vm7497_vm5, %v18201_v6  ;;  %14058 = vmatmul.mubr.msk.f32.gmra.mxu1 %vm7497_vm5, %v17987_v57  ;;  %v18225_v57 = vld [vmem:[#allocation4 + $0x15a] sm:$0xff] }
 0x42d   : > { %14008 = vmatprep.mubr.msk.f32.mxu0 %vm7497_vm5, %v18207_v16  ;;  %14060 = vmatprep.mubr.msk.f32.mxu1 %vm7497_vm5, %v18004_v23  ;;  %v18231_v23 = vld [vmem:[#allocation4 + $0x16a] sm:$0xff] }
 0x430   : > { %14009 = vmatmul.mubr.msk.f32.gmra.mxu0 %vm7497_vm5, %v18213_v5  ;;  %14061 = vmatmul.mubr.msk.f32.gmra.mxu1 %vm7497_vm5, %v18006_v39  ;;  %v18239_v39 = vld [vmem:[#allocation4 + $0x172] sm:$0xff] }
 0x431   : > { %14011 = vmatprep.mubr.msk.f32.mxu0 %vm7497_vm5, %v18219_v37  ;;  %14063 = vmatprep.mubr.msk.f32.mxu1 %vm7497_vm5, %v18021_v34  ;;  %v18241_v34 = vld [vmem:[#allocation4 + $0x188] sm:$0xff] }
 0x434   : > { %14012 = vmatmul.mubr.msk.f32.gmra.mxu0 %vm7497_vm5, %v18225_v57  ;;  %14064 = vmatmul.mubr.msk.f32.gmra.mxu1 %vm7497_vm5, %v18023_v26 }
 0x435   : > { %14014 = vmatprep.mubr.msk.f32.mxu0 %vm7497_vm5, %v18231_v23  ;;  %14066 = vmatprep.mubr.msk.f32.mxu1 %vm7497_vm5, %v18233_v54  ;;  %v11954_v54 = vld [vmem:[%s19214_s5 + $0x60] sm:$0xff] }
 0x438   : > { %14015 = vmatmul.mubr.msk.f32.gmra.mxu0 %vm7497_vm5, %v18239_v39  ;;  %14067 = vmatmul.mubr.msk.f32.gmra.mxu1 %vm7497_vm5, %v18241_v34 }
 0x439   : > { %14073 = vmatprep.mubr.msk.f32.mxu0 %vm7497_vm5, %v17633_v29  ;;  %14125 = vmatprep.mubr.msk.f32.mxu1 %vm7497_vm5, %v18044_v55  ;;  %v11988_v29 = vld [vmem:[%s19214_s5 + $0x70] sm:$0xff]  ;;  %v19853_v55 = vld [vmem:[#allocation43_spill] sm:$0xff] }
 0x43c   : > { %14074 = vmatmul.mubr.msk.f32.vlgmr.msra.gmra.mxu0 %vm7497_vm5, %v17646_v43  ;;  %14126 = vmatmul.mubr.msk.f32.vlgmr.msra.gmra.mxu1 %vm7497_vm5, %v18053_v45  ;;  %v18270_v43 = vld [vmem:[%s19214_s5 + $0x88] sm:$0xff]  ;;  %v19852_v45 = vld [vmem:[#allocation63_spill] sm:$0xff] }
 0x43d   : > { %14174 = vmatpush3.msra.mxu0 %v18062_v22  ;;  %14076 = vmatprep.mubr.msk.f32.mxu0 %vm7497_vm5, %v17667_v48 }
 0x43e   : > { %14128 = vmatprep.mubr.msk.f32.mxu1 %vm7497_vm5, %v18068_v10  ;;  %14175 = vmatprep.subr.mxu0 %v11954_v54 }
 0x43f   : > { %14176 = vmatpush3.msra.mxu0 %v11954_v54  ;;  %14226 = vmatpush3.msra.mxu1 %v18080_v59  ;;  %v19851_v54 = vld [vmem:[#allocation30_spill] sm:$0xff] }
 0x440   : > { %14077 = vmatmul.mubr.msk.f32.gmra.mxu0 %vm7497_vm5, %v17680_v12  ;;  %14129 = vmatmul.mubr.msk.f32.gmra.mxu1 %vm7497_vm5, %v18075_v24 }
 0x441   : > { %14079 = vmatprep.mubr.msk.f32.mxu0 %vm7497_vm5, %v17700_v38  ;;  %14131 = vmatprep.mubr.msk.f32.mxu1 %vm7497_vm5, %v18086_v18 }
 0x442   : > { %14227 = vmatprep.subr.mxu1 %v11988_v29  ;;  %14277 = vmatprep.subr.mxu0 %v18270_v43 }
 0x443   : > { %14228 = vmatpush3.msra.mxu1 %v11988_v29 }
 0x444   : > { %14080 = vmatmul.mubr.msk.f32.gmra.mxu0 %vm7497_vm5, %v17713_v7  ;;  %14132 = vmatmul.mubr.msk.f32.gmra.mxu1 %vm7497_vm5, %v18093_v56 }
 0x445   : > { %14082 = vmatprep.mubr.msk.f32.mxu0 %vm7497_vm5, %v17733_v60  ;;  %14134 = vmatprep.mubr.msk.f32.mxu1 %vm7497_vm5, %v18099_v28 }
 0x448   : > { %14083 = vmatmul.mubr.msk.f32.gmra.mxu0 %vm7497_vm5, %v17746_v30  ;;  %14135 = vmatmul.mubr.msk.f32.gmra.mxu1 %vm7497_vm5, %v18105_v58 }
 0x449   : > { %14085 = vmatprep.mubr.msk.f32.mxu0 %vm7497_vm5, %v17766_v31  ;;  %14137 = vmatprep.mubr.msk.f32.mxu1 %vm7497_vm5, %v18111_v61 }
 0x44c   : > { %14086 = vmatmul.mubr.msk.f32.gmra.mxu0 %vm7497_vm5, %v17779_v40  ;;  %14138 = vmatmul.mubr.msk.f32.gmra.mxu1 %vm7497_vm5, %v18117_v8 }
 0x44d   : > { %14088 = vmatprep.mubr.msk.f32.mxu0 %vm7497_vm5, %v17799_v19  ;;  %14140 = vmatprep.mubr.msk.f32.mxu1 %vm7497_vm5, %v18123_v17 }
 0x450   : > { %14089 = vmatmul.mubr.msk.f32.gmra.mxu0 %vm7497_vm5, %v19851_v54  ;;  %14141 = vmatmul.mubr.msk.f32.gmra.mxu1 %vm7497_vm5, %v18129_v2 }
 0x451   : > { %14091 = vmatprep.mubr.msk.f32.mxu0 %vm7497_vm5, %v19852_v45  ;;  %14143 = vmatprep.mubr.msk.f32.mxu1 %vm7497_vm5, %v18135_v25 }
 0x454   : > { %14092 = vmatmul.mubr.msk.f32.gmra.mxu0 %vm7497_vm5, %v19853_v55  ;;  %14144 = vmatmul.mubr.msk.f32.gmra.mxu1 %vm7497_vm5, %v18141_v20  ;;  %v19854_v20 = vld [vmem:[#allocation60_spill] sm:$0xff] }
 0x455   : > { %14094 = vmatprep.mubr.msk.f32.mxu0 %vm7497_vm5, %v17863_v27  ;;  %14146 = vmatprep.mubr.msk.f32.mxu1 %vm7497_vm5, %v18147_v62 }
 0x458   : > { %14095 = vmatmul.mubr.msk.f32.gmra.mxu0 %vm7497_vm5, %v17876_v32  ;;  %14147 = vmatmul.mubr.msk.f32.gmra.mxu1 %vm7497_vm5, %v18153_v13  ;;  %v18381_v13 = vld [vmem:[#allocation4 + $0x181] sm:$0xff] }
 0x459   : > { %14097 = vmatprep.mubr.msk.f32.mxu0 %vm7497_vm5, %v17892_v52  ;;  %14149 = vmatprep.mubr.msk.f32.mxu1 %vm7497_vm5, %v18159_v33 }
 0x45c   : > { %14098 = vmatmul.mubr.msk.f32.gmra.mxu0 %vm7497_vm5, %v17905_v53  ;;  %14150 = vmatmul.mubr.msk.f32.gmra.mxu1 %vm7497_vm5, %v18165_v11  ;;  %v18383_v11 = vld [vmem:[#allocation4 + $0x182] sm:$0xff] }
 0x45d   : > { %14100 = vmatprep.mubr.msk.f32.mxu0 %vm7497_vm5, %v17920_v44  ;;  %14152 = vmatprep.mubr.msk.f32.mxu1 %vm7497_vm5, %v18171_v50  ;;  %v18389_v50 = vld [vmem:[#allocation4 + $0x189] sm:$0xff] }
 0x460   : > { %14101 = vmatmul.mubr.msk.f32.gmra.mxu0 %vm7497_vm5, %v17932_v49  ;;  %14153 = vmatmul.mubr.msk.f32.gmra.mxu1 %vm7497_vm5, %v18177_v42  ;;  %v18391_v42 = vld [vmem:[#allocation4 + $0x18a] sm:$0xff] }
 0x461   : > { %14103 = vmatprep.mubr.msk.f32.mxu0 %vm7497_vm5, %v17942_v21  ;;  %14155 = vmatprep.mubr.msk.f32.mxu1 %vm7497_vm5, %v18183_v41  ;;  %v12022_v41 = vld [vmem:[%s19214_s5 + $0x80] sm:$0xff] }
 0x464   : > { %14104 = vmatmul.mubr.msk.f32.gmra.mxu0 %vm7497_vm5, %v17955_v35  ;;  %14156 = vmatmul.mubr.msk.f32.gmra.mxu1 %vm7497_vm5, %v18189_v46  ;;  %v18411_v46 = vpop.f32.mrf.mxu0 }
 0x465   : > { %14106 = vmatprep.mubr.msk.f32.mxu0 %vm7497_vm5, %v17963_v0  ;;  %14158 = vmatprep.mubr.msk.f32.mxu1 %vm7497_vm5, %v18195_v51 }
 0x468   : > { %14107 = vmatmul.mubr.msk.f32.gmra.mxu0 %vm7497_vm5, %v17975_v47  ;;  %14159 = vmatmul.mubr.msk.f32.gmra.mxu1 %vm7497_vm5, %v18201_v6 }
 0x469   : > { %14109 = vmatprep.mubr.msk.f32.mxu0 %vm7497_vm5, %v17983_v36  ;;  %14161 = vmatprep.mubr.msk.f32.mxu1 %vm7497_vm5, %v18207_v16 }
 0x46c   : > { %14110 = vmatmul.mubr.msk.f32.gmra.mxu0 %vm7497_vm5, %v17995_v4  ;;  %14162 = vmatmul.mubr.msk.f32.gmra.mxu1 %vm7497_vm5, %v18213_v5 }
 0x46d   : > { %14112 = vmatprep.mubr.msk.f32.mxu0 %vm7497_vm5, %v18002_v9  ;;  %14164 = vmatprep.mubr.msk.f32.mxu1 %vm7497_vm5, %v18219_v37 }
 0x470   : > { %14113 = vmatmul.mubr.msk.f32.gmra.mxu0 %vm7497_vm5, %v18013_v3  ;;  %14165 = vmatmul.mubr.msk.f32.gmra.mxu1 %vm7497_vm5, %v18225_v57  ;;  %v19857_v57 = vld [vmem:[#allocation18_spill] sm:$0xff] }
 0x471   : > { %14115 = vmatprep.mubr.msk.f32.mxu0 %vm7497_vm5, %v18019_v14  ;;  %14167 = vmatprep.mubr.msk.f32.mxu1 %vm7497_vm5, %v18231_v23  ;;  %v19858_v23 = vld [vmem:[#allocation59_spill] sm:$0xff] }
 0x474   : > { %14116 = vmatmul.mubr.msk.f32.gmra.mxu0 %vm7497_vm5, %v19854_v20  ;;  %14168 = vmatmul.mubr.msk.f32.gmra.mxu1 %vm7497_vm5, %v18239_v39 }
 0x475   : > { %14118 = vmatprep.mubr.msk.f32.mxu0 %vm7497_vm5, %v18381_v13  ;;  %14170 = vmatprep.mubr.msk.f32.mxu1 %vm7497_vm5, %v18383_v11 }
 0x478   : > { %14119 = vmatmul.mubr.msk.f32.gmra.mxu0 %vm7497_vm5, %v18389_v50  ;;  %14171 = vmatmul.mubr.msk.f32.gmra.mxu1 %vm7497_vm5, %v18391_v42 }
 0x479   : > { %14177 = vmatprep.mubr.msk.f32.mxu0 %vm7497_vm5, %v17669_v15  ;;  %14229 = vmatprep.mubr.msk.f32.mxu1 %vm7497_vm5, %v17667_v48  ;;  %v18413_v15 = vpop.f32.mrf.mxu1 }
 0x47b   : > { %v13870_v48 = vpop.f32.mrf.mxu0 }
 0x47c   : > { %14178 = vmatmul.mubr.msk.f32.vlgmr.msra.gmra.mxu0 %vm7497_vm5, %v17671_v63  ;;  %14230 = vmatmul.mubr.msk.f32.vlgmr.msra.gmra.mxu1 %vm7497_vm5, %v17680_v12  ;;  %v13922_v51 = vpop.f32.mrf.mxu1  ;;  %v19855_v63 = vld [vmem:[#allocation64_spill] sm:$0xff] }
 0x47d   : > { %14278 = vmatpush3.msra.mxu0 %v18270_v43  ;;  %14180 = vmatprep.mubr.msk.f32.mxu0 %vm7497_vm5, %v17702_v1  ;;  %v18421_v12 = vadd.f32 %v13922_v51, %v13870_v48  ;;  %v19856_v1 = vld [vmem:[#allocation9_spill] sm:$0xff]  ;;  %v7827_v6 = vpop.f32.mrf.mxu0 }
 0x47e   : > { %14232 = vmatprep.mubr.msk.f32.mxu1 %vm7497_vm5, %v17700_v38  ;;  %14279 = vmatprep.subr.mxu0 %v12022_v41  ;;  %v8148_v38 = vpop.f32.mrf.mxu1  ;;  %v19859_v43 = vld [vmem:[#allocation29_spill] sm:$0xff] }
 0x47f   : > { %14280 = vmatpush3.msra.mxu0 %v12022_v41  ;;  %v18427_v16 = vadd.f32 %v8148_v38, %v7827_v6  ;;  %v13873_v5 = vpop.f32.mrf.mxu0  ;;  %v19860_v41 = vld [vmem:[#allocation15_spill] sm:$0xff]  ;;  %v19861_v6 = vld [vmem:[#allocation66_spill] sm:$0xff]  ;;  %v19862_v38 = vld [vmem:[#allocation17_spill] sm:$0xff] }
 0x480   : > { %14181 = vmatmul.mubr.msk.f32.gmra.mxu0 %vm7497_vm5, %v19855_v63  ;;  %14233 = vmatmul.mubr.msk.f32.gmra.mxu1 %vm7497_vm5, %v17713_v7  ;;  %v13925_v37 = vpop.f32.mrf.mxu1 }
 0x481   : > { %14183 = vmatprep.mubr.msk.f32.mxu0 %vm7497_vm5, %v19856_v1  ;;  %14235 = vmatprep.mubr.msk.f32.mxu1 %vm7497_vm5, %v17733_v60  ;;  %v18433_v7 = vadd.f32 %v13925_v37, %v13873_v5  ;;  %v7837_v60 = vpop.f32.mrf.mxu0 }
 0x482   : > { %v8158_v39 = vpop.f32.mrf.mxu1 }
 0x483   : > { %v18439_v22 = vadd.f32 %v8158_v39, %v7837_v60  ;;  %v19863_v60 = vld [vmem:[#allocation73_spill] sm:$0xff] }
 0x484   : > { %14184 = vmatmul.mubr.msk.f32.gmra.mxu0 %vm7497_vm5, %v19857_v57  ;;  %14236 = vmatmul.mubr.msk.f32.gmra.mxu1 %vm7497_vm5, %v17746_v30  ;;  %v13876_v59 = vpop.f32.mrf.mxu0  ;;  %v13928_v29 = vpop.f32.mrf.mxu1  ;;  %v19864_v39 = vld [vmem:[#allocation53_spill] sm:$0xff] }
 0x485   : > { %14186 = vmatprep.mubr.msk.f32.mxu0 %vm7497_vm5, %v19858_v23  ;;  %14238 = vmatprep.mubr.msk.f32.mxu1 %vm7497_vm5, %v17766_v31  ;;  %v18445_v30 = vadd.f32 %v13928_v29, %v13876_v59 }
 0x486   : > { %v7847_v31 = vpop.f32.mrf.mxu0  ;;  %v8168_v48 = vpop.f32.mrf.mxu1 }
 0x487   : > { %v18451_v51 = vadd.f32 %v8168_v48, %v7847_v31  ;;  %v19865_v31 = vld [vmem:[#allocation27_spill] sm:$0xff]  ;;  %v19866_v48 = vld [vmem:[#allocation34_spill] sm:$0xff] }
 0x488   : > { %14187 = vmatmul.mubr.msk.f32.gmra.mxu0 %vm7497_vm5, %v19859_v43  ;;  %14239 = vmatmul.mubr.msk.f32.gmra.mxu1 %vm7497_vm5, %v17779_v40  ;;  %v13879_v63 = vpop.f32.mrf.mxu0  ;;  %v13931_v1 = vpop.f32.mrf.mxu1 }
 0x489   : > { %14189 = vmatprep.mubr.msk.f32.mxu0 %vm7497_vm5, %v19860_v41  ;;  %14241 = vmatprep.mubr.msk.f32.mxu1 %vm7497_vm5, %v17799_v19  ;;  %v18457_v40 = vadd.f32 %v13931_v1, %v13879_v63 }
 0x48a   : > { %v7857_v19 = vpop.f32.mrf.mxu0  ;;  %v8178_v5 = vpop.f32.mrf.mxu1 }
 0x48b   : > { %v18463_v37 = vadd.f32 %v8178_v5, %v7857_v19  ;;  %v19867_v19 = vld [vmem:[#allocation61_spill] sm:$0xff]  ;;  %v19868_v5 = vld [vmem:[#allocation42_spill] sm:$0xff] }
 0x48c   : > { %14190 = vmatmul.mubr.msk.f32.gmra.mxu0 %vm7497_vm5, %v19861_v6  ;;  %14242 = vmatmul.mubr.msk.f32.gmra.mxu1 %vm7497_vm5, %v19851_v54  ;;  %v13882_v57 = vpop.f32.mrf.mxu0 }
 0x48d   : > { %14192 = vmatprep.mubr.msk.f32.mxu0 %vm7497_vm5, %v19862_v38  ;;  %14244 = vmatprep.mubr.msk.f32.mxu1 %vm7497_vm5, %v19852_v45  ;;  %v13934_v23 = vpop.f32.mrf.mxu1 }
 0x48e   : > { %v18469_v54 = vadd.f32 %v13934_v23, %v13882_v57  ;;  %v7867_v45 = vpop.f32.mrf.mxu0 }
 0x48f   : > { %v8188_v59 = vpop.f32.mrf.mxu1 }
 0x490   : > { %14193 = vmatmul.mubr.msk.f32.gmra.mxu0 %vm7497_vm5, %v19863_v60  ;;  %14245 = vmatmul.mubr.msk.f32.gmra.mxu1 %vm7497_vm5, %v19853_v55  ;;  %v18475_v29 = vadd.f32 %v8188_v59, %v7867_v45  ;;  %v19869_v45 = vld [vmem:[#allocation22_spill] sm:$0xff]  ;;  %v19870_v59 = vld [vmem:[#allocation57_spill] sm:$0xff] }
 0x491   : > { %14195 = vmatprep.mubr.msk.f32.mxu0 %vm7497_vm5, %v19864_v39  ;;  %14247 = vmatprep.mubr.msk.f32.mxu1 %vm7497_vm5, %v17863_v27  ;;  %v13885_v43 = vpop.f32.mrf.mxu0 }
 0x492   : > { %v13937_v41 = vpop.f32.mrf.mxu1 }
 0x493   : > { %v18481_v55 = vadd.f32 %v13937_v41, %v13885_v43  ;;  %v7877_v27 = vpop.f32.mrf.mxu0 }
 0x494   : > { %14196 = vmatmul.mubr.msk.f32.gmra.mxu0 %vm7497_vm5, %v19865_v31  ;;  %14248 = vmatmul.mubr.msk.f32.gmra.mxu1 %vm7497_vm5, %v17876_v32  ;;  %v8198_v63 = vpop.f32.mrf.mxu1 }
 0x495   : > { %14198 = vmatprep.mubr.msk.f32.mxu0 %vm7497_vm5, %v19866_v48  ;;  %14250 = vmatprep.mubr.msk.f32.mxu1 %vm7497_vm5, %v17892_v52  ;;  %v18487_v1 = vadd.f32 %v8198_v63, %v7877_v27  ;;  %v13888_v6 = vpop.f32.mrf.mxu0  ;;  %v19871_v27 = vld [vmem:[#allocation28_spill] sm:$0xff]  ;;  %v19872_v63 = vld [vmem:[#allocation11_spill] sm:$0xff] }
 0x496   : > { %v13940_v38 = vpop.f32.mrf.mxu1 }
 0x497   : > { %v18493_v32 = vadd.f32 %v13940_v38, %v13888_v6  ;;  %v7887_v52 = vpop.f32.mrf.mxu0 }
 0x498   : > { %14199 = vmatmul.mubr.msk.f32.gmra.mxu0 %vm7497_vm5, %v19867_v19  ;;  %14251 = vmatmul.mubr.msk.f32.gmra.mxu1 %vm7497_vm5, %v17905_v53  ;;  %v8208_v57 = vpop.f32.mrf.mxu1 }
 0x499   : > { %14201 = vmatprep.mubr.msk.f32.mxu0 %vm7497_vm5, %v19868_v5  ;;  %14253 = vmatprep.mubr.msk.f32.mxu1 %vm7497_vm5, %v17920_v44  ;;  %v18499_v23 = vadd.f32 %v8208_v57, %v7887_v52  ;;  %v19873_v52 = vld [vmem:[#allocation68_spill] sm:$0xff]  ;;  %v19874_v57 = vld [vmem:[#allocation33_spill] sm:$0xff] }
 0x49b   : > { %v13891_v60 = vpop.f32.mrf.mxu0  ;;  %v13943_v39 = vpop.f32.mrf.mxu1 }
 0x49c   : > { %14202 = vmatmul.mubr.msk.f32.gmra.mxu0 %vm7497_vm5, %v19869_v45  ;;  %14254 = vmatmul.mubr.msk.f32.gmra.mxu1 %vm7497_vm5, %v17932_v49  ;;  %v18505_v53 = vadd.f32 %v13943_v39, %v13891_v60 }
 0x49d   : > { %14204 = vmatprep.mubr.msk.f32.mxu0 %vm7497_vm5, %v19870_v59  ;;  %14256 = vmatprep.mubr.msk.f32.mxu1 %vm7497_vm5, %v17942_v21  ;;  %v7897_v44 = vpop.f32.mrf.mxu0  ;;  %v8218_v43 = vpop.f32.mrf.mxu1 }
 0x49e   : > { %v18511_v41 = vadd.f32 %v8218_v43, %v7897_v44  ;;  %v19875_v44 = vld [vmem:[#allocation70_spill] sm:$0xff]  ;;  %v19876_v43 = vld [vmem:[#allocation12_spill] sm:$0xff] }
 0x49f   : > { %v13894_v31 = vpop.f32.mrf.mxu0  ;;  %v13946_v48 = vpop.f32.mrf.mxu1 }
 0x4a0   : > { %14205 = vmatmul.mubr.msk.f32.gmra.mxu0 %vm7497_vm5, %v19871_v27  ;;  %14257 = vmatmul.mubr.msk.f32.gmra.mxu1 %vm7497_vm5, %v17955_v35  ;;  %v18517_v49 = vadd.f32 %v13946_v48, %v13894_v31 }
 0x4a1   : > { %14207 = vmatprep.mubr.msk.f32.mxu0 %vm7497_vm5, %v19872_v63  ;;  %14259 = vmatprep.mubr.msk.f32.mxu1 %vm7497_vm5, %v17963_v0  ;;  %v7907_v21 = vpop.f32.mrf.mxu0  ;;  %v8228_v6 = vpop.f32.mrf.mxu1 }
 0x4a2   : > { %v18523_v38 = vadd.f32 %v8228_v6, %v7907_v21  ;;  %v19877_v21 = vld [vmem:[#allocation79_spill] sm:$0xff]  ;;  %v19878_v6 = vld [vmem:[#allocation92_spill] sm:$0xff] }
 0x4a3   : > { %v13897_v19 = vpop.f32.mrf.mxu0  ;;  %v13949_v5 = vpop.f32.mrf.mxu1 }
 0x4a4   : > { %14208 = vmatmul.mubr.msk.f32.gmra.mxu0 %vm7497_vm5, %v19873_v52  ;;  %14260 = vmatmul.mubr.msk.f32.gmra.mxu1 %vm7497_vm5, %v17975_v47  ;;  %v18529_v35 = vadd.f32 %v13949_v5, %v13897_v19 }
 0x4a5   : > { %14210 = vmatprep.mubr.msk.f32.mxu0 %vm7497_vm5, %v19874_v57  ;;  %14262 = vmatprep.mubr.msk.f32.mxu1 %vm7497_vm5, %v17983_v36  ;;  %v7917_v0 = vpop.f32.mrf.mxu0  ;;  %v8238_v60 = vpop.f32.mrf.mxu1 }
 0x4a6   : > { %v18535_v39 = vadd.f32 %v8238_v60, %v7917_v0  ;;  %v19879_v0 = vld [vmem:[#allocation46_spill] sm:$0xff] }
 0x4a7   : > { %v13900_v45 = vpop.f32.mrf.mxu0  ;;  %v13952_v59 = vpop.f32.mrf.mxu1 }
 0x4a8   : > { %14211 = vmatmul.mubr.msk.f32.gmra.mxu0 %vm7497_vm5, %v19875_v44  ;;  %14263 = vmatmul.mubr.msk.f32.gmra.mxu1 %vm7497_vm5, %v17995_v4  ;;  %v18541_v47 = vadd.f32 %v13952_v59, %v13900_v45  ;;  %v9880_v45 = vld [vmem:[#allocation4 + $0x198] sm:$0xff] }
 0x4a9   : > { %14213 = vmatprep.mubr.msk.f32.mxu0 %vm7497_vm5, %v19876_v43  ;;  %14265 = vmatprep.mubr.msk.f32.mxu1 %vm7497_vm5, %v18002_v9  ;;  %v7927_v36 = vpop.f32.mrf.mxu0  ;;  %v8248_v31 = vpop.f32.mrf.mxu1  ;;  %v10268_v59 = vld [vmem:[#allocation4 + $0x199] sm:$0xff] }
 0x4aa   : > { %v18547_v48 = vadd.f32 %v8248_v31, %v7927_v36 }
 0x4ab   : > { %v13903_v27 = vpop.f32.mrf.mxu0  ;;  %v13955_v63 = vpop.f32.mrf.mxu1 }
 0x4ac   : > { %14214 = vmatmul.mubr.msk.f32.gmra.mxu0 %vm7497_vm5, %v19877_v21  ;;  %14266 = vmatmul.mubr.msk.f32.gmra.mxu1 %vm7497_vm5, %v18013_v3  ;;  %v18553_v4 = vadd.f32 %v13955_v63, %v13903_v27 }
 0x4ad   : > { %14216 = vmatprep.mubr.msk.f32.mxu0 %vm7497_vm5, %v19878_v6  ;;  %14268 = vmatprep.mubr.msk.f32.mxu1 %vm7497_vm5, %v18019_v14  ;;  %v7937_v9 = vpop.f32.mrf.mxu0  ;;  %v8258_v19 = vpop.f32.mrf.mxu1 }
 0x4ae   : > { %v18559_v5 = vadd.f32 %v8258_v19, %v7937_v9 }
 0x4af   : > { %v13906_v52 = vpop.f32.mrf.mxu0  ;;  %v13958_v57 = vpop.f32.mrf.mxu1 }
 0x4b0   : > { %14217 = vmatmul.mubr.msk.f32.gmra.mxu0 %vm7497_vm5, %v18023_v26  ;;  %14269 = vmatmul.mubr.msk.f32.gmra.mxu1 %vm7497_vm5, %v19854_v20  ;;  %v18565_v3 = vadd.f32 %v13958_v57, %v13906_v52  ;;  %v9881_v20 = vld [vmem:[#allocation4 + $0x1a0] sm:$0xff] }
 0x4b1   : > { %14219 = vmatprep.mubr.msk.f32.mxu0 %vm7497_vm5, %v19879_v0  ;;  %14271 = vmatprep.mubr.msk.f32.mxu1 %vm7497_vm5, %v18381_v13  ;;  %v7947_v14 = vpop.f32.mrf.mxu0  ;;  %v8268_v60 = vpop.f32.mrf.mxu1  ;;  %v10269_v13 = vld [vmem:[#allocation4 + $0x1a1] sm:$0xff]  ;;  %v8139_v0 = vadd.f32 %v18413_v15, %v18411_v46 }
 0x4b2   : > { %v18571_v44 = vadd.f32 %v8268_v60, %v7947_v14  ;;  %v19880_v14 = vld [vmem:[#allocation75_spill] sm:$0xff] }
 0x4b3   : > { %v13909_v43 = vpop.f32.mrf.mxu0 }
 0x4b4   : > { %v13961_v36 = vpop.f32.mrf.mxu1  ;;  %14220 = vmatmul.mubr.msk.f32.gmra.mxu0 %vm7497_vm5, %v18241_v34  ;;  %14272 = vmatmul.mubr.msk.f32.gmra.mxu1 %vm7497_vm5, %v18389_v50 }
 0x4b5   : > { %v18577_v26 = vadd.f32 %v13961_v36, %v13909_v43  ;;  %14222 = vmatprep.mubr.msk.f32.mxu0 %vm7497_vm5, %v9880_v45  ;;  %14274 = vmatprep.mubr.msk.f32.mxu1 %vm7497_vm5, %v10268_v59  ;;  %v7957_v31 = vpop.f32.mrf.mxu0 }
 0x4b6   : > { %v8278_v27 = vpop.f32.mrf.mxu1 }
 0x4b7   : > { %v18581_v63 = vadd.f32 %v8278_v27, %v7957_v31  ;;  %v13912_v21 = vpop.f32.mrf.mxu0 }
 0x4b8   : > { %v13964_v6 = vpop.f32.mrf.mxu1  ;;  %14223 = vmatmul.mubr.msk.f32.gmra.mxu0 %vm7497_vm5, %v9881_v20  ;;  %14275 = vmatmul.mubr.msk.f32.gmra.mxu1 %vm7497_vm5, %v10269_v13 }
 0x4b9   : > { %v18585_v34 = vadd.f32 %v13964_v6, %v13912_v21  ;;  %14281 = vmatprep.mubr.msk.f32.mxu0 %vm7497_vm5, %v18068_v10  ;;  %v7967_v50 = vpop.f32.mrf.mxu0 }
 0x4ba   : > { %v8288_v9 = vpop.f32.mrf.mxu1 }
 0x4bb   : > { %v18589_v19 = vadd.f32 %v8288_v9, %v7967_v50  ;;  %v13971_v52 = vpop.f32.mrf.mxu0 }
 0x4bc   : > { %v14023_v57 = vpop.f32.mrf.mxu1  ;;  %14282 = vmatmul.mubr.msk.f32.vlgmr.msra.gmra.mxu0 %vm7497_vm5, %v18075_v24  ;;  %v8654_v60 = vadd.f32 %v13971_v52, %v19880_v14 }
 0x4bd   : > { %14284 = vmatprep.mubr.msk.f32.mxu0 %vm7497_vm5, %v18086_v18  ;;  %v8494_v45 = vpop.f32.mrf.mxu0 }
 0x4be   : > { %v8882_v59 = vpop.f32.mrf.mxu1  ;;  %v18598_v10 = vadd.f32 %v14023_v57, %v8654_v60  ;;  %v8653_v43 = vadd.f32 %v8494_v45, %v8139_v0 }
 0x4c0   : > { %v13974_v36 = vpop.f32.mrf.mxu0  ;;  %v14026_v20 = vpop.f32.mrf.mxu1  ;;  %14285 = vmatmul.mubr.msk.f32.gmra.mxu0 %vm7497_vm5, %v18093_v56  ;;  %v18602_v13 = vadd.f32 %v8882_v59, %v8653_v43 }
 0x4c1   : > { %v8656_v24 = vadd.f32 %v13974_v36, %v18421_v12  ;;  %14287 = vmatprep.mubr.msk.f32.mxu0 %vm7497_vm5, %v18099_v28  ;;  %v10637_v36 = vld [vmem:[#allocation4 + $0xb2] sm:$0xff] }
 0x4c2   : > { %v8504_v46 = vpop.f32.mrf.mxu0  ;;  %v8892_v15 = vpop.f32.mrf.mxu1 }
 0x4c3   : > { %v18607_v18 = vadd.f32 %v14026_v20, %v8656_v24  ;;  %v8655_v31 = vadd.f32 %v8504_v46, %v18427_v16 }
 0x4c4   : > { %v13977_v27 = vpop.f32.mrf.mxu0  ;;  %v14029_v21 = vpop.f32.mrf.mxu1  ;;  %14288 = vmatmul.mubr.msk.f32.gmra.mxu0 %vm7497_vm5, %v18105_v58 }
 0x4c5   : > { %v18612_v6 = vadd.f32 %v8892_v15, %v8655_v31  ;;  %v8658_v56 = vadd.f32 %v13977_v27, %v18433_v7  ;;  %14290 = vmatprep.mubr.msk.f32.mxu0 %vm7497_vm5, %v18111_v61  ;;  %v10639_v31 = vld [vmem:[#allocation4 + $0xca] sm:$0xff] }
 0x4c6   : > { %v8514_v12 = vpop.f32.mrf.mxu0  ;;  %v8902_v28 = vpop.f32.mrf.mxu1 }
 0x4c7   : > { %v18617_v50 = vadd.f32 %v14029_v21, %v8658_v56  ;;  %v8657_v9 = vadd.f32 %v8514_v12, %v18439_v22 }
 0x4c8   : > { %v13980_v52 = vpop.f32.mrf.mxu0  ;;  %v14032_v16 = vpop.f32.mrf.mxu1  ;;  %14291 = vmatmul.mubr.msk.f32.gmra.mxu0 %vm7497_vm5, %v18117_v8 }
 0x4c9   : > { %v18622_v57 = vadd.f32 %v8902_v28, %v8657_v9  ;;  %v8660_v58 = vadd.f32 %v13980_v52, %v18445_v30  ;;  %14293 = vmatprep.mubr.msk.f32.mxu0 %vm7497_vm5, %v18123_v17  ;;  %v10641_v9 = vld [vmem:[#allocation4 + $0xe2] sm:$0xff] }
 0x4ca   : > { %v8524_v7 = vpop.f32.mrf.mxu0  ;;  %v8912_v61 = vpop.f32.mrf.mxu1 }
 0x4cb   : > { %v18627_v0 = vadd.f32 %v14032_v16, %v8660_v58  ;;  %v8659_v14 = vadd.f32 %v8524_v7, %v18451_v51  ;;  %v10642_v16 = vld [vmem:[#allocation4 + $0xf2] sm:$0xff] }
 0x4cc   : > { %v13983_v60 = vpop.f32.mrf.mxu0  ;;  %v14035_v22 = vpop.f32.mrf.mxu1  ;;  %14294 = vmatmul.mubr.msk.f32.gmra.mxu0 %vm7497_vm5, %v18129_v2 }
 0x4cd   : > { %v18632_v45 = vadd.f32 %v8912_v61, %v8659_v14  ;;  %v8662_v8 = vadd.f32 %v13983_v60, %v18457_v40  ;;  %14296 = vmatprep.mubr.msk.f32.mxu0 %vm7497_vm5, %v18135_v25  ;;  %v10643_v60 = vld [vmem:[#allocation4 + $0xfa] sm:$0xff] }
 0x4ce   : > { %v8534_v30 = vpop.f32.mrf.mxu0  ;;  %v8922_v17 = vpop.f32.mrf.mxu1 }
 0x4cf   : > { %v18637_v59 = vadd.f32 %v14035_v22, %v8662_v8  ;;  %v8661_v43 = vadd.f32 %v8534_v30, %v18463_v37  ;;  %v10644_v8 = vld [vmem:[#allocation4 + $0x10a] sm:$0xff] }
 0x4d0   : > { %v13986_v51 = vpop.f32.mrf.mxu0  ;;  %v14038_v20 = vpop.f32.mrf.mxu1  ;;  %14297 = vmatmul.mubr.msk.f32.gmra.mxu0 %vm7497_vm5, %v10637_v36 }
 0x4d1   : > { %v18641_v24 = vadd.f32 %v8922_v17, %v8661_v43  ;;  %v8664_v2 = vadd.f32 %v13986_v51, %v18469_v54  ;;  %14299 = vmatprep.mubr.msk.f32.mxu0 %vm7497_vm5, %v18147_v62 }
 0x4d2   : > { %v8544_v40 = vpop.f32.mrf.mxu0  ;;  %v8932_v25 = vpop.f32.mrf.mxu1 }
 0x4d3   : > { %v18646_v46 = vadd.f32 %v14038_v20, %v8664_v2  ;;  %v8663_v15 = vadd.f32 %v8544_v40, %v18475_v29  ;;  %v10645_v20 = vld [vmem:[#allocation4 + $0x112] sm:$0xff]  ;;  %v10646_v40 = vld [vmem:[#allocation4 + $0x122] sm:$0xff] }
 0x4d4   : > { %v13989_v37 = vpop.f32.mrf.mxu0  ;;  %v14041_v27 = vpop.f32.mrf.mxu1  ;;  %14300 = vmatmul.mubr.msk.f32.gmra.mxu0 %vm7497_vm5, %v10639_v31 }
 0x4d5   : > { %v18650_v21 = vadd.f32 %v8932_v25, %v8663_v15  ;;  %v8666_v56 = vadd.f32 %v13989_v37, %v18481_v55  ;;  %14302 = vmatprep.mubr.msk.f32.mxu0 %vm7497_vm5, %v18159_v33 }
 0x4d6   : > { %v8554_v54 = vpop.f32.mrf.mxu0  ;;  %v8942_v62 = vpop.f32.mrf.mxu1 }
 0x4d7   : > { %v18655_v12 = vadd.f32 %v14041_v27, %v8666_v56  ;;  %v8665_v28 = vadd.f32 %v8554_v54, %v18487_v1  ;;  %v10647_v56 = vld [vmem:[#allocation4 + $0x12a] sm:$0xff] }
 0x4d8   : > { %v13992_v29 = vpop.f32.mrf.mxu0  ;;  %v14044_v52 = vpop.f32.mrf.mxu1  ;;  %14303 = vmatmul.mubr.msk.f32.gmra.mxu0 %vm7497_vm5, %v10641_v9 }
 0x4d9   : > { %v18659_v58 = vadd.f32 %v8942_v62, %v8665_v28  ;;  %v8668_v7 = vadd.f32 %v13992_v29, %v18493_v32  ;;  %14305 = vmatprep.mubr.msk.f32.mxu0 %vm7497_vm5, %v10642_v16  ;;  %v10648_v62 = vld [vmem:[#allocation4 + $0x13a] sm:$0xff] }
 0x4da   : > { %v8564_v55 = vpop.f32.mrf.mxu0  ;;  %v8952_v33 = vpop.f32.mrf.mxu1 }
 0x4db   : > { %v18663_v61 = vadd.f32 %v14044_v52, %v8668_v7  ;;  %v8667_v14 = vadd.f32 %v8564_v55, %v18499_v23  ;;  %v10649_v7 = vld [vmem:[#allocation4 + $0x142] sm:$0xff] }
 0x4dc   : > { %v13995_v1 = vpop.f32.mrf.mxu0  ;;  %v14047_v22 = vpop.f32.mrf.mxu1  ;;  %14306 = vmatmul.mubr.msk.f32.gmra.mxu0 %vm7497_vm5, %v10643_v60 }
 0x4dd   : > { %v18667_v30 = vadd.f32 %v8952_v33, %v8667_v14  ;;  %v8670_v17 = vadd.f32 %v13995_v1, %v18505_v53  ;;  %14308 = vmatprep.mubr.msk.f32.mxu0 %vm7497_vm5, %v10644_v8  ;;  %v10650_v33 = vld [vmem:[#allocation4 + $0x152] sm:$0xff] }
 0x4de   : > { %v8574_v32 = vpop.f32.mrf.mxu0  ;;  %v8962_v43 = vpop.f32.mrf.mxu1 }
 0x4df   : > { %v18671_v36 = vadd.f32 %v14047_v22, %v8670_v17  ;;  %v8669_v51 = vadd.f32 %v8574_v32, %v18511_v41  ;;  %v10651_v17 = vld [vmem:[#allocation4 + $0x15a] sm:$0xff] }
 0x4e0   : > { %v13998_v23 = vpop.f32.mrf.mxu0  ;;  %v14050_v2 = vpop.f32.mrf.mxu1  ;;  %14309 = vmatmul.mubr.msk.f32.gmra.mxu0 %vm7497_vm5, %v10645_v20 }
 0x4e1   : > { %v18675_v25 = vadd.f32 %v8962_v43, %v8669_v51  ;;  %v8672_v15 = vadd.f32 %v13998_v23, %v18517_v49  ;;  %14311 = vmatprep.mubr.msk.f32.mxu0 %vm7497_vm5, %v10646_v40  ;;  %v10652_v43 = vld [vmem:[#allocation4 + $0x16a] sm:$0xff] }
 0x4e2   : > { %v8584_v53 = vpop.f32.mrf.mxu0  ;;  %v8972_v31 = vpop.f32.mrf.mxu1 }
 0x4e3   : > { %v18679_v37 = vadd.f32 %v14050_v2, %v8672_v15  ;;  %v8671_v27 = vadd.f32 %v8584_v53, %v18523_v38  ;;  %v10653_v15 = vld [vmem:[#allocation4 + $0x172] sm:$0xff] }
 0x4e4   : > { %v14001_v41 = vpop.f32.mrf.mxu0  ;;  %v14053_v54 = vpop.f32.mrf.mxu1  ;;  %14312 = vmatmul.mubr.msk.f32.gmra.mxu0 %vm7497_vm5, %v10647_v56 }
 0x4e5   : > { %v18683_v28 = vadd.f32 %v8972_v31, %v8671_v27  ;;  %v8674_v9 = vadd.f32 %v14001_v41, %v18529_v35  ;;  %14314 = vmatprep.mubr.msk.f32.mxu0 %vm7497_vm5, %v10648_v62  ;;  %v10656_v41 = vld [vmem:[#allocation4 + $0x19a] sm:$0xff] }
 0x4e6   : > { %v8594_v49 = vpop.f32.mrf.mxu0  ;;  %v8982_v29 = vpop.f32.mrf.mxu1 }
 0x4e7   : > { %v18687_v52 = vadd.f32 %v14053_v54, %v8674_v9  ;;  %v8673_v16 = vadd.f32 %v8594_v49, %v18535_v39 }
 0x4e8   : > { %v14004_v38 = vpop.f32.mrf.mxu0  ;;  %v14056_v55 = vpop.f32.mrf.mxu1  ;;  %14315 = vmatmul.mubr.msk.f32.gmra.mxu0 %vm7497_vm5, %v10649_v7 }
 0x4e9   : > { %v18691_v14 = vadd.f32 %v8982_v29, %v8673_v16  ;;  %v8676_v60 = vadd.f32 %v14004_v38, %v18541_v47  ;;  %14317 = vmatprep.mubr.msk.f32.mxu0 %vm7497_vm5, %v10650_v33 }
 0x4ea   : > { %v8604_v35 = vpop.f32.mrf.mxu0  ;;  %v8992_v1 = vpop.f32.mrf.mxu1 }
 0x4eb   : > { %v18695_v22 = vadd.f32 %v14056_v55, %v8676_v60  ;;  %v8675_v8 = vadd.f32 %v8604_v35, %v18547_v48 }
 0x4ec   : > { %v14007_v39 = vpop.f32.mrf.mxu0  ;;  %v14059_v32 = vpop.f32.mrf.mxu1  ;;  %14318 = vmatmul.mubr.msk.f32.gmra.mxu0 %vm7497_vm5, %v10651_v17 }
 0x4ed   : > { %v18699_v51 = vadd.f32 %v8992_v1, %v8675_v8  ;;  %v8678_v20 = vadd.f32 %v14007_v39, %v18553_v4  ;;  %14320 = vmatprep.mubr.msk.f32.mxu0 %vm7497_vm5, %v10652_v43 }
 0x4ee   : > { %v8614_v47 = vpop.f32.mrf.mxu0  ;;  %v9002_v23 = vpop.f32.mrf.mxu1 }
 0x4ef   : > { %v18703_v2 = vadd.f32 %v14059_v32, %v8678_v20  ;;  %v8677_v40 = vadd.f32 %v8614_v47, %v18559_v5 }
 0x4f0   : > { %v14010_v48 = vpop.f32.mrf.mxu0  ;;  %v14062_v53 = vpop.f32.mrf.mxu1  ;;  %14321 = vmatmul.mubr.msk.f32.gmra.mxu0 %vm7497_vm5, %v10653_v15 }
 0x4f1   : > { %v18707_v31 = vadd.f32 %v9002_v23, %v8677_v40  ;;  %v8680_v27 = vadd.f32 %v14010_v48, %v18565_v3  ;;  %14323 = vmatprep.mubr.msk.f32.mxu0 %vm7497_vm5, %v18383_v11  ;;  %v10657_v3 = vld [vmem:[#allocation4 + $0x1a2] sm:$0xff] }
 0x4f2   : > { %v8624_v4 = vpop.f32.mrf.mxu0  ;;  %v9012_v56 = vpop.f32.mrf.mxu1 }
 0x4f3   : > { %v18712_v54 = vadd.f32 %v14062_v53, %v8680_v27  ;;  %v8679_v62 = vadd.f32 %v8624_v4, %v18571_v44 }
 0x4f4   : > { %v14013_v5 = vpop.f32.mrf.mxu0  ;;  %v14065_v9 = vpop.f32.mrf.mxu1  ;;  %14324 = vmatmul.mubr.msk.f32.gmra.mxu0 %vm7497_vm5, %v18391_v42 }
 0x4f5   : > { %v18717_v49 = vadd.f32 %v9012_v56, %v8679_v62  ;;  %v8682_v29 = vadd.f32 %v14013_v5, %v18577_v26  ;;  %14326 = vmatprep.mubr.msk.f32.mxu0 %vm7497_vm5, %v10656_v41 }
 0x4f6   : > { %v8634_v11 = vpop.f32.mrf.mxu0  ;;  %v9022_v16 = vpop.f32.mrf.mxu1 }
 0x4f7   : > { %v18721_v7 = vadd.f32 %v14065_v9, %v8682_v29  ;;  %v8681_v38 = vadd.f32 %v8634_v11, %v18581_v63 }
 0x4f8   : > { %v14016_v55 = vpop.f32.mrf.mxu0  ;;  %v14068_v44 = vpop.f32.mrf.mxu1  ;;  %14327 = vmatmul.mubr.msk.f32.gmra.mxu0 %vm7497_vm5, %v10657_v3 }
 0x4f9   : > { %v18725_v33 = vadd.f32 %v9022_v16, %v8681_v38  ;;  %v8684_v42 = vadd.f32 %v14016_v55, %v18585_v34 }
 0x4fa   : > { %v8644_v60 = vpop.f32.mrf.mxu0  ;;  %v9032_v35 = vpop.f32.mrf.mxu1 }
 0x4fb   : > { %v18728_v26 = vadd.f32 %v14068_v44, %v8684_v42  ;;  %v8683_v1 = vadd.f32 %v8644_v60, %v18589_v19 }
 0x4fc   : > { %v14075_v8 = vpop.f32.mrf.mxu0  ;;  %v18731_v17 = vpop.f32.mrf.mxu1 }
 0x4fd   : > { %v18733_v39 = vadd.f32 %v9032_v35, %v8683_v1  ;;  %v18736_v63 = vadd.f32 %v14075_v8, %v18598_v10 }
 0x4fe   : > { %v9270_v32 = vpop.f32.mrf.mxu0  ;;  %v18738_v43 = vpop.f32.mrf.mxu1 }
 0x4ff   : > { %v18741_v20 = vadd.f32 %v9270_v32, %v18602_v13 }
 0x500   : > { %v14078_v34 = vpop.f32.mrf.mxu0  ;;  %v18743_v47 = vpop.f32.mrf.mxu1 }
 0x501   : > { %v18746_v23 = vadd.f32 %v14078_v34, %v18607_v18 }
 0x502   : > { %v9280_v19 = vpop.f32.mrf.mxu0  ;;  %v18748_v40 = vpop.f32.mrf.mxu1 }
 0x503   : > { %v18751_v15 = vadd.f32 %v9280_v19, %v18612_v6 }
 0x504   : > { %v14081_v10 = vpop.f32.mrf.mxu0  ;;  %v18753_v48 = vpop.f32.mrf.mxu1 }
 0x505   : > { %v18756_v53 = vadd.f32 %v14081_v10, %v18617_v50 }
 0x506   : > { %v9290_v13 = vpop.f32.mrf.mxu0  ;;  %v18758_v27 = vpop.f32.mrf.mxu1 }
 0x507   : > { %v18761_v4 = vadd.f32 %v9290_v13, %v18622_v57 }
 0x508   : > { %v14084_v18 = vpop.f32.mrf.mxu0  ;;  %v18763_v56 = vpop.f32.mrf.mxu1 }
 0x509   : > { %v18766_v41 = vadd.f32 %v14084_v18, %v18627_v0 }
 0x50a   : > { %v9300_v6 = vpop.f32.mrf.mxu0  ;;  %v18768_v62 = vpop.f32.mrf.mxu1 }
 0x50b   : > { %v18771_v5 = vadd.f32 %v9300_v6, %v18632_v45 }
 0x50c   : > { %v14087_v50 = vpop.f32.mrf.mxu0  ;;  %v18773_v9 = vpop.f32.mrf.mxu1 }
 0x50d   : > { %v18776_v29 = vadd.f32 %v14087_v50, %v18637_v59 }
 0x50e   : > { %v9310_v57 = vpop.f32.mrf.mxu0  ;;  %v18778_v3 = vpop.f32.mrf.mxu1 }
 0x50f   : > { %v18781_v11 = vadd.f32 %v9310_v57, %v18641_v24 }
 0x510   : > { %v14090_v0 = vpop.f32.mrf.mxu0  ;;  %v18783_v16 = vpop.f32.mrf.mxu1 }
 0x511   : > { %v18786_v38 = vadd.f32 %v14090_v0, %v18646_v46 }
 0x512   : > { %v9320_v45 = vpop.f32.mrf.mxu0  ;;  %v18788_v55 = vpop.f32.mrf.mxu1 }
 0x513   : > { %v18791_v44 = vadd.f32 %v9320_v45, %v18650_v21 }
 0x514   : > { %v14093_v59 = vpop.f32.mrf.mxu0  ;;  %v18793_v42 = vpop.f32.mrf.mxu1 }
 0x515   : > { %v18796_v60 = vadd.f32 %v14093_v59, %v18655_v12 }
 0x516   : > { %v9330_v24 = vpop.f32.mrf.mxu0  ;;  %v18798_v35 = vpop.f32.mrf.mxu1 }
 0x517   : > { %v18801_v1 = vadd.f32 %v9330_v24, %v18659_v58 }
 0x518   : > { %v14096_v46 = vpop.f32.mrf.mxu0  ;;  %v18803_v8 = vpop.f32.mrf.mxu1 }
 0x519   : > { %19881 = vst [vmem:[#allocation55_spill] sm:$0xff] %v18803_v8  ;;  %v18806_v32 = vadd.f32 %v14096_v46, %v18663_v61 }
 0x51a   : > { %v9340_v21 = vpop.f32.mrf.mxu0  ;;  %v18808_v34 = vpop.f32.mrf.mxu1 }
 0x51b   : > { %19882 = vst [vmem:[#allocation95_spill] sm:$0xff] %v18808_v34  ;;  %v18811_v19 = vadd.f32 %v9340_v21, %v18667_v30 }
 0x51c   : > { %v14099_v12 = vpop.f32.mrf.mxu0  ;;  %v18813_v10 = vpop.f32.mrf.mxu1 }
 0x51d   : > { %19883 = vst [vmem:[#allocation65_spill] sm:$0xff] %v18811_v19  ;;  %19884 = vst [vmem:[#allocation37_spill] sm:$0xff] %v18813_v10  ;;  %v18816_v13 = vadd.f32 %v14099_v12, %v18671_v36 }
 0x51e   : > { %v9350_v58 = vpop.f32.mrf.mxu0  ;;  %v18818_v18 = vpop.f32.mrf.mxu1 }
 0x51f   : > { %19885 = vst [vmem:[#allocation36_spill] sm:$0xff] %v18816_v13  ;;  %19886 = vst [vmem:[#allocation41_spill] sm:$0xff] %v18818_v18  ;;  %v18821_v6 = vadd.f32 %v9350_v58, %v18675_v25 }
 0x520   : > { %v14102_v61 = vpop.f32.mrf.mxu0  ;;  %v18823_v50 = vpop.f32.mrf.mxu1 }
 0x521   : > { %19887 = vst [vmem:[#allocation81_spill] sm:$0xff] %v18821_v6  ;;  %19888 = vst [vmem:[#allocation62_spill] sm:$0xff] %v18823_v50  ;;  %v18826_v57 = vadd.f32 %v14102_v61, %v18679_v37 }
 0x522   : > { %v9360_v30 = vpop.f32.mrf.mxu0  ;;  %v18828_v0 = vpop.f32.mrf.mxu1 }
 0x523   : > { %19889 = vst [vmem:[#allocation98_spill] sm:$0xff] %v18826_v57  ;;  %19890 = vst [vmem:[#allocation77_spill] sm:$0xff] %v18828_v0  ;;  %v18831_v45 = vadd.f32 %v9360_v30, %v18683_v28 }
 0x524   : > { %v14105_v36 = vpop.f32.mrf.mxu0  ;;  %v18833_v59 = vpop.f32.mrf.mxu1 }
 0x525   : > { %19891 = vst [vmem:[#allocation21_spill] sm:$0xff] %v18831_v45  ;;  %19892 = vst [vmem:[#allocation32_spill] sm:$0xff] %v18833_v59  ;;  %v18836_v24 = vadd.f32 %v14105_v36, %v18687_v52 }
 0x526   : > { %v9370_v25 = vpop.f32.mrf.mxu0  ;;  %v18838_v46 = vpop.f32.mrf.mxu1 }
 0x527   : > { %19893 = vst [vmem:[#allocation72_spill] sm:$0xff] %v18836_v24  ;;  %19894 = vst [vmem:[#allocation10_spill] sm:$0xff] %v18838_v46  ;;  %v18841_v21 = vadd.f32 %v9370_v25, %v18691_v14 }
 0x528   : > { %v14108_v37 = vpop.f32.mrf.mxu0  ;;  %v18843_v12 = vpop.f32.mrf.mxu1 }
 0x529   : > { %19895 = vst [vmem:[#allocation83_spill] sm:$0xff] %v18841_v21  ;;  %19896 = vst [vmem:[#allocation45_spill] sm:$0xff] %v18843_v12  ;;  %v18846_v58 = vadd.f32 %v14108_v37, %v18695_v22 }
 0x52a   : > { %v9380_v28 = vpop.f32.mrf.mxu0  ;;  %v18848_v61 = vpop.f32.mrf.mxu1 }
 0x52b   : > { %19897 = vst [vmem:[#allocation31_spill] sm:$0xff] %v18846_v58  ;;  %19898 = vst [vmem:[#allocation78_spill] sm:$0xff] %v18848_v61  ;;  %v18851_v30 = vadd.f32 %v9380_v28, %v18699_v51 }
 0x52c   : > { %v14111_v52 = vpop.f32.mrf.mxu0  ;;  %v18853_v36 = vpop.f32.mrf.mxu1 }
 0x52d   : > { %19899 = vst [vmem:[#allocation49_spill] sm:$0xff] %v18851_v30  ;;  %19900 = vst [vmem:[#allocation90_spill] sm:$0xff] %v18853_v36  ;;  %v18856_v46 = vadd.f32 %v14111_v52, %v18703_v2 }
 0x52e   : > { %v9390_v14 = vpop.f32.mrf.mxu0  ;;  %v18858_v25 = vpop.f32.mrf.mxu1 }
 0x52f   : > { %19901 = vst [vmem:[#allocation20_spill] sm:$0xff] %v18856_v46  ;;  %19902 = vst [vmem:[#allocation67_spill] sm:$0xff] %v18858_v25  ;;  %v18861_v12 = vadd.f32 %v9390_v14, %v18707_v31 }
 0x530   : > { %v14114_v22 = vpop.f32.mrf.mxu0  ;;  %v18863_v37 = vpop.f32.mrf.mxu1 }
 0x531   : > { %19903 = vst [vmem:[#allocation44_spill] sm:$0xff] %v18861_v12  ;;  %19904 = vst [vmem:[#allocation85_spill] sm:$0xff] %v18863_v37  ;;  %v18866_v61 = vadd.f32 %v14114_v22, %v18712_v54 }
 0x532   : > { %v9400_v51 = vpop.f32.mrf.mxu0  ;;  %v18868_v28 = vpop.f32.mrf.mxu1 }
 0x533   : > { %19905 = vst [vmem:[#allocation91_spill] sm:$0xff] %v18866_v61  ;;  %19906 = vst [vmem:[#allocation80_spill] sm:$0xff] %v18868_v28  ;;  %v18871_v36 = vadd.f32 %v9400_v51, %v18717_v49 }
 0x534   : > { %v14117_v2 = vpop.f32.mrf.mxu0  ;;  %v18873_v52 = vpop.f32.mrf.mxu1 }
 0x535   : > { %19907 = vst [vmem:[#allocation88_spill] sm:$0xff] %v18871_v36  ;;  %19908 = vst [vmem:[#allocation93_spill] sm:$0xff] %v18873_v52  ;;  %v18876_v25 = vadd.f32 %v14117_v2, %v18721_v7 }
 0x536   : > { %v9410_v31 = vpop.f32.mrf.mxu0  ;;  %v18878_v14 = vpop.f32.mrf.mxu1 }
 0x537   : > { %19909 = vst [vmem:[#allocation74_spill] sm:$0xff] %v18876_v25  ;;  %19910 = vst [vmem:[#allocation35_spill] sm:$0xff] %v18878_v14  ;;  %v18881_v37 = vadd.f32 %v9410_v31, %v18725_v33 }
 0x538   : > { %v14120_v54 = vpop.f32.mrf.mxu0  ;;  %v18883_v22 = vpop.f32.mrf.mxu1 }
 0x539   : > { %19911 = vst [vmem:[#allocation82_spill] sm:$0xff] %v18881_v37  ;;  %19912 = vst [vmem:[#allocation48_spill] sm:$0xff] %v18883_v22  ;;  %v18886_v28 = vadd.f32 %v14120_v54, %v18728_v26 }
 0x53a   : > { %v9420_v49 = vpop.f32.mrf.mxu0  ;;  %v18888_v51 = vpop.f32.mrf.mxu1 }
 0x53b   : > { %19913 = vst [vmem:[#allocation94_spill] sm:$0xff] %v18886_v28  ;;  %19914 = vst [vmem:[#allocation47_spill] sm:$0xff] %v18888_v51  ;;  %v18891_v52 = vadd.f32 %v9420_v49, %v18733_v39 }
 0x53c   : > { %v14179_v7 = vpop.f32.mrf.mxu0  ;;  %v14231_v2 = vpop.f32.mrf.mxu1 }
 0x53d   : > { %19915 = vst [vmem:[#allocation86_spill] sm:$0xff] %v18891_v52 }
 0x53e   : > { %v10047_v25 = vpop.f32.mrf.mxu0  ;;  %v10435_v36 = vpop.f32.mrf.mxu1 }
 0x540   : > { %v14182_v14 = vpop.f32.mrf.mxu0  ;;  %v14234_v33 = vpop.f32.mrf.mxu1 }
 0x542   : > { %v10057_v61 = vpop.f32.mrf.mxu0  ;;  %v18895_v22 = vpop.f32.mrf.mxu1 }
 0x544   : > { %v14185_v31 = vpop.f32.mrf.mxu0  ;;  %v18901_v51 = vpop.f32.mrf.mxu1 }
 0x546   : > { %v18893_v37 = vpop.f32.mrf.mxu0  ;;  %v18907_v52 = vpop.f32.mrf.mxu1 }
 0x548   : > { %v18897_v26 = vpop.f32.mrf.mxu0  ;;  %v18913_v46 = vpop.f32.mrf.mxu1 }
 0x54a   : > { %v18899_v54 = vpop.f32.mrf.mxu0  ;;  %v18919_v21 = vpop.f32.mrf.mxu1 }
 0x54c   : > { %v18903_v39 = vpop.f32.mrf.mxu0  ;;  %v18925_v0 = vpop.f32.mrf.mxu1 }
 0x54e   : > { %v18905_v49 = vpop.f32.mrf.mxu0  ;;  %v18931_v57 = vpop.f32.mrf.mxu1 }
 0x550   : > { %v18909_v28 = vpop.f32.mrf.mxu0  ;;  %v18937_v10 = vpop.f32.mrf.mxu1 }
 0x552   : > { %v18911_v12 = vpop.f32.mrf.mxu0 }
 0x554   : > { %v18915_v30 = vpop.f32.mrf.mxu0 }
 0x556   : > { %v18917_v58 = vpop.f32.mrf.mxu0 }
 0x557   : > { %19916 = vst [vmem:[#allocation96_spill] sm:$0xff] %v18917_v58 }
 0x558   : > { %v18921_v59 = vpop.f32.mrf.mxu0 }
 0x559   : > { %19917 = vst [vmem:[#allocation40_spill] sm:$0xff] %v18921_v59  ;;  %v18943_v59 = vpop.f32.mrf.mxu1 }
 0x55a   : > { %v18923_v24 = vpop.f32.mrf.mxu0 }
 0x55b   : > { %19918 = vst [vmem:[#allocation69_spill] sm:$0xff] %v18923_v24 }
 0x55c   : > { %v18927_v45 = vpop.f32.mrf.mxu0 }
 0x55d   : > { %19919 = vst [vmem:[#allocation50_spill] sm:$0xff] %v18927_v45  ;;  %v18949_v45 = vpop.f32.mrf.mxu1 }
 0x55e   : > { %v18929_v50 = vpop.f32.mrf.mxu0  ;;  %19927 = vst [vmem:[#allocation26_spill] sm:$0xff] %v18949_v45 }
 0x55f   : > { %19920 = vst [vmem:[#allocation84_spill] sm:$0xff] %v18929_v50 }
 0x560   : > { %v18933_v18 = vpop.f32.mrf.mxu0 }
 0x561   : > { %19921 = vst [vmem:[#allocation97_spill] sm:$0xff] %v18933_v18  ;;  %v18955_v18 = vpop.f32.mrf.mxu1 }
 0x562   : > { %v18935_v6 = vpop.f32.mrf.mxu0  ;;  %19930 = vst [vmem:[#allocation8_spill] sm:$0xff] %v18955_v18 }
 0x563   : > { %19922 = vst [vmem:[#allocation87_spill] sm:$0xff] %v18935_v6 }
 0x564   : > { %v18939_v13 = vpop.f32.mrf.mxu0 }
 0x565   : > { %19923 = vst [vmem:[#allocation51_spill] sm:$0xff] %v18939_v13  ;;  %v18961_v13 = vpop.f32.mrf.mxu1 }
 0x566   : > { %v18941_v34 = vpop.f32.mrf.mxu0  ;;  %19933 = vst [vmem:[#allocation71_spill] sm:$0xff] %v18961_v13 }
 0x567   : > { %19924 = vst [vmem:[#allocation99_spill] sm:$0xff] %v18941_v34 }
 0x568   : > { %v18945_v24 = vpop.f32.mrf.mxu0 }
 0x569   : > { %19925 = vst [vmem:[#allocation39_spill] sm:$0xff] %v18945_v24  ;;  %v9818_v24 = vadd.f32 %v18731_v17, %v18736_v63  ;;  %v9819_v17 = vadd.f32 %v18748_v40, %v18751_v15 }
 0x56a   : > { %v18947_v19 = vpop.f32.mrf.mxu0 }
 0x56b   : > { %19926 = vst [vmem:[#allocation76_spill] sm:$0xff] %v18947_v19  ;;  %v10207_v45 = vadd.f32 %v14179_v7, %v9818_v24  ;;  %v9822_v24 = vadd.f32 %v18753_v48, %v18756_v53  ;;  %v9824_v53 = vadd.f32 %v18763_v56, %v18766_v41 }
 0x56c   : > { %v18951_v50 = vpop.f32.mrf.mxu0 }
 0x56d   : > { %19928 = vst [vmem:[#allocation89_spill] sm:$0xff] %v18951_v50  ;;  %v9817_v50 = vadd.f32 %v18738_v43, %v18741_v20  ;;  %v10595_v63 = vadd.f32 %v14231_v2, %v10207_v45  ;;  %v18986_v20 = vld [vmem:[%s19215_s6] ss:$0 sm:$0xff]  ;;  %v10213_v56 = vadd.f32 %v18897_v26, %v9824_v53  ;;  %v9825_v26 = vadd.f32 %v18778_v3, %v18781_v11 }
 0x56e   : > { %v18953_v58 = vpop.f32.mrf.mxu0 }
 0x56f   : > { %19929 = vst [vmem:[#allocation100_spill] sm:$0xff] %v18953_v58  ;;  %v18971_v58 = vpop.f32.mrf.mxu1  ;;  %v10214_v3 = vadd.f32 %v18905_v49, %v9825_v26  ;;  %v9830_v49 = vadd.f32 %v18793_v42, %v18796_v60 }
 0x570   : > { %v18957_v6 = vpop.f32.mrf.mxu0 }
 0x571   : > { %19931 = vst [vmem:[#allocation6_spill] sm:$0xff] %v18957_v6  ;;  %v10206_v6 = vadd.f32 %v10047_v25, %v9817_v50  ;;  %v9821_v25 = vadd.f32 %v18758_v27, %v18761_v4  ;;  %v10219_v42 = vadd.f32 %v18915_v30, %v9830_v49 }
 0x572   : > { %v18959_v8 = vpop.f32.mrf.mxu0 }
 0x573   : > { %19932 = vst [vmem:[#allocation19_spill] sm:$0xff] %v18959_v8  ;;  %v9820_v8 = vadd.f32 %v18743_v47, %v18746_v23  ;;  %v10594_v47 = vadd.f32 %v10435_v36, %v10206_v6  ;;  %v10208_v23 = vadd.f32 %v10057_v61, %v9819_v17  ;;  %v10210_v61 = vadd.f32 %v18893_v37, %v9821_v25 }
 0x574   : > { %v18963_v34 = vpop.f32.mrf.mxu0 }
 0x575   : > { %19934 = vst [vmem:[#allocation5_spill] sm:$0xff] %v18963_v34  ;;  %v18981_v34 = vpop.f32.mrf.mxu1  ;;  %v10596_v4 = vadd.f32 %v18895_v22, %v10208_v23  ;;  %v9826_v22 = vadd.f32 %v18773_v9, %v18776_v29  ;;  %v10598_v17 = vadd.f32 %v18907_v52, %v10210_v61 }
 0x576   : > { %v18967_v19 = vpop.f32.mrf.mxu0 }
 0x577   : > { %19935 = vst [vmem:[#allocation58_spill] sm:$0xff] %v18967_v19  ;;  %v10209_v19 = vadd.f32 %v14182_v14, %v9820_v8  ;;  %v10211_v8 = vadd.f32 %v14185_v31, %v9822_v24  ;;  %v19002_v6 = vpop.f32.mrf.mxu1  ;;  %v9823_v14 = vadd.f32 %v18768_v62, %v18771_v5  ;;  %v10215_v9 = vadd.f32 %v18903_v39, %v9826_v22  ;;  %v19942_v22 = vld [vmem:[#allocation36_spill] sm:$0xff] }
 0x578   : > { %v18973_v18 = vpop.f32.mrf.mxu0  ;;  %v9827_v39 = vadd.f32 %v18788_v55, %v18791_v44 }
 0x579   : > { %v10597_v15 = vadd.f32 %v14234_v33, %v10209_v19  ;;  %v10599_v2 = vadd.f32 %v18901_v51, %v10211_v8  ;;  %v19018_v33 = vpop.f32.mrf.mxu1  ;;  %v10212_v62 = vadd.f32 %v18899_v54, %v9823_v14  ;;  %v9828_v54 = vadd.f32 %v18783_v16, %v18786_v38 }
 0x57a   : > { %v18977_v13 = vpop.f32.mrf.mxu0  ;;  %v10603_v25 = vadd.f32 %v18925_v0, %v10215_v9  ;;  %v10602_v8 = vadd.f32 %v18931_v57, %v10214_v3  ;;  %v10216_v55 = vadd.f32 %v18911_v12, %v9827_v39  ;;  %v19936_v12 = vld [vmem:[#allocation55_spill] sm:$0xff] }
 0x57b   : > { %v19034_v24 = vpop.f32.mrf.mxu1  ;;  %v10600_v23 = vadd.f32 %v18919_v21, %v10212_v62  ;;  %v10217_v16 = vadd.f32 %v18909_v28, %v9828_v54  ;;  %v9829_v28 = vadd.f32 %v18798_v35, %v18801_v1  ;;  %v9832_v53 = vadd.f32 %v19936_v12, %v18806_v32  ;;  %v19937_v35 = vld [vmem:[#allocation96_spill] sm:$0xff]  ;;  %v19947_v54 = vld [vmem:[#allocation41_spill] sm:$0xff]  ;;  %v19948_v3 = vld [vmem:[#allocation71_spill] sm:$0xff] }
 0x57c   : > { %v14283_v43 = vpop.f32.mrf.mxu0  ;;  %v10604_v61 = vadd.f32 %v18943_v59, %v10216_v55  ;;  %v19941_v32 = vld [vmem:[#allocation40_spill] sm:$0xff]  ;;  %v19955_v12 = vld [vmem:[#allocation97_spill] sm:$0xff] }
 0x57d   : > { %v10983_v50 = vadd.f32 %v14283_v43, %v10595_v63  ;;  %v10601_v43 = vadd.f32 %v18913_v46, %v10213_v56  ;;  %v10218_v1 = vadd.f32 %v19937_v35, %v9829_v28  ;;  %v19952_v55 = vld [vmem:[#allocation84_spill] sm:$0xff] }
 0x57e   : > { %v10823_v40 = vpop.f32.mrf.mxu0  ;;  %v19957_v35 = vld [vmem:[#allocation32_spill] sm:$0xff] }
 0x57f   : > { %v11022_v45 = vadd.f32 %v18986_v20, %v10983_v50  ;;  %v10982_v48 = vadd.f32 %v10823_v40, %v10594_v47  ;;  %v19050_v40 = vpop.f32.mrf.mxu1 }
 0x580   : > { %v14286_v27 = vpop.f32.mrf.mxu0 }
 0x581   : > { %11054 = vst.msk [vmem:[%s18997_s9 + $0x8] sm:$0xff] %vm279_vm1, %v11022_v45  ;;  %v11021_v19 = vadd.f32 %v18986_v20, %v10982_v48  ;;  %v10985_v36 = vadd.f32 %v14286_v27, %v10597_v15  ;;  %v10605_v48 = vadd.f32 %v18937_v10, %v10217_v16  ;;  %v19066_v27 = vpop.f32.mrf.mxu1  ;;  %v19950_v16 = vld [vmem:[#allocation98_spill] sm:$0xff] }
 0x582   : > { %v10833_v7 = vpop.f32.mrf.mxu0 }
 0x583   : > { %11053 = vst.msk [vmem:[%s18997_s9] sm:$0xff] %vm279_vm1, %v11021_v19  ;;  %v11024_v41 = vadd.f32 %v18986_v20, %v10985_v36  ;;  %v10984_v37 = vadd.f32 %v10833_v7, %v10596_v4  ;;  %v19938_v19 = vld [vmem:[#allocation65_spill] sm:$0xff]  ;;  %v19939_v36 = vld [vmem:[#allocation95_spill] sm:$0xff]  ;;  %v19082_v62 = vpop.f32.mrf.mxu1 }
 0x584   : > { %v14289_v31 = vpop.f32.mrf.mxu0  ;;  %v9831_v14 = vadd.f32 %v19939_v36, %v19938_v19  ;;  %v19958_v36 = vld [vmem:[#allocation87_spill] sm:$0xff] }
 0x585   : > { %11056 = vst.msk [vmem:[%s18997_s9 + $0x18] sm:$0xff] %vm279_vm1, %v11024_v41  ;;  %v11023_v5 = vadd.f32 %v18986_v20, %v10984_v37  ;;  %v10987_v51 = vadd.f32 %v14289_v31, %v10599_v2  ;;  %v19940_v2 = vld [vmem:[#allocation26_spill] sm:$0xff]  ;;  %v10221_v41 = vadd.f32 %v19941_v32, %v9832_v53  ;;  %v19943_v31 = vld [vmem:[#allocation37_spill] sm:$0xff]  ;;  %v10545_v49 = vpop.f32.mrf.mxu1 }
 0x586   : > { %v10843_v63 = vpop.f32.mrf.mxu0  ;;  %v10607_v56 = vadd.f32 %v19940_v2, %v10219_v42  ;;  %v19959_v2 = vld [vmem:[#allocation83_spill] sm:$0xff] }
 0x587   : > { %11055 = vst.msk [vmem:[%s18997_s9 + $0x10] sm:$0xff] %vm279_vm1, %v11023_v5  ;;  %v11026_v29 = vadd.f32 %v18986_v20, %v10987_v51  ;;  %v10986_v52 = vadd.f32 %v10843_v63, %v10598_v17  ;;  %v9834_v17 = vadd.f32 %v19943_v31, %v19942_v22  ;;  %v19944_v51 = vld [vmem:[#allocation8_spill] sm:$0xff]  ;;  %v19945_v63 = vld [vmem:[#allocation69_spill] sm:$0xff] }
 0x588   : > { %v14292_v47 = vpop.f32.mrf.mxu0  ;;  %v10606_v26 = vadd.f32 %v19944_v51, %v10218_v1 }
 0x589   : > { %11058 = vst.msk [vmem:[%s18997_s9 + $0x28] sm:$0xff] %vm279_vm1, %v11026_v29  ;;  %v11025_v11 = vadd.f32 %v18986_v20, %v10986_v52  ;;  %v10989_v46 = vadd.f32 %v14292_v47, %v10601_v43  ;;  %v10220_v43 = vadd.f32 %v19945_v63, %v9831_v14  ;;  %v19946_v52 = vld [vmem:[#allocation81_spill] sm:$0xff] }
 0x58a   : > { %v10853_v50 = vpop.f32.mrf.mxu0  ;;  %v9833_v47 = vadd.f32 %v19947_v54, %v19946_v52  ;;  %v19965_v54 = vld [vmem:[#allocation49_spill] sm:$0xff] }
 0x58b   : > { %11057 = vst.msk [vmem:[%s18997_s9 + $0x20] sm:$0xff] %vm279_vm1, %v11025_v11  ;;  %v11028_v38 = vadd.f32 %v18986_v20, %v10989_v46  ;;  %v10988_v21 = vadd.f32 %v10853_v50, %v10600_v23  ;;  %v10609_v11 = vadd.f32 %v19948_v3, %v10221_v41  ;;  %v19949_v46 = vld [vmem:[#allocation50_spill] sm:$0xff] }
 0x58c   : > { %v14295_v15 = vpop.f32.mrf.mxu0  ;;  %v10223_v39 = vadd.f32 %v19949_v46, %v9834_v17  ;;  %v19962_v17 = vld [vmem:[#allocation31_spill] sm:$0xff] }
 0x58d   : > { %11060 = vst.msk [vmem:[%s18997_s9 + $0x38] sm:$0xff] %vm279_vm1, %v11028_v38  ;;  %v11027_v44 = vadd.f32 %v18986_v20, %v10988_v21  ;;  %v10991_v0 = vadd.f32 %v14295_v15, %v10603_v25  ;;  %v19951_v38 = vld [vmem:[#allocation62_spill] sm:$0xff]  ;;  %v19967_v46 = vld [vmem:[#allocation39_spill] sm:$0xff] }
 0x58e   : > { %v10863_v45 = vpop.f32.mrf.mxu0  ;;  %v9836_v21 = vadd.f32 %v19951_v38, %v19950_v16  ;;  %v19969_v16 = vld [vmem:[#allocation90_spill] sm:$0xff] }
 0x58f   : > { %11059 = vst.msk [vmem:[%s18997_s9 + $0x30] sm:$0xff] %vm279_vm1, %v11027_v44  ;;  %v11030_v60 = vadd.f32 %v18986_v20, %v10991_v0  ;;  %v10990_v57 = vadd.f32 %v10863_v45, %v10602_v8  ;;  %v10608_v8 = vadd.f32 %v18971_v58, %v10220_v43  ;;  %v10222_v44 = vadd.f32 %v19952_v55, %v9833_v47  ;;  %v19953_v45 = vld [vmem:[#allocation21_spill] sm:$0xff]  ;;  %v19966_v47 = vld [vmem:[#allocation78_spill] sm:$0xff]  ;;  %v19970_v55 = vld [vmem:[#allocation76_spill] sm:$0xff] }
 0x590   : > { %v14298_v4 = vpop.f32.mrf.mxu0  ;;  %v10225_v53 = vadd.f32 %v19955_v12, %v9836_v21 }
 0x591   : > { %11062 = vst.msk [vmem:[%s18997_s9 + $0x48] sm:$0xff] %vm279_vm1, %v11030_v60  ;;  %v11029_v10 = vadd.f32 %v18986_v20, %v10990_v57  ;;  %v10993_v30 = vadd.f32 %v14298_v4, %v10605_v48  ;;  %v19954_v48 = vld [vmem:[#allocation77_spill] sm:$0xff]  ;;  %v10611_v57 = vadd.f32 %v18981_v34, %v10223_v39  ;;  %v10610_v19 = vadd.f32 %v19002_v6, %v10222_v44 }
 0x592   : > { %v10873_v7 = vpop.f32.mrf.mxu0  ;;  %v9835_v42 = vadd.f32 %v19954_v48, %v19953_v45  ;;  %v19972_v45 = vld [vmem:[#allocation67_spill] sm:$0xff] }
 0x593   : > { %11061 = vst.msk [vmem:[%s18997_s9 + $0x40] sm:$0xff] %vm279_vm1, %v11029_v10  ;;  %v11032_v59 = vadd.f32 %v18986_v20, %v10993_v30  ;;  %v10992_v37 = vadd.f32 %v10873_v7, %v10604_v61  ;;  %v19956_v61 = vld [vmem:[#allocation72_spill] sm:$0xff]  ;;  %v14267_v10 = vpop.f32.mrf.mxu1 }
 0x594   : > { %v14301_v5 = vpop.f32.mrf.mxu0  ;;  %v9838_v1 = vadd.f32 %v19957_v35, %v19956_v61  ;;  %v10224_v14 = vadd.f32 %v19958_v36, %v9835_v42 }
 0x595   : > { %11064 = vst.msk [vmem:[%s18997_s9 + $0x58] sm:$0xff] %vm279_vm1, %v11032_v59  ;;  %v11031_v9 = vadd.f32 %v18986_v20, %v10992_v37  ;;  %v10995_v29 = vadd.f32 %v14301_v5, %v10607_v56  ;;  %v19960_v56 = vld [vmem:[#allocation10_spill] sm:$0xff]  ;;  %v10613_v59 = vadd.f32 %v19018_v33, %v10225_v53  ;;  %v19961_v37 = vld [vmem:[#allocation51_spill] sm:$0xff]  ;;  %v19963_v5 = vld [vmem:[#allocation45_spill] sm:$0xff] }
 0x596   : > { %v10883_v23 = vpop.f32.mrf.mxu0  ;;  %v9837_v32 = vadd.f32 %v19960_v56, %v19959_v2  ;;  %v10227_v22 = vadd.f32 %v19961_v37, %v9838_v1  ;;  %v9840_v51 = vadd.f32 %v19963_v5, %v19962_v17  ;;  %v10612_v43 = vadd.f32 %v19034_v24, %v10224_v14 }
 0x597   : > { %11063 = vst.msk [vmem:[%s18997_s9 + $0x50] sm:$0xff] %vm279_vm1, %v11031_v9  ;;  %v11034_v50 = vadd.f32 %v18986_v20, %v10995_v29  ;;  %v10994_v25 = vadd.f32 %v10883_v23, %v10606_v26  ;;  %v10555_v26 = vpop.f32.mrf.mxu1  ;;  %v19964_v9 = vld [vmem:[#allocation99_spill] sm:$0xff]  ;;  %v9839_v23 = vadd.f32 %v19966_v47, %v19965_v54 }
 0x598   : > { %v14304_v15 = vpop.f32.mrf.mxu0  ;;  %v10226_v29 = vadd.f32 %v19964_v9, %v9837_v32  ;;  %v10229_v39 = vadd.f32 %v19967_v46, %v9840_v51  ;;  %v19986_v46 = vld [vmem:[#allocation94_spill] sm:$0xff] }
 0x599   : > { %11066 = vst.msk [vmem:[%s18997_s9 + $0x68] sm:$0xff] %vm279_vm1, %v11034_v50  ;;  %v11033_v0 = vadd.f32 %v18986_v20, %v10994_v25  ;;  %v10997_v28 = vadd.f32 %v14304_v15, %v10609_v11  ;;  %v10615_v11 = vadd.f32 %v19050_v40, %v10227_v22  ;;  %v19968_v25 = vld [vmem:[#allocation20_spill] sm:$0xff]  ;;  %v14270_v21 = vpop.f32.mrf.mxu1  ;;  %v10228_v44 = vadd.f32 %v19970_v55, %v9839_v23  ;;  %v19980_v22 = vld [vmem:[#allocation74_spill] sm:$0xff]  ;;  %v19985_v23 = vld [vmem:[#allocation5_spill] sm:$0xff] }
 0x59a   : > { %v10893_v60 = vpop.f32.mrf.mxu0  ;;  %v9842_v38 = vadd.f32 %v19969_v16, %v19968_v25  ;;  %v19989_v55 = vld [vmem:[#allocation86_spill] sm:$0xff] }
 0x59b   : > { %11065 = vst.msk [vmem:[%s18997_s9 + $0x60] sm:$0xff] %vm279_vm1, %v11033_v0  ;;  %v11036_v58 = vadd.f32 %v18986_v20, %v10997_v28  ;;  %v10996_v4 = vadd.f32 %v10893_v60, %v10608_v8  ;;  %v10614_v8 = vadd.f32 %v19066_v27, %v10226_v29  ;;  %v19971_v28 = vld [vmem:[#allocation44_spill] sm:$0xff]  ;;  %v10617_v60 = vadd.f32 %v19082_v62, %v10229_v39  ;;  %v10565_v35 = vpop.f32.mrf.mxu1  ;;  %v19983_v29 = vld [vmem:[#allocation82_spill] sm:$0xff] }
 0x59c   : > { %v14307_v30 = vpop.f32.mrf.mxu0  ;;  %v9841_v48 = vadd.f32 %v19972_v45, %v19971_v28  ;;  %v19987_v39 = vld [vmem:[#allocation48_spill] sm:$0xff] }
 0x59d   : > { %11068 = vst.msk [vmem:[%s18997_s9 + $0x78] sm:$0xff] %vm279_vm1, %v11036_v58  ;;  %v11035_v34 = vadd.f32 %v18986_v20, %v10996_v4  ;;  %v10999_v7 = vadd.f32 %v14307_v30, %v10611_v57  ;;  %v19973_v57 = vld [vmem:[#allocation89_spill] sm:$0xff]  ;;  %v19974_v58 = vld [vmem:[#allocation91_spill] sm:$0xff]  ;;  %v10616_v30 = vadd.f32 %v10545_v49, %v10228_v44  ;;  %v14273_v17 = vpop.f32.mrf.mxu1 }
 0x59e   : > { %v10903_v41 = vpop.f32.mrf.mxu0  ;;  %v10231_v12 = vadd.f32 %v19973_v57, %v9842_v38  ;;  %v19975_v4 = vld [vmem:[#allocation85_spill] sm:$0xff]  ;;  %v19988_v38 = vld [vmem:[#allocation58_spill] sm:$0xff]  ;;  %v19990_v44 = vld [vmem:[#allocation47_spill] sm:$0xff] }
 0x59f   : > { %11067 = vst.msk [vmem:[%s18997_s9 + $0x70] sm:$0xff] %vm279_vm1, %v11035_v34  ;;  %v11038_v6 = vadd.f32 %v18986_v20, %v10999_v7  ;;  %v10998_v31 = vadd.f32 %v10903_v41, %v10610_v19  ;;  %v9844_v61 = vadd.f32 %v19975_v4, %v19974_v58  ;;  %v19976_v19 = vld [vmem:[#allocation100_spill] sm:$0xff]  ;;  %v19979_v41 = vld [vmem:[#allocation6_spill] sm:$0xff] }
 0x5a0   : > { %v14310_v63 = vpop.f32.mrf.mxu0  ;;  %v10230_v36 = vadd.f32 %v19976_v19, %v9841_v48  ;;  %v19977_v34 = vld [vmem:[#allocation88_spill] sm:$0xff]  ;;  %v10619_v32 = vadd.f32 %v14267_v10, %v10231_v12 }
 0x5a1   : > { %11070 = vst.msk [vmem:[%s18997_s9 + $0x88] sm:$0xff] %vm279_vm1, %v11038_v6  ;;  %v11037_v33 = vadd.f32 %v18986_v20, %v10998_v31  ;;  %v11001_v52 = vadd.f32 %v14310_v63, %v10613_v59  ;;  %v19978_v7 = vld [vmem:[#allocation80_spill] sm:$0xff]  ;;  %v10233_v59 = vadd.f32 %v19979_v41, %v9844_v61  ;;  %v19981_v6 = vld [vmem:[#allocation93_spill] sm:$0xff]  ;;  %v19982_v63 = vld [vmem:[#allocation19_spill] sm:$0xff] }
 0x5a2   : > { %v10913_v3 = vpop.f32.mrf.mxu0  ;;  %v9843_v2 = vadd.f32 %v19978_v7, %v19977_v34  ;;  %v9846_v31 = vadd.f32 %v19981_v6, %v19980_v22  ;;  %v10618_v51 = vadd.f32 %v10555_v26, %v10230_v36 }
 0x5a3   : > { %11069 = vst.msk [vmem:[%s18997_s9 + $0x80] sm:$0xff] %vm279_vm1, %v11037_v33  ;;  %v11040_v24 = vadd.f32 %v18986_v20, %v11001_v52  ;;  %v11000_v50 = vadd.f32 %v10913_v3, %v10612_v43  ;;  %v19984_v33 = vld [vmem:[#allocation35_spill] sm:$0xff]  ;;  %v10621_v47 = vadd.f32 %v14270_v21, %v10233_v59 }
 0x5a4   : > { %v14313_v15 = vpop.f32.mrf.mxu0  ;;  %v10232_v43 = vadd.f32 %v19982_v63, %v9843_v2  ;;  %v9845_v52 = vadd.f32 %v19984_v33, %v19983_v29  ;;  %v10235_v3 = vadd.f32 %v19985_v23, %v9846_v31 }
 0x5a5   : > { %11072 = vst.msk [vmem:[%s18997_s9 + $0x98] sm:$0xff] %vm279_vm1, %v11040_v24  ;;  %v11039_v40 = vadd.f32 %v18986_v20, %v11000_v50  ;;  %v11003_v0 = vadd.f32 %v14313_v15, %v10615_v11  ;;  %v9848_v24 = vadd.f32 %v19987_v39, %v19986_v46  ;;  %v10575_v50 = vpop.f32.mrf.mxu1 }
 0x5a6   : > { %v10923_v42 = vpop.f32.mrf.mxu0  ;;  %v10620_v16 = vadd.f32 %v10565_v35, %v10232_v43  ;;  %v10234_v15 = vadd.f32 %v19988_v38, %v9845_v52  ;;  %v10623_v45 = vadd.f32 %v14273_v17, %v10235_v3 }
 0x5a7   : > { %11071 = vst.msk [vmem:[%s18997_s9 + $0x90] sm:$0xff] %vm279_vm1, %v11039_v40  ;;  %v11042_v27 = vadd.f32 %v18986_v20, %v11003_v0  ;;  %v11002_v53 = vadd.f32 %v10923_v42, %v10614_v8  ;;  %v9847_v40 = vadd.f32 %v19990_v44, %v19989_v55  ;;  %v14276_v0 = vpop.f32.mrf.mxu1  ;;  %v10237_v48 = vadd.f32 %v18973_v18, %v9848_v24 }
 0x5a8   : > { %v14316_v1 = vpop.f32.mrf.mxu0  ;;  %v10622_v12 = vadd.f32 %v10575_v50, %v10234_v15 }
 0x5a9   : > { %11074 = vst.msk [vmem:[%s18997_s9 + $0xa8] sm:$0xff] %vm279_vm1, %v11042_v27  ;;  %v11041_v62 = vadd.f32 %v18986_v20, %v11002_v53  ;;  %v11005_v14 = vadd.f32 %v14316_v1, %v10617_v60  ;;  %v10236_v27 = vadd.f32 %v18977_v13, %v9847_v40  ;;  %v10585_v4 = vpop.f32.mrf.mxu1  ;;  %v10625_v18 = vadd.f32 %v14276_v0, %v10237_v48 }
 0x5aa   : > { %v10933_v56 = vpop.f32.mrf.mxu0 }
 0x5ab   : > { %11073 = vst.msk [vmem:[%s18997_s9 + $0xa0] sm:$0xff] %vm279_vm1, %v11041_v62  ;;  %v11044_v49 = vadd.f32 %v18986_v20, %v11005_v14  ;;  %v11004_v37 = vadd.f32 %v10933_v56, %v10616_v30  ;;  %v10624_v19 = vadd.f32 %v10585_v4, %v10236_v27 }
 0x5ac   : > { %v14319_v5 = vpop.f32.mrf.mxu0 }
 0x5ad   : > { %11076 = vst.msk [vmem:[%s18997_s9 + $0xb8] sm:$0xff] %vm279_vm1, %v11044_v49  ;;  %v11043_v10 = vadd.f32 %v18986_v20, %v11004_v37  ;;  %v11007_v9 = vadd.f32 %v14319_v5, %v10619_v32 }
 0x5ae   : > { %v10943_v54 = vpop.f32.mrf.mxu0 }
 0x5af   : > { %11075 = vst.msk [vmem:[%s18997_s9 + $0xb0] sm:$0xff] %vm279_vm1, %v11043_v10  ;;  %v11046_v26 = vadd.f32 %v18986_v20, %v11007_v9  ;;  %v11006_v11 = vadd.f32 %v10943_v54, %v10618_v51 }
 0x5b0   : > { %v14322_v25 = vpop.f32.mrf.mxu0 }
 0x5b1   : > { %11078 = vst.msk [vmem:[%s18997_s9 + $0xc8] sm:$0xff] %vm279_vm1, %v11046_v26  ;;  %v11045_v21 = vadd.f32 %v18986_v20, %v11006_v11  ;;  %v11009_v8 = vadd.f32 %v14322_v25, %v10621_v47 }
 0x5b2   : > { %v10953_v28 = vpop.f32.mrf.mxu0 }
 0x5b3   : > { %11077 = vst.msk [vmem:[%s18997_s9 + $0xc0] sm:$0xff] %vm279_vm1, %v11045_v21  ;;  %v11048_v42 = vadd.f32 %v18986_v20, %v11009_v8  ;;  %v11008_v60 = vadd.f32 %v10953_v28, %v10620_v16 }
 0x5b4   : > { %v14325_v57 = vpop.f32.mrf.mxu0 }
 0x5b5   : > { %11080 = vst.msk [vmem:[%s18997_s9 + $0xd8] sm:$0xff] %vm279_vm1, %v11048_v42  ;;  %v11047_v53 = vadd.f32 %v18986_v20, %v11008_v60  ;;  %v11011_v58 = vadd.f32 %v14325_v57, %v10623_v45 }
 0x5b6   : > { %v10963_v61 = vpop.f32.mrf.mxu0 }
 0x5b7   : > { %11079 = vst.msk [vmem:[%s18997_s9 + $0xd0] sm:$0xff] %vm279_vm1, %v11047_v53  ;;  %v11050_v35 = vadd.f32 %v18986_v20, %v11011_v58  ;;  %v11010_v1 = vadd.f32 %v10963_v61, %v10622_v12 }
 0x5b8   : > { %v14328_v30 = vpop.f32.mrf.mxu0 }
 0x5b9   : > { %11082 = vst.msk [vmem:[%s18997_s9 + $0xe8] sm:$0xff] %vm279_vm1, %v11050_v35  ;;  %v11049_v13 = vadd.f32 %v18986_v20, %v11010_v1  ;;  %v11013_v36 = vadd.f32 %v14328_v30, %v10625_v18 }
 0x5ba   : > { %v10973_v62 = vpop.f32.mrf.mxu0 }
 0x5bb   : > { %11081 = vst.msk [vmem:[%s18997_s9 + $0xe0] sm:$0xff] %vm279_vm1, %v11049_v13  ;;  %v11052_v14 = vadd.f32 %v18986_v20, %v11013_v36  ;;  %v11012_v34 = vadd.f32 %v10973_v62, %v10624_v19 }
 0x5bd   : > { %11084 = vst.msk [vmem:[%s18997_s9 + $0xf8] sm:$0xff] %vm279_vm1, %v11052_v14  ;;  %v11051_v7 = vadd.f32 %v18986_v20, %v11012_v34 }
 0x5bf   : > { %11083 = vst.msk [vmem:[%s18997_s9 + $0xf0] sm:$0xff] %vm279_vm1, %v11051_v7 }
 0x5c0 PF: > { %s17_s24 = sadd.s32 1, %s14347_s24  }
 0x5c1   : > { %p14_p4 = scmp.ge.s32.totalorder %s17_s24, 4  }
 0x5c3   :  { %16 = sbr.rel (!%p14_p4) target bundleno = 1 (0x1), region = 108 }

</bundles_post_ra>
